<compile_context>
chip_gen: v5e
topology: v5e:2x2
jax: 0.10.0
libtpu: 0.0.40
codegen_flags: <defaults>
</compile_context>

<pallas_src>
import functools

import jax
import jax.numpy as jnp
from jax import lax
from jax.experimental import pallas as pl
from jax.experimental.pallas import tpu as pltpu

EPS = 1e-5


# ---------------------------------------------------------------------------
# Fused BasicBlock kernel (one batch element per grid step, stride=1)
# ---------------------------------------------------------------------------
def _basic_block_kernel(*refs, H, W, Cin, C, HS, has_ds):
    if has_ds:
        (x_ref, w1_ref, b1_ref, w2_ref, b2_ref, wd_ref, bd_ref,
         o_ref, pad1, pad2, slab) = refs
    else:
        (x_ref, w1_ref, b1_ref, w2_ref, b2_ref,
         o_ref, pad1, pad2, slab) = refs

    n_strips = (H + HS - 1) // HS

    # ---- zero only the 1-pixel halo border; interiors are overwritten ------
    pad1[0:1, :, :] = jnp.zeros((1, W + 2, Cin), pad1.dtype)
    pad1[H + 1:H + 2, :, :] = jnp.zeros((1, W + 2, Cin), pad1.dtype)
    pad1[:, 0:1, :] = jnp.zeros((H + 2, 1, Cin), pad1.dtype)
    pad1[:, W + 1:W + 2, :] = jnp.zeros((H + 2, 1, Cin), pad1.dtype)

    pad2[0:1, :, :] = jnp.zeros((1, W + 2, C), pad2.dtype)
    pad2[H + 1:H + 2, :, :] = jnp.zeros((1, W + 2, C), pad2.dtype)
    pad2[:, 0:1, :] = jnp.zeros((H + 2, 1, C), pad2.dtype)
    pad2[:, W + 1:W + 2, :] = jnp.zeros((H + 2, 1, C), pad2.dtype)

    # Interior: cast to bf16 on the VPU (input may arrive f32).
    # TODO(synk): when the input is already bf16 use a VMEM->VMEM DMA here.
    pad1[1:H + 1, 1:W + 1, :] = x_ref[0].astype(pad1.dtype)

    w1 = w1_ref[...]
    b1 = b1_ref[...]
    w2 = w2_ref[...]
    b2 = b2_ref[...]

    # -------------- conv1 (+ folded bn1) + relu, per H-row strip ------------
    for t in range(n_strips):
        h0 = t * HS
        hs = min(HS, H - h0)
        s0 = (t % 2) * HS                                    # slab slot offset
        for ky in range(3):
            for kx in range(3):
                tap = ky * 3 + kx
                slab[s0:s0 + hs, :, tap * Cin:(tap + 1) * Cin] = (
                    pad1[h0 + ky:h0 + ky + hs, kx:kx + W, :])
        lhs = slab[s0:s0 + hs, :, 0:9 * Cin].reshape(hs * W, 9 * Cin)
        a1 = jnp.dot(lhs, w1, preferred_element_type=jnp.float32)
        y1 = jnp.maximum(a1 + b1, 0.0)
        pad2[h0 + 1:h0 + 1 + hs, 1:W + 1, :] = (
            y1.reshape(hs, W, C).astype(pad2.dtype))

    # -------- conv2 (+ folded bn2) + residual + relu, per H-row strip -------
    for t in range(n_strips):
        h0 = t * HS
        hs = min(HS, H - h0)
        s0 = ((n_strips + t) % 2) * HS
        for ky in range(3):
            for kx in range(3):
                tap = ky * 3 + kx
                slab[s0:s0 + hs, :, tap * C:(tap + 1) * C] = (
                    pad2[h0 + ky:h0 + ky + hs, kx:kx + W, :])
        lhs = slab[s0:s0 + hs, :, 0:9 * C].reshape(hs * W, 9 * C)
        a2 = jnp.dot(lhs, w2, preferred_element_type=jnp.float32) + b2

        if has_ds:
            # 1x1 downsample conv on the (bf16) input interior.
            xid = pad1[h0 + 1:h0 + 1 + hs, 1:W + 1, :]
            idn = jnp.dot(xid.reshape(hs * W, Cin), wd_ref[...],
                          preferred_element_type=jnp.float32) + bd_ref[...]
        else:
            # f32 skip connection from the unquantized input (PyTorch-like).
            idn = x_ref[0, h0:h0 + hs, :, :].reshape(hs * W, C).astype(jnp.float32)

        out = jnp.maximum(a2 + idn, 0.0)
        o_ref[0, h0:h0 + hs, :, :] = out.reshape(hs, W, C).astype(o_ref.dtype)


# ---------------------------------------------------------------------------
# Module wrapper
# ---------------------------------------------------------------------------
def _bn_fold(c, bn=True):
    if not bn:
        return jnp.ones((c,), jnp.float32), jnp.zeros((c,), jnp.float32)
    # PyTorch BatchNorm2d inference defaults: gamma=1, beta=0, mean=0, var=1.
    gamma = jnp.ones((c,), jnp.float32)
    beta = jnp.zeros((c,), jnp.float32)
    mean = jnp.zeros((c,), jnp.float32)
    var = jnp.ones((c,), jnp.float32)
    scale = gamma / jnp.sqrt(var + EPS)
    bias = beta - mean * scale
    return scale, bias


class BasicBlockPallas:
    expansion = 1

    def __init__(self, in_channels, planes, stride=1, act='relu', bn=True,
                 bias=False, key=None, strip_rows=8):
        if act != 'relu':
            raise NotImplementedError("TODO(synk): only act='relu' is implemented")
        if bias:
            raise NotImplementedError("TODO(synk): conv bias=True not implemented")
        if stride != 1:
            # TODO(synk): stride>1 needs strided tap selection at the HBM->VMEM
            # boundary (parity split / Element blocks / manual DMA); sublane-
            # strided VMEM reads do not lower cleanly, so it is not faked here.
            raise NotImplementedError("stride != 1 not implemented")
        if key is None:
            key = jax.random.PRNGKey(0)
        k1, k2, k3 = jax.random.split(key, 3)
        self.in_channels = in_channels
        self.planes = planes
        self.stride = stride
        self.strip_rows = strip_rows
        self.has_downsample = in_channels != planes * self.expansion

        w1 = 0.1 * jax.random.normal(k1, (3, 3, in_channels, planes), jnp.float32)
        w2 = 0.1 * jax.random.normal(k2, (3, 3, planes, planes), jnp.float32)
        s1, b1 = _bn_fold(planes, bn)
        s2, b2 = _bn_fold(planes, bn)

        # Fold BN scale into the conv weights, pack taps to deep-K, cast bf16.
        self.w1p = (w1 * s1).reshape(9 * in_channels, planes).astype(jnp.bfloat16)
        self.w2p = (w2 * s2).reshape(9 * planes, planes).astype(jnp.bfloat16)
        self.b1r = b1.reshape(1, planes).astype(jnp.float32)
        self.b2r = b2.reshape(1, planes).astype(jnp.float32)

        if self.has_downsample:
            wd = 0.1 * jax.random.normal(k3, (in_channels, planes), jnp.float32)
            sd, bd = _bn_fold(planes, bn)
            self.wdp = (wd * sd).astype(jnp.bfloat16)
            self.bdr = bd.reshape(1, planes).astype(jnp.float32)

    def forward_nhwc(self, x_nhwc):
        N, H, W, Cin = x_nhwc.shape
        assert Cin == self.in_channels
        C = self.planes
        HS = max(1, min(self.strip_rows, H))
        cmax = max(Cin, C)

        kernel = functools.partial(
            _basic_block_kernel, H=H, W=W, Cin=Cin, C=C, HS=HS,
            has_ds=self.has_downsample)

        in_specs = [
            pl.BlockSpec((1, H, W, Cin), lambda n: (n, 0, 0, 0)),
            pl.BlockSpec((9 * Cin, C), lambda n: (0, 0)),
            pl.BlockSpec((1, C), lambda n: (0, 0)),
            pl.BlockSpec((9 * C, C), lambda n: (0, 0)),
            pl.BlockSpec((1, C), lambda n: (0, 0)),
        ]
        args = [x_nhwc, self.w1p, self.b1r, self.w2p, self.b2r]
        if self.has_downsample:
            in_specs += [pl.BlockSpec((Cin, C), lambda n: (0, 0)),
                         pl.BlockSpec((1, C), lambda n: (0, 0))]
            args += [self.wdp, self.bdr]

        # VMEM budget from actual scratch + double-buffered IO blocks + weights.
        xbytes = x_nhwc.dtype.itemsize
        scratch_bytes = ((H + 2) * (W + 2) * (Cin + C) * 2          # pad1 + pad2
                         + 2 * HS * W * 9 * cmax * 2)               # im2col slab
        io_bytes = 2 * H * W * (Cin * xbytes + C * 2)               # dbl-buffered
        wgt_bytes = 2 * ((9 * Cin + 9 * C + Cin) * C * 2 + 3 * C * 4)
        vmem_limit = max(int(1.3 * (scratch_bytes + io_bytes + wgt_bytes))
                         + (2 << 20), 32 << 20)

        flops = 2 * N * H * W * (9 * Cin * C + 9 * C * C
                                 + (Cin * C if self.has_downsample else 0))
        bytes_accessed = (N * H * W * Cin * xbytes + N * H * W * C * 2
                          + wgt_bytes // 2)

        return pl.pallas_call(
            kernel,
            out_shape=jax.ShapeDtypeStruct((N, H, W, C), jnp.bfloat16),
            grid=(N,),
            in_specs=in_specs,
            out_specs=pl.BlockSpec((1, H, W, C), lambda n: (n, 0, 0, 0)),
            scratch_shapes=[
                pltpu.VMEM((H + 2, W + 2, Cin), jnp.bfloat16),    # padded input
                pltpu.VMEM((H + 2, W + 2, C), jnp.bfloat16),      # padded conv1 out
                pltpu.VMEM((2 * HS, W, 9 * cmax), jnp.bfloat16),  # reused im2col slab
            ],
            compiler_params=pltpu.CompilerParams(
                dimension_semantics=("parallel",),
                vmem_limit_bytes=vmem_limit),
            cost_estimate=pl.CostEstimate(
                flops=flops, transcendentals=0, bytes_accessed=bytes_accessed),
        )(*args)

    def __call__(self, x_nchw):
        # PyTorch-compatible NCHW interface; chained blocks should call
        # forward_nhwc directly (bf16 in / bf16 out, no transposes).
        x = jnp.transpose(x_nchw, (0, 2, 3, 1))
        y = self.forward_nhwc(x)
        return jnp.transpose(y, (0, 3, 1, 2)).astype(jnp.float32)


# ---------------------------------------------------------------------------
# Pure-JAX reference (bf16-quantized conv inputs, f32 math, f32 skip)
# ---------------------------------------------------------------------------
def _ref_forward(block, x_nchw):
    x = jnp.transpose(x_nchw, (0, 2, 3, 1)).astype(jnp.float32)
    xq = x.astype(jnp.bfloat16).astype(jnp.float32)     # what the kernel's pad1 sees
    Cin, C = block.in_channels, block.planes

    def conv(inp, w, stride, pad):
        return lax.conv_general_dilated(
            inp, w, (stride, stride), ((pad, pad), (pad, pad)),
            dimension_numbers=("NHWC", "HWIO", "NHWC"))

    w1 = block.w1p.astype(jnp.float32).reshape(3, 3, Cin, C)
    w2 = block.w2p.astype(jnp.float32).reshape(3, 3, C, C)
    out = jnp.maximum(conv(xq, w1, block.stride, 1) + block.b1r, 0.0)
    outq = out.astype(jnp.bfloat16).astype(jnp.float32)  # bf16 intermediate in VMEM
    out = conv(outq, w2, 1, 1) + block.b2r
    if block.has_downsample:
        wd = block.wdp.astype(jnp.float32).reshape(1, 1, Cin, C)
        identity = conv(xq, wd, block.stride, 0) + block.bdr
    else:
        identity = x                                     # f32 skip, like PyTorch
    out = jnp.maximum(out + identity, 0.0)
    return jnp.transpose(out, (0, 3, 1, 2))


if __name__ == "__main__":
    key = jax.random.PRNGKey(0)
    k_x, k_w, k_w2 = jax.random.split(key, 3)

    # Case 1: downsample path (in_channels != planes), NCHW like PyTorch.
    x = jax.random.normal(k_x, (2, 4, 16, 16), jnp.float32)
    block = BasicBlockPallas(in_channels=4, planes=8, stride=1, key=k_w)
    y = jax.block_until_ready(block(x))
    y_ref = jax.block_until_ready(_ref_forward(block, x))
    assert y.shape == (2, 8, 16, 16), y.shape
    err = float(jnp.max(jnp.abs(y - y_ref)))
    # bf16 MXU inputs + bf16 intermediate/output => loosened tolerance.
    assert jnp.allclose(y, y_ref, atol=3e-2, rtol=3e-2), err

    # Case 2: identity path (in_channels == planes), f32 skip connection.
    x2 = jax.random.normal(k_x, (2, 8, 16, 16), jnp.float32)
    block2 = BasicBlockPallas(in_channels=8, planes=8, stride=1, key=k_w2)
    y2 = jax.block_until_ready(block2(x2))
    y2_ref = jax.block_until_ready(_ref_forward(block2, x2))
    assert y2.shape == (2, 8, 16, 16), y2.shape
    err2 = float(jnp.max(jnp.abs(y2 - y2_ref)))
    assert jnp.allclose(y2, y2_ref, atol=3e-2, rtol=3e-2), err2

    print("KERNEL_OK")
</pallas_src>

<mosaic_0001>
module attributes {stable_mosaic.version = 11 : i64} {
  func.func @_basic_block_kernel(%arg0: i32, %arg1: memref<1x16x16x4xf32, #tpu.memory_space<vmem>>, %arg2: memref<36x8xbf16, #tpu.memory_space<vmem>>, %arg3: memref<1x8xf32, #tpu.memory_space<vmem>>, %arg4: memref<72x8xbf16, #tpu.memory_space<vmem>>, %arg5: memref<1x8xf32, #tpu.memory_space<vmem>>, %arg6: memref<4x8xbf16, #tpu.memory_space<vmem>>, %arg7: memref<1x8xf32, #tpu.memory_space<vmem>>, %arg8: memref<1x16x16x8xbf16, #tpu.memory_space<vmem>>, %arg9: memref<18x18x4xbf16, #tpu.memory_space<vmem>>, %arg10: memref<18x18x8xbf16, #tpu.memory_space<vmem>>, %arg11: memref<16x16x72xbf16, #tpu.memory_space<vmem>>) attributes {dimension_semantics = [#tpu.dimension_semantics<parallel>], iteration_bounds = array<i64: 2>, scalar_prefetch = 0 : i64, scratch_operands = 3 : i64, tpu.core_type = #tpu.core_type<tc>, window_params = [{transform_indices = @transform_0, window_bounds = array<i64: 1, 16, 16, 4>}, {pipeline_mode = #tpu.pipeline_mode<synchronous>, transform_indices = @transform_1, window_bounds = array<i64: 36, 8>}, {pipeline_mode = #tpu.pipeline_mode<synchronous>, transform_indices = @transform_2, window_bounds = array<i64: 1, 8>}, {pipeline_mode = #tpu.pipeline_mode<synchronous>, transform_indices = @transform_3, window_bounds = array<i64: 72, 8>}, {pipeline_mode = #tpu.pipeline_mode<synchronous>, transform_indices = @transform_4, window_bounds = array<i64: 1, 8>}, {pipeline_mode = #tpu.pipeline_mode<synchronous>, transform_indices = @transform_5, window_bounds = array<i64: 4, 8>}, {pipeline_mode = #tpu.pipeline_mode<synchronous>, transform_indices = @transform_6, window_bounds = array<i64: 1, 8>}, {transform_indices = @transform_7, window_bounds = array<i64: 1, 16, 16, 8>}]} {
    %cst = arith.constant 0.000000e+00 : bf16
    %0 = vector.broadcast %cst : bf16 to vector<1x18x4xbf16>
    %c0 = arith.constant 0 : index
    %c0_0 = arith.constant 0 : index
    %c0_1 = arith.constant 0 : index
    %1 = vector.load %arg9[%c0, %c0_0, %c0_1] : memref<18x18x4xbf16, #tpu.memory_space<vmem>>, vector<1x18x4xbf16>
    tpu.vector_store %arg9[%c0, %c0_0, %c0_1], %0 {strides = array<i32>} : memref<18x18x4xbf16, #tpu.memory_space<vmem>>, vector<1x18x4xbf16>,
    %cst_2 = arith.constant 0.000000e+00 : bf16
    %2 = vector.broadcast %cst_2 : bf16 to vector<1x18x4xbf16>
    %c17 = arith.constant 17 : index
    %c0_3 = arith.constant 0 : index
    %c0_4 = arith.constant 0 : index
    %3 = vector.load %arg9[%c17, %c0_3, %c0_4] : memref<18x18x4xbf16, #tpu.memory_space<vmem>>, vector<1x18x4xbf16>
    tpu.vector_store %arg9[%c17, %c0_3, %c0_4], %2 {strides = array<i32>} : memref<18x18x4xbf16, #tpu.memory_space<vmem>>, vector<1x18x4xbf16>,
    %cst_5 = arith.constant 0.000000e+00 : bf16
    %4 = vector.broadcast %cst_5 : bf16 to vector<18x1x4xbf16>
    %c0_6 = arith.constant 0 : index
    %c0_7 = arith.constant 0 : index
    %c0_8 = arith.constant 0 : index
    %5 = vector.load %arg9[%c0_6, %c0_7, %c0_8] : memref<18x18x4xbf16, #tpu.memory_space<vmem>>, vector<18x1x4xbf16>
    tpu.vector_store %arg9[%c0_6, %c0_7, %c0_8], %4 {strides = array<i32>} : memref<18x18x4xbf16, #tpu.memory_space<vmem>>, vector<18x1x4xbf16>,
    %cst_9 = arith.constant 0.000000e+00 : bf16
    %6 = vector.broadcast %cst_9 : bf16 to vector<18x1x4xbf16>
    %c0_10 = arith.constant 0 : index
    %c17_11 = arith.constant 17 : index
    %c0_12 = arith.constant 0 : index
    %7 = vector.load %arg9[%c0_10, %c17_11, %c0_12] : memref<18x18x4xbf16, #tpu.memory_space<vmem>>, vector<18x1x4xbf16>
    tpu.vector_store %arg9[%c0_10, %c17_11, %c0_12], %6 {strides = array<i32>} : memref<18x18x4xbf16, #tpu.memory_space<vmem>>, vector<18x1x4xbf16>,
    %cst_13 = arith.constant 0.000000e+00 : bf16
    %8 = vector.broadcast %cst_13 : bf16 to vector<1x18x8xbf16>
    %c0_14 = arith.constant 0 : index
    %c0_15 = arith.constant 0 : index
    %c0_16 = arith.constant 0 : index
    %9 = vector.load %arg10[%c0_14, %c0_15, %c0_16] : memref<18x18x8xbf16, #tpu.memory_space<vmem>>, vector<1x18x8xbf16>
    tpu.vector_store %arg10[%c0_14, %c0_15, %c0_16], %8 {strides = array<i32>} : memref<18x18x8xbf16, #tpu.memory_space<vmem>>, vector<1x18x8xbf16>,
    %cst_17 = arith.constant 0.000000e+00 : bf16
    %10 = vector.broadcast %cst_17 : bf16 to vector<1x18x8xbf16>
    %c17_18 = arith.constant 17 : index
    %c0_19 = arith.constant 0 : index
    %c0_20 = arith.constant 0 : index
    %11 = vector.load %arg10[%c17_18, %c0_19, %c0_20] : memref<18x18x8xbf16, #tpu.memory_space<vmem>>, vector<1x18x8xbf16>
    tpu.vector_store %arg10[%c17_18, %c0_19, %c0_20], %10 {strides = array<i32>} : memref<18x18x8xbf16, #tpu.memory_space<vmem>>, vector<1x18x8xbf16>,
    %cst_21 = arith.constant 0.000000e+00 : bf16
    %12 = vector.broadcast %cst_21 : bf16 to vector<18x1x8xbf16>
    %c0_22 = arith.constant 0 : index
    %c0_23 = arith.constant 0 : index
    %c0_24 = arith.constant 0 : index
    %13 = vector.load %arg10[%c0_22, %c0_23, %c0_24] : memref<18x18x8xbf16, #tpu.memory_space<vmem>>, vector<18x1x8xbf16>
    tpu.vector_store %arg10[%c0_22, %c0_23, %c0_24], %12 {strides = array<i32>} : memref<18x18x8xbf16, #tpu.memory_space<vmem>>, vector<18x1x8xbf16>,
    %cst_25 = arith.constant 0.000000e+00 : bf16
    %14 = vector.broadcast %cst_25 : bf16 to vector<18x1x8xbf16>
    %c0_26 = arith.constant 0 : index
    %c17_27 = arith.constant 17 : index
    %c0_28 = arith.constant 0 : index
    %15 = vector.load %arg10[%c0_26, %c17_27, %c0_28] : memref<18x18x8xbf16, #tpu.memory_space<vmem>>, vector<18x1x8xbf16>
    tpu.vector_store %arg10[%c0_26, %c17_27, %c0_28], %14 {strides = array<i32>} : memref<18x18x8xbf16, #tpu.memory_space<vmem>>, vector<18x1x8xbf16>,
    %c0_29 = arith.constant 0 : index
    %c0_30 = arith.constant 0 : index
    %c0_31 = arith.constant 0 : index
    %c0_32 = arith.constant 0 : index
    %16 = vector.load %arg1[%c0_29, %c0_30, %c0_31, %c0_32] : memref<1x16x16x4xf32, #tpu.memory_space<vmem>>, vector<1x16x16x4xf32>
    %17 = vector.shape_cast %16 : vector<1x16x16x4xf32> to vector<16x16x4xf32>
    %18 = arith.truncf %17 : vector<16x16x4xf32> to vector<16x16x4xbf16>
    %c1 = arith.constant 1 : index
    %c1_33 = arith.constant 1 : index
    %c0_34 = arith.constant 0 : index
    %19 = vector.load %arg9[%c1, %c1_33, %c0_34] : memref<18x18x4xbf16, #tpu.memory_space<vmem>>, vector<16x16x4xbf16>
    tpu.vector_store %arg9[%c1, %c1_33, %c0_34], %18 {strides = array<i32>} : memref<18x18x4xbf16, #tpu.memory_space<vmem>>, vector<16x16x4xbf16>,
    %c0_35 = arith.constant 0 : index
    %c0_36 = arith.constant 0 : index
    %20 = vector.load %arg2[%c0_35, %c0_36] : memref<36x8xbf16, #tpu.memory_space<vmem>>, vector<36x8xbf16>
    %c0_37 = arith.constant 0 : index
    %c0_38 = arith.constant 0 : index
    %21 = vector.load %arg3[%c0_37, %c0_38] : memref<1x8xf32, #tpu.memory_space<vmem>>, vector<1x8xf32>
    %c0_39 = arith.constant 0 : index
    %c0_40 = arith.constant 0 : index
    %22 = vector.load %arg4[%c0_39, %c0_40] : memref<72x8xbf16, #tpu.memory_space<vmem>>, vector<72x8xbf16>
    %c0_41 = arith.constant 0 : index
    %c0_42 = arith.constant 0 : index
    %23 = vector.load %arg5[%c0_41, %c0_42] : memref<1x8xf32, #tpu.memory_space<vmem>>, vector<1x8xf32>
    %c0_43 = arith.constant 0 : index
    %c0_44 = arith.constant 0 : index
    %c0_45 = arith.constant 0 : index
    %24 = vector.load %arg9[%c0_43, %c0_44, %c0_45] : memref<18x18x4xbf16, #tpu.memory_space<vmem>>, vector<8x16x4xbf16>
    %c0_46 = arith.constant 0 : index
    %c0_47 = arith.constant 0 : index
    %c0_48 = arith.constant 0 : index
    %25 = vector.load %arg11[%c0_46, %c0_47, %c0_48] : memref<16x16x72xbf16, #tpu.memory_space<vmem>>, vector<8x16x4xbf16>
    tpu.vector_store %arg11[%c0_46, %c0_47, %c0_48], %24 {strides = array<i32>} : memref<16x16x72xbf16, #tpu.memory_space<vmem>>, vector<8x16x4xbf16>,
    %c0_49 = arith.constant 0 : index
    %c1_50 = arith.constant 1 : index
    %c0_51 = arith.constant 0 : index
    %26 = vector.load %arg9[%c0_49, %c1_50, %c0_51] : memref<18x18x4xbf16, #tpu.memory_space<vmem>>, vector<8x16x4xbf16>
    %c0_52 = arith.constant 0 : index
    %c0_53 = arith.constant 0 : index
    %c4 = arith.constant 4 : index
    %27 = vector.load %arg11[%c0_52, %c0_53, %c4] : memref<16x16x72xbf16, #tpu.memory_space<vmem>>, vector<8x16x4xbf16>
    tpu.vector_store %arg11[%c0_52, %c0_53, %c4], %26 {strides = array<i32>} : memref<16x16x72xbf16, #tpu.memory_space<vmem>>, vector<8x16x4xbf16>,
    %c0_54 = arith.constant 0 : index
    %c2 = arith.constant 2 : index
    %c0_55 = arith.constant 0 : index
    %28 = vector.load %arg9[%c0_54, %c2, %c0_55] : memref<18x18x4xbf16, #tpu.memory_space<vmem>>, vector<8x16x4xbf16>
    %c0_56 = arith.constant 0 : index
    %c0_57 = arith.constant 0 : index
    %c8 = arith.constant 8 : index
    %29 = vector.load %arg11[%c0_56, %c0_57, %c8] : memref<16x16x72xbf16, #tpu.memory_space<vmem>>, vector<8x16x4xbf16>
    tpu.vector_store %arg11[%c0_56, %c0_57, %c8], %28 {strides = array<i32>} : memref<16x16x72xbf16, #tpu.memory_space<vmem>>, vector<8x16x4xbf16>,
    %c1_58 = arith.constant 1 : index
    %c0_59 = arith.constant 0 : index
    %c0_60 = arith.constant 0 : index
    %30 = vector.load %arg9[%c1_58, %c0_59, %c0_60] : memref<18x18x4xbf16, #tpu.memory_space<vmem>>, vector<8x16x4xbf16>
    %c0_61 = arith.constant 0 : index
    %c0_62 = arith.constant 0 : index
    %c12 = arith.constant 12 : index
    %31 = vector.load %arg11[%c0_61, %c0_62, %c12] : memref<16x16x72xbf16, #tpu.memory_space<vmem>>, vector<8x16x4xbf16>
    tpu.vector_store %arg11[%c0_61, %c0_62, %c12], %30 {strides = array<i32>} : memref<16x16x72xbf16, #tpu.memory_space<vmem>>, vector<8x16x4xbf16>,
    %c1_63 = arith.constant 1 : index
    %c1_64 = arith.constant 1 : index
    %c0_65 = arith.constant 0 : index
    %32 = vector.load %arg9[%c1_63, %c1_64, %c0_65] : memref<18x18x4xbf16, #tpu.memory_space<vmem>>, vector<8x16x4xbf16>
    %c0_66 = arith.constant 0 : index
    %c0_67 = arith.constant 0 : index
    %c16 = arith.constant 16 : index
    %33 = vector.load %arg11[%c0_66, %c0_67, %c16] : memref<16x16x72xbf16, #tpu.memory_space<vmem>>, vector<8x16x4xbf16>
    tpu.vector_store %arg11[%c0_66, %c0_67, %c16], %32 {strides = array<i32>} : memref<16x16x72xbf16, #tpu.memory_space<vmem>>, vector<8x16x4xbf16>,
    %c1_68 = arith.constant 1 : index
    %c2_69 = arith.constant 2 : index
    %c0_70 = arith.constant 0 : index
    %34 = vector.load %arg9[%c1_68, %c2_69, %c0_70] : memref<18x18x4xbf16, #tpu.memory_space<vmem>>, vector<8x16x4xbf16>
    %c0_71 = arith.constant 0 : index
    %c0_72 = arith.constant 0 : index
    %c20 = arith.constant 20 : index
    %35 = vector.load %arg11[%c0_71, %c0_72, %c20] : memref<16x16x72xbf16, #tpu.memory_space<vmem>>, vector<8x16x4xbf16>
    tpu.vector_store %arg11[%c0_71, %c0_72, %c20], %34 {strides = array<i32>} : memref<16x16x72xbf16, #tpu.memory_space<vmem>>, vector<8x16x4xbf16>,
    %c2_73 = arith.constant 2 : index
    %c0_74 = arith.constant 0 : index
    %c0_75 = arith.constant 0 : index
    %36 = vector.load %arg9[%c2_73, %c0_74, %c0_75] : memref<18x18x4xbf16, #tpu.memory_space<vmem>>, vector<8x16x4xbf16>
    %c0_76 = arith.constant 0 : index
    %c0_77 = arith.constant 0 : index
    %c24 = arith.constant 24 : index
    %37 = vector.load %arg11[%c0_76, %c0_77, %c24] : memref<16x16x72xbf16, #tpu.memory_space<vmem>>, vector<8x16x4xbf16>
    tpu.vector_store %arg11[%c0_76, %c0_77, %c24], %36 {strides = array<i32>} : memref<16x16x72xbf16, #tpu.memory_space<vmem>>, vector<8x16x4xbf16>,
    %c2_78 = arith.constant 2 : index
    %c1_79 = arith.constant 1 : index
    %c0_80 = arith.constant 0 : index
    %38 = vector.load %arg9[%c2_78, %c1_79, %c0_80] : memref<18x18x4xbf16, #tpu.memory_space<vmem>>, vector<8x16x4xbf16>
    %c0_81 = arith.constant 0 : index
    %c0_82 = arith.constant 0 : index
    %c28 = arith.constant 28 : index
    %39 = vector.load %arg11[%c0_81, %c0_82, %c28] : memref<16x16x72xbf16, #tpu.memory_space<vmem>>, vector<8x16x4xbf16>
    tpu.vector_store %arg11[%c0_81, %c0_82, %c28], %38 {strides = array<i32>} : memref<16x16x72xbf16, #tpu.memory_space<vmem>>, vector<8x16x4xbf16>,
    %c2_83 = arith.constant 2 : index
    %c2_84 = arith.constant 2 : index
    %c0_85 = arith.constant 0 : index
    %40 = vector.load %arg9[%c2_83, %c2_84, %c0_85] : memref<18x18x4xbf16, #tpu.memory_space<vmem>>, vector<8x16x4xbf16>
    %c0_86 = arith.constant 0 : index
    %c0_87 = arith.constant 0 : index
    %c32 = arith.constant 32 : index
    %41 = vector.load %arg11[%c0_86, %c0_87, %c32] : memref<16x16x72xbf16, #tpu.memory_space<vmem>>, vector<8x16x4xbf16>
    tpu.vector_store %arg11[%c0_86, %c0_87, %c32], %40 {strides = array<i32>} : memref<16x16x72xbf16, #tpu.memory_space<vmem>>, vector<8x16x4xbf16>,
    %c0_88 = arith.constant 0 : index
    %c0_89 = arith.constant 0 : index
    %c0_90 = arith.constant 0 : index
    %42 = vector.load %arg11[%c0_88, %c0_89, %c0_90] : memref<16x16x72xbf16, #tpu.memory_space<vmem>>, vector<8x16x36xbf16>
    %43 = vector.shape_cast %42 : vector<8x16x36xbf16> to vector<128x36xbf16>
    %cst_91 = arith.constant dense<0.000000e+00> : vector<128x8xf32>
    %44 = tpu.matmul %43, %20, %cst_91 {dimension_numbers = #tpu.dot_dimension_numbers<[1], [0], [0], [1], [0, 0, 1, 1], [], []>} : vector<128x36xbf16>, vector<36x8xbf16>, vector<128x8xf32> -> vector<128x8xf32>
    %45 = vector.broadcast %21 : vector<1x8xf32> to vector<128x8xf32>
    %46 = arith.addf %44, %45 : vector<128x8xf32>
    %cst_92 = arith.constant 0.000000e+00 : f32
    %47 = vector.broadcast %cst_92 : f32 to vector<128x8xf32>
    %48 = arith.maximumf %46, %47 : vector<128x8xf32>
    %49 = vector.shape_cast %48 : vector<128x8xf32> to vector<8x16x8xf32>
    %50 = arith.truncf %49 : vector<8x16x8xf32> to vector<8x16x8xbf16>
    %c1_93 = arith.constant 1 : index
    %c1_94 = arith.constant 1 : index
    %c0_95 = arith.constant 0 : index
    %51 = vector.load %arg10[%c1_93, %c1_94, %c0_95] : memref<18x18x8xbf16, #tpu.memory_space<vmem>>, vector<8x16x8xbf16>
    tpu.vector_store %arg10[%c1_93, %c1_94, %c0_95], %50 {strides = array<i32>} : memref<18x18x8xbf16, #tpu.memory_space<vmem>>, vector<8x16x8xbf16>,
    %c8_96 = arith.constant 8 : index
    %c0_97 = arith.constant 0 : index
    %c0_98 = arith.constant 0 : index
    %52 = vector.load %arg9[%c8_96, %c0_97, %c0_98] : memref<18x18x4xbf16, #tpu.memory_space<vmem>>, vector<8x16x4xbf16>
    %c8_99 = arith.constant 8 : index
    %c0_100 = arith.constant 0 : index
    %c0_101 = arith.constant 0 : index
    %53 = vector.load %arg11[%c8_99, %c0_100, %c0_101] : memref<16x16x72xbf16, #tpu.memory_space<vmem>>, vector<8x16x4xbf16>
    tpu.vector_store %arg11[%c8_99, %c0_100, %c0_101], %52 {strides = array<i32>} : memref<16x16x72xbf16, #tpu.memory_space<vmem>>, vector<8x16x4xbf16>,
    %c8_102 = arith.constant 8 : index
    %c1_103 = arith.constant 1 : index
    %c0_104 = arith.constant 0 : index
    %54 = vector.load %arg9[%c8_102, %c1_103, %c0_104] : memref<18x18x4xbf16, #tpu.memory_space<vmem>>, vector<8x16x4xbf16>
    %c8_105 = arith.constant 8 : index
    %c0_106 = arith.constant 0 : index
    %c4_107 = arith.constant 4 : index
    %55 = vector.load %arg11[%c8_105, %c0_106, %c4_107] : memref<16x16x72xbf16, #tpu.memory_space<vmem>>, vector<8x16x4xbf16>
    tpu.vector_store %arg11[%c8_105, %c0_106, %c4_107], %54 {strides = array<i32>} : memref<16x16x72xbf16, #tpu.memory_space<vmem>>, vector<8x16x4xbf16>,
    %c8_108 = arith.constant 8 : index
    %c2_109 = arith.constant 2 : index
    %c0_110 = arith.constant 0 : index
    %56 = vector.load %arg9[%c8_108, %c2_109, %c0_110] : memref<18x18x4xbf16, #tpu.memory_space<vmem>>, vector<8x16x4xbf16>
    %c8_111 = arith.constant 8 : index
    %c0_112 = arith.constant 0 : index
    %c8_113 = arith.constant 8 : index
    %57 = vector.load %arg11[%c8_111, %c0_112, %c8_113] : memref<16x16x72xbf16, #tpu.memory_space<vmem>>, vector<8x16x4xbf16>
    tpu.vector_store %arg11[%c8_111, %c0_112, %c8_113], %56 {strides = array<i32>} : memref<16x16x72xbf16, #tpu.memory_space<vmem>>, vector<8x16x4xbf16>,
    %c9 = arith.constant 9 : index
    %c0_114 = arith.constant 0 : index
    %c0_115 = arith.constant 0 : index
    %58 = vector.load %arg9[%c9, %c0_114, %c0_115] : memref<18x18x4xbf16, #tpu.memory_space<vmem>>, vector<8x16x4xbf16>
    %c8_116 = arith.constant 8 : index
    %c0_117 = arith.constant 0 : index
    %c12_118 = arith.constant 12 : index
    %59 = vector.load %arg11[%c8_116, %c0_117, %c12_118] : memref<16x16x72xbf16, #tpu.memory_space<vmem>>, vector<8x16x4xbf16>
    tpu.vector_store %arg11[%c8_116, %c0_117, %c12_118], %58 {strides = array<i32>} : memref<16x16x72xbf16, #tpu.memory_space<vmem>>, vector<8x16x4xbf16>,
    %c9_119 = arith.constant 9 : index
    %c1_120 = arith.constant 1 : index
    %c0_121 = arith.constant 0 : index
    %60 = vector.load %arg9[%c9_119, %c1_120, %c0_121] : memref<18x18x4xbf16, #tpu.memory_space<vmem>>, vector<8x16x4xbf16>
    %c8_122 = arith.constant 8 : index
    %c0_123 = arith.constant 0 : index
    %c16_124 = arith.constant 16 : index
    %61 = vector.load %arg11[%c8_122, %c0_123, %c16_124] : memref<16x16x72xbf16, #tpu.memory_space<vmem>>, vector<8x16x4xbf16>
    tpu.vector_store %arg11[%c8_122, %c0_123, %c16_124], %60 {strides = array<i32>} : memref<16x16x72xbf16, #tpu.memory_space<vmem>>, vector<8x16x4xbf16>,
    %c9_125 = arith.constant 9 : index
    %c2_126 = arith.constant 2 : index
    %c0_127 = arith.constant 0 : index
    %62 = vector.load %arg9[%c9_125, %c2_126, %c0_127] : memref<18x18x4xbf16, #tpu.memory_space<vmem>>, vector<8x16x4xbf16>
    %c8_128 = arith.constant 8 : index
    %c0_129 = arith.constant 0 : index
    %c20_130 = arith.constant 20 : index
    %63 = vector.load %arg11[%c8_128, %c0_129, %c20_130] : memref<16x16x72xbf16, #tpu.memory_space<vmem>>, vector<8x16x4xbf16>
    tpu.vector_store %arg11[%c8_128, %c0_129, %c20_130], %62 {strides = array<i32>} : memref<16x16x72xbf16, #tpu.memory_space<vmem>>, vector<8x16x4xbf16>,
    %c10 = arith.constant 10 : index
    %c0_131 = arith.constant 0 : index
    %c0_132 = arith.constant 0 : index
    %64 = vector.load %arg9[%c10, %c0_131, %c0_132] : memref<18x18x4xbf16, #tpu.memory_space<vmem>>, vector<8x16x4xbf16>
    %c8_133 = arith.constant 8 : index
    %c0_134 = arith.constant 0 : index
    %c24_135 = arith.constant 24 : index
    %65 = vector.load %arg11[%c8_133, %c0_134, %c24_135] : memref<16x16x72xbf16, #tpu.memory_space<vmem>>, vector<8x16x4xbf16>
    tpu.vector_store %arg11[%c8_133, %c0_134, %c24_135], %64 {strides = array<i32>} : memref<16x16x72xbf16, #tpu.memory_space<vmem>>, vector<8x16x4xbf16>,
    %c10_136 = arith.constant 10 : index
    %c1_137 = arith.constant 1 : index
    %c0_138 = arith.constant 0 : index
    %66 = vector.load %arg9[%c10_136, %c1_137, %c0_138] : memref<18x18x4xbf16, #tpu.memory_space<vmem>>, vector<8x16x4xbf16>
    %c8_139 = arith.constant 8 : index
    %c0_140 = arith.constant 0 : index
    %c28_141 = arith.constant 28 : index
    %67 = vector.load %arg11[%c8_139, %c0_140, %c28_141] : memref<16x16x72xbf16, #tpu.memory_space<vmem>>, vector<8x16x4xbf16>
    tpu.vector_store %arg11[%c8_139, %c0_140, %c28_141], %66 {strides = array<i32>} : memref<16x16x72xbf16, #tpu.memory_space<vmem>>, vector<8x16x4xbf16>,
    %c10_142 = arith.constant 10 : index
    %c2_143 = arith.constant 2 : index
    %c0_144 = arith.constant 0 : index
    %68 = vector.load %arg9[%c10_142, %c2_143, %c0_144] : memref<18x18x4xbf16, #tpu.memory_space<vmem>>, vector<8x16x4xbf16>
    %c8_145 = arith.constant 8 : index
    %c0_146 = arith.constant 0 : index
    %c32_147 = arith.constant 32 : index
    %69 = vector.load %arg11[%c8_145, %c0_146, %c32_147] : memref<16x16x72xbf16, #tpu.memory_space<vmem>>, vector<8x16x4xbf16>
    tpu.vector_store %arg11[%c8_145, %c0_146, %c32_147], %68 {strides = array<i32>} : memref<16x16x72xbf16, #tpu.memory_space<vmem>>, vector<8x16x4xbf16>,
    %c8_148 = arith.constant 8 : index
    %c0_149 = arith.constant 0 : index
    %c0_150 = arith.constant 0 : index
    %70 = vector.load %arg11[%c8_148, %c0_149, %c0_150] : memref<16x16x72xbf16, #tpu.memory_space<vmem>>, vector<8x16x36xbf16>
    %71 = vector.shape_cast %70 : vector<8x16x36xbf16> to vector<128x36xbf16>
    %cst_151 = arith.constant dense<0.000000e+00> : vector<128x8xf32>
    %72 = tpu.matmul %71, %20, %cst_151 {dimension_numbers = #tpu.dot_dimension_numbers<[1], [0], [0], [1], [0, 0, 1, 1], [], []>} : vector<128x36xbf16>, vector<36x8xbf16>, vector<128x8xf32> -> vector<128x8xf32>
    %73 = vector.broadcast %21 : vector<1x8xf32> to vector<128x8xf32>
    %74 = arith.addf %72, %73 : vector<128x8xf32>
    %cst_152 = arith.constant 0.000000e+00 : f32
    %75 = vector.broadcast %cst_152 : f32 to vector<128x8xf32>
    %76 = arith.maximumf %74, %75 : vector<128x8xf32>
    %77 = vector.shape_cast %76 : vector<128x8xf32> to vector<8x16x8xf32>
    %78 = arith.truncf %77 : vector<8x16x8xf32> to vector<8x16x8xbf16>
    %c9_153 = arith.constant 9 : index
    %c1_154 = arith.constant 1 : index
    %c0_155 = arith.constant 0 : index
    %79 = vector.load %arg10[%c9_153, %c1_154, %c0_155] : memref<18x18x8xbf16, #tpu.memory_space<vmem>>, vector<8x16x8xbf16>
    tpu.vector_store %arg10[%c9_153, %c1_154, %c0_155], %78 {strides = array<i32>} : memref<18x18x8xbf16, #tpu.memory_space<vmem>>, vector<8x16x8xbf16>,
    %c0_156 = arith.constant 0 : index
    %c0_157 = arith.constant 0 : index
    %c0_158 = arith.constant 0 : index
    %80 = vector.load %arg10[%c0_156, %c0_157, %c0_158] : memref<18x18x8xbf16, #tpu.memory_space<vmem>>, vector<8x16x8xbf16>
    %c0_159 = arith.constant 0 : index
    %c0_160 = arith.constant 0 : index
    %c0_161 = arith.constant 0 : index
    %81 = vector.load %arg11[%c0_159, %c0_160, %c0_161] : memref<16x16x72xbf16, #tpu.memory_space<vmem>>, vector<8x16x8xbf16>
    tpu.vector_store %arg11[%c0_159, %c0_160, %c0_161], %80 {strides = array<i32>} : memref<16x16x72xbf16, #tpu.memory_space<vmem>>, vector<8x16x8xbf16>,
    %c0_162 = arith.constant 0 : index
    %c1_163 = arith.constant 1 : index
    %c0_164 = arith.constant 0 : index
    %82 = vector.load %arg10[%c0_162, %c1_163, %c0_164] : memref<18x18x8xbf16, #tpu.memory_space<vmem>>, vector<8x16x8xbf16>
    %c0_165 = arith.constant 0 : index
    %c0_166 = arith.constant 0 : index
    %c8_167 = arith.constant 8 : index
    %83 = vector.load %arg11[%c0_165, %c0_166, %c8_167] : memref<16x16x72xbf16, #tpu.memory_space<vmem>>, vector<8x16x8xbf16>
    tpu.vector_store %arg11[%c0_165, %c0_166, %c8_167], %82 {strides = array<i32>} : memref<16x16x72xbf16, #tpu.memory_space<vmem>>, vector<8x16x8xbf16>,
    %c0_168 = arith.constant 0 : index
    %c2_169 = arith.constant 2 : index
    %c0_170 = arith.constant 0 : index
    %84 = vector.load %arg10[%c0_168, %c2_169, %c0_170] : memref<18x18x8xbf16, #tpu.memory_space<vmem>>, vector<8x16x8xbf16>
    %c0_171 = arith.constant 0 : index
    %c0_172 = arith.constant 0 : index
    %c16_173 = arith.constant 16 : index
    %85 = vector.load %arg11[%c0_171, %c0_172, %c16_173] : memref<16x16x72xbf16, #tpu.memory_space<vmem>>, vector<8x16x8xbf16>
    tpu.vector_store %arg11[%c0_171, %c0_172, %c16_173], %84 {strides = array<i32>} : memref<16x16x72xbf16, #tpu.memory_space<vmem>>, vector<8x16x8xbf16>,
    %c1_174 = arith.constant 1 : index
    %c0_175 = arith.constant 0 : index
    %c0_176 = arith.constant 0 : index
    %86 = vector.load %arg10[%c1_174, %c0_175, %c0_176] : memref<18x18x8xbf16, #tpu.memory_space<vmem>>, vector<8x16x8xbf16>
    %c0_177 = arith.constant 0 : index
    %c0_178 = arith.constant 0 : index
    %c24_179 = arith.constant 24 : index
    %87 = vector.load %arg11[%c0_177, %c0_178, %c24_179] : memref<16x16x72xbf16, #tpu.memory_space<vmem>>, vector<8x16x8xbf16>
    tpu.vector_store %arg11[%c0_177, %c0_178, %c24_179], %86 {strides = array<i32>} : memref<16x16x72xbf16, #tpu.memory_space<vmem>>, vector<8x16x8xbf16>,
    %c1_180 = arith.constant 1 : index
    %c1_181 = arith.constant 1 : index
    %c0_182 = arith.constant 0 : index
    %88 = vector.load %arg10[%c1_180, %c1_181, %c0_182] : memref<18x18x8xbf16, #tpu.memory_space<vmem>>, vector<8x16x8xbf16>
    %c0_183 = arith.constant 0 : index
    %c0_184 = arith.constant 0 : index
    %c32_185 = arith.constant 32 : index
    %89 = vector.load %arg11[%c0_183, %c0_184, %c32_185] : memref<16x16x72xbf16, #tpu.memory_space<vmem>>, vector<8x16x8xbf16>
    tpu.vector_store %arg11[%c0_183, %c0_184, %c32_185], %88 {strides = array<i32>} : memref<16x16x72xbf16, #tpu.memory_space<vmem>>, vector<8x16x8xbf16>,
    %c1_186 = arith.constant 1 : index
    %c2_187 = arith.constant 2 : index
    %c0_188 = arith.constant 0 : index
    %90 = vector.load %arg10[%c1_186, %c2_187, %c0_188] : memref<18x18x8xbf16, #tpu.memory_space<vmem>>, vector<8x16x8xbf16>
    %c0_189 = arith.constant 0 : index
    %c0_190 = arith.constant 0 : index
    %c40 = arith.constant 40 : index
    %91 = vector.load %arg11[%c0_189, %c0_190, %c40] : memref<16x16x72xbf16, #tpu.memory_space<vmem>>, vector<8x16x8xbf16>
    tpu.vector_store %arg11[%c0_189, %c0_190, %c40], %90 {strides = array<i32>} : memref<16x16x72xbf16, #tpu.memory_space<vmem>>, vector<8x16x8xbf16>,
    %c2_191 = arith.constant 2 : index
    %c0_192 = arith.constant 0 : index
    %c0_193 = arith.constant 0 : index
    %92 = vector.load %arg10[%c2_191, %c0_192, %c0_193] : memref<18x18x8xbf16, #tpu.memory_space<vmem>>, vector<8x16x8xbf16>
    %c0_194 = arith.constant 0 : index
    %c0_195 = arith.constant 0 : index
    %c48 = arith.constant 48 : index
    %93 = vector.load %arg11[%c0_194, %c0_195, %c48] : memref<16x16x72xbf16, #tpu.memory_space<vmem>>, vector<8x16x8xbf16>
    tpu.vector_store %arg11[%c0_194, %c0_195, %c48], %92 {strides = array<i32>} : memref<16x16x72xbf16, #tpu.memory_space<vmem>>, vector<8x16x8xbf16>,
    %c2_196 = arith.constant 2 : index
    %c1_197 = arith.constant 1 : index
    %c0_198 = arith.constant 0 : index
    %94 = vector.load %arg10[%c2_196, %c1_197, %c0_198] : memref<18x18x8xbf16, #tpu.memory_space<vmem>>, vector<8x16x8xbf16>
    %c0_199 = arith.constant 0 : index
    %c0_200 = arith.constant 0 : index
    %c56 = arith.constant 56 : index
    %95 = vector.load %arg11[%c0_199, %c0_200, %c56] : memref<16x16x72xbf16, #tpu.memory_space<vmem>>, vector<8x16x8xbf16>
    tpu.vector_store %arg11[%c0_199, %c0_200, %c56], %94 {strides = array<i32>} : memref<16x16x72xbf16, #tpu.memory_space<vmem>>, vector<8x16x8xbf16>,
    %c2_201 = arith.constant 2 : index
    %c2_202 = arith.constant 2 : index
    %c0_203 = arith.constant 0 : index
    %96 = vector.load %arg10[%c2_201, %c2_202, %c0_203] : memref<18x18x8xbf16, #tpu.memory_space<vmem>>, vector<8x16x8xbf16>
    %c0_204 = arith.constant 0 : index
    %c0_205 = arith.constant 0 : index
    %c64 = arith.constant 64 : index
    %97 = vector.load %arg11[%c0_204, %c0_205, %c64] : memref<16x16x72xbf16, #tpu.memory_space<vmem>>, vector<8x16x8xbf16>
    tpu.vector_store %arg11[%c0_204, %c0_205, %c64], %96 {strides = array<i32>} : memref<16x16x72xbf16, #tpu.memory_space<vmem>>, vector<8x16x8xbf16>,
    %c0_206 = arith.constant 0 : index
    %c0_207 = arith.constant 0 : index
    %c0_208 = arith.constant 0 : index
    %98 = vector.load %arg11[%c0_206, %c0_207, %c0_208] : memref<16x16x72xbf16, #tpu.memory_space<vmem>>, vector<8x16x72xbf16>
    %99 = vector.shape_cast %98 : vector<8x16x72xbf16> to vector<128x72xbf16>
    %cst_209 = arith.constant dense<0.000000e+00> : vector<128x8xf32>
    %100 = tpu.matmul %99, %22, %cst_209 {dimension_numbers = #tpu.dot_dimension_numbers<[1], [0], [0], [1], [0, 0, 1, 1], [], []>} : vector<128x72xbf16>, vector<72x8xbf16>, vector<128x8xf32> -> vector<128x8xf32>
    %101 = vector.broadcast %23 : vector<1x8xf32> to vector<128x8xf32>
    %102 = arith.addf %100, %101 : vector<128x8xf32>
    %c1_210 = arith.constant 1 : index
    %c1_211 = arith.constant 1 : index
    %c0_212 = arith.constant 0 : index
    %103 = vector.load %arg9[%c1_210, %c1_211, %c0_212] : memref<18x18x4xbf16, #tpu.memory_space<vmem>>, vector<8x16x4xbf16>
    %104 = vector.shape_cast %103 : vector<8x16x4xbf16> to vector<128x4xbf16>
    %c0_213 = arith.constant 0 : index
    %c0_214 = arith.constant 0 : index
    %105 = vector.load %arg6[%c0_213, %c0_214] : memref<4x8xbf16, #tpu.memory_space<vmem>>, vector<4x8xbf16>
    %cst_215 = arith.constant dense<0.000000e+00> : vector<128x8xf32>
    %106 = tpu.matmul %104, %105, %cst_215 {dimension_numbers = #tpu.dot_dimension_numbers<[1], [0], [0], [1], [0, 0, 1, 1], [], []>} : vector<128x4xbf16>, vector<4x8xbf16>, vector<128x8xf32> -> vector<128x8xf32>
    %c0_216 = arith.constant 0 : index
    %c0_217 = arith.constant 0 : index
    %107 = vector.load %arg7[%c0_216, %c0_217] : memref<1x8xf32, #tpu.memory_space<vmem>>, vector<1x8xf32>
    %108 = vector.broadcast %107 : vector<1x8xf32> to vector<128x8xf32>
    %109 = arith.addf %106, %108 : vector<128x8xf32>
    %110 = arith.addf %102, %109 : vector<128x8xf32>
    %cst_218 = arith.constant 0.000000e+00 : f32
    %111 = vector.broadcast %cst_218 : f32 to vector<128x8xf32>
    %112 = arith.maximumf %110, %111 : vector<128x8xf32>
    %113 = vector.shape_cast %112 : vector<128x8xf32> to vector<8x16x8xf32>
    %114 = arith.truncf %113 : vector<8x16x8xf32> to vector<8x16x8xbf16>
    %c0_219 = arith.constant 0 : index
    %c0_220 = arith.constant 0 : index
    %c0_221 = arith.constant 0 : index
    %c0_222 = arith.constant 0 : index
    %115 = vector.load %arg8[%c0_219, %c0_220, %c0_221, %c0_222] : memref<1x16x16x8xbf16, #tpu.memory_space<vmem>>, vector<1x8x16x8xbf16>
    %116 = vector.shape_cast %115 : vector<1x8x16x8xbf16> to vector<8x16x8xbf16>
    %117 = vector.shape_cast %114 : vector<8x16x8xbf16> to vector<1x8x16x8xbf16>
    tpu.vector_store %arg8[%c0_219, %c0_220, %c0_221, %c0_222], %117 {strides = array<i32>} : memref<1x16x16x8xbf16, #tpu.memory_space<vmem>>, vector<1x8x16x8xbf16>,
    %c8_223 = arith.constant 8 : index
    %c0_224 = arith.constant 0 : index
    %c0_225 = arith.constant 0 : index
    %118 = vector.load %arg10[%c8_223, %c0_224, %c0_225] : memref<18x18x8xbf16, #tpu.memory_space<vmem>>, vector<8x16x8xbf16>
    %c8_226 = arith.constant 8 : index
    %c0_227 = arith.constant 0 : index
    %c0_228 = arith.constant 0 : index
    %119 = vector.load %arg11[%c8_226, %c0_227, %c0_228] : memref<16x16x72xbf16, #tpu.memory_space<vmem>>, vector<8x16x8xbf16>
    tpu.vector_store %arg11[%c8_226, %c0_227, %c0_228], %118 {strides = array<i32>} : memref<16x16x72xbf16, #tpu.memory_space<vmem>>, vector<8x16x8xbf16>,
    %c8_229 = arith.constant 8 : index
    %c1_230 = arith.constant 1 : index
    %c0_231 = arith.constant 0 : index
    %120 = vector.load %arg10[%c8_229, %c1_230, %c0_231] : memref<18x18x8xbf16, #tpu.memory_space<vmem>>, vector<8x16x8xbf16>
    %c8_232 = arith.constant 8 : index
    %c0_233 = arith.constant 0 : index
    %c8_234 = arith.constant 8 : index
    %121 = vector.load %arg11[%c8_232, %c0_233, %c8_234] : memref<16x16x72xbf16, #tpu.memory_space<vmem>>, vector<8x16x8xbf16>
    tpu.vector_store %arg11[%c8_232, %c0_233, %c8_234], %120 {strides = array<i32>} : memref<16x16x72xbf16, #tpu.memory_space<vmem>>, vector<8x16x8xbf16>,
    %c8_235 = arith.constant 8 : index
    %c2_236 = arith.constant 2 : index
    %c0_237 = arith.constant 0 : index
    %122 = vector.load %arg10[%c8_235, %c2_236, %c0_237] : memref<18x18x8xbf16, #tpu.memory_space<vmem>>, vector<8x16x8xbf16>
    %c8_238 = arith.constant 8 : index
    %c0_239 = arith.constant 0 : index
    %c16_240 = arith.constant 16 : index
    %123 = vector.load %arg11[%c8_238, %c0_239, %c16_240] : memref<16x16x72xbf16, #tpu.memory_space<vmem>>, vector<8x16x8xbf16>
    tpu.vector_store %arg11[%c8_238, %c0_239, %c16_240], %122 {strides = array<i32>} : memref<16x16x72xbf16, #tpu.memory_space<vmem>>, vector<8x16x8xbf16>,
    %c9_241 = arith.constant 9 : index
    %c0_242 = arith.constant 0 : index
    %c0_243 = arith.constant 0 : index
    %124 = vector.load %arg10[%c9_241, %c0_242, %c0_243] : memref<18x18x8xbf16, #tpu.memory_space<vmem>>, vector<8x16x8xbf16>
    %c8_244 = arith.constant 8 : index
    %c0_245 = arith.constant 0 : index
    %c24_246 = arith.constant 24 : index
    %125 = vector.load %arg11[%c8_244, %c0_245, %c24_246] : memref<16x16x72xbf16, #tpu.memory_space<vmem>>, vector<8x16x8xbf16>
    tpu.vector_store %arg11[%c8_244, %c0_245, %c24_246], %124 {strides = array<i32>} : memref<16x16x72xbf16, #tpu.memory_space<vmem>>, vector<8x16x8xbf16>,
    %c9_247 = arith.constant 9 : index
    %c1_248 = arith.constant 1 : index
    %c0_249 = arith.constant 0 : index
    %126 = vector.load %arg10[%c9_247, %c1_248, %c0_249] : memref<18x18x8xbf16, #tpu.memory_space<vmem>>, vector<8x16x8xbf16>
    %c8_250 = arith.constant 8 : index
    %c0_251 = arith.constant 0 : index
    %c32_252 = arith.constant 32 : index
    %127 = vector.load %arg11[%c8_250, %c0_251, %c32_252] : memref<16x16x72xbf16, #tpu.memory_space<vmem>>, vector<8x16x8xbf16>
    tpu.vector_store %arg11[%c8_250, %c0_251, %c32_252], %126 {strides = array<i32>} : memref<16x16x72xbf16, #tpu.memory_space<vmem>>, vector<8x16x8xbf16>,
    %c9_253 = arith.constant 9 : index
    %c2_254 = arith.constant 2 : index
    %c0_255 = arith.constant 0 : index
    %128 = vector.load %arg10[%c9_253, %c2_254, %c0_255] : memref<18x18x8xbf16, #tpu.memory_space<vmem>>, vector<8x16x8xbf16>
    %c8_256 = arith.constant 8 : index
    %c0_257 = arith.constant 0 : index
    %c40_258 = arith.constant 40 : index
    %129 = vector.load %arg11[%c8_256, %c0_257, %c40_258] : memref<16x16x72xbf16, #tpu.memory_space<vmem>>, vector<8x16x8xbf16>
    tpu.vector_store %arg11[%c8_256, %c0_257, %c40_258], %128 {strides = array<i32>} : memref<16x16x72xbf16, #tpu.memory_space<vmem>>, vector<8x16x8xbf16>,
    %c10_259 = arith.constant 10 : index
    %c0_260 = arith.constant 0 : index
    %c0_261 = arith.constant 0 : index
    %130 = vector.load %arg10[%c10_259, %c0_260, %c0_261] : memref<18x18x8xbf16, #tpu.memory_space<vmem>>, vector<8x16x8xbf16>
    %c8_262 = arith.constant 8 : index
    %c0_263 = arith.constant 0 : index
    %c48_264 = arith.constant 48 : index
    %131 = vector.load %arg11[%c8_262, %c0_263, %c48_264] : memref<16x16x72xbf16, #tpu.memory_space<vmem>>, vector<8x16x8xbf16>
    tpu.vector_store %arg11[%c8_262, %c0_263, %c48_264], %130 {strides = array<i32>} : memref<16x16x72xbf16, #tpu.memory_space<vmem>>, vector<8x16x8xbf16>,
    %c10_265 = arith.constant 10 : index
    %c1_266 = arith.constant 1 : index
    %c0_267 = arith.constant 0 : index
    %132 = vector.load %arg10[%c10_265, %c1_266, %c0_267] : memref<18x18x8xbf16, #tpu.memory_space<vmem>>, vector<8x16x8xbf16>
    %c8_268 = arith.constant 8 : index
    %c0_269 = arith.constant 0 : index
    %c56_270 = arith.constant 56 : index
    %133 = vector.load %arg11[%c8_268, %c0_269, %c56_270] : memref<16x16x72xbf16, #tpu.memory_space<vmem>>, vector<8x16x8xbf16>
    tpu.vector_store %arg11[%c8_268, %c0_269, %c56_270], %132 {strides = array<i32>} : memref<16x16x72xbf16, #tpu.memory_space<vmem>>, vector<8x16x8xbf16>,
    %c10_271 = arith.constant 10 : index
    %c2_272 = arith.constant 2 : index
    %c0_273 = arith.constant 0 : index
    %134 = vector.load %arg10[%c10_271, %c2_272, %c0_273] : memref<18x18x8xbf16, #tpu.memory_space<vmem>>, vector<8x16x8xbf16>
    %c8_274 = arith.constant 8 : index
    %c0_275 = arith.constant 0 : index
    %c64_276 = arith.constant 64 : index
    %135 = vector.load %arg11[%c8_274, %c0_275, %c64_276] : memref<16x16x72xbf16, #tpu.memory_space<vmem>>, vector<8x16x8xbf16>
    tpu.vector_store %arg11[%c8_274, %c0_275, %c64_276], %134 {strides = array<i32>} : memref<16x16x72xbf16, #tpu.memory_space<vmem>>, vector<8x16x8xbf16>,
    %c8_277 = arith.constant 8 : index
    %c0_278 = arith.constant 0 : index
    %c0_279 = arith.constant 0 : index
    %136 = vector.load %arg11[%c8_277, %c0_278, %c0_279] : memref<16x16x72xbf16, #tpu.memory_space<vmem>>, vector<8x16x72xbf16>
    %137 = vector.shape_cast %136 : vector<8x16x72xbf16> to vector<128x72xbf16>
    %cst_280 = arith.constant dense<0.000000e+00> : vector<128x8xf32>
    %138 = tpu.matmul %137, %22, %cst_280 {dimension_numbers = #tpu.dot_dimension_numbers<[1], [0], [0], [1], [0, 0, 1, 1], [], []>} : vector<128x72xbf16>, vector<72x8xbf16>, vector<128x8xf32> -> vector<128x8xf32>
    %139 = vector.broadcast %23 : vector<1x8xf32> to vector<128x8xf32>
    %140 = arith.addf %138, %139 : vector<128x8xf32>
    %c9_281 = arith.constant 9 : index
    %c1_282 = arith.constant 1 : index
    %c0_283 = arith.constant 0 : index
    %141 = vector.load %arg9[%c9_281, %c1_282, %c0_283] : memref<18x18x4xbf16, #tpu.memory_space<vmem>>, vector<8x16x4xbf16>
    %142 = vector.shape_cast %141 : vector<8x16x4xbf16> to vector<128x4xbf16>
    %c0_284 = arith.constant 0 : index
    %c0_285 = arith.constant 0 : index
    %143 = vector.load %arg6[%c0_284, %c0_285] : memref<4x8xbf16, #tpu.memory_space<vmem>>, vector<4x8xbf16>
    %cst_286 = arith.constant dense<0.000000e+00> : vector<128x8xf32>
    %144 = tpu.matmul %142, %143, %cst_286 {dimension_numbers = #tpu.dot_dimension_numbers<[1], [0], [0], [1], [0, 0, 1, 1], [], []>} : vector<128x4xbf16>, vector<4x8xbf16>, vector<128x8xf32> -> vector<128x8xf32>
    %c0_287 = arith.constant 0 : index
    %c0_288 = arith.constant 0 : index
    %145 = vector.load %arg7[%c0_287, %c0_288] : memref<1x8xf32, #tpu.memory_space<vmem>>, vector<1x8xf32>
    %146 = vector.broadcast %145 : vector<1x8xf32> to vector<128x8xf32>
    %147 = arith.addf %144, %146 : vector<128x8xf32>
    %148 = arith.addf %140, %147 : vector<128x8xf32>
    %cst_289 = arith.constant 0.000000e+00 : f32
    %149 = vector.broadcast %cst_289 : f32 to vector<128x8xf32>
    %150 = arith.maximumf %148, %149 : vector<128x8xf32>
    %151 = vector.shape_cast %150 : vector<128x8xf32> to vector<8x16x8xf32>
    %152 = arith.truncf %151 : vector<8x16x8xf32> to vector<8x16x8xbf16>
    %c0_290 = arith.constant 0 : index
    %c8_291 = arith.constant 8 : index
    %c0_292 = arith.constant 0 : index
    %c0_293 = arith.constant 0 : index
    %153 = vector.load %arg8[%c0_290, %c8_291, %c0_292, %c0_293] : memref<1x16x16x8xbf16, #tpu.memory_space<vmem>>, vector<1x8x16x8xbf16>
    %154 = vector.shape_cast %153 : vector<1x8x16x8xbf16> to vector<8x16x8xbf16>
    %155 = vector.shape_cast %152 : vector<8x16x8xbf16> to vector<1x8x16x8xbf16>
    tpu.vector_store %arg8[%c0_290, %c8_291, %c0_292, %c0_293], %155 {strides = array<i32>} : memref<1x16x16x8xbf16, #tpu.memory_space<vmem>>, vector<1x8x16x8xbf16>,
    return
  }
  func.func @transform_0(%arg0: i32) -> (i32, i32, i32, i32) {
    %c0_i32 = arith.constant 0 : i32
    %c0_i32_0 = arith.constant 0 : i32
    %c0_i32_1 = arith.constant 0 : i32
    %c0_i32_2 = arith.constant 0 : i32
    return %arg0, %c0_i32, %c0_i32_0, %c0_i32_1 : i32, i32, i32, i32
  }
  func.func @transform_1(%arg0: i32) -> (i32, i32) {
    %c0_i32 = arith.constant 0 : i32
    %c0_i32_0 = arith.constant 0 : i32
    %c0_i32_1 = arith.constant 0 : i32
    return %c0_i32, %c0_i32_0 : i32, i32
  }
  func.func @transform_2(%arg0: i32) -> (i32, i32) {
    %c0_i32 = arith.constant 0 : i32
    %c0_i32_0 = arith.constant 0 : i32
    %c0_i32_1 = arith.constant 0 : i32
    return %c0_i32, %c0_i32_0 : i32, i32
  }
  func.func @transform_3(%arg0: i32) -> (i32, i32) {
    %c0_i32 = arith.constant 0 : i32
    %c0_i32_0 = arith.constant 0 : i32
    %c0_i32_1 = arith.constant 0 : i32
    return %c0_i32, %c0_i32_0 : i32, i32
  }
  func.func @transform_4(%arg0: i32) -> (i32, i32) {
    %c0_i32 = arith.constant 0 : i32
    %c0_i32_0 = arith.constant 0 : i32
    %c0_i32_1 = arith.constant 0 : i32
    return %c0_i32, %c0_i32_0 : i32, i32
  }
  func.func @transform_5(%arg0: i32) -> (i32, i32) {
    %c0_i32 = arith.constant 0 : i32
    %c0_i32_0 = arith.constant 0 : i32
    %c0_i32_1 = arith.constant 0 : i32
    return %c0_i32, %c0_i32_0 : i32, i32
  }
  func.func @transform_6(%arg0: i32) -> (i32, i32) {
    %c0_i32 = arith.constant 0 : i32
    %c0_i32_0 = arith.constant 0 : i32
    %c0_i32_1 = arith.constant 0 : i32
    return %c0_i32, %c0_i32_0 : i32, i32
  }
  func.func @transform_7(%arg0: i32) -> (i32, i32, i32, i32) {
    %c0_i32 = arith.constant 0 : i32
    %c0_i32_0 = arith.constant 0 : i32
    %c0_i32_1 = arith.constant 0 : i32
    %c0_i32_2 = arith.constant 0 : i32
    return %arg0, %c0_i32, %c0_i32_0, %c0_i32_1 : i32, i32, i32, i32
  }
}

</mosaic_0001>

<bundles_post_ra>
// kernel: tpu_custom_call.1
= control target key start
LH: loop header
LB: loop body
LE: loop exit
PB: predicated region body
PF: predicated region fallthrough
CT: control target
= control target key end

     0   :  { %s9699_s24 = smov 0   ;;  %s13280_s0 = inlined_call_operand.vmem [shape: f32[2,16,16,4], index: 0, kind: input, shape index: {}]   ;;  %s13281_s1 = inlined_call_operand.vmem [shape: bf16[36,8], index: 1, kind: input, shape index: {}]   ;;  %s13282_s2 = inlined_call_operand.vmem [shape: f32[1,8], index: 2, kind: input, shape index: {}]   ;;  %s13283_s3 = inlined_call_operand.vmem [shape: bf16[72,8], index: 3, kind: input, shape index: {}]   ;;  %s13284_s4 = inlined_call_operand.vmem [shape: f32[1,8], index: 4, kind: input, shape index: {}]   ;;  %s13285_s5 = inlined_call_operand.vmem [shape: bf16[4,8], index: 5, kind: input, shape index: {}]   ;;  %s13286_s6 = inlined_call_operand.vmem [shape: f32[1,8], index: 6, kind: input, shape index: {}]   ;;  %s13287_s7 = inlined_call_operand.vmem [shape: bf16[2,16,16,8], index: 7, kind: output, shape index: {}]  }
   0x1 LB: > { %s9242_s25 = sadd.s32 4294967295, %s9644_s24   ;;  %p9246_p0 = scmp.ge.s32.totalorder %s9644_s24, 1  ;;  %s9644_s24 = sphi %s9699_s24, %s17_s24  }
   0x2   : > { %p237_p1 = scmp.lt.s32.totalorder %s9644_s24, 3 }
   0x4   : > { %p238_p2 = pnand %p9246_p0, %p237_p1 }
   0x5   : > { %p269_p3 = scmp.lt.s32.totalorder (!%p238_p2), %s9242_s25, 1  ;;  %s9647_s30 = smov (!%p238_p2), 4  }
   0x6   : > { %241 = sbr.rel (%p238_p2) target bundleno = 1695 (0x69f), region = 48  ;;  %s9648_s8 = smov (!%p238_p2), 8  }
   0x7   : > { %s9649_s9 = smov (!%p238_p2), 12   ;;  %s9650_s10 = smov (!%p238_p2), 16  }
   0x8   : > { %s9651_s11 = smov (!%p238_p2), 20   ;;  %s9652_s12 = smov (!%p238_p2), 24  }
   0x9   : > { %s9653_s13 = smov (!%p238_p2), 28   ;;  %s9654_s14 = smov (!%p238_p2), 32  }
   0xa   : > { %s9655_s23 = smov (!%p238_p2), 40  }
   0xb   : > { %vm280_vm0 = vcmask 27648   ;;  %vm283_vm1 = vcmask 24576   ;;  %v9646_v0 = vmov 0   ;;  %vm290_vm2 = vsmask.f32 256  ;;  %s13358_s25 = smov (!%p269_p3, %s9242_s25), 1 }
   0xc   : > { %282 = vst.msk [vmem:[#allocation2 + $0x4] sm:$0xf] %vm280_vm0, %v9646_v0  ;;  %vm13291_vm3 = vsmask.f32 7938  ;;  %vm9712_vm4 = vmand %vm283_vm1, %vm290_vm2  ;;  %vm402_vm5 = vcmask 60416   ;;  %vm405_vm6 = vcmask 57344  }
   0xd   : > { %284 = vst.msk [vmem:[#allocation2 + $0x8] sm:$0x1] %vm283_vm1, %v9646_v0  ;;  %v298_v2 = vld [vmem:[#allocation2 + $0x18] sm:$0x1]  ;;  %v295_v3 = vld [vmem:[#allocation2 + $0xc] sm:$0x1]  ;;  %vm9723_vm8 = vmand %vm283_vm1, %vm13291_vm3 }
   0xe   : > { %281 = vst.msk [vmem:[#allocation2] sm:$0xf] %vm280_vm0, %v9646_v0  ;;  %vm586_vm7 = vsmask.f32 4368  ;;  %v301_v4 = vld [vmem:[#allocation2 + $0x24] sm:$0x1]  ;;  %vm9776_vm12 = vmand %vm280_vm0, %vm13291_vm3 }
   0xf   : > { %286 = vst.msk [vmem:[#allocation2 + $0xcc] sm:$0xf] %vm280_vm0, %v9646_v0  ;;  %s9565_s26 = sshll.u32 %s13358_s25, 8  ;;  %v299_v6 = vsel %vm9712_vm4, 0, %v298_v2  ;;  %v296_v7 = vsel %vm9712_vm4, 0, %v295_v3  ;;  %v302_v8 = vsel %vm9712_vm4, 0, %v301_v4  ;;  %vm9764_vm11 = vmor %vm290_vm2, %vm586_vm7 }
  0x10   : > { %287 = vst.msk [vmem:[#allocation2 + $0xd0] sm:$0xf] %vm280_vm0, %v9646_v0  ;;  %s9739_s29 = scalar_lea.vmem %s13280_s0, %s9565_s26  ;;  %v354_v10 = vld [vmem:[#allocation2 + $0x20] sm:$0x1]  ;;  %vm1095_vm9 = vsmask.f32 3328  ;;  %vm10849_vm3 = vmand %vm405_vm6, %vm290_vm2 }
  0x11   : > { %288 = vst.msk [vmem:[#allocation2 + $0xd4] sm:$0x1] %vm283_vm1, %v9646_v0  ;;  %vm1096_vm10 = vsmask.f32 7440  ;;  %v524_v16 = vld [vmem:[%s9739_s29 + $0x10] sm:$0xff]  ;;  %v525_v20 = vld [vmem:[%s9739_s29 + $0x18] sm:$0xff] }
  0x12   : > { %403 = vst.msk [vmem:[#allocation3] sm:$0xf] %vm402_vm5, %v9646_v0  ;;  %v556_v21 = vpack.c.bf16 %v524_v16, %v524_v16  ;;  %v557_v22 = vpack.c.bf16 %v525_v20, %v525_v20  ;;  %v522_v23 = vld [vmem:[%s9739_s29] sm:$0xff]  ;;  %v523_v24 = vld [vmem:[%s9739_s29 + $0x8] sm:$0xff]  ;;  %v355_v26 = vsel %vm9723_vm8, 0, %v354_v10  ;;  %v528_v55 = vld [vmem:[%s9739_s29 + $0x30] sm:$0xff] }
  0x13   : > { %v1072_v9 = vld [vmem:[#allocation2 + $0x4] sm:$0xf]  ;;  %404 = vst.msk [vmem:[#allocation3 + $0x4] sm:$0xf] %vm402_vm5, %v9646_v0  ;;  %v554_v30 = vpack.c.bf16 %v522_v23, %v522_v23  ;;  %v527_v31 = vld [vmem:[%s9739_s29 + $0x28] sm:$0xff]  ;;  %v555_v34 = vpack.c.bf16 %v523_v24, %v523_v24  ;;  %vm9782_vm13 = vmor %vm1095_vm9, %vm1096_vm10  ;;  %v560_v10 = vpack.c.bf16 %v528_v55, %v528_v55  ;;  %vm1403_vm14 = vcmask 1042432  }
  0x14   : > { %v348_v11 = vld [vmem:[#allocation2 + $0x8] sm:$0x1]  ;;  %v1108_v12 = vshll.u32 %v1072_v9, 16  ;;  %v1112_v13 = vshrl.u32 %v1072_v9, 16  ;;  %406 = vst.msk [vmem:[#allocation3 + $0x8] sm:$0x1] %vm405_vm6, %v9646_v0  ;;  %v559_v43 = vpack.c.bf16 %v527_v31, %v527_v31 }
  0x15   : > { %v349_v14 = vsel %vm9723_vm8, 0, %v348_v11  ;;  %408 = vst.msk [vmem:[#allocation3 + $0xcc] sm:$0xf] %vm402_vm5, %v9646_v0  ;;  %v292_v15 = vld [vmem:[#allocation2] sm:$0x1]  ;;  %v606_v28 = vshrl.u32 %v556_v21, 16 }
  0x16   : > { %350 = vst [vmem:[#allocation2 + $0x8] sm:$0x1] %v349_v14  ;;  %v9746_v17 = vrot.slane %v1108_v12, 5  ;;  %v1114_v18 = vrot.slane %v1112_v13, 4  ;;  %v293_v19 = vsel %vm9712_vm4, 0, %v292_v15  ;;  %v526_v25 = vld [vmem:[%s9739_s29 + $0x20] sm:$0xff] }
  0x17   : > { %409 = vst.msk [vmem:[#allocation3 + $0xd0] sm:$0xf] %vm402_vm5, %v9646_v0  ;;  %v609_v29 = vshll.u32 %v556_v21, 16  ;;  %v614_v32 = vshrl.u32 %v557_v22, 16  ;;  %v617_v33 = vshll.u32 %v557_v22, 16  ;;  %v558_v35 = vpack.c.bf16 %v526_v25, %v526_v25  ;;  %v529_v4 = vld [vmem:[%s9739_s29 + $0x38] sm:$0xff] }
  0x18   : > { %v1115_v27 = vor.u32 %v1114_v18, %v9746_v17  ;;  %410 = vst.msk [vmem:[#allocation3 + $0xd4] sm:$0x1] %vm405_vm6, %v9646_v0  ;;  %v608_v37 = vrot.slane %v606_v28, 7  ;;  %v589_v38 = vshrl.u32 %v554_v30, 16  ;;  %v592_v39 = vshll.u32 %v554_v30, 16  ;;  %v532_v11 = vld [vmem:[%s9739_s29 + $0x50] sm:$0xff] }
  0x19   : > { %294 = vst [vmem:[#allocation2] sm:$0x1] %v293_v19  ;;  %v9760_v40 = vrot.slane %v614_v32, 7  ;;  %v597_v41 = vshrl.u32 %v555_v34, 16  ;;  %v600_v42 = vshll.u32 %v555_v34, 16  ;;  %v623_v48 = vshrl.u32 %v558_v35, 16 }
  0x1a   : > { %v1116_v36 = vrot.slane %v1115_v27, 4  ;;  %300 = vst [vmem:[#allocation2 + $0x18] sm:$0x1] %v299_v6  ;;  %v611_v45 = vor.u32 %v609_v29, %v608_v37  ;;  %v612_v46 = vrot.slane %v608_v37, 4  ;;  %v591_v47 = vrot.slane %v589_v38, 7  ;;  %v533_v24 = vld [vmem:[%s9739_s29 + $0x58] sm:$0xff] }
  0x1b   : > { %297 = vst [vmem:[#allocation2 + $0xc] sm:$0x1] %v296_v7  ;;  %v619_v50 = vor.u32 %v617_v33, %v9760_v40  ;;  %v9769_v51 = vrot.slane %v597_v41, 7  ;;  %v626_v52 = vshll.u32 %v558_v35, 16  ;;  %v631_v53 = vshrl.u32 %v559_v43, 16  ;;  %v530_v25 = vld [vmem:[%s9739_s29 + $0x40] sm:$0xff] }
  0x1c   : > { %303 = vst [vmem:[#allocation2 + $0x24] sm:$0x1] %v302_v8  ;;  %v9771_v54 = vld [vmem:[#allocation2 + $0x14] sm:$0x1]  ;;  %v594_v58 = vor.u32 %v592_v39, %v591_v47  ;;  %v595_v59 = vrot.slane %v591_v47, 4  ;;  %v625_v60 = vrot.slane %v623_v48, 7  ;;  %v561_v34 = vpack.c.bf16 %v529_v4, %v529_v4 }
  0x1d   : > { %v1073_v49 = vld [vmem:[#allocation2 + $0x8] sm:$0x1]  ;;  %356 = vst [vmem:[#allocation2 + $0x20] sm:$0x1] %v355_v26  ;;  %v620_v62 = vsel %vm9764_vm11, %v612_v46, %v619_v50  ;;  %v602_v63 = vor.u32 %v600_v42, %v9769_v51  ;;  %v9789_v0 = vrot.slane %v631_v53, 7  ;;  %v634_v2 = vshll.u32 %v559_v43, 16 }
  0x1e   : > { %v1118_v57 = vshll.u32 %v1073_v49, 16  ;;  %v360_v3 = vld [vmem:[#allocation2 + $0x38] sm:$0x1]  ;;  %921 = vst.msk [vmem:[#allocation2 + $0x1c] sm:$0xf] %vm280_vm0, %v620_v62  ;;  %v628_v8 = vor.u32 %v626_v52, %v625_v60  ;;  %v629_v9 = vrot.slane %v625_v60, 4  ;;  %v9830_v49 = vpack.c.bf16 %v533_v24, %v533_v24 }
  0x1f   : > { %v603_v15 = vsel %vm9764_vm11, %v595_v59, %v602_v63  ;;  %v636_v16 = vor.u32 %v634_v2, %v9789_v0  ;;  %v9797_v18 = vld [vmem:[#allocation2 + $0x30] sm:$0x1]  ;;  %v621_v22 = vrot.slane %v9760_v40, 4  ;;  %v352_v23 = vsel %vm9723_vm8, 0, %v9771_v54  ;;  %v9820_v35 = vld [vmem:[#allocation2 + $0x2c] sm:$0x1] }
  0x20   : > { %v1120_v6 = vrot.slane %v1118_v57, 5  ;;  %v1071_v7 = vld [vmem:[#allocation2] sm:$0xf]  ;;  %914 = vst.msk [vmem:[#allocation2 + $0x10] sm:$0xf] %vm280_vm0, %v603_v15  ;;  %v604_v32 = vrot.slane %v9769_v51, 4  ;;  %v9825_v40 = vpack.c.bf16 %v532_v11, %v532_v11  ;;  %v9832_v50 = vpack.c.bf16 %v530_v25, %v530_v25 }
  0x21   : > { %v1099_v12 = vshrl.u32 %v1071_v7, 16  ;;  %v1102_v13 = vshll.u32 %v1071_v7, 16  ;;  %v918_v14 = vld [vmem:[#allocation2 + $0x18] sm:$0xf]  ;;  %v637_v29 = vsel %vm9764_vm11, %v629_v9, %v636_v16  ;;  %v361_v33 = vsel %vm9723_vm8, 0, %v360_v3  ;;  %s9656_s26 = smov 48  }
  0x22   : > { %v1121_v19 = vsel %vm9782_vm13, %v1116_v36, %v1120_v6  ;;  %v919_v20 = vsel %vm9776_vm12, %v611_v45, %v918_v14  ;;  %v911_v21 = vld [vmem:[#allocation2 + $0xc] sm:$0xf]  ;;  %v640_v38 = vshrl.u32 %v560_v10, 16  ;;  %v305_v39 = vsel %vm9712_vm4, 0, %v9797_v18  ;;  %928 = vst.msk [vmem:[#allocation2 + $0x28] sm:$0xf] %vm280_vm0, %v637_v29 }
  0x23   : > { %1292 = vrot.lane.b32.xlu0 %v1121_v19, %s9647_s30  ;;  %v1101_v26 = vrot.slane %v1099_v12, 4  ;;  %v1104_v27 = vrot.slane %v1102_v13, 5  ;;  %920 = vst [vmem:[#allocation2 + $0x18] sm:$0xf] %v919_v20  ;;  %v912_v28 = vsel %vm9776_vm12, %v594_v58, %v911_v21  ;;  %v925_v30 = vld [vmem:[#allocation2 + $0x24] sm:$0xf] }
  0x24   : > { %913 = vst [vmem:[#allocation2 + $0xc] sm:$0xf] %v912_v28  ;;  %v926_v31 = vsel %vm9776_vm12, %v628_v8, %v925_v30  ;;  %v922_v37 = vld [vmem:[#allocation2 + $0x20] sm:$0x1]  ;;  %v648_v42 = vshrl.u32 %v561_v34, 16  ;;  %v651_v43 = vshll.u32 %v561_v34, 16 }
  0x25   : > { %v1105_v36 = vor.u32 %v1104_v27, %v1101_v26  ;;  %927 = vst [vmem:[#allocation2 + $0x24] sm:$0xf] %v926_v31  ;;  %v923_v41 = vsel %vm9712_vm4, %v621_v22, %v922_v37  ;;  %v643_v45 = vshll.u32 %v560_v10, 16  ;;  %v1078_v47 = vld [vmem:[#allocation2 + $0x1c] sm:$0xf]  ;;  %v642_v48 = vrot.slane %v640_v38, 7 }
  0x26   : > { %924 = vst [vmem:[#allocation2 + $0x20] sm:$0x1] %v923_v41  ;;  %v1156_v52 = vshll.u32 %v1078_v47, 16  ;;  %v1160_v53 = vshrl.u32 %v1078_v47, 16  ;;  %v650_v54 = vrot.slane %v648_v42, 7  ;;  %v358_v55 = vsel %vm9723_vm8, 0, %v9820_v35 }
  0x27   : > { %v1106_v46 = vrot.slane %v1105_v36, 4  ;;  %353 = vst [vmem:[#allocation2 + $0x14] sm:$0x1] %v352_v23  ;;  %v1075_v58 = vld [vmem:[#allocation2 + $0x10] sm:$0xf]  ;;  %v646_v59 = vrot.slane %v642_v48, 4  ;;  %v9840_v60 = vor.u32 %v643_v45, %v642_v48 }
  0x28   : > { %362 = vst [vmem:[#allocation2 + $0x38] sm:$0x1] %v361_v33  ;;  %v638_v62 = vrot.slane %v9789_v0, 4  ;;  %v1158_v2 = vrot.slane %v1156_v52, 5  ;;  %v1162_v3 = vrot.slane %v1160_v53, 4  ;;  %v1132_v4 = vshll.u32 %v1075_v58, 16 }
  0x29   : > { %v1111_v57 = vsel %vm9782_vm13, %v1106_v46, %v9746_v17  ;;  %v1136_v6 = vshrl.u32 %v1075_v58, 16  ;;  %v653_v10 = vor.u32 %v651_v43, %v650_v54  ;;  %v655_v11 = vrot.slane %v650_v54, 4  ;;  %v1081_v19 = vld [vmem:[#allocation2 + $0x28] sm:$0xf]  ;;  %306 = vst [vmem:[#allocation2 + $0x30] sm:$0x1] %v305_v39 }
  0x2a   : > { %v1077_v63 = vld [vmem:[#allocation2 + $0x18] sm:$0xf]  ;;  %v1134_v13 = vrot.slane %v1132_v4, 5  ;;  %v1180_v24 = vshll.u32 %v1081_v19, 16  ;;  %v1184_v25 = vshrl.u32 %v1081_v19, 16  ;;  %v1163_v30 = vor.u32 %v1162_v3, %v1158_v2  ;;  %s9566_s18 = sshll.u32 %s13358_s25, 7 }
  0x2b   : > { %1290 = vrot.lane.b32.xlu0 %v1111_v57, %s9647_s30  ;;  %v1147_v7 = vshrl.u32 %v1077_v63, 16  ;;  %v1150_v8 = vshll.u32 %v1077_v63, 16  ;;  %v1074_v9 = vld [vmem:[#allocation2 + $0xc] sm:$0xf]  ;;  %v1138_v14 = vrot.slane %v1136_v6, 4  ;;  %v654_v47 = vsel %vm9764_vm11, %v646_v59, %v653_v10 }
  0x2c   : > { %v1123_v17 = vshrl.u32 %v1074_v9, 16  ;;  %v1126_v12 = vshll.u32 %v1074_v9, 16  ;;  %v1080_v15 = vld [vmem:[#allocation2 + $0x24] sm:$0xf]  ;;  %v1182_v34 = vrot.slane %v1180_v24, 5  ;;  %v9848_v42 = vrot.slane %v1163_v30, 4 }
  0x2d   : > { %v1149_v16 = vrot.slane %v1147_v7, 4  ;;  %v1152_v18 = vrot.slane %v1150_v8, 5  ;;  %v1171_v20 = vshrl.u32 %v1080_v15, 16  ;;  %v1174_v21 = vshll.u32 %v1080_v15, 16  ;;  %v1079_v26 = vld [vmem:[#allocation2 + $0x20] sm:$0x1] }
  0x2e   : > { %v1125_v22 = vrot.slane %v1123_v17, 4  ;;  %v1128_v23 = vrot.slane %v1126_v12, 5  ;;  %v915_v31 = vld [vmem:[#allocation2 + $0x14] sm:$0x1]  ;;  %v1166_v35 = vshll.u32 %v1079_v26, 16  ;;  %v1139_v43 = vor.u32 %v1138_v14, %v1134_v13  ;;  %v535_v26 = vld [vmem:[%s9739_s29 + $0x68] sm:$0xff] }
  0x2f   : > { %v1153_v27 = vor.u32 %v1152_v18, %v1149_v16  ;;  %v1173_v28 = vrot.slane %v1171_v20, 4  ;;  %v1176_v29 = vrot.slane %v1174_v21, 5  ;;  %v916_v36 = vsel %vm9712_vm4, %v604_v32, %v915_v31  ;;  %v936_v37 = vld [vmem:[#allocation2 + $0x38] sm:$0x1]  ;;  %359 = vst [vmem:[#allocation2 + $0x2c] sm:$0x1] %v358_v55 }
  0x30   : > { %v1129_v33 = vor.u32 %v1128_v23, %v1125_v22  ;;  %917 = vst [vmem:[#allocation2 + $0x14] sm:$0x1] %v916_v36  ;;  %v310_v45 = vld [vmem:[#allocation2 + $0x48] sm:$0x1]  ;;  %v1168_v39 = vrot.slane %v1166_v35, 5  ;;  %v937_v51 = vsel %vm9712_vm4, %v655_v11, %v936_v37  ;;  %v9856_v53 = vrot.slane %v1139_v43, 4 }
  0x31   : > { %v1154_v38 = vrot.slane %v1153_v27, 4  ;;  %v1177_v41 = vor.u32 %v1176_v29, %v1173_v28  ;;  %v363_v32 = vld [vmem:[#allocation2 + $0x44] sm:$0x1]  ;;  %935 = vst.msk [vmem:[#allocation2 + $0x34] sm:$0xf] %vm280_vm0, %v654_v47  ;;  %v1186_v54 = vrot.slane %v1184_v25, 4 }
  0x32   : > { %v1130_v46 = vrot.slane %v1129_v33, 4  ;;  %v531_v55 = vld [vmem:[%s9739_s29 + $0x48] sm:$0xff]  ;;  %v1169_v58 = vsel %vm9782_vm13, %v9848_v42, %v1168_v39  ;;  %938 = vst [vmem:[#allocation2 + $0x38] sm:$0x1] %v937_v51  ;;  %v311_v59 = vsel %vm9712_vm4, 0, %v310_v45  ;;  %v674_v63 = vshrl.u32 %v9825_v40, 16 }
  0x33   : > { %v1159_v48 = vsel %vm9782_vm13, %v1154_v38, %v1158_v2  ;;  %v1178_v52 = vrot.slane %v1177_v41, 4  ;;  %v534_v2 = vld [vmem:[%s9739_s29 + $0x60] sm:$0xff]  ;;  %v1187_v4 = vor.u32 %v1186_v54, %v1182_v34  ;;  %312 = vst [vmem:[#allocation2 + $0x48] sm:$0x1] %v311_v59  ;;  %v677_v6 = vshll.u32 %v9825_v40, 16 }
  0x34   : > { %1298 = vrot.lane.b32.xlu2 %v1159_v48, %s9647_s30  ;;  %v1135_v57 = vsel %vm9782_vm13, %v1130_v46, %v1134_v13  ;;  %v682_v7 = vshrl.u32 %v9830_v49, 16  ;;  %v307_v8 = vld [vmem:[#allocation2 + $0x3c] sm:$0x1]  ;;  %v932_v10 = vld [vmem:[#allocation2 + $0x30] sm:$0xf]  ;;  %v676_v11 = vrot.slane %v674_v63, 7  ;;  %v563_v13 = vpack.c.bf16 %v531_v55, %v531_v55 }
  0x35   : > { %1294 = vrot.lane.b32.xlu1 %v1135_v57, %s9647_s30  ;;  %v1183_v3 = vsel %vm9782_vm13, %v1178_v52, %v1182_v34  ;;  %v369_v9 = vld [vmem:[#allocation2 + $0x5c] sm:$0x1]  ;;  %v685_v17 = vshll.u32 %v9830_v49, 16  ;;  %v364_v12 = vsel %vm9723_vm8, 0, %v363_v32  ;;  %v933_v14 = vsel %vm9776_vm12, %v9840_v60, %v932_v10  ;;  %v366_v10 = vld [vmem:[#allocation2 + $0x50] sm:$0x1] }
  0x36   : > { %1302 = vrot.lane.b32.xlu0 %v1183_v3, %s9647_s30  ;;  %v929_v15 = vld [vmem:[#allocation2 + $0x2c] sm:$0x1]  ;;  %v9882_v40 = vrot.slane %v1187_v4, 4  ;;  %v9884_v16 = vrot.slane %v682_v7, 7  ;;  %365 = vst [vmem:[#allocation2 + $0x44] sm:$0x1] %v364_v12  ;;  %v9886_v18 = vpack.c.bf16 %v534_v2, %v534_v2  ;;  %v679_v20 = vor.u32 %v677_v6, %v676_v11 }
  0x37   : > { %v1076_v19 = vld [vmem:[#allocation2 + $0x14] sm:$0x1]  ;;  %934 = vst [vmem:[#allocation2 + $0x30] sm:$0xf] %v933_v14  ;;  %v930_v49 = vsel %vm9712_vm4, %v638_v62, %v929_v15  ;;  %v680_v21 = vrot.slane %v676_v11, 4  ;;  %v657_v60 = vshrl.u32 %v9832_v50, 16  ;;  %v567_v41 = vpack.c.bf16 %v535_v26, %v535_v26 }
  0x38   : > { %v1142_v22 = vshll.u32 %v1076_v19, 16  ;;  %931 = vst [vmem:[#allocation2 + $0x2c] sm:$0x1] %v930_v49  ;;  %v687_v23 = vor.u32 %v685_v17, %v9884_v16  ;;  %v665_v24 = vshrl.u32 %v563_v13, 16  ;;  %v668_v25 = vshll.u32 %v563_v13, 16 }
  0x39   : > { %v1084_v27 = vld [vmem:[#allocation2 + $0x34] sm:$0xf]  ;;  %v659_v28 = vrot.slane %v657_v60, 7  ;;  %v308_v29 = vsel %vm9712_vm4, 0, %v307_v8  ;;  %v660_v0 = vshll.u32 %v9832_v50, 16  ;;  %v370_v62 = vsel %vm9723_vm8, 0, %v369_v9 }
  0x3a   : > { %v1144_v30 = vrot.slane %v1142_v22, 5  ;;  %v1085_v31 = vld [vmem:[#allocation2 + $0x38] sm:$0x1]  ;;  %v1204_v33 = vshll.u32 %v1084_v27, 16  ;;  %v1208_v34 = vshrl.u32 %v1084_v27, 16  ;;  %v688_v35 = vsel %vm9764_vm11, %v680_v21, %v687_v23 }
  0x3b   : > { %v1214_v36 = vshll.u32 %v1085_v31, 16  ;;  %v946_v37 = vld [vmem:[#allocation2 + $0x48] sm:$0xf]  ;;  %949 = vst.msk [vmem:[#allocation2 + $0x4c] sm:$0xf] %vm280_vm0, %v688_v35  ;;  %v663_v38 = vrot.slane %v659_v28, 4  ;;  %v662_v2 = vor.u32 %v660_v0, %v659_v28 }
  0x3c   : > { %1300 = vrot.lane.b32.xlu2 %v1169_v58, %s9647_s30  ;;  %v1145_v50 = vsel %vm9782_vm13, %v9856_v53, %v1144_v30  ;;  %v1206_v42 = vrot.slane %v1204_v33, 5  ;;  %v1210_v43 = vrot.slane %v1208_v34, 4  ;;  %v947_v45 = vsel %vm9776_vm12, %v679_v20, %v946_v37  ;;  %309 = vst [vmem:[#allocation2 + $0x3c] sm:$0x1] %v308_v29  ;;  %v313_v9 = vld [vmem:[#allocation2 + $0x54] sm:$0x1] }
  0x3d   : > { %1296 = vrot.lane.b32.xlu1 %v1145_v50, %s9647_s30  ;;  %v1216_v46 = vrot.slane %v1214_v36, 5  ;;  %948 = vst [vmem:[#allocation2 + $0x48] sm:$0xf] %v947_v45  ;;  %v667_v39 = vrot.slane %v665_v24, 7  ;;  %v943_v47 = vld [vmem:[#allocation2 + $0x44] sm:$0x1] }
  0x3e   : > { %v1211_v51 = vor.u32 %v1210_v43, %v1206_v42  ;;  %v1083_v32 = vld [vmem:[#allocation2 + $0x30] sm:$0xf]  ;;  %371 = vst [vmem:[#allocation2 + $0x5c] sm:$0x1] %v370_v62  ;;  %v691_v48 = vshrl.u32 %v9886_v18, 16  ;;  %v699_v52 = vshrl.u32 %v567_v41, 16 }
  0x3f   : > { %v1195_v54 = vshrl.u32 %v1083_v32, 16  ;;  %v1198_v53 = vshll.u32 %v1083_v32, 16  ;;  %v1082_v55 = vld [vmem:[#allocation2 + $0x2c] sm:$0x1]  ;;  %v670_v57 = vor.u32 %v668_v25, %v667_v39  ;;  %v672_v58 = vrot.slane %v667_v39, 4 }
  0x40   : > { %v1212_v59 = vrot.slane %v1211_v51, 4  ;;  %v1190_v63 = vshll.u32 %v1082_v55, 16  ;;  %v693_v3 = vrot.slane %v691_v48, 7  ;;  %v701_v13 = vrot.slane %v699_v52, 7 }
  0x41   : > { %v1197_v4 = vrot.slane %v1195_v54, 4  ;;  %v1200_v6 = vrot.slane %v1198_v53, 5  ;;  %v671_v7 = vsel %vm9764_vm11, %v663_v38, %v670_v57  ;;  %v944_v8 = vsel %vm9712_vm4, %v672_v58, %v943_v47 }
  0x42   : > { %v1217_v11 = vsel %vm9782_vm13, %v1212_v59, %v1216_v46  ;;  %v1192_v17 = vrot.slane %v1190_v63, 5  ;;  %v9917_v12 = vld [vmem:[#allocation2 + $0x4c] sm:$0xf]  ;;  %942 = vst.msk [vmem:[#allocation2 + $0x40] sm:$0xf] %vm280_vm0, %v671_v7  ;;  %v697_v19 = vrot.slane %v693_v3, 4 }
  0x43   : > { %1308 = vrot.lane.b32.xlu0 %v1217_v11, %s9647_s30  ;;  %v1201_v14 = vor.u32 %v1200_v6, %v1197_v4  ;;  %945 = vst [vmem:[#allocation2 + $0x44] sm:$0x1] %v944_v8  ;;  %v939_v15 = vld [vmem:[#allocation2 + $0x3c] sm:$0xf]  ;;  %v702_v60 = vshll.u32 %v567_v41, 16  ;;  %v706_v22 = vrot.slane %v701_v13, 4 }
  0x44   : > { %v1193_v49 = vsel %vm9782_vm13, %v9882_v40, %v1192_v17  ;;  %v1089_v20 = vld [vmem:[#allocation2 + $0x48] sm:$0xf]  ;;  %v940_v21 = vsel %vm9776_vm12, %v662_v2, %v939_v15  ;;  %v1252_v26 = vshll.u32 %v9917_v12, 16  ;;  %v314_v29 = vsel %vm9712_vm4, 0, %v313_v9 }
  0x45   : > { %v1202_v23 = vrot.slane %v1201_v14, 4  ;;  %1304 = vrot.lane.b32.xlu1 %v1193_v49, %s9647_s30  ;;  %v1243_v24 = vshrl.u32 %v1089_v20, 16  ;;  %v1246_v25 = vshll.u32 %v1089_v20, 16  ;;  %941 = vst [vmem:[#allocation2 + $0x3c] sm:$0xf] %v940_v21  ;;  %v704_v27 = vor.u32 %v702_v60, %v701_v13 }
  0x46   : > { %v957_v28 = vld [vmem:[#allocation2 + $0x5c] sm:$0x1]  ;;  %v694_v40 = vshll.u32 %v9886_v18, 16  ;;  %v367_v0 = vsel %vm9723_vm8, 0, %v366_v10  ;;  %315 = vst [vmem:[#allocation2 + $0x54] sm:$0x1] %v314_v29 }
  0x47   : > { %v1207_v62 = vsel %vm9782_vm13, %v1202_v23, %v1206_v42  ;;  %v1245_v30 = vrot.slane %v1243_v24, 4  ;;  %v1248_v31 = vrot.slane %v1246_v25, 5  ;;  %v958_v33 = vsel %vm9712_vm4, %v706_v22, %v957_v28  ;;  %368 = vst [vmem:[#allocation2 + $0x50] sm:$0x1] %v367_v0  ;;  %v1358_v23 = vld [vmem:[#allocation2 + $0xc] sm:$0xe] }
  0x48   : > { %1306 = vrot.lane.b32.xlu2 %v1207_v62, %s9647_s30  ;;  %v705_v34 = vsel %vm9764_vm11, %v697_v19, %v704_v27  ;;  %959 = vst [vmem:[#allocation2 + $0x5c] sm:$0x1] %v958_v33  ;;  %v1254_v18 = vrot.slane %v1252_v26, 5  ;;  %v696_v43 = vor.u32 %v694_v40, %v693_v3  ;;  %v689_v53 = vrot.slane %v9884_v16, 4  ;;  %v1359_v24 = vld [vmem:[#allocation2 + $0x10] sm:$0xf] }
  0x49   : > { %v1249_v35 = vor.u32 %v1248_v31, %v1245_v30  ;;  %v1087_v36 = vld [vmem:[#allocation2 + $0x40] sm:$0xf]  ;;  %956 = vst.msk [vmem:[#allocation2 + $0x58] sm:$0xf] %vm280_vm0, %v705_v34  ;;  %v1256_v55 = vshrl.u32 %v9917_v12, 16  ;;  %vm1404_vm15 = vcmask 1046532  }
  0x4a   : > { %v1088_v37 = vld [vmem:[#allocation2 + $0x44] sm:$0x1]  ;;  %v1228_v38 = vshll.u32 %v1087_v36, 16  ;;  %v1232_v41 = vshrl.u32 %v1087_v36, 16  ;;  %v9252_v0 = vrot.slane %v1358_v23, 9  ;;  %v1415_v62 = vrot.slane %v1359_v24, 5  ;;  %vm9959_vm1 = vmor %vm1403_vm14, %vm1404_vm15 }
  0x4b   : > { %v1250_v50 = vrot.slane %v1249_v35, 4  ;;  %v1238_v42 = vshll.u32 %v1088_v37, 16  ;;  %v1258_v13 = vrot.slane %v1256_v55, 4  ;;  %v1356_v30 = vld [vmem:[#allocation2 + $0x4] sm:$0xf]  ;;  %vm1338_vm7 = vcmask 60448  }
  0x4c   : > { %v1230_v45 = vrot.slane %v1228_v38, 5  ;;  %v1234_v46 = vrot.slane %v1232_v41, 4  ;;  %v1086_v39 = vld [vmem:[#allocation2 + $0x3c] sm:$0xf]  ;;  %v1408_v36 = vrot.slane %v1356_v30, 5  ;;  %v1416_v41 = vsel %vm9959_vm1, %v9252_v0, %v1415_v62 }
  0x4d   : > { %v1255_v47 = vsel %vm9782_vm13, %v1250_v50, %v1254_v18  ;;  %v1219_v51 = vshrl.u32 %v1086_v39, 16  ;;  %v1222_v32 = vshll.u32 %v1086_v39, 16  ;;  %v1240_v52 = vrot.slane %v1238_v42, 5  ;;  %v953_v54 = vld [vmem:[#allocation2 + $0x54] sm:$0xf] }
  0x4e   : > { %1314 = vrot.lane.b32.xlu0 %v1255_v47, %s9647_s30  ;;  %v1235_v48 = vor.u32 %v1234_v46, %v1230_v45  ;;  %v954_v63 = vsel %vm9776_vm12, %v696_v43, %v953_v54  ;;  %v950_v9 = vld [vmem:[#allocation2 + $0x50] sm:$0x1]  ;;  %v1259_v21 = vor.u32 %v1258_v13, %v1254_v18  ;;  %v1362_v34 = vld [vmem:[#allocation2 + $0x1c] sm:$0xf]  ;;  %v1355_v37 = vld [vmem:[#allocation2] sm:$0xe] }
  0x4f   : > { %v1221_v57 = vrot.slane %v1219_v51, 4  ;;  %v1224_v58 = vrot.slane %v1222_v32, 5  ;;  %v1094_v59 = vld [vmem:[#allocation2 + $0x5c] sm:$0x1]  ;;  %955 = vst [vmem:[#allocation2 + $0x54] sm:$0xf] %v954_v63  ;;  %v951_v16 = vsel %vm9712_vm4, %v689_v53, %v950_v9 }
  0x50   : > { %v1236_v2 = vrot.slane %v1235_v48, 4  ;;  %v1093_v3 = vld [vmem:[#allocation2 + $0x58] sm:$0xf]  ;;  %v1286_v8 = vshll.u32 %v1094_v59, 16  ;;  %952 = vst [vmem:[#allocation2 + $0x50] sm:$0x1] %v951_v16 }
  0x51   : > { %v1225_v4 = vor.u32 %v1224_v58, %v1221_v57  ;;  %v1276_v6 = vshll.u32 %v1093_v3, 16  ;;  %v1280_v7 = vshrl.u32 %v1093_v3, 16  ;;  %v1260_v29 = vrot.slane %v1259_v21, 4  ;;  %v1357_v50 = vld [vmem:[#allocation2 + $0x8] sm:$0x1] }
  0x52   : > { %v1241_v10 = vsel %vm9782_vm13, %v1236_v2, %v1240_v52  ;;  %v1288_v19 = vrot.slane %v1286_v8, 5  ;;  %v1422_v42 = vrot.slane %v1362_v34, 5  ;;  %v9251_v46 = vrot.slane %v1355_v37, 9  ;;  %v1360_v54 = vld [vmem:[#allocation2 + $0x14] sm:$0x1] }
  0x53   : > { %1312 = vrot.lane.b32.xlu2 %v1241_v10, %s9647_s30  ;;  %v1226_v11 = vrot.slane %v1225_v4, 4  ;;  %v1278_v17 = vrot.slane %v1276_v6, 5  ;;  %v1282_v12 = vrot.slane %v1280_v7, 4  ;;  %v1410_v39 = vrot.slane %v1408_v36, 4  ;;  %v1361_v55 = vld [vmem:[#allocation2 + $0x18] sm:$0xe] }
  0x54   : > { %v1411_v47 = vrot.slane %v1357_v50, 5  ;;  %v1424_v51 = vrot.slane %v1422_v42, 4  ;;  %v1409_v48 = vsel %vm9959_vm1, %v9251_v46, %v1408_v36  ;;  %v1367_v57 = vld [vmem:[#allocation2 + $0x30] sm:$0xe]  ;;  %v1368_v58 = vld [vmem:[#allocation2 + $0x34] sm:$0xf] }
  0x55   : > { %v1231_v14 = vsel %vm9782_vm13, %v1226_v11, %v1230_v45  ;;  %v1283_v15 = vor.u32 %v1282_v12, %v1278_v17  ;;  %v1363_v45 = vld [vmem:[#allocation2 + $0x20] sm:$0x1]  ;;  %v1417_v59 = vrot.slane %v1415_v62, 4  ;;  %v1418_v63 = vrot.slane %v1360_v54, 5  ;;  %v1365_v6 = vld [vmem:[#allocation2 + $0x28] sm:$0xf] }
  0x56   : > { %1310 = vrot.lane.b32.xlu1 %v1231_v14, %s9647_s30  ;;  %v1092_v20 = vld [vmem:[#allocation2 + $0x54] sm:$0xf]  ;;  %v1425_v32 = vrot.slane %v1363_v45, 5  ;;  %v1412_v52 = vsel %vm9959_vm1, %v1410_v39, %v1411_v47  ;;  %v9253_v2 = vrot.slane %v1361_v55, 9  ;;  %v9255_v3 = vrot.slane %v1367_v57, 9 }
  0x57   : > { %v1284_v49 = vrot.slane %v1283_v15, 4  ;;  %v1267_v60 = vshrl.u32 %v1092_v20, 16  ;;  %v1270_v22 = vshll.u32 %v1092_v20, 16  ;;  %v1091_v28 = vld [vmem:[#allocation2 + $0x50] sm:$0x1]  ;;  %v1436_v4 = vrot.slane %v1368_v58, 5 }
  0x58   : > { %v1262_v40 = vshll.u32 %v1091_v28, 16  ;;  %v1426_v53 = vsel %vm9959_vm1, %v1424_v51, %v1425_v32  ;;  %v1371_v7 = vld [vmem:[#allocation2 + $0x40] sm:$0xf]  ;;  %v1419_v8 = vsel %vm9959_vm1, %v1417_v59, %v1418_v63  ;;  %v1423_v9 = vsel %vm9959_vm1, %v9253_v2, %v1422_v42  ;;  %v1364_v16 = vld [vmem:[#allocation2 + $0x24] sm:$0xe]  ;;  %v536_v32 = vld [vmem:[%s9739_s29 + $0x70] sm:$0xff] }
  0x59   : > { %v1289_v25 = vsel %vm9782_vm13, %v1284_v49, %v1288_v19  ;;  %v1269_v26 = vrot.slane %v1267_v60, 4  ;;  %v1272_v27 = vrot.slane %v1270_v22, 5  ;;  %v1429_v10 = vrot.slane %v1365_v6, 5  ;;  %v1372_v13 = vld [vmem:[#allocation2 + $0x44] sm:$0x1] }
  0x5a   : > { %1320 = vrot.lane.b32.xlu0 %v1289_v25, %s9647_s30  ;;  %v1264_v35 = vrot.slane %v1262_v40, 5  ;;  %v1437_v11 = vsel %vm9959_vm1, %v9255_v3, %v1436_v4  ;;  %v1443_v12 = vrot.slane %v1371_v7, 5  ;;  %v9254_v14 = vrot.slane %v1364_v16, 9  ;;  %v1369_v22 = vld [vmem:[#allocation2 + $0x38] sm:$0x1] }
  0x5b   : > { %v1273_v31 = vor.u32 %v1272_v27, %v1269_v26  ;;  %v1431_v15 = vrot.slane %v1429_v10, 4  ;;  %v1446_v20 = vrot.slane %v1372_v13, 5  ;;  %v1370_v24 = vld [vmem:[#allocation2 + $0x3c] sm:$0xe]  ;;  %v1376_v25 = vld [vmem:[#allocation2 + $0x54] sm:$0xe]  ;;  %v568_v55 = vpack.c.bf16 %v536_v32, %v536_v32 }
  0x5c   : > { %v1265_v38 = vsel %vm9782_vm13, %v1260_v29, %v1264_v35  ;;  %v1445_v49 = vrot.slane %v1443_v12, 4  ;;  %v1430_v21 = vsel %vm9959_vm1, %v9254_v14, %v1429_v10  ;;  %v1377_v26 = vld [vmem:[#allocation2 + $0x58] sm:$0xf]  ;;  %v1438_v27 = vrot.slane %v1436_v4, 4  ;;  %v1374_v30 = vld [vmem:[#allocation2 + $0x4c] sm:$0xf] }
  0x5d   : > { %v1274_v18 = vrot.slane %v1273_v31, 4  ;;  %v1439_v28 = vrot.slane %v1369_v22, 5  ;;  %v1043_v29 = vld [vmem:[#allocation2 + $0x18] sm:$0xf]  ;;  %v9256_v40 = vrot.slane %v1370_v24, 9  ;;  %v9258_v0 = vrot.slane %v1376_v25, 9 }
  0x5e   : > { %1316 = vrot.lane.b32.xlu1 %v1265_v38, %s9647_s30  ;;  %v1447_v23 = vsel %vm9959_vm1, %v1445_v49, %v1446_v20  ;;  %1059 = vst.msk [vmem:[#allocation4 + $0x10] sm:$0xf] %vm280_vm0, %v1043_v29  ;;  %v1457_v62 = vrot.slane %v1377_v26, 5  ;;  %v1450_v35 = vrot.slane %v1374_v30, 5  ;;  %v1375_v37 = vld [vmem:[#allocation2 + $0x50] sm:$0x1] }
  0x5f   : > { %v1279_v43 = vsel %vm9782_vm13, %v1274_v18, %v1278_v17  ;;  %v1366_v17 = vld [vmem:[#allocation2 + $0x2c] sm:$0x1]  ;;  %v1440_v31 = vsel %vm9959_vm1, %v1438_v27, %v1439_v28  ;;  %v1444_v34 = vsel %vm9959_vm1, %v9256_v40, %v1443_v12  ;;  %v1373_v18 = vld [vmem:[#allocation2 + $0x48] sm:$0xe]  ;;  %v1453_v42 = vrot.slane %v1375_v37, 5 }
  0x60   : > { %1318 = vrot.lane.b32.xlu2 %v1279_v43, %s9647_s30  ;;  %v1432_v19 = vrot.slane %v1366_v17, 5  ;;  %v1458_v36 = vsel %vm9959_vm1, %v9258_v0, %v1457_v62  ;;  %v9257_v38 = vrot.slane %v1373_v18, 9  ;;  %v1452_v50 = vrot.slane %v1450_v35, 4  ;;  %v1040_v43 = vld [vmem:[#allocation2 + $0x4] sm:$0xf] }
  0x61   : > { %1056 = vst.msk [vmem:[#allocation4 + $0x4] sm:$0xf] %vm280_vm0, %v1040_v43  ;;  %v1378_v46 = vld [vmem:[#allocation2 + $0x5c] sm:$0x1]  ;;  %v316_v47 = vld [vmem:[#allocation2 + $0x60] sm:$0x1] }
  0x62   : > { %1466 = vrot.lane.b32.xlu0 %v1416_v41, %s9648_s8  ;;  %v1433_v60 = vsel %vm9959_vm1, %v1431_v15, %v1432_v19  ;;  %v1044_v41 = vld [vmem:[#allocation2 + $0x1c] sm:$0xf]  ;;  %v1451_v45 = vsel %vm9959_vm1, %v9257_v38, %v1450_v35  ;;  %v1454_v39 = vsel %vm9959_vm1, %v1452_v50, %v1453_v42  ;;  %v1528_v51 = vld [vmem:[#allocation2 + $0x10] sm:$0xf]  ;;  %v1459_v54 = vrot.slane %v1457_v62, 4 }
  0x63   : > { %1060 = vst.msk [vmem:[#allocation4 + $0x14] sm:$0xf] %vm280_vm0, %v1044_v41  ;;  %v1047_v58 = vld [vmem:[#allocation2 + $0x30] sm:$0xf]  ;;  %v1039_v59 = vld [vmem:[#allocation2] sm:$0xf] }
  0x64   : > { %1063 = vst.msk [vmem:[#allocation4 + $0x20] sm:$0xf] %vm280_vm0, %v1047_v58  ;;  %v708_v63 = vshrl.u32 %v568_v55, 16  ;;  %v1527_v10 = vld [vmem:[#allocation2 + $0xc] sm:$0xf]  ;;  %vm1510_vm9 = vcmask 93248  }
  0x65   : > { %1055 = vst.msk [vmem:[#allocation4] sm:$0xf] %vm280_vm0, %v1039_v59  ;;  %v1531_v16 = vld [vmem:[#allocation2 + $0x24] sm:$0xf]  ;;  %v1050_v12 = vld [vmem:[#allocation2 + $0x40] sm:$0xf] }
  0x66   : > { %1462 = vrot.lane.b32.xlu1 %v1409_v48, %s9648_s8  ;;  %v537_v48 = vld [vmem:[%s9739_s29 + $0x78] sm:$0xff]  ;;  %v710_v7 = vrot.slane %v708_v63, 7  ;;  %v1041_v13 = vld [vmem:[#allocation2 + $0xc] sm:$0xf]  ;;  %1066 = vst.msk [vmem:[#allocation4 + $0x2c] sm:$0xf] %vm280_vm0, %v1050_v12 }
  0x67   : > { %v569_v57 = vpack.c.bf16 %v537_v48, %v537_v48  ;;  %v1045_v15 = vld [vmem:[#allocation2 + $0x24] sm:$0xf]  ;;  %1057 = vst.msk [vmem:[#allocation4 + $0x8] sm:$0xf] %vm280_vm0, %v1041_v13  ;;  %v1534_v24 = vld [vmem:[#allocation2 + $0x34] sm:$0xf] }
  0x68   : > { %1464 = vrot.lane.b32.xlu2 %v1412_v52, %s9648_s8  ;;  %v317_v52 = vsel %vm9712_vm4, 0, %v316_v47  ;;  %1061 = vst.msk [vmem:[#allocation4 + $0x18] sm:$0xf] %vm280_vm0, %v1045_v15  ;;  %v1053_v25 = vld [vmem:[#allocation2 + $0x54] sm:$0xf]  ;;  %vm1607_vm10 = vcmask 126048  }
  0x69   : > { %318 = vst [vmem:[#allocation2 + $0x60] sm:$0x1] %v317_v52  ;;  %v716_v2 = vshrl.u32 %v569_v57, 16  ;;  %v719_v4 = vshll.u32 %v569_v57, 16  ;;  %v1042_v26 = vld [vmem:[#allocation2 + $0x10] sm:$0xf] }
  0x6a   : > { %1472 = vrot.lane.b32.xlu0 %v1426_v53, %s9648_s8  ;;  %v1460_v53 = vrot.slane %v1378_v46, 5  ;;  %1069 = vst.msk [vmem:[#allocation4 + $0x38] sm:$0xf] %vm280_vm0, %v1053_v25  ;;  %v1624_v27 = vld [vmem:[#allocation2 + $0xc] sm:$0xf]  ;;  %vm13288_vm14 = vcmask 158848  }
  0x6b   : > { %1058 = vst.msk [vmem:[#allocation4 + $0xc] sm:$0xf] %vm280_vm0, %v1042_v26  ;;  %v1048_v29 = vld [vmem:[#allocation2 + $0x34] sm:$0xf]  ;;  %v1532_v40 = vld [vmem:[#allocation2 + $0x28] sm:$0xf] }
  0x6c   : > { %v1461_v3 = vsel %vm9959_vm1, %v1459_v54, %v1460_v53  ;;  %v1533_v0 = vld [vmem:[#allocation2 + $0x30] sm:$0xf]  ;;  %v1649_v62 = vshrl.u32 %v1624_v27, 16  ;;  %v1652_v30 = vshll.u32 %v1624_v27, 16  ;;  %1064 = vst.msk [vmem:[#allocation4 + $0x24] sm:$0xf] %vm280_vm0, %v1048_v29 }
  0x6d   : > { %v1046_v37 = vld [vmem:[#allocation2 + $0x28] sm:$0xf]  ;;  %v1625_v38 = vld [vmem:[#allocation2 + $0x10] sm:$0xf]  ;;  %v1535_v50 = vld [vmem:[#allocation2 + $0x3c] sm:$0xf] }
  0x6e   : > { %1468 = vrot.lane.b32.xlu1 %v1419_v8, %s9648_s8  ;;  %v10026_v8 = vrot.slane %v716_v2, 7  ;;  %v1651_v35 = vrot.slane %v1649_v62, 4  ;;  %v1654_v18 = vrot.slane %v1652_v30, 5  ;;  %1062 = vst.msk [vmem:[#allocation4 + $0x1c] sm:$0xf] %vm280_vm0, %v1046_v37  ;;  %v1658_v47 = vshll.u32 %v1625_v38, 16 }
  0x6f   : > { %v1051_v41 = vld [vmem:[#allocation2 + $0x48] sm:$0xf]  ;;  %v1627_v48 = vld [vmem:[#allocation2 + $0x18] sm:$0xf]  ;;  %v1049_v59 = vld [vmem:[#allocation2 + $0x3c] sm:$0xf] }
  0x70   : > { %1470 = vrot.lane.b32.xlu2 %v1423_v9, %s9648_s8  ;;  %v711_v9 = vshll.u32 %v568_v55, 16  ;;  %v721_v17 = vor.u32 %v719_v4, %v10026_v8  ;;  %v960_v19 = vld [vmem:[#allocation2 + $0x60] sm:$0xf]  ;;  %1067 = vst.msk [vmem:[#allocation4 + $0x30] sm:$0xf] %vm280_vm0, %v1051_v41  ;;  %v10063_v55 = vrot.slane %v1658_v47, 5 }
  0x71   : > { %v1673_v57 = vshrl.u32 %v1627_v48, 16  ;;  %v1676_v58 = vshll.u32 %v1627_v48, 16  ;;  %v1629_v63 = vld [vmem:[#allocation2 + $0x20] sm:$0x1]  ;;  %1065 = vst.msk [vmem:[#allocation4 + $0x28] sm:$0xf] %vm280_vm0, %v1049_v59 }
  0x72   : > { %1478 = vrot.lane.b32.xlu0 %v1437_v11, %s9648_s8  ;;  %v714_v11 = vrot.slane %v710_v7, 4  ;;  %v713_v14 = vor.u32 %v711_v9, %v710_v7  ;;  %v372_v2 = vld [vmem:[#allocation2 + $0x68] sm:$0x1]  ;;  %v1054_v4 = vld [vmem:[#allocation2 + $0x58] sm:$0xf]  ;;  %v1662_v9 = vshrl.u32 %v1625_v38, 16 }
  0x73   : > { %1070 = vst.msk [vmem:[#allocation4 + $0x3c] sm:$0xf] %vm280_vm0, %v1054_v4  ;;  %v373_v12 = vsel %vm9723_vm8, 0, %v372_v2  ;;  %v1678_v15 = vrot.slane %v1676_v58, 5  ;;  %v1631_v25 = vld [vmem:[#allocation2 + $0x28] sm:$0xf] }
  0x74   : > { %v722_v20 = vsel %vm9764_vm11, %v714_v11, %v721_v17  ;;  %v961_v22 = vsel %vm9776_vm12, %v713_v14, %v960_v19  ;;  %v1692_v17 = vshll.u32 %v1629_v63, 16  ;;  %v1675_v14 = vrot.slane %v1673_v57, 4  ;;  %v1626_v19 = vld [vmem:[#allocation2 + $0x14] sm:$0x1]  ;;  %374 = vst [vmem:[#allocation2 + $0x68] sm:$0x1] %v373_v12 }
  0x75   : > { %963 = vst.msk [vmem:[#allocation2 + $0x64] sm:$0xf] %vm280_vm0, %v722_v20  ;;  %v1052_v26 = vld [vmem:[#allocation2 + $0x4c] sm:$0xf]  ;;  %v1710_v37 = vshrl.u32 %v1631_v25, 16  ;;  %vm13289_vm15 = vcmask 191648  }
  0x76   : > { %1474 = vrot.lane.b32.xlu1 %v1430_v21, %s9648_s8  ;;  %v1529_v21 = vld [vmem:[#allocation2 + $0x18] sm:$0xf]  ;;  %962 = vst [vmem:[#allocation2 + $0x60] sm:$0xf] %v961_v22  ;;  %v1630_v22 = vld [vmem:[#allocation2 + $0x24] sm:$0xf]  ;;  %v1679_v27 = vor.u32 %v1678_v15, %v1675_v14 }
  0x77   : > { %1068 = vst.msk [vmem:[#allocation4 + $0x34] sm:$0xf] %vm280_vm0, %v1052_v26  ;;  %v1697_v62 = vshrl.u32 %v1630_v22, 16  ;;  %v1700_v30 = vshll.u32 %v1630_v22, 16  ;;  %v1636_v59 = vld [vmem:[#allocation2 + $0x3c] sm:$0xf] }
  0x78   : > { %1476 = vrot.lane.b32.xlu2 %v1433_v60, %s9648_s8  ;;  %v1632_v4 = vld [vmem:[#allocation2 + $0x2c] sm:$0x1]  ;;  %v1748_v12 = vshll.u32 %v1636_v59, 16  ;;  %v1635_v22 = vld [vmem:[#allocation2 + $0x38] sm:$0x1]  ;;  %vm2605_vm2 = vcmask 290048  }
  0x79   : > { %v1716_v14 = vshll.u32 %v1632_v4, 16 }
  0x7a   : > { %1484 = vrot.lane.b32.xlu0 %v1447_v23, %s9648_s8  ;;  %v1530_v23 = vld [vmem:[#allocation2 + $0x1c] sm:$0xf] }
  0x7c   : > { %v1542_v38 = vld [vmem:[#allocation2 + $0x64] sm:$0xf] }
  0x7e   : > { %1480 = vrot.lane.b32.xlu1 %v1440_v31, %s9648_s8  ;;  %v1537_v31 = vld [vmem:[#allocation2 + $0x48] sm:$0xf] }
  0x80   : > { %1482 = vrot.lane.b32.xlu2 %v1444_v34, %s9648_s8 }
  0x82   : > { %1490 = vrot.lane.b32.xlu0 %v1458_v36, %s9648_s8  ;;  %v1628_v36 = vld [vmem:[#allocation2 + $0x1c] sm:$0xf] }
  0x83   : > { %v1682_v42 = vshll.u32 %v1628_v36, 16  ;;  %v1686_v43 = vshrl.u32 %v1628_v36, 16  ;;  %v1706_v36 = vshll.u32 %v1631_v25, 16 }
  0x85   : > { %v10060_v52 = vrot.slane %v1682_v42, 5  ;;  %v1688_v54 = vrot.slane %v1686_v43, 4  ;;  %v1680_v43 = vrot.slane %v1679_v27, 4  ;;  %v1718_v27 = vrot.slane %v1716_v14, 5 }
  0x86   : > { %1486 = vrot.lane.b32.xlu1 %v1451_v45, %s9648_s8  ;;  %v1536_v45 = vld [vmem:[#allocation2 + $0x40] sm:$0xf] }
  0x88   : > { %1488 = vrot.lane.b32.xlu2 %v1454_v39, %s9648_s8  ;;  %v1655_v39 = vor.u32 %v1654_v18, %v1651_v35 }
  0x8a   : > { %1561 = vrot.lane.b32.xlu0 %v1528_v51, %s9649_s9  ;;  %v1540_v51 = vld [vmem:[#allocation2 + $0x58] sm:$0xf]  ;;  %v1656_v53 = vrot.slane %v1655_v39, 4 }
  0x8c   : > { %v1661_v11 = vsel %vm9782_vm13, %v1656_v53, %v10063_v55  ;;  %v1712_v53 = vrot.slane %v1710_v37, 4 }
  0x8e   : > { %v1299_v6 = vpop.permute.xlu2 %1298  ;;  %1492 = vrot.lane.b32.xlu1 %v1461_v3, %s9648_s8  ;;  %v1633_v3 = vld [vmem:[#allocation2 + $0x30] sm:$0xf] }
  0x8f   : > { %1343 = vst.msk [vmem:[#allocation4 + $0x10] sm:$0xf] %vm1338_vm7, %v1299_v6  ;;  %v1538_v6 = vld [vmem:[#allocation2 + $0x4c] sm:$0xf]  ;;  %v1724_v20 = vshll.u32 %v1633_v3, 16 }
  0x90   : > { %1559 = vrot.lane.b32.xlu2 %v1527_v10, %s9649_s9  ;;  %v1689_v10 = vor.u32 %v1688_v54, %v10060_v52  ;;  %v10087_v54 = vrot.slane %v1706_v36, 5  ;;  %v1646_v36 = vld [vmem:[#allocation2 + $0x64] sm:$0xf] }
  0x91   : > { %v1726_v29 = vrot.slane %v1724_v20, 5 }
  0x92   : > { %1567 = vrot.lane.b32.xlu0 %v1531_v16, %s9649_s9  ;;  %v1539_v16 = vld [vmem:[#allocation2 + $0x54] sm:$0xf] }
  0x95   : > { %v1293_v49 = vpop.permute.xlu0 %1292 }
  0x96   : > { %v1301_v60 = vpop.permute.xlu2 %1300  ;;  %1340 = vst.msk [vmem:[#allocation4 + $0x4] sm:$0xf] %vm1338_vm7, %v1293_v49  ;;  %1563 = vrot.lane.b32.xlu1 %v1529_v21, %s9649_s9  ;;  %v1721_v49 = vshrl.u32 %v1633_v3, 16  ;;  %v1690_v21 = vrot.slane %v1689_v10, 4  ;;  %v1642_v10 = vld [vmem:[#allocation2 + $0x54] sm:$0xf] }
  0x97   : > { %1344 = vst.msk [vmem:[#allocation4 + $0x14] sm:$0xf] %vm1338_vm7, %v1301_v60  ;;  %v1664_v60 = vrot.slane %v1662_v9, 4  ;;  %v1793_v20 = vshrl.u32 %v1642_v10, 16 }
  0x98   : > { %1565 = vrot.lane.b32.xlu2 %v1530_v23, %s9649_s9  ;;  %v1694_v23 = vrot.slane %v1692_v17, 5  ;;  %v1745_v17 = vshrl.u32 %v1636_v59, 16  ;;  %v1641_v59 = vld [vmem:[#allocation2 + $0x50] sm:$0x1] }
  0x99   : > { %v1665_v18 = vor.u32 %v1664_v60, %v10063_v55 }
  0x9a   : > { %1573 = vrot.lane.b32.xlu0 %v1534_v24, %s9649_s9  ;;  %v1668_v24 = vshll.u32 %v1626_v19, 16  ;;  %v1695_v41 = vsel %vm9782_vm13, %v1690_v21, %v1694_v23  ;;  %v1796_v21 = vshll.u32 %v1642_v10, 16  ;;  %v1747_v23 = vrot.slane %v1745_v17, 4  ;;  %v1645_v10 = vld [vmem:[#allocation2 + $0x60] sm:$0xf] }
  0x9b   : > { %v1666_v48 = vrot.slane %v1665_v18, 4  ;;  %v1643_v18 = vld [vmem:[#allocation2 + $0x58] sm:$0xf] }
  0x9d   : > { %v1291_v28 = vpop.permute.xlu0 %1290 }
  0x9e   : > { %1339 = vst.msk [vmem:[#allocation4] sm:$0xf] %vm1338_vm7, %v1291_v28  ;;  %1569 = vrot.lane.b32.xlu1 %v1532_v40, %s9649_s9  ;;  %v1723_v28 = vrot.slane %v1721_v49, 4  ;;  %v1637_v40 = vld [vmem:[#allocation2 + $0x40] sm:$0xf] }
  0x9f   : > { %v1758_v42 = vshrl.u32 %v1637_v40, 16 }
  0xa0   : > { %1571 = vrot.lane.b32.xlu2 %v1533_v0, %s9649_s9  ;;  %v1634_v0 = vld [vmem:[#allocation2 + $0x34] sm:$0xf]  ;;  %v1727_v39 = vor.u32 %v1726_v29, %v1723_v28 }
  0xa1   : > { %v1730_v47 = vshll.u32 %v1634_v0, 16  ;;  %v1760_v58 = vrot.slane %v1758_v42, 4 }
  0xa2   : > { %1579 = vrot.lane.b32.xlu0 %v1537_v31, %s9649_s9  ;;  %v1307_v34 = vpop.permute.xlu2 %1306  ;;  %v723_v31 = vrot.slane %v10026_v8, 4  ;;  %v1699_v8 = vrot.slane %v1697_v62, 4  ;;  %v1728_v2 = vrot.slane %v1727_v39, 4  ;;  %v1740_v62 = vshll.u32 %v1635_v22, 16 }
  0xa3   : > { %1347 = vst.msk [vmem:[#allocation4 + $0x20] sm:$0xf] %vm1338_vm7, %v1307_v34  ;;  %v1541_v34 = vld [vmem:[#allocation2 + $0x60] sm:$0xf]  ;;  %v1732_v3 = vrot.slane %v1730_v47, 5  ;;  %v1802_v47 = vshll.u32 %v1643_v18, 16 }
  0xa5   : > { %v1733_v49 = vsel %vm9782_vm13, %v1728_v2, %v1732_v3 }
  0xa6   : > { %1575 = vrot.lane.b32.xlu1 %v1535_v50, %s9649_s9  ;;  %v1754_v50 = vshll.u32 %v1637_v40, 16  ;;  %v1639_v40 = vld [vmem:[#allocation2 + $0x48] sm:$0xf] }
  0xa7   : > { %v1295_v46 = vpop.permute.xlu1 %1294 }
  0xa8   : > { %1341 = vst.msk [vmem:[#allocation4 + $0x8] sm:$0xf] %vm1338_vm7, %v1295_v46  ;;  %v1303_v32 = vpop.permute.xlu0 %1302  ;;  %1577 = vrot.lane.b32.xlu2 %v1536_v45, %s9649_s9  ;;  %v1670_v45 = vrot.slane %v1668_v24, 5  ;;  %v10092_v57 = vrot.slane %v1754_v50, 5  ;;  %v1750_v24 = vrot.slane %v1748_v12, 5  ;;  %v1772_v50 = vshll.u32 %v1639_v40, 16 }
  0xa9   : > { %1345 = vst.msk [vmem:[#allocation4 + $0x18] sm:$0xf] %vm1338_vm7, %v1303_v32  ;;  %v964_v32 = vld [vmem:[#allocation2 + $0x68] sm:$0x1] }
  0xaa   : > { %1585 = vrot.lane.b32.xlu0 %v1540_v51, %s9649_s9  ;;  %v1702_v51 = vrot.slane %v1700_v30, 5  ;;  %v965_v55 = vsel %vm9712_vm4, %v723_v31, %v964_v32  ;;  %v1761_v15 = vor.u32 %v1760_v58, %v10092_v57  ;;  %v1795_v30 = vrot.slane %v1793_v20, 4 }
  0xab   : > { %966 = vst [vmem:[#allocation2 + $0x68] sm:$0x1] %v965_v55  ;;  %v1798_v31 = vrot.slane %v1796_v21, 5  ;;  %v1751_v37 = vor.u32 %v1750_v24, %v1747_v23  ;;  %v1774_v58 = vrot.slane %v1772_v50, 5  ;;  %v1820_v20 = vshll.u32 %v1645_v10, 16 }
  0xac   : > { %v1703_v9 = vor.u32 %v1702_v51, %v1699_v8  ;;  %v1762_v28 = vrot.slane %v1761_v15, 4  ;;  %v1826_v8 = vshll.u32 %v1646_v36, 16  ;;  %v1830_v51 = vshrl.u32 %v1646_v36, 16 }
  0xad   : > { %v1313_v7 = vpop.permute.xlu2 %1312  ;;  %v1799_v39 = vor.u32 %v1798_v31, %v1795_v30 }
  0xae   : > { %1350 = vst.msk [vmem:[#allocation4 + $0x2c] sm:$0xf] %vm1338_vm7, %v1313_v7  ;;  %1581 = vrot.lane.b32.xlu1 %v1538_v6, %s9649_s9  ;;  %v1638_v6 = vld [vmem:[#allocation2 + $0x44] sm:$0x1]  ;;  %v1685_v7 = vsel %vm9782_vm13, %v1680_v43, %v10060_v52  ;;  %v1704_v60 = vrot.slane %v1703_v9, 4  ;;  %v1832_v9 = vrot.slane %v1830_v51, 4 }
  0xaf   : > { %v1297_v13 = vpop.permute.xlu1 %1296  ;;  %v1764_v19 = vshll.u32 %v1638_v6, 16  ;;  %v1800_v4 = vrot.slane %v1799_v39, 4  ;;  %v1804_v6 = vrot.slane %v1802_v47, 5  ;;  %v1906_v47 = vld [vmem:[#allocation2 + $0x10] sm:$0xf] }
  0xb0   : > { %1342 = vst.msk [vmem:[#allocation4 + $0xc] sm:$0xf] %vm1338_vm7, %v1297_v13  ;;  %1583 = vrot.lane.b32.xlu2 %v1539_v16, %s9649_s9  ;;  %v1671_v16 = vsel %vm9782_vm13, %v1666_v48, %v1670_v45  ;;  %v1713_v13 = vor.u32 %v1712_v53, %v10087_v54  ;;  %v1742_v48 = vrot.slane %v1740_v62, 5  ;;  %v1912_v51 = vld [vmem:[#allocation2 + $0x28] sm:$0xf] }
  0xb1   : > { %v1766_v29 = vrot.slane %v1764_v19, 5  ;;  %v1788_v19 = vshll.u32 %v1641_v59, 16  ;;  %v1805_v21 = vsel %vm9782_vm13, %v1800_v4, %v1804_v6  ;;  %v1969_v59 = vrot.slane %v1912_v51, 5 }
  0xb2   : > { %1840 = vrot.lane.b32.xlu0 %v1661_v11, %s9650_s10  ;;  %v1734_v11 = vshrl.u32 %v1634_v0, 16  ;;  %v1714_v26 = vrot.slane %v1713_v13, 4  ;;  %v1806_v13 = vshrl.u32 %v1643_v18, 16 }
  0xb3   : > { %v1767_v43 = vsel %vm9782_vm13, %v1762_v28, %v1766_v29  ;;  %v1644_v28 = vld [vmem:[#allocation2 + $0x5c] sm:$0x1] }
  0xb4   : > { %v1736_v25 = vrot.slane %v1734_v11, 4  ;;  %v1719_v42 = vsel %vm9782_vm13, %v1714_v26, %v1718_v27  ;;  %v1647_v11 = vld [vmem:[#allocation2 + $0x68] sm:$0x1]  ;;  %v1808_v22 = vrot.slane %v1806_v13, 4  ;;  %v1822_v27 = vrot.slane %v1820_v20, 5 }
  0xb5   : > { %v1309_v35 = vpop.permute.xlu0 %1308 }
  0xb6   : > { %1348 = vst.msk [vmem:[#allocation4 + $0x24] sm:$0xf] %vm1338_vm7, %v1309_v35  ;;  %1587 = vrot.lane.b32.xlu1 %v1541_v34, %s9649_s9  ;;  %v1640_v34 = vld [vmem:[#allocation2 + $0x4c] sm:$0xf]  ;;  %v1709_v35 = vsel %vm9782_vm13, %v1704_v60, %v10087_v54  ;;  %v1752_v54 = vrot.slane %v1751_v37, 4  ;;  %v1836_v60 = vshll.u32 %v1647_v11, 16  ;;  %v1809_v31 = vor.u32 %v1808_v22, %v1804_v6 }
  0xb7   : > { %v1305_v46 = vpop.permute.xlu1 %1304  ;;  %v1778_v45 = vshll.u32 %v1640_v34, 16  ;;  %v1908_v37 = vld [vmem:[#allocation2 + $0x18] sm:$0xe] }
  0xb8   : > { %1346 = vst.msk [vmem:[#allocation4 + $0x1c] sm:$0xf] %vm1338_vm7, %v1305_v46  ;;  %1589 = vrot.lane.b32.xlu2 %v1542_v38, %s9649_s9  ;;  %v1737_v38 = vor.u32 %v1736_v25, %v1732_v3  ;;  %v1782_v46 = vshrl.u32 %v1640_v34, 16  ;;  %v1757_v17 = vsel %vm9782_vm13, %v1752_v54, %v10092_v57  ;;  %v1790_v25 = vrot.slane %v1788_v19, 5  ;;  %v1918_v19 = vld [vmem:[#allocation2 + $0x40] sm:$0xf] }
  0xb9   : > { %v1812_v34 = vshll.u32 %v1644_v28, 16  ;;  %v1955_v54 = vrot.slane %v1906_v47, 5  ;;  %v1983_v22 = vrot.slane %v1918_v19, 5  ;;  %v1927_v47 = vld [vmem:[#allocation2 + $0x64] sm:$0xf] }
  0xba   : > { %1846 = vrot.lane.b32.xlu0 %v1695_v41, %s9650_s10  ;;  %v1319_v63 = vpop.permute.xlu2 %1318  ;;  %v1769_v41 = vshrl.u32 %v1639_v40, 16  ;;  %v1738_v53 = vrot.slane %v1737_v38, 4  ;;  %v1784_v2 = vrot.slane %v1782_v46, 4  ;;  %v1909_v38 = vld [vmem:[#allocation2 + $0x1c] sm:$0xf]  ;;  %v9260_v46 = vrot.slane %v1908_v37, 9 }
  0xbb   : > { %1353 = vst.msk [vmem:[#allocation4 + $0x38] sm:$0xf] %vm1338_vm7, %v1319_v63  ;;  %v1780_v63 = vrot.slane %v1778_v45, 5  ;;  %v1814_v50 = vrot.slane %v1812_v34, 5  ;;  %v1962_v39 = vrot.slane %v1909_v38, 5  ;;  %v1957_v4 = vrot.slane %v1955_v54, 4 }
  0xbc   : > { %v1771_v55 = vrot.slane %v1769_v41, 4  ;;  %v1743_v12 = vsel %vm9782_vm13, %v1738_v53, %v1742_v48  ;;  %v1810_v41 = vrot.slane %v1809_v31, 4  ;;  %v1905_v53 = vld [vmem:[#allocation2 + $0xc] sm:$0xe]  ;;  %v319_v19 = vld [vmem:[#allocation2 + $0x6c] sm:$0x1] }
  0xbd   : > { %v1785_v15 = vor.u32 %v1784_v2, %v1780_v63  ;;  %v9259_v2 = vrot.slane %v1905_v53, 9 }
  0xbe   : > { %1842 = vrot.lane.b32.xlu1 %v1671_v16, %s9650_s10  ;;  %v1775_v14 = vor.u32 %v1774_v58, %v1771_v55  ;;  %v1963_v55 = vsel %vm9959_vm1, %v9260_v46, %v1962_v39  ;;  %v1907_v58 = vld [vmem:[#allocation2 + $0x14] sm:$0x1]  ;;  %v1920_v46 = vld [vmem:[#allocation2 + $0x48] sm:$0xe] }
  0xbf   : > { %v1786_v24 = vrot.slane %v1785_v15, 4  ;;  %v1958_v6 = vrot.slane %v1907_v58, 5  ;;  %v1956_v11 = vsel %vm9959_vm1, %v9259_v2, %v1955_v54  ;;  %v1917_v15 = vld [vmem:[#allocation2 + $0x3c] sm:$0xe]  ;;  %v1924_v58 = vld [vmem:[#allocation2 + $0x58] sm:$0xf] }
  0xc0   : > { %v1315_v52 = vpop.permute.xlu0 %1314  ;;  %1844 = vrot.lane.b32.xlu2 %v1685_v7, %s9650_s10  ;;  %v10120_v7 = vrot.slane %v1826_v8, 5  ;;  %v1776_v57 = vrot.slane %v1775_v14, 4  ;;  %v1911_v14 = vld [vmem:[#allocation2 + $0x24] sm:$0xe] }
  0xc1   : > { %1351 = vst.msk [vmem:[#allocation4 + $0x30] sm:$0xf] %vm1338_vm7, %v1315_v52 }
  0xc2   : > { %1852 = vrot.lane.b32.xlu0 %v1733_v49, %s9650_s10  ;;  %v1465_v0 = vpop.permute.xlu2 %1464  ;;  %v1817_v49 = vshrl.u32 %v1645_v10, 16  ;;  %v1833_v52 = vor.u32 %v1832_v9, %v10120_v7  ;;  %v1781_v30 = vsel %vm9782_vm13, %v1776_v57, %v1780_v63  ;;  %v1913_v63 = vld [vmem:[#allocation2 + $0x2c] sm:$0x1]  ;;  %v1971_v9 = vrot.slane %v1969_v59, 4 }
  0xc3   : > { %1512 = vst.msk [vmem:[#allocation4 + $0x4] sm:$0xf] %vm1510_vm9, %v1465_v0  ;;  %v1838_v0 = vrot.slane %v1836_v60, 5  ;;  %v1972_v10 = vrot.slane %v1913_v63, 5  ;;  %v9263_v57 = vrot.slane %v1917_v15, 9 }
  0xc4   : > { %v1819_v26 = vrot.slane %v1817_v49, 4  ;;  %v1834_v40 = vrot.slane %v1833_v52, 4  ;;  %v1964_v49 = vrot.slane %v1962_v39, 4  ;;  %v9261_v52 = vrot.slane %v1911_v14, 9  ;;  %v1926_v39 = vld [vmem:[#allocation2 + $0x60] sm:$0xe] }
  0xc5   : > { %v1973_v13 = vsel %vm9959_vm1, %v1971_v9, %v1972_v10  ;;  %v9266_v53 = vrot.slane %v1926_v39, 9  ;;  %v1928_v15 = vld [vmem:[#allocation2 + $0x68] sm:$0x1]  ;;  %v2082_v39 = vld [vmem:[#allocation2 + $0x40] sm:$0xf] }
  0xc6   : > { %1848 = vrot.lane.b32.xlu1 %v1709_v35, %s9650_s10  ;;  %v1791_v35 = vsel %vm9782_vm13, %v1786_v24, %v1790_v25  ;;  %v1823_v18 = vor.u32 %v1822_v27, %v1819_v26  ;;  %v1839_v36 = vsel %vm9782_vm13, %v1834_v40, %v1838_v0  ;;  %v1921_v25 = vld [vmem:[#allocation2 + $0x4c] sm:$0xf]  ;;  %v1970_v27 = vsel %vm9959_vm1, %v9261_v52, %v1969_v59  ;;  %v1916_v0 = vld [vmem:[#allocation2 + $0x38] sm:$0x1] }
  0xc7   : > { %v1984_v40 = vsel %vm9959_vm1, %v9263_v57, %v1983_v22  ;;  %v320_v52 = vsel %vm9712_vm4, 0, %v319_v19 }
  0xc8   : > { %v1311_v32 = vpop.permute.xlu1 %1310  ;;  %1850 = vrot.lane.b32.xlu2 %v1719_v42, %s9650_s10  ;;  %321 = vst [vmem:[#allocation2 + $0x6c] sm:$0x1] %v320_v52 }
  0xc9   : > { %1349 = vst.msk [vmem:[#allocation4 + $0x28] sm:$0xf] %vm1338_vm7, %v1311_v32  ;;  %v1815_v32 = vsel %vm9782_vm13, %v1810_v41, %v1814_v50 }
  0xca   : > { %1858 = vrot.lane.b32.xlu0 %v1767_v43, %s9650_s10  ;;  %v1471_v3 = vpop.permute.xlu2 %1470  ;;  %v1824_v43 = vrot.slane %v1823_v18, 4  ;;  %v1979_v18 = vrot.slane %v1916_v0, 5 }
  0xcb   : > { %1515 = vst.msk [vmem:[#allocation4 + $0x10] sm:$0xf] %vm1510_vm9, %v1471_v3 }
  0xcc   : > { %v1321_v16 = vpop.permute.xlu0 %1320  ;;  %v1829_v48 = vsel %vm9782_vm13, %v1824_v43, %v10120_v7  ;;  %v1919_v43 = vld [vmem:[#allocation2 + $0x44] sm:$0x1] }
  0xcd   : > { %1354 = vst.msk [vmem:[#allocation4 + $0x3c] sm:$0xf] %vm1338_vm7, %v1321_v16  ;;  %v1986_v51 = vrot.slane %v1919_v43, 5 }
  0xce   : > { %1854 = vrot.lane.b32.xlu1 %v1743_v12, %s9650_s10  ;;  %v1910_v12 = vld [vmem:[#allocation2 + $0x20] sm:$0x1] }
  0xcf   : > { %v1965_v20 = vrot.slane %v1910_v12, 5 }
  0xd0   : > { %1856 = vrot.lane.b32.xlu2 %v1757_v17, %s9650_s10  ;;  %v1317_v23 = vpop.permute.xlu1 %1316  ;;  %v1959_v17 = vsel %vm9959_vm1, %v1957_v4, %v1958_v6  ;;  %v1923_v4 = vld [vmem:[#allocation2 + $0x54] sm:$0xe] }
  0xd1   : > { %1352 = vst.msk [vmem:[#allocation4 + $0x34] sm:$0xf] %vm1338_vm7, %v1317_v23  ;;  %v1915_v23 = vld [vmem:[#allocation2 + $0x34] sm:$0xf]  ;;  %v1966_v26 = vsel %vm9959_vm1, %v1964_v49, %v1965_v20  ;;  %v9265_v9 = vrot.slane %v1923_v4, 9  ;;  %v538_v20 = vld [vmem:[%s9739_s29 + $0x80] sm:$0xff] }
  0xd2   : > { %1864 = vrot.lane.b32.xlu0 %v1805_v21, %s9650_s10  ;;  %v1477_v29 = vpop.permute.xlu2 %1476  ;;  %v1976_v28 = vrot.slane %v1915_v23, 5  ;;  %v2076_v49 = vld [vmem:[#allocation2 + $0x1c] sm:$0xf]  ;;  %v2007_v23 = vrot.slane %v1928_v15, 5 }
  0xd3   : > { %1518 = vst.msk [vmem:[#allocation4 + $0x1c] sm:$0xf] %vm1510_vm9, %v1477_v29  ;;  %v1914_v29 = vld [vmem:[#allocation2 + $0x30] sm:$0xe] }
  0xd4   : > { %v1467_v62 = vpop.permute.xlu0 %1466  ;;  %v9262_v31 = vrot.slane %v1914_v29, 9 }
  0xd5   : > { %1513 = vst.msk [vmem:[#allocation4 + $0x8] sm:$0xf] %vm1510_vm9, %v1467_v62  ;;  %v1990_v62 = vrot.slane %v1921_v25, 5 }
  0xd6   : > { %1860 = vrot.lane.b32.xlu1 %v1781_v30, %s9650_s10  ;;  %v1922_v30 = vld [vmem:[#allocation2 + $0x50] sm:$0x1]  ;;  %v1977_v50 = vsel %vm9959_vm1, %v9262_v31, %v1976_v28 }
  0xd7   : > { %v1992_v37 = vrot.slane %v1990_v62, 4  ;;  %v1993_v38 = vrot.slane %v1922_v30, 5 }
  0xd8   : > { %1862 = vrot.lane.b32.xlu2 %v1791_v35, %s9650_s10  ;;  %v1463_v42 = vpop.permute.xlu1 %1462  ;;  %v1978_v35 = vrot.slane %v1976_v28, 4 }
  0xd9   : > { %1511 = vst.msk [vmem:[#allocation4] sm:$0xf] %vm1510_vm9, %v1463_v42 }
  0xda   : > { %1870 = vrot.lane.b32.xlu0 %v1839_v36, %s9650_s10  ;;  %v1483_v45 = vpop.permute.xlu2 %1482  ;;  %v1980_v42 = vsel %vm9959_vm1, %v1978_v35, %v1979_v18 }
  0xdb   : > { %1521 = vst.msk [vmem:[#allocation4 + $0x28] sm:$0xf] %vm1510_vm9, %v1483_v45  ;;  %v1994_v45 = vsel %vm9959_vm1, %v1992_v37, %v1993_v38  ;;  %v967_v37 = vld [vmem:[#allocation2 + $0x6c] sm:$0xf] }
  0xdc   : > { %v1473_v8 = vpop.permute.xlu0 %1472 }
  0xdd   : > { %1516 = vst.msk [vmem:[#allocation4 + $0x14] sm:$0xf] %vm1510_vm9, %v1473_v8  ;;  %v1985_v8 = vrot.slane %v1983_v22, 4 }
  0xde   : > { %1866 = vrot.lane.b32.xlu1 %v1815_v32, %s9650_s10 }
  0xdf   : > { %v1987_v63 = vsel %vm9959_vm1, %v1985_v8, %v1986_v51  ;;  %v2172_v51 = vld [vmem:[#allocation2 + $0x18] sm:$0xf] }
  0xe0   : > { %1868 = vrot.lane.b32.xlu2 %v1829_v48, %s9650_s10  ;;  %v1469_v3 = vpop.permute.xlu1 %1468  ;;  %v9264_v48 = vrot.slane %v1920_v46, 9  ;;  %v2078_v46 = vld [vmem:[#allocation2 + $0x28] sm:$0xf] }
  0xe1   : > { %1514 = vst.msk [vmem:[#allocation4 + $0xc] sm:$0xf] %vm1510_vm9, %v1469_v3  ;;  %v1997_v3 = vrot.slane %v1924_v58, 5  ;;  %v2085_v58 = vld [vmem:[#allocation2 + $0x54] sm:$0xf] }
  0xe2   : > { %2013 = vrot.lane.b32.xlu0 %v1963_v55, %s9651_s11  ;;  %v1489_v7 = vpop.permute.xlu2 %1488  ;;  %v2004_v55 = vrot.slane %v1927_v47, 5  ;;  %v1991_v2 = vsel %vm9959_vm1, %v9264_v48, %v1990_v62  ;;  %v2075_v62 = vld [vmem:[#allocation2 + $0x18] sm:$0xf]  ;;  %v2080_v48 = vld [vmem:[#allocation2 + $0x34] sm:$0xf] }
  0xe3   : > { %1524 = vst.msk [vmem:[#allocation4 + $0x34] sm:$0xf] %vm1510_vm9, %v1489_v7  ;;  %v1925_v7 = vld [vmem:[#allocation2 + $0x5c] sm:$0x1] }
  0xe4   : > { %v1479_v16 = vpop.permute.xlu0 %1478  ;;  %v2005_v6 = vsel %vm9959_vm1, %v9266_v53, %v2004_v55  ;;  %v2006_v22 = vrot.slane %v2004_v55, 4  ;;  %v2197_v53 = vshrl.u32 %v2172_v51, 16  ;;  %v2200_v55 = vshll.u32 %v2172_v51, 16  ;;  %v2182_v51 = vld [vmem:[#allocation2 + $0x40] sm:$0xf] }
  0xe5   : > { %1519 = vst.msk [vmem:[#allocation4 + $0x20] sm:$0xf] %vm1510_vm9, %v1479_v16  ;;  %v1999_v16 = vrot.slane %v1997_v3, 4 }
  0xe6   : > { %2009 = vrot.lane.b32.xlu1 %v1956_v11, %s9651_s11  ;;  %v2000_v11 = vrot.slane %v1925_v7, 5  ;;  %v2008_v29 = vsel %vm9959_vm1, %v2006_v22, %v2007_v23  ;;  %v2177_v22 = vld [vmem:[#allocation2 + $0x2c] sm:$0x1]  ;;  %v2181_v23 = vld [vmem:[#allocation2 + $0x3c] sm:$0xf] }
  0xe8   : > { %2011 = vrot.lane.b32.xlu2 %v1959_v17, %s9651_s11  ;;  %v1475_v21 = vpop.permute.xlu1 %1474  ;;  %v2001_v14 = vsel %vm9959_vm1, %v1999_v16, %v2000_v11  ;;  %v2084_v11 = vld [vmem:[#allocation2 + $0x4c] sm:$0xf] }
  0xe9   : > { %1517 = vst.msk [vmem:[#allocation4 + $0x18] sm:$0xf] %vm1510_vm9, %v1475_v21  ;;  %v539_v21 = vld [vmem:[%s9739_s29 + $0x88] sm:$0xff] }
  0xea   : > { %2019 = vrot.lane.b32.xlu0 %v1973_v13, %s9651_s11  ;;  %v1560_v60 = vpop.permute.xlu2 %1559  ;;  %v1998_v13 = vsel %vm9959_vm1, %v9265_v9, %v1997_v3  ;;  %v571_v57 = vpack.c.bf16 %v539_v21, %v539_v21  ;;  %v2176_v3 = vld [vmem:[#allocation2 + $0x28] sm:$0xf] }
  0xeb   : > { %1608 = vst.msk [vmem:[#allocation4] sm:$0xf] %vm1607_vm10, %v1560_v60  ;;  %v570_v60 = vpack.c.bf16 %v538_v20, %v538_v20  ;;  %v2083_v9 = vld [vmem:[#allocation2 + $0x48] sm:$0xf]  ;;  %v2234_v16 = vshrl.u32 %v2176_v3, 16 }
  0xec   : > { %v1485_v24 = vpop.permute.xlu0 %1484  ;;  %v736_v30 = vshll.u32 %v571_v57, 16 }
  0xed   : > { %1522 = vst.msk [vmem:[#allocation4 + $0x2c] sm:$0xf] %vm1510_vm9, %v1485_v24  ;;  %v725_v25 = vshrl.u32 %v570_v60, 16  ;;  %v728_v31 = vshll.u32 %v570_v60, 16  ;;  %v2236_v19 = vrot.slane %v2234_v16, 4 }
  0xee   : > { %2015 = vrot.lane.b32.xlu1 %v1966_v26, %s9651_s11  ;;  %v733_v26 = vshrl.u32 %v571_v57, 16 }
  0xf0   : > { %2017 = vrot.lane.b32.xlu2 %v1970_v27, %s9651_s11  ;;  %v1481_v34 = vpop.permute.xlu1 %1480  ;;  %v10227_v0 = vrot.slane %v733_v26, 7 }
  0xf1   : > { %1520 = vst.msk [vmem:[#allocation4 + $0x24] sm:$0xf] %vm1510_vm9, %v1481_v34  ;;  %v2079_v34 = vld [vmem:[#allocation2 + $0x30] sm:$0xf] }
  0xf2   : > { %2025 = vrot.lane.b32.xlu0 %v1984_v40, %s9651_s11  ;;  %v1566_v36 = vpop.permute.xlu2 %1565  ;;  %v727_v40 = vrot.slane %v725_v25, 7  ;;  %v738_v18 = vor.u32 %v736_v30, %v10227_v0  ;;  %v2269_v30 = vshrl.u32 %v2181_v23, 16 }
  0xf3   : > { %1611 = vst.msk [vmem:[#allocation4 + $0xc] sm:$0xf] %vm1607_vm10, %v1566_v36 }
  0xf4   : > { %v1491_v41 = vpop.permute.xlu0 %1490  ;;  %v731_v35 = vrot.slane %v727_v40, 4  ;;  %v730_v36 = vor.u32 %v728_v31, %v727_v40  ;;  %v2087_v40 = vld [vmem:[#allocation2 + $0x60] sm:$0xf]  ;;  %v2272_v31 = vshll.u32 %v2181_v23, 16  ;;  %v2184_v23 = vld [vmem:[#allocation2 + $0x48] sm:$0xf] }
  0xf5   : > { %1525 = vst.msk [vmem:[#allocation4 + $0x38] sm:$0xf] %vm1510_vm9, %v1491_v41 }
  0xf6   : > { %2021 = vrot.lane.b32.xlu1 %v1977_v50, %s9651_s11  ;;  %v739_v50 = vsel %vm9764_vm11, %v731_v35, %v738_v18  ;;  %v968_v43 = vsel %vm9776_vm12, %v730_v36, %v967_v37  ;;  %v740_v35 = vrot.slane %v10227_v0, 4  ;;  %v2174_v18 = vld [vmem:[#allocation2 + $0x20] sm:$0x1] }
  0xf7   : > { %970 = vst.msk [vmem:[#allocation2 + $0x70] sm:$0xf] %vm280_vm0, %v739_v50  ;;  %v2179_v50 = vld [vmem:[#allocation2 + $0x34] sm:$0xf] }
  0xf8   : > { %2023 = vrot.lane.b32.xlu2 %v1980_v42, %s9651_s11  ;;  %v1487_v32 = vpop.permute.xlu1 %1486  ;;  %969 = vst [vmem:[#allocation2 + $0x6c] sm:$0xf] %v968_v43 }
  0xf9   : > { %1523 = vst.msk [vmem:[#allocation4 + $0x30] sm:$0xf] %vm1510_vm9, %v1487_v32 }
  0xfa   : > { %2031 = vrot.lane.b32.xlu0 %v1994_v45, %s9651_s11  ;;  %v1572_v54 = vpop.permute.xlu2 %1571  ;;  %v2077_v45 = vld [vmem:[#allocation2 + $0x24] sm:$0xf] }
  0xfb   : > { %1614 = vst.msk [vmem:[#allocation4 + $0x18] sm:$0xf] %vm1607_vm10, %v1572_v54  ;;  %v2081_v54 = vld [vmem:[#allocation2 + $0x3c] sm:$0xf] }
  0xfc   : > { %v1562_v59 = vpop.permute.xlu0 %1561 }
  0xfd   : > { %1609 = vst.msk [vmem:[#allocation4 + $0x4] sm:$0xf] %vm1607_vm10, %v1562_v59 }
  0xfe   : > { %2027 = vrot.lane.b32.xlu1 %v1987_v63, %s9651_s11  ;;  %v2199_v63 = vrot.slane %v2197_v53, 4  ;;  %v2254_v53 = vshll.u32 %v2179_v50, 16 }
 0x100   : > { %2029 = vrot.lane.b32.xlu2 %v1991_v2, %s9651_s11  ;;  %v1493_v10 = vpop.permute.xlu1 %1492  ;;  %v2202_v2 = vrot.slane %v2200_v55, 5  ;;  %v2258_v55 = vshrl.u32 %v2179_v50, 16 }
 0x101   : > { %1526 = vst.msk [vmem:[#allocation4 + $0x3c] sm:$0xf] %vm1510_vm9, %v1493_v10  ;;  %v2230_v10 = vshll.u32 %v2176_v3, 16 }
 0x102   : > { %2037 = vrot.lane.b32.xlu0 %v2005_v6, %s9651_s11  ;;  %v1578_v17 = vpop.permute.xlu2 %1577  ;;  %v2173_v6 = vld [vmem:[#allocation2 + $0x1c] sm:$0xf] }
 0x103   : > { %1617 = vst.msk [vmem:[#allocation4 + $0x24] sm:$0xf] %vm1607_vm10, %v1578_v17  ;;  %v2203_v17 = vor.u32 %v2202_v2, %v2199_v63  ;;  %v10255_v15 = vrot.slane %v2230_v10, 5  ;;  %v2090_v63 = vld [vmem:[#allocation2 + $0x70] sm:$0xf] }
 0x104   : > { %v1568_v12 = vpop.permute.xlu0 %1567  ;;  %v2089_v2 = vld [vmem:[#allocation2 + $0x6c] sm:$0xf] }
 0x105   : > { %1612 = vst.msk [vmem:[#allocation4 + $0x10] sm:$0xf] %vm1607_vm10, %v1568_v12  ;;  %v2206_v12 = vshll.u32 %v2173_v6, 16  ;;  %v2204_v52 = vrot.slane %v2203_v17, 4  ;;  %v2260_v17 = vrot.slane %v2258_v55, 4 }
 0x106   : > { %2033 = vrot.lane.b32.xlu1 %v1998_v13, %s9651_s11  ;;  %v2088_v13 = vld [vmem:[#allocation2 + $0x64] sm:$0xf]  ;;  %v2188_v55 = vld [vmem:[#allocation2 + $0x58] sm:$0xf] }
 0x107   : > { %v10260_v60 = vrot.slane %v2206_v12, 5 }
 0x108   : > { %2035 = vrot.lane.b32.xlu2 %v2001_v14, %s9651_s11  ;;  %v1564_v24 = vpop.permute.xlu1 %1563  ;;  %v375_v14 = vld [vmem:[#allocation2 + $0x74] sm:$0x1] }
 0x109   : > { %1610 = vst.msk [vmem:[#allocation4 + $0x8] sm:$0xf] %vm1607_vm10, %v1564_v24  ;;  %v376_v20 = vsel %vm9723_vm8, 0, %v375_v14 }
 0x10a   : > { %2109 = vrot.lane.b32.xlu0 %v2076_v49, %s9652_s12  ;;  %v1584_v27 = vpop.permute.xlu2 %1583  ;;  %v2175_v49 = vld [vmem:[#allocation2 + $0x24] sm:$0xf]  ;;  %377 = vst [vmem:[#allocation2 + $0x74] sm:$0x1] %v376_v20  ;;  %v2180_v20 = vld [vmem:[#allocation2 + $0x38] sm:$0x1] }
 0x10b   : > { %1620 = vst.msk [vmem:[#allocation4 + $0x30] sm:$0xf] %vm1607_vm10, %v1584_v27  ;;  %v2221_v25 = vshrl.u32 %v2175_v49, 16  ;;  %v2224_v26 = vshll.u32 %v2175_v49, 16  ;;  %v2086_v27 = vld [vmem:[#allocation2 + $0x58] sm:$0xf] }
 0x10c   : > { %v1574_v28 = vpop.permute.xlu0 %1573 }
 0x10d   : > { %1615 = vst.msk [vmem:[#allocation4 + $0x1c] sm:$0xf] %vm1607_vm10, %v1574_v28  ;;  %v2210_v28 = vshrl.u32 %v2173_v6, 16  ;;  %v2223_v36 = vrot.slane %v2221_v25, 4  ;;  %v2226_v37 = vrot.slane %v2224_v26, 5 }
 0x10e   : > { %2039 = vrot.lane.b32.xlu1 %v2008_v29, %s9651_s11  ;;  %v2237_v29 = vor.u32 %v2236_v19, %v10255_v15  ;;  %v2186_v25 = vld [vmem:[#allocation2 + $0x50] sm:$0x1]  ;;  %v2190_v26 = vld [vmem:[#allocation2 + $0x60] sm:$0xf] }
 0x10f   : > { %v2227_v3 = vor.u32 %v2226_v37, %v2223_v36  ;;  %v2312_v36 = vshll.u32 %v2186_v25, 16  ;;  %v2341_v37 = vshrl.u32 %v2190_v26, 16 }
 0x110   : > { %2107 = vrot.lane.b32.xlu2 %v2075_v62, %s9652_s12  ;;  %v1570_v38 = vpop.permute.xlu1 %1569  ;;  %v2240_v62 = vshll.u32 %v2177_v22, 16 }
 0x111   : > { %1613 = vst.msk [vmem:[#allocation4 + $0x14] sm:$0xf] %vm1607_vm10, %v1570_v38  ;;  %v2238_v38 = vrot.slane %v2237_v29, 4  ;;  %v971_v0 = vld [vmem:[#allocation2 + $0x74] sm:$0x1]  ;;  %v2228_v14 = vrot.slane %v2227_v3, 4 }
 0x112   : > { %2115 = vrot.lane.b32.xlu0 %v2079_v34, %s9652_s12  ;;  %v1590_v41 = vpop.permute.xlu2 %1589  ;;  %v2209_v34 = vsel %vm9782_vm13, %v2204_v52, %v10260_v60  ;;  %v2194_v3 = vld [vmem:[#allocation2 + $0x70] sm:$0xf] }
 0x113   : > { %1623 = vst.msk [vmem:[#allocation4 + $0x3c] sm:$0xf] %vm1607_vm10, %v1590_v41  ;;  %v2212_v41 = vrot.slane %v2210_v28, 4  ;;  %v2282_v28 = vshrl.u32 %v2182_v51, 16 }
 0x114   : > { %v1580_v42 = vpop.permute.xlu0 %1579 }
 0x115   : > { %1618 = vst.msk [vmem:[#allocation4 + $0x28] sm:$0xf] %vm1607_vm10, %v1580_v42  ;;  %v2178_v42 = vld [vmem:[#allocation2 + $0x30] sm:$0xf] }
 0x116   : > { %2111 = vrot.lane.b32.xlu1 %v2077_v45, %s9652_s12  ;;  %v2242_v45 = vrot.slane %v2240_v62, 5 }
 0x118   : > { %2113 = vrot.lane.b32.xlu2 %v2078_v46, %s9652_s12  ;;  %v1576_v47 = vpop.permute.xlu1 %1575  ;;  %v2216_v46 = vshll.u32 %v2174_v18, 16  ;;  %v2243_v16 = vsel %vm9782_vm13, %v2238_v38, %v2242_v45  ;;  %v2344_v38 = vshll.u32 %v2190_v26, 16 }
 0x119   : > { %1616 = vst.msk [vmem:[#allocation4 + $0x20] sm:$0xf] %vm1607_vm10, %v1576_v47  ;;  %v2274_v47 = vrot.slane %v2272_v31, 5 }
 0x11a   : > { %2121 = vrot.lane.b32.xlu0 %v2082_v39, %s9652_s12  ;;  %v1845_v8 = vpop.permute.xlu2 %1844  ;;  %v2271_v39 = vrot.slane %v2269_v30, 4  ;;  %v2218_v49 = vrot.slane %v2216_v46, 5  ;;  %v2233_v30 = vsel %vm9782_vm13, %v2228_v14, %v10255_v15  ;;  %v2374_v14 = vshll.u32 %v2194_v3, 16 }
 0x11b   : > { %1891 = vst.msk [vmem:[#allocation4 + $0x8] sm:$0xf] %vm13288_vm14, %v1845_v8 }
 0x11c   : > { %v1586_v32 = vpop.permute.xlu0 %1585  ;;  %v2275_v6 = vor.u32 %v2274_v47, %v2271_v39  ;;  %v2183_v39 = vld [vmem:[#allocation2 + $0x44] sm:$0x1] }
 0x11d   : > { %1621 = vst.msk [vmem:[#allocation4 + $0x34] sm:$0xf] %vm1607_vm10, %v1586_v32  ;;  %v2185_v32 = vld [vmem:[#allocation2 + $0x4c] sm:$0xf] }
 0x11e   : > { %2117 = vrot.lane.b32.xlu1 %v2080_v48, %s9652_s12  ;;  %v972_v48 = vsel %vm9712_vm4, %v740_v35, %v971_v0  ;;  %v2306_v10 = vshrl.u32 %v2185_v32, 16  ;;  %v2276_v52 = vrot.slane %v2275_v6, 4  ;;  %v2296_v35 = vshll.u32 %v2184_v23, 16 }
 0x11f   : > { %973 = vst [vmem:[#allocation2 + $0x74] sm:$0x1] %v972_v48  ;;  %v2187_v48 = vld [vmem:[#allocation2 + $0x54] sm:$0xf]  ;;  %v2288_v6 = vshll.u32 %v2183_v39, 16 }
 0x120   : > { %2119 = vrot.lane.b32.xlu2 %v2081_v54, %s9652_s12  ;;  %v1582_v59 = vpop.permute.xlu1 %1581  ;;  %v2308_v22 = vrot.slane %v2306_v10, 4  ;;  %v2298_v46 = vrot.slane %v2296_v35, 5 }
 0x121   : > { %1619 = vst.msk [vmem:[#allocation4 + $0x2c] sm:$0xf] %vm1607_vm10, %v1582_v59  ;;  %v2248_v59 = vshll.u32 %v2178_v42, 16 }
 0x122   : > { %2127 = vrot.lane.b32.xlu0 %v2085_v58, %s9652_s12  ;;  %v1851_v4 = vpop.permute.xlu2 %1850  ;;  %v2245_v58 = vshrl.u32 %v2178_v42, 16 }
 0x123   : > { %1894 = vst.msk [vmem:[#allocation4 + $0x14] sm:$0xf] %vm13288_vm14, %v1851_v4  ;;  %v2213_v4 = vor.u32 %v2212_v41, %v10260_v60 }
 0x124   : > { %v1841_v7 = vpop.permute.xlu0 %1840  ;;  %v2247_v12 = vrot.slane %v2245_v58, 4 }
 0x125   : > { %1889 = vst.msk [vmem:[#allocation4] sm:$0xf] %vm13288_vm14, %v1841_v7  ;;  %v2278_v7 = vshll.u32 %v2182_v51, 16  ;;  %v2214_v19 = vrot.slane %v2213_v4, 4  ;;  %v2343_v51 = vrot.slane %v2341_v37, 4 }
 0x126   : > { %2123 = vrot.lane.b32.xlu1 %v2083_v9, %s9652_s12  ;;  %v2302_v9 = vshll.u32 %v2185_v32, 16  ;;  %v2346_v32 = vrot.slane %v2344_v38, 5 }
 0x127   : > { %v10286_v60 = vrot.slane %v2278_v7, 5  ;;  %v2219_v31 = vsel %vm9782_vm13, %v2214_v19, %v2218_v49  ;;  %v2317_v7 = vshrl.u32 %v2187_v48, 16  ;;  %v2378_v19 = vshrl.u32 %v2194_v3, 16  ;;  %v2456_v3 = vld [vmem:[#allocation2 + $0x24] sm:$0xe] }
 0x128   : > { %2125 = vrot.lane.b32.xlu2 %v2084_v11, %s9652_s12  ;;  %v1588_v21 = vpop.permute.xlu1 %1587  ;;  %v10282_v11 = vrot.slane %v2254_v53, 5  ;;  %v2191_v53 = vld [vmem:[#allocation2 + $0x64] sm:$0xf]  ;;  %v2347_v10 = vor.u32 %v2346_v32, %v2343_v51 }
 0x129   : > { %1622 = vst.msk [vmem:[#allocation4 + $0x38] sm:$0xf] %vm1607_vm10, %v1588_v21  ;;  %v2281_v41 = vsel %vm9782_vm13, %v2276_v52, %v10286_v60  ;;  %v2354_v35 = vshrl.u32 %v2191_v53, 16 }
 0x12a   : > { %2133 = vrot.lane.b32.xlu0 %v2088_v13, %s9652_s12  ;;  %v1857_v57 = vpop.permute.xlu2 %1856  ;;  %v2250_v13 = vrot.slane %v2248_v59, 5  ;;  %v2261_v29 = vor.u32 %v2260_v17, %v10282_v11  ;;  %v2326_v17 = vshll.u32 %v2188_v55, 16 }
 0x12b   : > { %1897 = vst.msk [vmem:[#allocation4 + $0x20] sm:$0xf] %vm13288_vm14, %v1857_v57  ;;  %v10288_v57 = vrot.slane %v2302_v9, 5  ;;  %v2320_v9 = vshll.u32 %v2187_v48, 16 }
 0x12c   : > { %v1847_v24 = vpop.permute.xlu0 %1846  ;;  %v2251_v62 = vor.u32 %v2250_v13, %v2247_v12  ;;  %v2262_v50 = vrot.slane %v2261_v29, 4  ;;  %v2330_v12 = vshrl.u32 %v2188_v55, 16  ;;  %v2328_v25 = vrot.slane %v2326_v17, 5 }
 0x12d   : > { %1892 = vst.msk [vmem:[#allocation4 + $0xc] sm:$0xf] %vm13288_vm14, %v1847_v24  ;;  %v2309_v18 = vor.u32 %v2308_v22, %v10288_v57  ;;  %v2322_v52 = vrot.slane %v2320_v9, 5  ;;  %v2348_v22 = vrot.slane %v2347_v10, 4  ;;  %v2380_v29 = vrot.slane %v2378_v19, 4 }
 0x12e   : > { %2129 = vrot.lane.b32.xlu1 %v2086_v27, %s9652_s12  ;;  %v2252_v42 = vrot.slane %v2251_v62, 4  ;;  %v2332_v26 = vrot.slane %v2330_v12, 4  ;;  %v2454_v9 = vld [vmem:[#allocation2 + $0x1c] sm:$0xf]  ;;  %v9268_v17 = vrot.slane %v2456_v3, 9 }
 0x12f   : > { %v2310_v0 = vrot.slane %v2309_v18, 4  ;;  %v2455_v19 = vld [vmem:[#allocation2 + $0x20] sm:$0x1]  ;;  %v10412_v3 = vld [vmem:[#allocation2 + $0x54] sm:$0xe] }
 0x130   : > { %2131 = vrot.lane.b32.xlu2 %v2087_v40, %s9652_s12  ;;  %v1843_v43 = vpop.permute.xlu1 %1842  ;;  %v2264_v40 = vshll.u32 %v2180_v20, 16  ;;  %v2290_v20 = vrot.slane %v2288_v6, 5 }
 0x131   : > { %1890 = vst.msk [vmem:[#allocation4 + $0x4] sm:$0xf] %vm13288_vm14, %v1843_v43  ;;  %v2284_v43 = vrot.slane %v2282_v28, 4  ;;  %v10321_v28 = vrot.slane %v2374_v14, 5 }
 0x132   : > { %2388 = vrot.lane.b32.xlu0 %v2209_v34, %s9653_s13  ;;  %v1863_v8 = vpop.permute.xlu2 %1862  ;;  %v2293_v34 = vshrl.u32 %v2184_v23, 16  ;;  %v2266_v15 = vrot.slane %v2264_v40, 5  ;;  %v2193_v40 = vld [vmem:[#allocation2 + $0x6c] sm:$0xf] }
 0x133   : > { %1900 = vst.msk [vmem:[#allocation4 + $0x2c] sm:$0xf] %vm13288_vm14, %v1863_v8  ;;  %v2314_v8 = vrot.slane %v2312_v36, 5  ;;  %v2333_v36 = vor.u32 %v2332_v26, %v2328_v25  ;;  %v2365_v38 = vshrl.u32 %v2193_v40, 16  ;;  %v540_v26 = vld [vmem:[%s9739_s29 + $0x90] sm:$0xff] }
 0x134   : > { %v1853_v54 = vpop.permute.xlu0 %1852  ;;  %v2295_v45 = vrot.slane %v2293_v34, 4  ;;  %v2267_v58 = vsel %vm9782_vm13, %v2262_v50, %v2266_v15  ;;  %v2381_v15 = vor.u32 %v2380_v29, %v10321_v28  ;;  %v10364_v29 = vld [vmem:[#allocation2 + $0x30] sm:$0xe] }
 0x135   : > { %1895 = vst.msk [vmem:[#allocation4 + $0x18] sm:$0xf] %vm13288_vm14, %v1853_v54  ;;  %v2315_v13 = vsel %vm9782_vm13, %v2310_v0, %v2314_v8  ;;  %v2192_v8 = vld [vmem:[#allocation2 + $0x68] sm:$0x1] }
 0x136   : > { %2135 = vrot.lane.b32.xlu1 %v2089_v2, %s9652_s12  ;;  %v2285_v2 = vor.u32 %v2284_v43, %v10286_v60  ;;  %v2299_v4 = vor.u32 %v2298_v46, %v2295_v45  ;;  %v2356_v43 = vrot.slane %v2354_v35, 4  ;;  %v2334_v46 = vrot.slane %v2333_v36, 4  ;;  %v541_v35 = vld [vmem:[%s9739_s29 + $0x98] sm:$0xff] }
 0x137   : > { %v2382_v32 = vrot.slane %v2381_v15, 4  ;;  %v9269_v15 = vrot.slane %v10364_v29, 9 }
 0x138   : > { %2137 = vrot.lane.b32.xlu2 %v2090_v63, %s9652_s12  ;;  %v1849_v21 = vpop.permute.xlu1 %1848  ;;  %v2257_v63 = vsel %vm9782_vm13, %v2252_v42, %v10282_v11  ;;  %v2286_v11 = vrot.slane %v2285_v2, 4  ;;  %v2300_v49 = vrot.slane %v2299_v4, 4  ;;  %v2457_v4 = vld [vmem:[#allocation2 + $0x28] sm:$0xf] }
 0x139   : > { %1893 = vst.msk [vmem:[#allocation4 + $0x10] sm:$0xf] %vm13288_vm14, %v1849_v21  ;;  %v2319_v21 = vrot.slane %v2317_v7, 4  ;;  %v2510_v12 = vrot.slane %v2457_v4, 5  ;;  %v3060_v4 = vld [vmem:[#allocation2 + $0x64] sm:$0xf] }
 0x13a   : > { %2394 = vrot.lane.b32.xlu0 %v2243_v16, %s9653_s13  ;;  %v1869_v24 = vpop.permute.xlu2 %1868  ;;  %v2350_v16 = vshll.u32 %v2191_v53, 16  ;;  %v2291_v34 = vsel %vm9782_vm13, %v2286_v11, %v2290_v20  ;;  %v322_v11 = vld [vmem:[#allocation2 + $0x78] sm:$0x1]  ;;  %v2503_v20 = vrot.slane %v2454_v9, 5 }
 0x13b   : > { %1903 = vst.msk [vmem:[#allocation4 + $0x38] sm:$0xf] %vm13288_vm14, %v1869_v24  ;;  %v2189_v24 = vld [vmem:[#allocation2 + $0x5c] sm:$0x1]  ;;  %v2323_v18 = vor.u32 %v2322_v52, %v2319_v21  ;;  %v2453_v52 = vld [vmem:[#allocation2 + $0x18] sm:$0xe] }
 0x13c   : > { %v1859_v27 = vpop.permute.xlu0 %1858  ;;  %v2352_v23 = vrot.slane %v2350_v16, 5  ;;  %v2336_v37 = vshll.u32 %v2189_v24, 16  ;;  %v2506_v24 = vrot.slane %v2455_v19, 5 }
 0x13d   : > { %1898 = vst.msk [vmem:[#allocation4 + $0x24] sm:$0xf] %vm13288_vm14, %v1859_v27 }
 0x13e   : > { %2390 = vrot.lane.b32.xlu1 %v2219_v31, %s9653_s13  ;;  %v2305_v31 = vsel %vm9782_vm13, %v2300_v49, %v10288_v57  ;;  %v2353_v50 = vsel %vm9782_vm13, %v2348_v22, %v2352_v23  ;;  %v2324_v57 = vrot.slane %v2323_v18, 4  ;;  %v2338_v39 = vrot.slane %v2336_v37, 5  ;;  %v10379_v37 = vld [vmem:[#allocation2 + $0x4c] sm:$0xf] }
 0x13f   : > { %v2357_v55 = vor.u32 %v2356_v43, %v2352_v23  ;;  %v323_v22 = vsel %vm9712_vm4, 0, %v322_v11  ;;  %v9267_v18 = vrot.slane %v2453_v52, 9  ;;  %v10386_v43 = vpack.c.bf16 %v541_v35, %v541_v35  ;;  %v10427_v52 = vld [vmem:[#allocation2 + $0x64] sm:$0xf] }
 0x140   : > { %2392 = vrot.lane.b32.xlu2 %v2233_v30, %s9653_s13  ;;  %v1855_v47 = vpop.permute.xlu1 %1854  ;;  %v2195_v30 = vld [vmem:[#allocation2 + $0x74] sm:$0x1]  ;;  %v2329_v53 = vsel %vm9782_vm13, %v2324_v57, %v2328_v25  ;;  %v2461_v25 = vld [vmem:[#allocation2 + $0x38] sm:$0x1]  ;;  %324 = vst [vmem:[#allocation2 + $0x78] sm:$0x1] %v323_v22 }
 0x141   : > { %1896 = vst.msk [vmem:[#allocation4 + $0x1c] sm:$0xf] %vm13288_vm14, %v1855_v47  ;;  %v2384_v42 = vshll.u32 %v2195_v30, 16  ;;  %v2367_v47 = vrot.slane %v2365_v38, 4  ;;  %v2358_v6 = vrot.slane %v2357_v55, 4  ;;  %v572_v30 = vpack.c.bf16 %v540_v26, %v540_v26 }
 0x142   : > { %2400 = vrot.lane.b32.xlu0 %v2281_v41, %s9653_s13  ;;  %v2012_v54 = vpop.permute.xlu2 %2011  ;;  %v2368_v41 = vshll.u32 %v2193_v40, 16  ;;  %v10366_v40 = vld [vmem:[#allocation2 + $0x2c] sm:$0x1]  ;;  %v10400_v55 = vld [vmem:[#allocation2 + $0x5c] sm:$0x1] }
 0x143   : > { %2059 = vst.msk [vmem:[#allocation4 + $0x4] sm:$0xf] %vm13289_vm15, %v2012_v54  ;;  %v2386_v48 = vrot.slane %v2384_v42, 5  ;;  %v742_v38 = vshrl.u32 %v572_v30, 16  ;;  %v10383_v42 = vld [vmem:[#allocation2 + $0x44] sm:$0x1] }
 0x144   : > { %v1865_v59 = vpop.permute.xlu0 %1864  ;;  %v2370_v0 = vrot.slane %v2368_v41, 5  ;;  %v381_v22 = vld [vmem:[#allocation2 + $0x8c] sm:$0x1]  ;;  %v3061_v26 = vld [vmem:[#allocation2 + $0x68] sm:$0x1] }
 0x145   : > { %1901 = vst.msk [vmem:[#allocation4 + $0x30] sm:$0xf] %vm13288_vm14, %v1865_v59  ;;  %v2339_v59 = vsel %vm9782_vm13, %v2334_v46, %v2338_v39  ;;  %v2387_v2 = vsel %vm9782_vm13, %v2382_v32, %v2386_v48  ;;  %v2512_v46 = vrot.slane %v2510_v12, 4  ;;  %v2513_v39 = vrot.slane %v10366_v40, 5  ;;  %v10394_v32 = vld [vmem:[#allocation2 + $0x3c] sm:$0xe] }
 0x146   : > { %2396 = vrot.lane.b32.xlu1 %v2257_v63, %s9653_s13  ;;  %v2371_v63 = vor.u32 %v2370_v0, %v2367_v47  ;;  %v745_v48 = vshll.u32 %v572_v30, 16  ;;  %v543_v30 = vld [vmem:[%s9739_s29 + $0xa8] sm:$0xff] }
 0x147   : > { %v2514_v35 = vsel %vm9959_vm1, %v2512_v46, %v2513_v39 }
 0x148   : > { %2398 = vrot.lane.b32.xlu2 %v2267_v58, %s9653_s13  ;;  %v1861_v60 = vpop.permute.xlu1 %1860  ;;  %v2360_v58 = vshll.u32 %v2192_v8, 16  ;;  %v2372_v16 = vrot.slane %v2371_v63, 4 }
 0x149   : > { %1899 = vst.msk [vmem:[#allocation4 + $0x28] sm:$0xf] %vm13288_vm14, %v1861_v60 }
 0x14a   : > { %2406 = vrot.lane.b32.xlu0 %v2315_v13, %s9653_s13  ;;  %v2018_v27 = vpop.permute.xlu2 %2017  ;;  %v2362_v7 = vrot.slane %v2360_v58, 5  ;;  %v10348_v13 = vld [vmem:[#allocation2 + $0x34] sm:$0xf]  ;;  %v2377_v23 = vsel %vm9782_vm13, %v2372_v16, %v10321_v28  ;;  %v10373_v28 = vld [vmem:[#allocation2 + $0x58] sm:$0xf]  ;;  %v10402_v58 = vrot.slane %v742_v38, 7 }
 0x14b   : > { %2062 = vst.msk [vmem:[#allocation4 + $0x10] sm:$0xf] %vm13289_vm15, %v2018_v27  ;;  %v2517_v60 = vrot.slane %v10348_v13, 5  ;;  %v2511_v27 = vsel %vm9959_vm1, %v9268_v17, %v2510_v12  ;;  %v2538_v0 = vrot.slane %v10373_v28, 5  ;;  %v3097_v16 = vshrl.u32 %v3060_v4, 16 }
 0x14c   : > { %v1871_v62 = vpop.permute.xlu0 %1870  ;;  %v2363_v21 = vsel %vm9782_vm13, %v2358_v6, %v2362_v7  ;;  %v750_v6 = vshrl.u32 %v10386_v43, 16  ;;  %v9270_v7 = vrot.slane %v10394_v32, 9  ;;  %v3059_v17 = vld [vmem:[#allocation2 + $0x60] sm:$0xf]  ;;  %v2541_v12 = vrot.slane %v10400_v55, 5 }
 0x14d   : > { %1904 = vst.msk [vmem:[#allocation4 + $0x3c] sm:$0xf] %vm13288_vm14, %v1871_v62  ;;  %v10368_v62 = vld [vmem:[#allocation2 + $0x40] sm:$0xf]  ;;  %v2519_v36 = vrot.slane %v2517_v60, 4  ;;  %v10418_v9 = vrot.slane %v2538_v0, 4  ;;  %v747_v11 = vor.u32 %v745_v48, %v10402_v58 }
 0x14e   : > { %2402 = vrot.lane.b32.xlu1 %v2291_v34, %s9653_s13  ;;  %v10371_v34 = vld [vmem:[#allocation2 + $0x48] sm:$0xe]  ;;  %v2524_v57 = vrot.slane %v10368_v62, 5  ;;  %v3087_v19 = vshll.u32 %v3059_v17, 16  ;;  %v748_v29 = vrot.slane %v10402_v58, 4  ;;  %v10438_v40 = vrot.slane %v750_v6, 7 }
 0x14f   : > { %v9271_v47 = vrot.slane %v10371_v34, 9  ;;  %v10446_v13 = vld [vmem:[#allocation2 + $0x70] sm:$0xf]  ;;  %v2545_v48 = vrot.slane %v10427_v52, 5  ;;  %v575_v58 = vpack.c.bf16 %v543_v30, %v543_v30  ;;  %v3062_v34 = vld [vmem:[#allocation2 + $0x6c] sm:$0xf] }
 0x150   : > { %2404 = vrot.lane.b32.xlu2 %v2305_v31, %s9653_s13  ;;  %v1867_v45 = vpop.permute.xlu1 %1866  ;;  %v2505_v31 = vrot.slane %v2503_v20, 4  ;;  %v10527_v32 = vld [vmem:[#allocation2 + $0x74] sm:$0x1] }
 0x151   : > { %1902 = vst.msk [vmem:[#allocation4 + $0x34] sm:$0xf] %vm13288_vm14, %v1867_v45  ;;  %vm13290_vm14 = vcmask 224448  }
 0x152   : > { %2412 = vrot.lane.b32.xlu0 %v2353_v50, %s9653_s13  ;;  %v2024_v51 = vpop.permute.xlu2 %2023  ;;  %v2520_v50 = vrot.slane %v2461_v25, 5  ;;  %v2518_v25 = vsel %vm9959_vm1, %v9269_v15, %v2517_v60  ;;  %v753_v60 = vshll.u32 %v10386_v43, 16  ;;  %v10461_v43 = vld [vmem:[#allocation2 + $0x68] sm:$0x1] }
 0x153   : > { %2065 = vst.msk [vmem:[#allocation4 + $0x1c] sm:$0xf] %vm13289_vm15, %v2024_v51  ;;  %v2531_v51 = vrot.slane %v10379_v37, 5  ;;  %v2552_v37 = vrot.slane %v10446_v13, 5 }
 0x154   : > { %v2014_v54 = vpop.permute.xlu0 %2013  ;;  %v2521_v63 = vsel %vm9959_vm1, %v2519_v36, %v2520_v50  ;;  %v3099_v36 = vrot.slane %v3097_v16, 4  ;;  %v10475_v16 = vld [vmem:[#allocation2 + $0x60] sm:$0xe] }
 0x155   : > { %2060 = vst.msk [vmem:[#allocation4 + $0x8] sm:$0xf] %vm13289_vm15, %v2014_v54  ;;  %v2504_v54 = vsel %vm9959_vm1, %v9267_v18, %v2503_v20  ;;  %v9272_v20 = vrot.slane %v10412_v3, 9  ;;  %v10444_v18 = vld [vmem:[#allocation2 + $0x6c] sm:$0xe]  ;;  %v10459_v39 = vrot.slane %v2531_v51, 4 }
 0x156   : > { %2408 = vrot.lane.b32.xlu1 %v2329_v53, %s9653_s13  ;;  %v2527_v53 = vrot.slane %v10383_v42, 5  ;;  %v2542_v42 = vsel %vm9959_vm1, %v10418_v9, %v2541_v12  ;;  %v10525_v62 = vrot.slane %v2552_v37, 4 }
 0x158   : > { %2410 = vrot.lane.b32.xlu2 %v2339_v59, %s9653_s13  ;;  %v2010_v10 = vpop.permute.xlu1 %2009  ;;  %v2507_v59 = vsel %vm9959_vm1, %v2505_v31, %v2506_v24 }
 0x159   : > { %2058 = vst.msk [vmem:[#allocation4] sm:$0xf] %vm13289_vm15, %v2010_v10  ;;  %v3093_v10 = vshll.u32 %v3060_v4, 16 }
 0x15a   : > { %2418 = vrot.lane.b32.xlu0 %v2387_v2, %s9653_s13  ;;  %v2030_v14 = vpop.permute.xlu2 %2029  ;;  %v10410_v2 = vrot.slane %v2524_v57, 4 }
 0x15b   : > { %2068 = vst.msk [vmem:[#allocation4 + $0x28] sm:$0xf] %vm13289_vm15, %v2030_v14  ;;  %v3084_v14 = vshrl.u32 %v3059_v17, 16 }
 0x15c   : > { %v2020_v49 = vpop.permute.xlu0 %2019 }
 0x15d   : > { %2063 = vst.msk [vmem:[#allocation4 + $0x14] sm:$0xf] %vm13289_vm15, %v2020_v49  ;;  %v974_v49 = vld [vmem:[#allocation2 + $0x78] sm:$0xf]  ;;  %v3086_v15 = vrot.slane %v3084_v14, 4 }
 0x15e   : > { %2414 = vrot.lane.b32.xlu1 %v2363_v21, %s9653_s13  ;;  %v10425_v21 = vld [vmem:[#allocation2 + $0x50] sm:$0x1]  ;;  %v975_v38 = vsel %vm9776_vm12, %v747_v11, %v974_v49  ;;  %v9274_v11 = vrot.slane %v10444_v18, 9 }
 0x15f   : > { %976 = vst [vmem:[#allocation2 + $0x78] sm:$0xf] %v975_v38  ;;  %v770_v38 = vshll.u32 %v575_v58, 16 }
 0x160   : > { %2416 = vrot.lane.b32.xlu2 %v2377_v23, %s9653_s13  ;;  %v2016_v41 = vpop.permute.xlu1 %2015  ;;  %v542_v23 = vld [vmem:[%s9739_s29 + $0xa0] sm:$0xff] }
 0x161   : > { %2061 = vst.msk [vmem:[#allocation4 + $0xc] sm:$0xf] %vm13289_vm15, %v2016_v41  ;;  %v325_v41 = vld [vmem:[#allocation2 + $0x84] sm:$0x1]  ;;  %v10454_v46 = vpack.c.bf16 %v542_v23, %v542_v23  ;;  %v767_v23 = vshrl.u32 %v575_v58, 16  ;;  %v2525_v58 = vsel %vm9959_vm1, %v9270_v7, %v2524_v57 }
 0x162   : > { %2561 = vrot.lane.b32.xlu0 %v2511_v27, %s9654_s14  ;;  %v2036_v45 = vpop.permute.xlu2 %2035  ;;  %v10435_v27 = vrot.slane %v3093_v10, 5  ;;  %v326_v6 = vsel %vm9712_vm4, 0, %v325_v41  ;;  %v2532_v10 = vsel %vm9959_vm1, %v9271_v47, %v2531_v51  ;;  %v10487_v47 = vrot.slane %v2545_v48, 4  ;;  %v546_v41 = vld [vmem:[%s9739_s29 + $0xc0] sm:$0xff] }
 0x163   : > { %2071 = vst.msk [vmem:[#allocation4 + $0x34] sm:$0xf] %vm13289_vm15, %v2036_v45  ;;  %v3089_v45 = vrot.slane %v3087_v19, 5  ;;  %v759_v4 = vshrl.u32 %v10454_v46, 16  ;;  %v3063_v19 = vld [vmem:[#allocation2 + $0x70] sm:$0xf] }
 0x164   : > { %v2026_v8 = vpop.permute.xlu0 %2025  ;;  %v3100_v17 = vor.u32 %v3099_v36, %v10435_v27  ;;  %v2548_v51 = vrot.slane %v10461_v43, 5  ;;  %327 = vst [vmem:[#allocation2 + $0x84] sm:$0x1] %v326_v6  ;;  %v3117_v30 = vshll.u32 %v3063_v19, 16 }
 0x165   : > { %2066 = vst.msk [vmem:[#allocation4 + $0x20] sm:$0xf] %vm13289_vm15, %v2026_v8  ;;  %v382_v8 = vsel %vm9723_vm8, 0, %v381_v22  ;;  %v3090_v49 = vor.u32 %v3089_v45, %v3086_v15  ;;  %v761_v22 = vrot.slane %v759_v4, 7  ;;  %v3111_v45 = vshll.u32 %v3062_v34, 16 }
 0x166   : > { %2557 = vrot.lane.b32.xlu1 %v2504_v54, %s9654_s14  ;;  %v755_v54 = vor.u32 %v753_v60, %v10438_v40  ;;  %383 = vst [vmem:[#allocation2 + $0x8c] sm:$0x1] %v382_v8  ;;  %v10495_v36 = vrot.slane %v3100_v17, 4  ;;  %v3108_v60 = vshrl.u32 %v3062_v34, 16  ;;  %v769_v8 = vrot.slane %v767_v23, 7 }
 0x167   : > { %v10499_v15 = vrot.slane %v3090_v49, 4  ;;  %v765_v4 = vrot.slane %v761_v22, 4  ;;  %v10534_v7 = vld [vmem:[#allocation2 + $0x78] sm:$0xf]  ;;  %v10541_v9 = vrot.slane %v3111_v45, 5 }
 0x168   : > { %2559 = vrot.lane.b32.xlu2 %v2507_v59, %s9654_s14  ;;  %v2022_v24 = vpop.permute.xlu1 %2021  ;;  %v2534_v59 = vrot.slane %v10425_v21, 5  ;;  %v756_v14 = vsel %vm9764_vm11, %v748_v29, %v755_v54  ;;  %v762_v54 = vshll.u32 %v10454_v46, 16  ;;  %v547_v46 = vld [vmem:[%s9739_s29 + $0xc8] sm:$0xff]  ;;  %v10536_v17 = vrot.slane %v3108_v60, 4 }
 0x169   : > { %2064 = vst.msk [vmem:[#allocation4 + $0x18] sm:$0xf] %vm13289_vm15, %v2022_v24  ;;  %v772_v55 = vor.u32 %v770_v38, %v769_v8  ;;  %v579_v34 = vpack.c.bf16 %v547_v46, %v547_v46  ;;  %v2553_v21 = vsel %vm9959_vm1, %v9274_v11, %v2552_v37  ;;  %v10595_v11 = vsel %vm9959_vm1, %v10487_v47, %v2548_v51 }
 0x16a   : > { %2567 = vrot.lane.b32.xlu0 %v2521_v63, %s9654_s14  ;;  %v2108_v31 = vpop.permute.xlu2 %2107  ;;  %v3103_v63 = vshll.u32 %v3061_v26, 16  ;;  %977 = vst.msk [vmem:[#allocation2 + $0x7c] sm:$0xf] %vm280_vm0, %v756_v14  ;;  %v9273_v26 = vrot.slane %v10475_v16, 9  ;;  %v774_v14 = vrot.slane %v769_v8, 4  ;;  %v764_v49 = vor.u32 %v762_v54, %v761_v22 }
 0x16b   : > { %2156 = vst.msk [vmem:[#allocation4] sm:$0xf] %vm13290_vm14, %v2108_v31  ;;  %v3121_v31 = vshrl.u32 %v3063_v19, 16  ;;  %v10538_v19 = vpack.c.bf16 %v546_v41, %v546_v41  ;;  %v2539_v22 = vsel %vm9959_vm1, %v9272_v20, %v2538_v0  ;;  %v2535_v28 = vsel %vm9959_vm1, %v10459_v39, %v2534_v59  ;;  %v384_v8 = vld [vmem:[#allocation2 + $0x98] sm:$0x1] }
 0x16c   : > { %v2032_v50 = vpop.permute.xlu0 %2031  ;;  %v10492_v29 = vrot.slane %v3103_v63, 5  ;;  %v2528_v63 = vsel %vm9959_vm1, %v10410_v2, %v2527_v53  ;;  %v10529_v53 = vrot.slane %v3117_v30, 5  ;;  %v545_v2 = vld [vmem:[%s9739_s29 + $0xb8] sm:$0xff]  ;;  %v773_v30 = vsel %vm9764_vm11, %v765_v4, %v772_v55 }
 0x16d   : > { %2069 = vst.msk [vmem:[#allocation4 + $0x2c] sm:$0xf] %vm13289_vm15, %v2032_v50  ;;  %v10531_v57 = vrot.slane %v3121_v31, 4  ;;  %v985_v12 = vld [vmem:[#allocation2 + $0x8c] sm:$0x1]  ;;  %v10550_v60 = vpack.c.bf16 %v545_v2, %v545_v2  ;;  %v793_v20 = vshrl.u32 %v10538_v19, 16  ;;  %v2546_v37 = vsel %vm9959_vm1, %v9273_v26, %v2545_v48 }
 0x16e   : > { %2563 = vrot.lane.b32.xlu1 %v2514_v35, %s9654_s14  ;;  %v981_v31 = vld [vmem:[#allocation2 + $0x84] sm:$0xf]  ;;  %984 = vst.msk [vmem:[#allocation2 + $0x88] sm:$0xf] %vm280_vm0, %v773_v30  ;;  %v986_v3 = vsel %vm9712_vm4, %v774_v14, %v985_v12  ;;  %v801_v59 = vshrl.u32 %v579_v34, 16  ;;  %v549_v4 = vld [vmem:[%s9739_s29 + $0xd8] sm:$0xff] }
 0x16f   : > { %v982_v39 = vsel %vm9776_vm12, %v764_v49, %v981_v31  ;;  %v795_v46 = vrot.slane %v793_v20, 7  ;;  %v784_v18 = vshrl.u32 %v10550_v60, 16  ;;  %987 = vst [vmem:[#allocation2 + $0x8c] sm:$0x1] %v986_v3  ;;  %v385_v2 = vsel %vm9723_vm8, 0, %v384_v8 }
 0x170   : > { %2565 = vrot.lane.b32.xlu2 %v2518_v25, %s9654_s14  ;;  %v2028_v24 = vpop.permute.xlu1 %2027  ;;  %v378_v25 = vld [vmem:[#allocation2 + $0x80] sm:$0x1]  ;;  %983 = vst [vmem:[#allocation2 + $0x84] sm:$0xf] %v982_v39  ;;  %v787_v51 = vshll.u32 %v10550_v60, 16  ;;  %v3124_v14 = vor.u32 %v10531_v57, %v10529_v53  ;;  %v796_v49 = vshll.u32 %v10538_v19, 16 }
 0x171   : > { %2067 = vst.msk [vmem:[#allocation4 + $0x24] sm:$0xf] %vm13289_vm15, %v2028_v24  ;;  %v379_v6 = vsel %vm9723_vm8, 0, %v378_v25  ;;  %v3127_v24 = vshll.u32 %v10527_v32, 16  ;;  %v757_v25 = vrot.slane %v10438_v40, 4  ;;  %v3135_v40 = vshll.u32 %v10534_v7, 16 }
 0x172   : > { %2573 = vrot.lane.b32.xlu0 %v2532_v10, %s9654_s14  ;;  %v2114_v35 = vpop.permute.xlu2 %2113  ;;  %v544_v10 = vld [vmem:[%s9739_s29 + $0xb0] sm:$0xff]  ;;  %380 = vst [vmem:[#allocation2 + $0x80] sm:$0x1] %v379_v6  ;;  %v10559_v41 = vld [vmem:[#allocation2 + $0x7c] sm:$0xf]  ;;  %v799_v47 = vrot.slane %v795_v46, 4 }
 0x173   : > { %2159 = vst.msk [vmem:[#allocation4 + $0xc] sm:$0xf] %vm13290_vm14, %v2114_v35  ;;  %v10543_v23 = vpack.c.bf16 %v544_v10, %v544_v10  ;;  %v331_v35 = vld [vmem:[#allocation2 + $0x9c] sm:$0x1]  ;;  %v3145_v0 = vshrl.u32 %v10559_v41, 16  ;;  %v3141_v48 = vshll.u32 %v10559_v41, 16 }
 0x174   : > { %v2038_v50 = vpop.permute.xlu0 %2037  ;;  %v332_v6 = vsel %vm9712_vm4, 0, %v331_v35  ;;  %v10624_v31 = vld [vmem:[#allocation2 + $0x74] sm:$0x1]  ;;  %386 = vst [vmem:[#allocation2 + $0x98] sm:$0x1] %v385_v2  ;;  %v551_v32 = vld [vmem:[%s9739_s29 + $0xe8] sm:$0xff] }
 0x175   : > { %2072 = vst.msk [vmem:[#allocation4 + $0x38] sm:$0xf] %vm13289_vm15, %v2038_v50  ;;  %v3132_v50 = vshrl.u32 %v10534_v7, 16  ;;  %v776_v13 = vshrl.u32 %v10543_v23, 16  ;;  %v10617_v7 = vrot.slane %v784_v18, 7  ;;  %v3147_v57 = vrot.slane %v3145_v0, 4 }
 0x176   : > { %2569 = vrot.lane.b32.xlu1 %v2525_v58, %s9654_s14  ;;  %v548_v58 = vld [vmem:[%s9739_s29 + $0xd0] sm:$0xff]  ;;  %v3069_v12 = vld [vmem:[#allocation2 + $0x88] sm:$0xf]  ;;  %333 = vst [vmem:[#allocation2 + $0x9c] sm:$0x1] %v332_v6  ;;  %v798_v0 = vor.u32 %v796_v49, %v795_v46  ;;  %v3106_v46 = vsel %vm9782_vm13, %v10495_v36, %v10492_v29  ;;  %v779_v29 = vshll.u32 %v10543_v23, 16 }
 0x177   : > { %v10610_v52 = vpack.c.bf16 %v548_v58, %v548_v58  ;;  %v10615_v26 = vrot.slane %v776_v13, 7  ;;  %v3134_v55 = vrot.slane %v3132_v50, 4  ;;  %v3165_v35 = vshll.u32 %v3069_v12, 16  ;;  %v328_v50 = vld [vmem:[#allocation2 + $0x90] sm:$0x1]  ;;  %v550_v36 = vld [vmem:[%s9739_s29 + $0xe0] sm:$0xff] }
 0x178   : > { %2571 = vrot.lane.b32.xlu2 %v2528_v63, %s9654_s14  ;;  %v2034_v38 = vpop.permute.xlu1 %2033  ;;  %v804_v63 = vshll.u32 %v579_v34, 16  ;;  %v581_v34 = vpack.c.bf16 %v549_v4, %v549_v4  ;;  %v3169_v60 = vshrl.u32 %v3069_v12, 16  ;;  %v789_v19 = vor.u32 %v787_v51, %v10617_v7  ;;  %v3068_v58 = vld [vmem:[#allocation2 + $0x84] sm:$0xf]  ;;  %v3070_v18 = vld [vmem:[#allocation2 + $0x8c] sm:$0x1] }
 0x179   : > { %2070 = vst.msk [vmem:[#allocation4 + $0x30] sm:$0xf] %vm13289_vm15, %v2034_v38  ;;  %v978_v10 = vld [vmem:[#allocation2 + $0x80] sm:$0x1]  ;;  %v782_v38 = vrot.slane %v10615_v26, 4  ;;  %v10635_v3 = vrot.slane %v3165_v35, 5 }
 0x17a   : > { %2579 = vrot.lane.b32.xlu0 %v2542_v42, %s9654_s14  ;;  %v2120_v45 = vpop.permute.xlu2 %2119  ;;  %v10603_v42 = vrot.slane %v801_v59, 7  ;;  %v979_v43 = vsel %vm9712_vm4, %v757_v25, %v978_v10  ;;  %v3137_v25 = vrot.slane %v3135_v40, 5  ;;  %v3171_v20 = vrot.slane %v3169_v60, 4  ;;  %v334_v2 = vld [vmem:[#allocation2 + $0xa8] sm:$0x1] }
 0x17b   : > { %2162 = vst.msk [vmem:[#allocation4 + $0x18] sm:$0xf] %vm13290_vm14, %v2120_v45  ;;  %v810_v45 = vshrl.u32 %v10610_v52, 16  ;;  %v818_v8 = vshrl.u32 %v581_v34, 16  ;;  %v821_v39 = vshll.u32 %v581_v34, 16  ;;  %v329_v4 = vsel %vm9712_vm4, 0, %v328_v50 }
 0x17c   : > { %v2110_v54 = vpop.permute.xlu0 %2109  ;;  %980 = vst [vmem:[#allocation2 + $0x80] sm:$0x1] %v979_v43  ;;  %v806_v16 = vor.u32 %v804_v63, %v10603_v42  ;;  %v3138_v59 = vor.u32 %v3137_v25, %v3134_v55  ;;  %v3114_v63 = vor.u32 %v10541_v9, %v10536_v17  ;;  %v2555_v13 = vrot.slane %v10624_v31, 5  ;;  %v390_v9 = vld [vmem:[#allocation2 + $0xb0] sm:$0x1] }
 0x17d   : > { %2157 = vst.msk [vmem:[#allocation4 + $0x4] sm:$0xf] %vm13290_vm14, %v2110_v54  ;;  %v790_v54 = vsel %vm9764_vm11, %v782_v38, %v789_v19  ;;  %v10647_v6 = vrot.slane %v818_v8, 7  ;;  %v791_v17 = vrot.slane %v10617_v7, 4  ;;  %v10658_v43 = vrot.slane %v3124_v14, 4 }
 0x17e   : > { %2575 = vrot.lane.b32.xlu1 %v2535_v28, %s9654_s14  ;;  %v807_v41 = vsel %vm9764_vm11, %v799_v47, %v806_v16  ;;  %v10633_v28 = vrot.slane %v3141_v48, 5  ;;  %991 = vst.msk [vmem:[#allocation2 + $0x94] sm:$0xf] %vm280_vm0, %v790_v54  ;;  %v3172_v47 = vor.u32 %v3171_v20, %v10635_v3  ;;  %v3156_v51 = vshrl.u32 %v3068_v58, 16  ;;  %v995_v48 = vld [vmem:[#allocation2 + $0x9c] sm:$0xf] }
 0x17f   : > { %998 = vst.msk [vmem:[#allocation2 + $0xa0] sm:$0xf] %vm280_vm0, %v807_v41  ;;  %v3159_v16 = vshll.u32 %v3068_v58, 16  ;;  %v996_v7 = vsel %vm9776_vm12, %v798_v0, %v995_v48  ;;  %v992_v55 = vld [vmem:[#allocation2 + $0x98] sm:$0x1]  ;;  %v823_v14 = vor.u32 %v821_v39, %v10647_v6  ;;  %v3139_v49 = vrot.slane %v3138_v59, 4 }
 0x180   : > { %2577 = vrot.lane.b32.xlu2 %v2539_v22, %s9654_s14  ;;  %v2040_v30 = vpop.permute.xlu1 %2039  ;;  %v3148_v10 = vor.u32 %v3147_v57, %v10633_v28  ;;  %330 = vst [vmem:[#allocation2 + $0x90] sm:$0x1] %v329_v4  ;;  %v10672_v23 = vrot.slane %v3127_v24, 5  ;;  %v3175_v34 = vshll.u32 %v3070_v18, 16  ;;  %v2556_v31 = vsel %vm9959_vm1, %v10525_v62, %v2555_v13  ;;  %v387_v0 = vld [vmem:[#allocation2 + $0xa4] sm:$0x1] }
 0x181   : > { %2073 = vst.msk [vmem:[#allocation4 + $0x3c] sm:$0xf] %vm13289_vm15, %v2040_v30  ;;  %v993_v60 = vsel %vm9712_vm4, %v791_v17, %v992_v55  ;;  %v781_v38 = vor.u32 %v779_v29, %v10615_v26  ;;  %v335_v57 = vsel %vm9712_vm4, 0, %v334_v2  ;;  %v10691_v41 = vpack.c.bf16 %v550_v36, %v550_v36  ;;  %v337_v36 = vld [vmem:[#allocation2 + $0xb4] sm:$0x1] }
 0x182   : > { %2585 = vrot.lane.b32.xlu0 %v2553_v21, %s9654_s14  ;;  %v2126_v22 = vpop.permute.xlu2 %2125  ;;  %v10640_v21 = vrot.slane %v810_v45, 7  ;;  %997 = vst [vmem:[#allocation2 + $0x9c] sm:$0xf] %v996_v7  ;;  %v10680_v35 = vrot.slane %v3148_v10, 4  ;;  %v10694_v62 = vrot.slane %v3172_v47, 4  ;;  %v3158_v19 = vrot.slane %v3156_v51, 4 }
 0x183   : > { %2165 = vst.msk [vmem:[#allocation4 + $0x24] sm:$0xf] %vm13290_vm14, %v2126_v22  ;;  %v3067_v25 = vld [vmem:[#allocation2 + $0x80] sm:$0x1]  ;;  %v391_v22 = vsel %vm9723_vm8, 0, %v390_v9  ;;  %v3161_v50 = vrot.slane %v3159_v16, 5  ;;  %v3096_v26 = vsel %vm9782_vm13, %v10499_v15, %v10435_v27  ;;  %v10706_v54 = vpack.c.bf16 %v551_v32, %v551_v32 }
 0x184   : > { %v2116_v40 = vpop.permute.xlu0 %2115  ;;  %v3151_v20 = vshll.u32 %v3067_v25, 16  ;;  %994 = vst [vmem:[#allocation2 + $0x98] sm:$0x1] %v993_v60  ;;  %v3144_v39 = vsel %vm9782_vm13, %v3139_v49, %v10633_v28  ;;  %v825_v27 = vrot.slane %v10647_v6, 4  ;;  %v827_v15 = vshrl.u32 %v10691_v41, 16 }
 0x185   : > { %2160 = vst.msk [vmem:[#allocation4 + $0x10] sm:$0xf] %vm13290_vm14, %v2116_v40  ;;  %v10702_v40 = vrot.slane %v3175_v34, 5  ;;  %v3072_v59 = vld [vmem:[#allocation2 + $0x94] sm:$0xf]  ;;  %v3162_v4 = vor.u32 %v3161_v50, %v3158_v19  ;;  %v813_v18 = vshll.u32 %v10610_v52, 16  ;;  %v3130_v51 = vsel %vm9782_vm13, %v10658_v43, %v10672_v23 }
 0x186   : > { %2581 = vrot.lane.b32.xlu1 %v2546_v37, %s9654_s14  ;;  %v816_v37 = vrot.slane %v10640_v21, 4  ;;  %v10704_v8 = vld [vmem:[#allocation2 + $0xa0] sm:$0xf]  ;;  %392 = vst [vmem:[#allocation2 + $0xb0] sm:$0x1] %v391_v22  ;;  %v3189_v9 = vshll.u32 %v3072_v59, 16 }
 0x187   : > { %v988_v58 = vld [vmem:[#allocation2 + $0x90] sm:$0xf]  ;;  %v3213_v13 = vshll.u32 %v10704_v8, 16  ;;  %336 = vst [vmem:[#allocation2 + $0xa8] sm:$0x1] %v335_v57  ;;  %v835_v2 = vshrl.u32 %v10706_v54, 16  ;;  %v3178_v23 = vsel %vm9782_vm13, %v10694_v62, %v10702_v40  ;;  %v815_v32 = vor.u32 %v813_v18, %v10640_v21 }
 0x188   : > { %2583 = vrot.lane.b32.xlu2 %v10595_v11, %s9654_s14  ;;  %v2112_v12 = vpop.permute.xlu1 %2111  ;;  %v10674_v11 = vrot.slane %v3114_v63, 4  ;;  %v824_v45 = vsel %vm9764_vm11, %v816_v37, %v823_v14  ;;  %v393_v63 = vld [vmem:[#allocation2 + $0xbc] sm:$0x1]  ;;  %v989_v28 = vsel %vm9776_vm12, %v781_v38, %v988_v58  ;;  %vm2436_vm15 = vcmask 257248  }
 0x189   : > { %2158 = vst.msk [vmem:[#allocation4 + $0x8] sm:$0xf] %vm13290_vm14, %v2112_v12  ;;  %v388_v48 = vsel %vm9723_vm8, 0, %v387_v0  ;;  %v394_v29 = vsel %vm9723_vm8, 0, %v393_v63  ;;  %v3193_v37 = vshrl.u32 %v3072_v59, 16  ;;  %v10736_v43 = vrot.slane %v827_v15, 7 }
 0x18a   : > { %3277 = vrot.lane.b32.xlu0 %v3106_v46, %s9647_s30  ;;  %v2132_v30 = vpop.permute.xlu2 %2131  ;;  %1005 = vst.msk [vmem:[#allocation2 + $0xac] sm:$0xf] %vm280_vm0, %v824_v45  ;;  %v3074_v46 = vld [vmem:[#allocation2 + $0x9c] sm:$0xf]  ;;  %v3120_v52 = vsel %vm9782_vm13, %v10674_v11, %v10529_v53  ;;  %v10739_v14 = vrot.slane %v3162_v4, 4  ;;  %v3153_v53 = vrot.slane %v3151_v20, 5 }
 0x18b   : > { %2168 = vst.msk [vmem:[#allocation4 + $0x30] sm:$0xf] %vm13290_vm14, %v2132_v30  ;;  %v3204_v6 = vshrl.u32 %v3074_v46, 16  ;;  %v3207_v17 = vshll.u32 %v3074_v46, 16  ;;  %v10741_v12 = vrot.slane %v3213_v13, 5  ;;  %v808_v49 = vrot.slane %v10603_v42, 4 }
 0x18c   : > { %v2122_v24 = vpop.permute.xlu0 %2121  ;;  %990 = vst [vmem:[#allocation2 + $0x90] sm:$0xf] %v989_v28  ;;  %v10748_v34 = vrot.slane %v3189_v9, 5  ;;  %v838_v42 = vshll.u32 %v10706_v54, 16  ;;  %v3195_v38 = vrot.slane %v3193_v37, 4  ;;  %v833_v62 = vrot.slane %v10736_v43, 4 }
 0x18d   : > { %2163 = vst.msk [vmem:[#allocation4 + $0x1c] sm:$0xf] %vm13290_vm14, %v2122_v24  ;;  %v3206_v7 = vrot.slane %v3204_v6, 4  ;;  %v3209_v55 = vrot.slane %v3207_v17, 5  ;;  %v1006_v30 = vld [vmem:[#allocation2 + $0xb0] sm:$0x1]  ;;  %v3168_v13 = vsel %vm9782_vm13, %v10739_v14, %v10635_v3  ;;  %v3154_v28 = vsel %vm9782_vm13, %v10680_v35, %v3153_v53 }
 0x18e   : > { %2587 = vrot.lane.b32.xlu1 %v2556_v31, %s9654_s14  ;;  %389 = vst [vmem:[#allocation2 + $0xa4] sm:$0x1] %v388_v48  ;;  %v837_v31 = vrot.slane %v835_v2, 7  ;;  %v1007_v25 = vsel %vm9712_vm4, %v825_v27, %v1006_v30  ;;  %v338_v24 = vsel %vm9712_vm4, 0, %v337_v36  ;;  %v3073_v19 = vld [vmem:[#allocation2 + $0x98] sm:$0x1]  ;;  %v3196_v6 = vor.u32 %v3195_v38, %v10748_v34 }
 0x18f   : > { %v3210_v11 = vor.u32 %v3209_v55, %v3206_v7  ;;  %395 = vst [vmem:[#allocation2 + $0xbc] sm:$0x1] %v394_v29  ;;  %v1002_v45 = vld [vmem:[#allocation2 + $0xa8] sm:$0xf]  ;;  %v830_v27 = vshll.u32 %v10691_v41, 16  ;;  %v3217_v18 = vshrl.u32 %v10704_v8, 16 }
 0x190   : > { %3275 = vrot.lane.b32.xlu2 %v3096_v26, %s9647_s30  ;;  %v2118_v10 = vpop.permute.xlu1 %2117  ;;  %1008 = vst [vmem:[#allocation2 + $0xb0] sm:$0x1] %v1007_v25  ;;  %v840_v21 = vor.u32 %v838_v42, %v837_v31  ;;  %v842_v54 = vrot.slane %v837_v31, 4  ;;  %v1003_v58 = vsel %vm9776_vm12, %v815_v32, %v1002_v45  ;;  %v3199_v17 = vshll.u32 %v3073_v19, 16  ;;  %v3340_v19 = vld [vmem:[#allocation2 + $0x64] sm:$0xf] }
 0x191   : > { %2161 = vst.msk [vmem:[#allocation4 + $0x14] sm:$0xf] %vm13290_vm14, %v2118_v10  ;;  %v3078_v60 = vld [vmem:[#allocation2 + $0xac] sm:$0xf]  ;;  %v3211_v40 = vrot.slane %v3210_v11, 4  ;;  %v3219_v36 = vrot.slane %v3217_v18, 4 }
 0x192   : > { %3283 = vrot.lane.b32.xlu0 %v3144_v39, %s9647_s30  ;;  %v2138_v47 = vpop.permute.xlu2 %2137  ;;  %v3237_v22 = vshll.u32 %v3078_v60, 16  ;;  %v3241_v57 = vshrl.u32 %v3078_v60, 16  ;;  %339 = vst [vmem:[#allocation2 + $0xb4] sm:$0x1] %v338_v24  ;;  %v841_v41 = vsel %vm9764_vm11, %v833_v62, %v840_v21  ;;  %v3197_v55 = vrot.slane %v3196_v6, 4 }
 0x193   : > { %2171 = vst.msk [vmem:[#allocation4 + $0x3c] sm:$0xf] %vm13290_vm14, %v2138_v47  ;;  %v3071_v50 = vld [vmem:[#allocation2 + $0x90] sm:$0xf]  ;;  %v3216_v47 = vsel %vm9782_vm13, %v3211_v40, %v10741_v12  ;;  %v3201_v37 = vrot.slane %v3199_v17, 5  ;;  %v3220_v31 = vor.u32 %v3219_v36, %v10741_v12 }
 0x194   : > { %v2128_v16 = vpop.permute.xlu0 %2127  ;;  %v3180_v20 = vshrl.u32 %v3071_v50, 16  ;;  %v3183_v0 = vshll.u32 %v3071_v50, 16  ;;  %v10761_v59 = vrot.slane %v3237_v22, 5  ;;  %v3243_v63 = vrot.slane %v3241_v57, 4  ;;  %1004 = vst [vmem:[#allocation2 + $0xa8] sm:$0xf] %v1003_v58 }
 0x195   : > { %2166 = vst.msk [vmem:[#allocation4 + $0x28] sm:$0xf] %vm13290_vm14, %v2128_v16  ;;  %v999_v10 = vld [vmem:[#allocation2 + $0xa4] sm:$0x1]  ;;  %v3202_v25 = vsel %vm9782_vm13, %v3197_v55, %v3201_v37  ;;  %v3339_v22 = vld [vmem:[#allocation2 + $0x60] sm:$0xe] }
 0x196   : > { %3279 = vrot.lane.b32.xlu1 %v3120_v52, %s9647_s30  ;;  %v3182_v4 = vrot.slane %v3180_v20, 4  ;;  %v3185_v46 = vrot.slane %v3183_v0, 5  ;;  %v1000_v3 = vsel %vm9712_vm4, %v808_v49, %v999_v10  ;;  %v1013_v2 = vld [vmem:[#allocation2 + $0xbc] sm:$0x1]  ;;  %v3244_v8 = vor.u32 %v3243_v63, %v10761_v59  ;;  %1012 = vst.msk [vmem:[#allocation2 + $0xb8] sm:$0xf] %vm280_vm0, %v841_v41 }
 0x197   : > { %v3079_v35 = vld [vmem:[#allocation2 + $0xb0] sm:$0x1]  ;;  %1001 = vst [vmem:[#allocation2 + $0xa4] sm:$0x1] %v1000_v3  ;;  %v832_v52 = vor.u32 %v830_v27, %v10736_v43  ;;  %v3221_v45 = vrot.slane %v3220_v31, 4  ;;  %v9323_v63 = vrot.slane %v3339_v22, 9 }
 0x198   : > { %3281 = vrot.lane.b32.xlu2 %v3130_v51, %s9647_s30  ;;  %v2124_v26 = vpop.permute.xlu1 %2123  ;;  %v3186_v9 = vor.u32 %v3185_v46, %v3182_v4  ;;  %v1014_v51 = vsel %vm9712_vm4, %v842_v54, %v1013_v2  ;;  %v3247_v48 = vshll.u32 %v3079_v35, 16  ;;  %v3245_v43 = vrot.slane %v3244_v8, 4  ;;  %v10810_v4 = vld [vmem:[#allocation2 + $0x70] sm:$0xf]  ;;  %v3341_v37 = vld [vmem:[#allocation2 + $0x68] sm:$0x1] }
 0x199   : > { %2164 = vst.msk [vmem:[#allocation4 + $0x20] sm:$0xf] %vm13290_vm14, %v2124_v26  ;;  %v1009_v16 = vld [vmem:[#allocation2 + $0xb4] sm:$0xf]  ;;  %v3389_v58 = vrot.slane %v3340_v19, 5  ;;  %v3392_v31 = vrot.slane %v3341_v37, 5 }
 0x19a   : > { %3289 = vrot.lane.b32.xlu0 %v3178_v23, %s9647_s30  ;;  %v2393_v39 = vpop.permute.xlu2 %2392  ;;  %v3187_v29 = vrot.slane %v3186_v9, 4  ;;  %1015 = vst [vmem:[#allocation2 + $0xbc] sm:$0x1] %v1014_v51  ;;  %v3249_v53 = vrot.slane %v3247_v48, 5  ;;  %v1010_v49 = vsel %vm9776_vm12, %v832_v52, %v1009_v16  ;;  %v3396_v9 = vrot.slane %v10810_v4, 5 }
 0x19b   : > { %2439 = vst.msk [vmem:[#allocation4 + $0x8] sm:$0xf] %vm2436_vm15, %v2393_v39  ;;  %v3077_v30 = vld [vmem:[#allocation2 + $0xa8] sm:$0xf]  ;;  %v3390_v17 = vsel %vm9959_vm1, %v9323_v63, %v3389_v58  ;;  %v3346_v22 = vld [vmem:[#allocation2 + $0x7c] sm:$0xf] }
 0x19c   : > { %v2134_v15 = vpop.permute.xlu0 %2133  ;;  %v3192_v11 = vsel %vm9782_vm13, %v3187_v29, %v10748_v34  ;;  %v3228_v60 = vshrl.u32 %v3077_v30, 16  ;;  %v3231_v32 = vshll.u32 %v3077_v30, 16  ;;  %1011 = vst [vmem:[#allocation2 + $0xb4] sm:$0xf] %v1010_v49  ;;  %v3250_v24 = vsel %vm9782_vm13, %v3245_v43, %v3249_v53  ;;  %v3342_v53 = vld [vmem:[#allocation2 + $0x6c] sm:$0xe] }
 0x19d   : > { %2169 = vst.msk [vmem:[#allocation4 + $0x34] sm:$0xf] %vm13290_vm14, %v2134_v15  ;;  %v3081_v57 = vld [vmem:[#allocation2 + $0xb8] sm:$0xf]  ;;  %v3398_v48 = vrot.slane %v3396_v9, 4  ;;  %v3391_v30 = vrot.slane %v3389_v58, 4 }
 0x19e   : > { %3285 = vrot.lane.b32.xlu1 %v3154_v28, %s9647_s30  ;;  %v3076_v42 = vld [vmem:[#allocation2 + $0xa4] sm:$0x1]  ;;  %v3230_v62 = vrot.slane %v3228_v60, 4  ;;  %v3233_v34 = vrot.slane %v3231_v32, 5  ;;  %v3261_v50 = vshll.u32 %v3081_v57, 16  ;;  %v3265_v12 = vshrl.u32 %v3081_v57, 16 }
 0x19f   : > { %v3223_v38 = vshll.u32 %v3076_v42, 16  ;;  %v3348_v49 = vld [vmem:[#allocation2 + $0x84] sm:$0xe]  ;;  %v9324_v32 = vrot.slane %v3342_v53, 9  ;;  %v3353_v63 = vld [vmem:[#allocation2 + $0x98] sm:$0x1] }
 0x1a0   : > { %3287 = vrot.lane.b32.xlu2 %v3168_v13, %s9647_s30  ;;  %v2130_v7 = vpop.permute.xlu1 %2129  ;;  %v3234_v40 = vor.u32 %v3233_v34, %v3230_v62  ;;  %v3263_v0 = vrot.slane %v3261_v50, 5  ;;  %v3267_v54 = vrot.slane %v3265_v12, 4  ;;  %v9326_v42 = vrot.slane %v3348_v49, 9  ;;  %v10845_v34 = vld [vmem:[#allocation2 + $0x94] sm:$0xf] }
 0x1a1   : > { %2167 = vst.msk [vmem:[#allocation4 + $0x2c] sm:$0xf] %vm13290_vm14, %v2130_v7  ;;  %v3225_v21 = vrot.slane %v3223_v38, 5  ;;  %v3082_v20 = vld [vmem:[#allocation2 + $0xbc] sm:$0x1]  ;;  %v3393_v12 = vsel %vm9959_vm1, %v3391_v30, %v3392_v31 }
 0x1a2   : > { %3295 = vrot.lane.b32.xlu0 %v3216_v47, %s9647_s30  ;;  %v2399_v14 = vpop.permute.xlu2 %2398  ;;  %v3235_v27 = vrot.slane %v3234_v40, 4  ;;  %v3271_v13 = vshll.u32 %v3082_v20, 16  ;;  %v3268_v10 = vor.u32 %v3267_v54, %v3263_v0  ;;  %v3344_v47 = vld [vmem:[#allocation2 + $0x74] sm:$0x1]  ;;  %v413_v50 = vld [vmem:[#allocation3] sm:$0x1] }
 0x1a3   : > { %2442 = vst.msk [vmem:[#allocation4 + $0x14] sm:$0xf] %vm2436_vm15, %v2399_v14  ;;  %v3226_v46 = vsel %vm9782_vm13, %v3221_v45, %v3225_v21  ;;  %v3080_v28 = vld [vmem:[#allocation2 + $0xb4] sm:$0xf]  ;;  %v3399_v29 = vrot.slane %v3344_v47, 5  ;;  %v414_v45 = vsel %vm10849_vm3, 0, %v413_v50 }
 0x1a4   : > { %v2389_v23 = vpop.permute.xlu0 %2388  ;;  %v3240_v18 = vsel %vm9782_vm13, %v3235_v27, %v10761_v59  ;;  %v3252_v41 = vshrl.u32 %v3080_v28, 16  ;;  %v3255_v6 = vshll.u32 %v3080_v28, 16  ;;  %v3269_v8 = vrot.slane %v3268_v10, 4  ;;  %v1027_v14 = vld [vmem:[%s13281_s1 + $0x10] sm:$0x3]  ;;  %v9568_v21 = vld [vmem:[%s13281_s1 + $0x8] sm:$0xff] }
 0x1a5   : > { %2437 = vst.msk [vmem:[#allocation4] sm:$0xf] %vm2436_vm15, %v2389_v23  ;;  %v3273_v59 = vrot.slane %v3271_v13, 5  ;;  %v3400_v43 = vsel %vm9959_vm1, %v3398_v48, %v3399_v29  ;;  %v2690_v23 = vunpack.c.l.b16 %v1027_v14  ;;  %v3403_v40 = vrot.slane %v3346_v22, 5  ;;  %v3345_v20 = vld [vmem:[#allocation2 + $0x78] sm:$0xe] }
 0x1a6   : > { %3291 = vrot.lane.b32.xlu1 %v3192_v11, %s9647_s30  ;;  %v3254_v3 = vrot.slane %v3252_v41, 4  ;;  %v3257_v2 = vrot.slane %v3255_v6, 5  ;;  %v10837_v11 = vld [vmem:[#allocation2 + $0x88] sm:$0xf]  ;;  %415 = vst [vmem:[#allocation3] sm:$0x1] %v414_v45 }
 0x1a7   : > { %v3274_v7 = vsel %vm9782_vm13, %v3269_v8, %v3273_v59  ;;  %v3410_v38 = vrot.slane %v10837_v11, 5  ;;  %v3347_v54 = vld [vmem:[#allocation2 + $0x80] sm:$0x1]  ;;  %v9325_v58 = vrot.slane %v3345_v20, 9  ;;  %v3405_v4 = vrot.slane %v3403_v40, 4 }
 0x1a8   : > { %3293 = vrot.lane.b32.xlu2 %v3202_v25, %s9647_s30  ;;  %v2136_v26 = vpop.permute.xlu1 %2135  ;;  %v3258_v51 = vor.u32 %v3257_v2, %v3254_v3  ;;  %v2693_v25 = vpack.c.b16 %v2690_v23, %v2690_v23  ;;  %v9567_v27 = vld [vmem:[%s13281_s1] sm:$0xff]  ;;  %v3351_v3 = vld [vmem:[#allocation2 + $0x90] sm:$0xe]  ;;  %v3357_v2 = vld [vmem:[#allocation2 + $0xa8] sm:$0xe] }
 0x1a9   : > { %2170 = vst.msk [vmem:[#allocation4 + $0x38] sm:$0xf] %vm13290_vm14, %v2136_v26  ;;  %vm13292_vm14 = vcmask 1041408   ;;  %v3397_v26 = vsel %vm9959_vm1, %v9324_v32, %v3396_v9  ;;  %v3404_v41 = vsel %vm9959_vm1, %v9325_v58, %v3403_v40  ;;  %v3358_v47 = vld [vmem:[#allocation2 + $0xac] sm:$0xf]  ;;  %v3412_v8 = vrot.slane %v3410_v38, 4 }
 0x1aa   : > { %3301 = vrot.lane.b32.xlu0 %v3250_v24, %s9647_s30  ;;  %v2405_v39 = vpop.permute.xlu2 %2404  ;;  %v3259_v16 = vrot.slane %v3258_v51, 4  ;;  %v2723_v57 = vsel %vm13292_vm14, %v2693_v25, 0  ;;  %v3026_v51 = vld [vmem:[#allocation2 + $0x60] sm:$0xf]  ;;  %v9327_v48 = vrot.slane %v3351_v3, 9  ;;  %v9329_v29 = vrot.slane %v3357_v2, 9 }
 0x1ab   : > { %2445 = vst.msk [vmem:[#allocation4 + $0x20] sm:$0xf] %vm2436_vm15, %v2405_v39  ;;  %2730 = vmatpush.bf16.msra.mxu0 %v2723_v57  ;;  %9605 = vmatpush.bf16.msra.mxu1 %v2723_v57  ;;  %v3417_v39 = vrot.slane %v10845_v34, 5  ;;  %v3361_v14 = vld [vmem:[#allocation2 + $0xb8] sm:$0xf]  ;;  %vm2696_vm14 = vcmask 293888  }
 0x1ac   : > { %v2395_v15 = vpop.permute.xlu0 %2394  ;;  %v3264_v55 = vsel %vm9782_vm13, %v3259_v16, %v3263_v0  ;;  %v3411_v0 = vsel %vm9959_vm1, %v9326_v42, %v3410_v38  ;;  %3043 = vst.msk [vmem:[#allocation4 + $0x40] sm:$0xf] %vm280_vm0, %v3026_v51  ;;  %v3354_v23 = vld [vmem:[#allocation2 + $0x9c] sm:$0xe]  ;;  %v3356_v30 = vld [vmem:[#allocation2 + $0xa4] sm:$0x1] }
 0x1ad   : > { %2440 = vst.msk [vmem:[#allocation4 + $0xc] sm:$0xf] %vm2436_vm15, %v2395_v15  ;;  %v3419_v28 = vrot.slane %v3417_v39, 4  ;;  %v3418_v53 = vsel %vm9959_vm1, %v9327_v48, %v3417_v39  ;;  %v3438_v31 = vrot.slane %v3361_v14, 5  ;;  %v3362_v25 = vld [vmem:[#allocation2 + $0xbc] sm:$0x1] }
 0x1ae   : > { %3297 = vrot.lane.b32.xlu1 %v3226_v46, %s9647_s30  ;;  %v3406_v46 = vrot.slane %v3347_v54, 5  ;;  %v3029_v32 = vld [vmem:[#allocation2 + $0x70] sm:$0xf]  ;;  %v3427_v38 = vrot.slane %v3356_v30, 5  ;;  %v3360_v20 = vld [vmem:[#allocation2 + $0xb4] sm:$0xe] }
 0x1af   : > { %2731 = vmatpush.bf16.msra.mxu0 %v9568_v21  ;;  %9606 = vmatpush.bf16.msra.mxu1 %v9568_v21  ;;  %3046 = vst.msk [vmem:[#allocation4 + $0x4c] sm:$0xf] %vm280_vm0, %v3029_v32  ;;  %v3359_v45 = vld [vmem:[#allocation2 + $0xb0] sm:$0x1]  ;;  %v3032_v58 = vld [vmem:[#allocation2 + $0x84] sm:$0xf] }
 0x1b0   : > { %3299 = vrot.lane.b32.xlu2 %v3240_v18, %s9647_s30  ;;  %v2391_v35 = vpop.permute.xlu1 %2390  ;;  %v3420_v18 = vrot.slane %v3353_v63, 5  ;;  %v3407_v6 = vsel %vm9959_vm1, %v3405_v4, %v3406_v46  ;;  %v3434_v63 = vrot.slane %v3359_v45, 5  ;;  %v9330_v4 = vrot.slane %v3360_v20, 9  ;;  %3049 = vst.msk [vmem:[#allocation4 + $0x58] sm:$0xf] %vm280_vm0, %v3032_v58 }
 0x1b1   : > { %2438 = vst.msk [vmem:[#allocation4 + $0x4] sm:$0xf] %vm2436_vm15, %v2391_v35  ;;  %v4976_v35 = vld [vmem:[#allocation3 + $0x4] sm:$0xf]  ;;  %v3027_v3 = vld [vmem:[#allocation2 + $0x64] sm:$0xf] }
 0x1b2   : > { %3443 = vrot.lane.b32.xlu0 %v3390_v17, %s9648_s8  ;;  %v2411_v52 = vpop.permute.xlu2 %2410  ;;  %v3350_v17 = vld [vmem:[#allocation2 + $0x8c] sm:$0x1]  ;;  %v3421_v9 = vsel %vm9959_vm1, %v3419_v28, %v3420_v18  ;;  %3044 = vst.msk [vmem:[#allocation4 + $0x44] sm:$0xf] %vm280_vm0, %v3027_v3  ;;  %v3038_v30 = vld [vmem:[#allocation2 + $0xa8] sm:$0xf] }
 0x1b3   : > { %2448 = vst.msk [vmem:[#allocation4 + $0x2c] sm:$0xf] %vm2436_vm15, %v2411_v52  ;;  %2732 = vmatpush.bf16.msra.mxu0 %v9567_v27  ;;  %9607 = vmatpush.bf16.msra.mxu1 %v9567_v27  ;;  %v3413_v59 = vrot.slane %v3350_v17, 5  ;;  %v4975_v17 = vld [vmem:[#allocation3] sm:$0xf] }
 0x1b4   : > { %v2401_v36 = vpop.permute.xlu0 %2400  ;;  %3055 = vst.msk [vmem:[#allocation4 + $0x70] sm:$0xf] %vm280_vm0, %v3038_v30  ;;  %v3515_v20 = vld [vmem:[#allocation2 + $0x94] sm:$0xf]  ;;  %v3604_v58 = vld [vmem:[#allocation2 + $0x6c] sm:$0xf] }
 0x1b5   : > { %2443 = vst.msk [vmem:[#allocation4 + $0x18] sm:$0xf] %vm2436_vm15, %v2401_v36  ;;  %v3431_v36 = vrot.slane %v3358_v47, 5  ;;  %v3518_v3 = vld [vmem:[#allocation2 + $0xa8] sm:$0xf] }
 0x1b6   : > { %3303 = vrot.lane.b32.xlu1 %v3264_v55, %s9647_s30  ;;  %v3355_v55 = vld [vmem:[#allocation2 + $0xa0] sm:$0xf] }
 0x1b7   : > { %4682 = vmatpush.bf16.msrb.mxu1 %v2723_v57  ;;  %v3424_v49 = vrot.slane %v3355_v55, 5  ;;  %v3432_v11 = vsel %vm9959_vm1, %v9329_v29, %v3431_v36  ;;  %v3440_v57 = vrot.slane %v3438_v31, 4  ;;  %v3433_v39 = vrot.slane %v3431_v36, 4  ;;  %v3035_v36 = vld [vmem:[#allocation2 + $0x94] sm:$0xf] }
 0x1b8   : > { %3305 = vrot.lane.b32.xlu2 %v3274_v7, %s9647_s30  ;;  %v2397_v60 = vpop.permute.xlu1 %2396  ;;  %3052 = vst.msk [vmem:[#allocation4 + $0x64] sm:$0xf] %vm280_vm0, %v3035_v36  ;;  %v3607_v36 = vld [vmem:[#allocation2 + $0x78] sm:$0xf]  ;;  %s9658_s30 = smov 64  }
 0x1b9   : > { %2441 = vst.msk [vmem:[#allocation4 + $0x10] sm:$0xf] %vm2436_vm15, %v2397_v60  ;;  %v9328_v60 = vrot.slane %v3354_v23, 9  ;;  %v3435_v28 = vsel %vm9959_vm1, %v3433_v39, %v3434_v63  ;;  %v3606_v63 = vld [vmem:[#allocation2 + $0x74] sm:$0x1] }
 0x1ba   : > { %3449 = vrot.lane.b32.xlu0 %v3400_v43, %s9648_s8  ;;  %v2417_v24 = vpop.permute.xlu2 %2416  ;;  %v3414_v43 = vsel %vm9959_vm1, %v3412_v8, %v3413_v59 }
 0x1bb   : > { %2451 = vst.msk [vmem:[#allocation4 + $0x38] sm:$0xf] %vm2436_vm15, %v2417_v24  ;;  %4683 = vmatpush.bf16.msrb.mxu1 %v9568_v21  ;;  %v3426_v24 = vrot.slane %v3424_v49, 4  ;;  %v3425_v50 = vsel %vm9959_vm1, %v9328_v60, %v3424_v49  ;;  %v340_v21 = vld [vmem:[#allocation2 + $0xc0] sm:$0x1] }
 0x1bc   : > { %v2407_v62 = vpop.permute.xlu0 %2406  ;;  %v3511_v60 = vld [vmem:[#allocation2 + $0x7c] sm:$0xf] }
 0x1bd   : > { %2446 = vst.msk [vmem:[#allocation4 + $0x24] sm:$0xf] %vm2436_vm15, %v2407_v62  ;;  %v3441_v62 = vrot.slane %v3362_v25, 5  ;;  %v3028_v25 = vld [vmem:[#allocation2 + $0x6c] sm:$0xf] }
 0x1be   : > { %3445 = vrot.lane.b32.xlu1 %v3393_v12, %s9648_s8  ;;  %v3428_v12 = vsel %vm9959_vm1, %v3426_v24, %v3427_v38  ;;  %v3516_v24 = vld [vmem:[#allocation2 + $0x9c] sm:$0xf]  ;;  %3045 = vst.msk [vmem:[#allocation4 + $0x48] sm:$0xf] %vm280_vm0, %v3028_v25  ;;  %v3605_v38 = vld [vmem:[#allocation2 + $0x70] sm:$0xf] }
 0x1bf   : > { %4684 = vmatpush.bf16.msrb.mxu1 %v9567_v27  ;;  %v3442_v40 = vsel %vm9959_vm1, %v3440_v57, %v3441_v62  ;;  %v3638_v45 = vshll.u32 %v3605_v38, 16  ;;  %v3656_v25 = vshll.u32 %v3607_v36, 16 }
 0x1c0   : > { %3447 = vrot.lane.b32.xlu2 %v3397_v26, %s9648_s8  ;;  %v2403_v15 = vpop.permute.xlu1 %2402  ;;  %v552_v26 = vld [vmem:[%s9739_s29 + $0xf0] sm:$0xff] }
 0x1c1   : > { %2444 = vst.msk [vmem:[#allocation4 + $0x1c] sm:$0xf] %vm2436_vm15, %v2403_v15  ;;  %v584_v54 = vpack.c.bf16 %v552_v26, %v552_v26  ;;  %v3031_v26 = vld [vmem:[#allocation2 + $0x7c] sm:$0xf] }
 0x1c2   : > { %3455 = vrot.lane.b32.xlu0 %v3411_v0, %s9648_s8  ;;  %v2560_v13 = vpop.permute.xlu2 %2559  ;;  %v341_v0 = vsel %vm9712_vm4, 0, %v340_v21  ;;  %v3642_v21 = vshrl.u32 %v3605_v38, 16  ;;  %3048 = vst.msk [vmem:[#allocation4 + $0x54] sm:$0xf] %vm280_vm0, %v3031_v26 }
 0x1c3   : > { %2607 = vst.msk [vmem:[#allocation4 + $0x4] sm:$0xf] %vm2605_vm2, %v2560_v13  ;;  %v844_v27 = vshrl.u32 %v584_v54, 16 }
 0x1c4   : > { %v2413_v10 = vpop.permute.xlu0 %2412  ;;  %342 = vst [vmem:[#allocation2 + $0xc0] sm:$0x1] %v341_v0  ;;  %v3519_v0 = vld [vmem:[#allocation2 + $0xac] sm:$0xf]  ;;  %v3644_v39 = vrot.slane %v3642_v21, 4 }
 0x1c5   : > { %2449 = vst.msk [vmem:[#allocation4 + $0x30] sm:$0xf] %vm2436_vm15, %v2413_v10  ;;  %v846_v18 = vrot.slane %v844_v27, 7  ;;  %v847_v10 = vshll.u32 %v584_v54, 16  ;;  %v10964_v54 = vrot.slane %v3638_v45, 5  ;;  %v3658_v45 = vrot.slane %v3656_v25, 5 }
 0x1c6   : > { %3451 = vrot.lane.b32.xlu1 %v3404_v41, %s9648_s8  ;;  %v3439_v41 = vsel %vm9959_vm1, %v9330_v4, %v3438_v31  ;;  %v3036_v27 = vld [vmem:[#allocation2 + $0x9c] sm:$0xf]  ;;  %v3609_v21 = vld [vmem:[#allocation2 + $0x80] sm:$0x1] }
 0x1c7   : > { %v849_v2 = vor.u32 %v847_v10, %v846_v18  ;;  %v850_v49 = vrot.slane %v846_v18, 4  ;;  %3053 = vst.msk [vmem:[#allocation4 + $0x68] sm:$0xf] %vm280_vm0, %v3036_v27  ;;  %v3645_v10 = vor.u32 %v3644_v39, %v10964_v54 }
 0x1c8   : > { %3453 = vrot.lane.b32.xlu2 %v3407_v6, %s9648_s8  ;;  %v2409_v52 = vpop.permute.xlu1 %2408  ;;  %v3510_v6 = vld [vmem:[#allocation2 + $0x78] sm:$0xf] }
 0x1c9   : > { %2447 = vst.msk [vmem:[#allocation4 + $0x28] sm:$0xf] %vm2436_vm15, %v2409_v52 }
 0x1ca   : > { %3461 = vrot.lane.b32.xlu0 %v3421_v9, %s9648_s8  ;;  %v10885_v16 = vld [vmem:[#allocation4] sm:$0xf0]  ;;  %v2566_v7 = vpop.permute.xlu2 %2565  ;;  %v553_v9 = vld [vmem:[%s9739_s29 + $0xf8] sm:$0xff]  ;;  %s9657_s29 = smov 56  }
 0x1cb   : > { %4992 = vst.msk [vmem:[#allocation4 + $0x4] sm:$0xf] %vm402_vm5, %v4976_v35  ;;  %v585_v47 = vpack.c.bf16 %v553_v9, %v553_v9  ;;  %v1016_v59 = vld [vmem:[#allocation2 + $0xc0] sm:$0xf] }
 0x1cc   : > { %v2419_v37 = vpop.permute.xlu0 %2418  ;;  %2610 = vst.msk [vmem:[#allocation4 + $0x10] sm:$0xf] %vm2605_vm2, %v2566_v7  ;;  %v3508_v7 = vld [vmem:[#allocation2 + $0x6c] sm:$0xf]  ;;  %v1017_v55 = vsel %vm9776_vm12, %v849_v2, %v1016_v59  ;;  %v3517_v9 = vld [vmem:[#allocation2 + $0xa0] sm:$0xf] }
 0x1cd   : > { %2452 = vst.msk [vmem:[#allocation4 + $0x3c] sm:$0xf] %vm2436_vm15, %v2419_v37  ;;  %v852_v48 = vshrl.u32 %v585_v47, 16  ;;  %v855_v14 = vshll.u32 %v585_v47, 16 }
 0x1ce   : > { %3457 = vrot.lane.b32.xlu1 %v3414_v43, %s9648_s8  ;;  %v3509_v43 = vld [vmem:[#allocation2 + $0x70] sm:$0xf]  ;;  %1018 = vst [vmem:[#allocation2 + $0xc0] sm:$0xf] %v1017_v55 }
 0x1cf   : > { %v10936_v37 = vrot.slane %v852_v48, 7 }
 0x1d0   : > { %3459 = vrot.lane.b32.xlu2 %v3418_v53, %s9648_s8  ;;  %v2415_v42 = vpop.permute.xlu1 %2414  ;;  %v3030_v53 = vld [vmem:[#allocation2 + $0x78] sm:$0xf] }
 0x1d1   : > { %2450 = vst.msk [vmem:[#allocation4 + $0x34] sm:$0xf] %vm2436_vm15, %v2415_v42  ;;  %v857_v23 = vor.u32 %v855_v14, %v10936_v37  ;;  %v3512_v42 = vld [vmem:[#allocation2 + $0x84] sm:$0xf]  ;;  %v10978_v14 = vld [vmem:[#allocation2 + $0x88] sm:$0xf] }
 0x1d2   : > { %3467 = vrot.lane.b32.xlu0 %v3432_v11, %s9648_s8  ;;  %v2572_v22 = vpop.permute.xlu2 %2571  ;;  %3047 = vst.msk [vmem:[#allocation4 + $0x50] sm:$0xf] %vm280_vm0, %v3030_v53  ;;  %v3686_v38 = vshll.u32 %v10978_v14, 16 }
 0x1d3   : > { %2613 = vst.msk [vmem:[#allocation4 + $0x1c] sm:$0xf] %vm2605_vm2, %v2572_v22  ;;  %v858_v32 = vsel %vm9764_vm11, %v850_v49, %v857_v23  ;;  %v3033_v22 = vld [vmem:[#allocation2 + $0x88] sm:$0xf]  ;;  %v3614_v49 = vld [vmem:[#allocation2 + $0x94] sm:$0xf] }
 0x1d4   : > { %v2562_v34 = vpop.permute.xlu0 %2561  ;;  %1019 = vst.msk [vmem:[#allocation2 + $0xc4] sm:$0xf] %vm280_vm0, %v858_v32  ;;  %v3037_v23 = vld [vmem:[#allocation2 + $0xa0] sm:$0xf] }
 0x1d5   : > { %2608 = vst.msk [vmem:[#allocation4 + $0x8] sm:$0xf] %vm2605_vm2, %v2562_v34 }
 0x1d6   : > { %3463 = vrot.lane.b32.xlu1 %v3425_v50, %s9648_s8  ;;  %3050 = vst.msk [vmem:[#allocation4 + $0x5c] sm:$0xf] %vm280_vm0, %v3033_v22  ;;  %v3041_v50 = vld [vmem:[#allocation2 + $0xb8] sm:$0xf]  ;;  %v3710_v22 = vshll.u32 %v3614_v49, 16 }
 0x1d7   : > { %3058 = vst.msk [vmem:[#allocation4 + $0x7c] sm:$0xf] %vm280_vm0, %v3041_v50 }
 0x1d8   : > { %3465 = vrot.lane.b32.xlu2 %v3428_v12, %s9648_s8  ;;  %v2558_v15 = vpop.permute.xlu1 %2557  ;;  %3054 = vst.msk [vmem:[#allocation4 + $0x6c] sm:$0xf] %vm280_vm0, %v3037_v23 }
 0x1d9   : > { %2606 = vst.msk [vmem:[#allocation4] sm:$0xf] %vm2605_vm2, %v2558_v15 }
 0x1da   : > { %3473 = vrot.lane.b32.xlu0 %v3442_v40, %s9648_s8  ;;  %v2578_v46 = vpop.permute.xlu2 %2577  ;;  %v3514_v40 = vld [vmem:[#allocation2 + $0x90] sm:$0xf] }
 0x1db   : > { %2616 = vst.msk [vmem:[#allocation4 + $0x28] sm:$0xf] %vm2605_vm2, %v2578_v46 }
 0x1dc   : > { %v2568_v13 = vpop.permute.xlu0 %2567 }
 0x1dd   : > { %2611 = vst.msk [vmem:[#allocation4 + $0x14] sm:$0xf] %vm2605_vm2, %v2568_v13  ;;  %v3610_v13 = vld [vmem:[#allocation2 + $0x84] sm:$0xf] }
 0x1de   : > { %3469 = vrot.lane.b32.xlu1 %v3435_v28, %s9648_s8  ;;  %v3034_v28 = vld [vmem:[#allocation2 + $0x90] sm:$0xf]  ;;  %v3677_v2 = vshrl.u32 %v3610_v13, 16  ;;  %v3680_v47 = vshll.u32 %v3610_v13, 16  ;;  %v3040_v13 = vld [vmem:[#allocation2 + $0xb4] sm:$0xf] }
 0x1df   : > { %3051 = vst.msk [vmem:[#allocation4 + $0x60] sm:$0xf] %vm280_vm0, %v3034_v28 }
 0x1e0   : > { %3471 = vrot.lane.b32.xlu2 %v3439_v41, %s9648_s8  ;;  %v9277_v35 = vld [vmem:[#allocation4] sm:$0xf]  ;;  %v2564_v8 = vpop.permute.xlu1 %2563  ;;  %v3648_v41 = vshll.u32 %v3606_v63, 16  ;;  %v10994_v63 = vrot.slane %v3686_v38, 5  ;;  %3057 = vst.msk [vmem:[#allocation4 + $0x78] sm:$0xf] %vm280_vm0, %v3040_v13 }
 0x1e1   : > { %4991 = vst.msk [vmem:[#allocation4] sm:$0xf] %vm402_vm5, %v4975_v17  ;;  %v9278_v52 = vor.u32 %v10885_v16, %v9277_v35  ;;  %v3513_v16 = vld [vmem:[#allocation2 + $0x88] sm:$0xf]  ;;  %v3632_v17 = vshll.u32 %v3604_v58, 16 }
 0x1e2   : > { %3544 = vrot.lane.b32.xlu0 %v3510_v6, %s9649_s9  ;;  %v2584_v51 = vpop.permute.xlu2 %2583  ;;  %2609 = vst.msk [vmem:[#allocation4 + $0xc] sm:$0xf] %vm2605_vm2, %v2564_v8  ;;  %v3629_v6 = vshrl.u32 %v3604_v58, 16  ;;  %v3522_v35 = vld [vmem:[#allocation2 + $0xc0] sm:$0xf]  ;;  %v3646_v8 = vrot.slane %v3645_v10, 4 }
 0x1e3   : > { %2619 = vst.msk [vmem:[#allocation4 + $0x34] sm:$0xf] %vm2605_vm2, %v2584_v51  ;;  %9315 = vmatmul.msk.bf16.vlgmr.msra.gmra.mxu0 %vm2696_vm14, %v9278_v52  ;;  %v3650_v59 = vrot.slane %v3648_v41, 5  ;;  %v3634_v52 = vrot.slane %v3632_v17, 5  ;;  %v10996_v58 = vrot.slane %v3710_v22, 5 }
 0x1e4   : > { %v2574_v29 = vpop.permute.xlu0 %2573  ;;  %v3631_v51 = vrot.slane %v3629_v6, 4  ;;  %v9575_v48 = vld [vmem:[#allocation4 + $0x10] sm:$0xff]  ;;  %v3615_v41 = vld [vmem:[#allocation2 + $0x98] sm:$0x1] }
 0x1e5   : > { %2614 = vst.msk [vmem:[#allocation4 + $0x20] sm:$0xf] %vm2605_vm2, %v2574_v29  ;;  %v3608_v29 = vld [vmem:[#allocation2 + $0x7c] sm:$0xf]  ;;  %v3623_v22 = vld [vmem:[#allocation2 + $0xb8] sm:$0xf] }
 0x1e6   : > { %3540 = vrot.lane.b32.xlu1 %v3508_v7, %s9649_s9  ;;  %v3039_v7 = vld [vmem:[#allocation2 + $0xac] sm:$0xf]  ;;  %v3635_v30 = vor.u32 %v3634_v52, %v3631_v51  ;;  %v3662_v32 = vshll.u32 %v3608_v29, 16 }
 0x1e7   : > { %3056 = vst.msk [vmem:[#allocation4 + $0x74] sm:$0xf] %vm280_vm0, %v3039_v7  ;;  %vm13307_vm0 = vsmask.f32 7938 }
 0x1e8   : > { %3542 = vrot.lane.b32.xlu2 %v3509_v43, %s9649_s9  ;;  %v2570_v56 = vpop.permute.xlu1 %2569  ;;  %v3679_v43 = vrot.slane %v3677_v2, 4  ;;  %v3636_v50 = vrot.slane %v3635_v30, 4  ;;  %v10991_v26 = vrot.slane %v3662_v32, 5  ;;  %v3617_v30 = vld [vmem:[#allocation2 + $0xa0] sm:$0xf]  ;;  %vm11124_vm12 = vmand %vm405_vm6, %vm13307_vm0 }
 0x1e9   : > { %2612 = vst.msk [vmem:[#allocation4 + $0x18] sm:$0xf] %vm2605_vm2, %v2570_v56  ;;  %v9574_v34 = vld [vmem:[#allocation4 + $0x8] sm:$0xff] }
 0x1ea   : > { %3550 = vrot.lane.b32.xlu0 %v3513_v16, %s9649_s9  ;;  %v3276_v11 = vpop.permute.xlu2 %3275  ;;  %v3682_v16 = vrot.slane %v3680_v47, 5  ;;  %v3521_v56 = vld [vmem:[#allocation2 + $0xb8] sm:$0xf]  ;;  %v3641_v17 = vsel %vm9782_vm13, %v3636_v50, %v10964_v54  ;;  %v3720_v54 = vshll.u32 %v3615_v41, 16  ;;  %v3738_v50 = vshrl.u32 %v3617_v30, 16 }
 0x1eb   : > { %3323 = vst.msk [vmem:[#allocation4 + $0x40] sm:$0xf] %vm1338_vm7, %v3276_v11 }
 0x1ec   : > { %v2580_v31 = vpop.permute.xlu0 %2579  ;;  %v3722_v25 = vrot.slane %v3720_v54, 5 }
 0x1ed   : > { %2617 = vst.msk [vmem:[#allocation4 + $0x2c] sm:$0xf] %vm2605_vm2, %v2580_v31  ;;  %v3653_v31 = vshrl.u32 %v3607_v36, 16 }
 0x1ee   : > { %3546 = vrot.lane.b32.xlu1 %v3511_v60, %s9649_s9  ;;  %v3520_v60 = vld [vmem:[#allocation2 + $0xb4] sm:$0xf] }
 0x1f0   : > { %3548 = vrot.lane.b32.xlu2 %v3512_v42, %s9649_s9  ;;  %v2576_v57 = vpop.permute.xlu1 %2575  ;;  %v3666_v42 = vshrl.u32 %v3608_v29, 16  ;;  %v9576_v7 = vld [vmem:[#allocation4 + $0x18] sm:$0xff] }
 0x1f1   : > { %2615 = vst.msk [vmem:[#allocation4 + $0x24] sm:$0xf] %vm2605_vm2, %v2576_v57  ;;  %v3714_v57 = vshrl.u32 %v3614_v49, 16 }
 0x1f2   : > { %3556 = vrot.lane.b32.xlu0 %v3516_v24, %s9649_s9  ;;  %v3282_v62 = vpop.permute.xlu2 %3281  ;;  %v3683_v24 = vor.u32 %v3682_v16, %v3679_v43  ;;  %v3616_v16 = vld [vmem:[#allocation2 + $0x9c] sm:$0xf] }
 0x1f3   : > { %3326 = vst.msk [vmem:[#allocation4 + $0x4c] sm:$0xf] %vm1338_vm7, %v3282_v62  ;;  %9316 = vmatmul.msk.bf16.gmra.mxu0 %vm2696_vm14, %v9574_v34  ;;  %v3651_v62 = vsel %vm9782_vm13, %v3646_v8, %v3650_v59  ;;  %v3716_v27 = vrot.slane %v3714_v57, 4  ;;  %v3728_v38 = vshll.u32 %v3616_v16, 16 }
 0x1f4   : > { %v2586_v12 = vpop.permute.xlu0 %2585  ;;  %v9578_v34 = vld [vmem:[#allocation4 + $0x28] sm:$0xff]  ;;  %v3684_v39 = vrot.slane %v3683_v24, 4  ;;  %v3725_v24 = vshrl.u32 %v3616_v16, 16 }
 0x1f5   : > { %2620 = vst.msk [vmem:[#allocation4 + $0x38] sm:$0xf] %vm2605_vm2, %v2586_v12  ;;  %v3655_v12 = vrot.slane %v3653_v31, 4  ;;  %v3717_v52 = vor.u32 %v3716_v27, %v10996_v58 }
 0x1f6   : > { %3552 = vrot.lane.b32.xlu1 %v3514_v40, %s9649_s9  ;;  %v3668_v40 = vrot.slane %v3666_v42, 4  ;;  %v3689_v51 = vsel %vm9782_vm13, %v3684_v39, %v10994_v63  ;;  %v3786_v39 = vshrl.u32 %v3623_v22, 16 }
 0x1f7   : > { %v3659_v10 = vor.u32 %v3658_v45, %v3655_v12  ;;  %v3718_v31 = vrot.slane %v3717_v52, 4 }
 0x1f8   : > { %3554 = vrot.lane.b32.xlu2 %v3515_v20, %s9649_s9  ;;  %v2582_v15 = vpop.permute.xlu1 %2581  ;;  %v9577_v4 = vld [vmem:[#allocation4 + $0x20] sm:$0xff]  ;;  %v396_v20 = vld [vmem:[#allocation2 + $0xc8] sm:$0x1]  ;;  %v3669_v2 = vor.u32 %v3668_v40, %v10991_v26 }
 0x1f9   : > { %2618 = vst.msk [vmem:[#allocation4 + $0x30] sm:$0xf] %vm2605_vm2, %v2582_v15  ;;  %9319 = vmatmul.msk.bf16.vlgmr.msra.gmra.mxu1 %vm2696_vm14, %v9577_v4  ;;  %v3613_v15 = vld [vmem:[#allocation2 + $0x90] sm:$0xf]  ;;  %v397_v6 = vsel %vm9723_vm8, 0, %v396_v20  ;;  %v3660_v36 = vrot.slane %v3659_v10, 4  ;;  %v3723_v20 = vsel %vm9782_vm13, %v3718_v31, %v3722_v25 }
 0x1fa   : > { %3562 = vrot.lane.b32.xlu0 %v3519_v0, %s9649_s9  ;;  %v3288_v46 = vpop.permute.xlu2 %3287  ;;  %v3701_v47 = vshrl.u32 %v3613_v15, 16  ;;  %398 = vst [vmem:[#allocation2 + $0xc8] sm:$0x1] %v397_v6  ;;  %v3625_v31 = vld [vmem:[#allocation2 + $0xc0] sm:$0xf] }
 0x1fb   : > { %3329 = vst.msk [vmem:[#allocation4 + $0x58] sm:$0xf] %vm1338_vm7, %v3288_v46  ;;  %v3619_v46 = vld [vmem:[#allocation2 + $0xa8] sm:$0xf]  ;;  %v3665_v42 = vsel %vm9782_vm13, %v3660_v36, %v10991_v26 }
 0x1fc   : > { %v3278_v18 = vpop.permute.xlu0 %3277  ;;  %v3749_v8 = vshrl.u32 %v3619_v46, 16  ;;  %v3752_v59 = vshll.u32 %v3619_v46, 16  ;;  %v3703_v49 = vrot.slane %v3701_v47, 4  ;;  %v3788_v47 = vrot.slane %v3786_v39, 4 }
 0x1fd   : > { %3324 = vst.msk [vmem:[#allocation4 + $0x44] sm:$0xf] %vm1338_vm7, %v3278_v18  ;;  %v3672_v18 = vshll.u32 %v3609_v21, 16 }
 0x1fe   : > { %3558 = vrot.lane.b32.xlu1 %v3517_v9, %s9649_s9  ;;  %v3523_v9 = vld [vmem:[#allocation2 + $0xc4] sm:$0xf] }
 0x1ff   : > { %v3674_v29 = vrot.slane %v3672_v18, 5 }
 0x200   : > { %3560 = vrot.lane.b32.xlu2 %v3518_v3, %s9649_s9  ;;  %v2588_v55 = vpop.permute.xlu1 %2587  ;;  %v3690_v3 = vshrl.u32 %v10978_v14, 16  ;;  %v3612_v14 = vld [vmem:[#allocation2 + $0x8c] sm:$0x1]  ;;  %v9579_v10 = vld [vmem:[#allocation4 + $0x30] sm:$0xff] }
 0x201   : > { %2621 = vst.msk [vmem:[#allocation4 + $0x3c] sm:$0xf] %vm2605_vm2, %v2588_v55  ;;  %v3670_v55 = vrot.slane %v3669_v2, 4  ;;  %v1020_v26 = vld [vmem:[#allocation2 + $0xc8] sm:$0x1] }
 0x202   : > { %3568 = vrot.lane.b32.xlu0 %v3522_v35, %s9649_s9  ;;  %v3294_v53 = vpop.permute.xlu2 %3293  ;;  %v3704_v35 = vshll.u32 %v3613_v15, 16  ;;  %v3692_v43 = vrot.slane %v3690_v3, 4  ;;  %v3730_v15 = vrot.slane %v3728_v38, 5 }
 0x203   : > { %3332 = vst.msk [vmem:[#allocation4 + $0x64] sm:$0xf] %vm1338_vm7, %v3294_v53  ;;  %9317 = vmatmul.msk.bf16.gmra.mxu0 %vm2696_vm14, %v9575_v48  ;;  %v859_v48 = vrot.slane %v10936_v37, 4  ;;  %v3675_v12 = vsel %vm9782_vm13, %v3670_v55, %v3674_v29 }
 0x204   : > { %v3284_v11 = vpop.permute.xlu0 %3283  ;;  %v3706_v23 = vrot.slane %v3704_v35, 5  ;;  %v3693_v57 = vor.u32 %v3692_v43, %v10994_v63  ;;  %v3727_v63 = vrot.slane %v3725_v24, 4  ;;  %v3622_v35 = vld [vmem:[#allocation2 + $0xb4] sm:$0xf] }
 0x205   : > { %3327 = vst.msk [vmem:[#allocation4 + $0x50] sm:$0xf] %vm1338_vm7, %v3284_v11  ;;  %v3754_v11 = vrot.slane %v3752_v59, 5  ;;  %v1021_v27 = vsel %vm9712_vm4, %v859_v48, %v1020_v26  ;;  %v3776_v55 = vshll.u32 %v3622_v35, 16  ;;  %v3884_v26 = vld [vmem:[#allocation2 + $0x6c] sm:$0xe] }
 0x206   : > { %3564 = vrot.lane.b32.xlu1 %v3520_v60, %s9649_s9  ;;  %v11019_v60 = vld [vmem:[#allocation2 + $0xac] sm:$0xf]  ;;  %v3707_v45 = vor.u32 %v3706_v23, %v3703_v49  ;;  %1022 = vst [vmem:[#allocation2 + $0xc8] sm:$0x1] %v1021_v27  ;;  %v3731_v59 = vor.u32 %v3730_v15, %v3727_v63 }
 0x207   : > { %v3758_v40 = vshll.u32 %v11019_v60, 16  ;;  %v3762_v54 = vshrl.u32 %v11019_v60, 16 }
 0x208   : > { %3566 = vrot.lane.b32.xlu2 %v3521_v56, %s9649_s9  ;;  %v3280_v0 = vpop.permute.xlu1 %3279  ;;  %v3751_v56 = vrot.slane %v3749_v8, 4  ;;  %v3708_v41 = vrot.slane %v3707_v45, 4 }
 0x209   : > { %3325 = vst.msk [vmem:[#allocation4 + $0x48] sm:$0xf] %vm1338_vm7, %v3280_v0  ;;  %9320 = vmatmul.msk.bf16.gmra.mxu1 %vm2696_vm14, %v9578_v34  ;;  %v3734_v34 = vshll.u32 %v3617_v30, 16  ;;  %v3782_v0 = vshll.u32 %v3623_v22, 16  ;;  %v3778_v30 = vrot.slane %v3776_v55, 5 }
 0x20a   : > { %3822 = vrot.lane.b32.xlu0 %v3651_v62, %s9650_s10  ;;  %v3300_v4 = vpop.permute.xlu2 %3299  ;;  %v3696_v62 = vshll.u32 %v3612_v14, 16  ;;  %v3755_v21 = vor.u32 %v3754_v11, %v3751_v56  ;;  %v3713_v36 = vsel %vm9782_vm13, %v3708_v41, %v10996_v58  ;;  %v3764_v56 = vrot.slane %v3762_v54, 4  ;;  %v3889_v54 = vld [vmem:[#allocation2 + $0x80] sm:$0x1] }
 0x20b   : > { %3335 = vst.msk [vmem:[#allocation4 + $0x70] sm:$0xf] %vm1338_vm7, %v3300_v4  ;;  %v3694_v4 = vrot.slane %v3693_v57, 4  ;;  %v3736_v13 = vrot.slane %v3734_v34, 5  ;;  %v11039_v2 = vrot.slane %v3782_v0, 5  ;;  %v3800_v34 = vshll.u32 %v3625_v31, 16 }
 0x20c   : > { %v3290_v28 = vpop.permute.xlu0 %3289  ;;  %v3698_v46 = vrot.slane %v3696_v62, 5  ;;  %v3756_v6 = vrot.slane %v3755_v21, 4  ;;  %v3797_v62 = vshrl.u32 %v3625_v31, 16 }
 0x20d   : > { %3330 = vst.msk [vmem:[#allocation4 + $0x5c] sm:$0xf] %vm1338_vm7, %v3290_v28  ;;  %v3740_v28 = vrot.slane %v3738_v50, 4  ;;  %v3789_v43 = vor.u32 %v3788_v47, %v11039_v2  ;;  %v3802_v63 = vrot.slane %v3800_v34, 5 }
 0x20e   : > { %3570 = vrot.lane.b32.xlu1 %v3523_v9, %s9649_s9  ;;  %v3618_v9 = vld [vmem:[#allocation2 + $0xa4] sm:$0x1]  ;;  %v3699_v52 = vsel %vm9782_vm13, %v3694_v4, %v3698_v46  ;;  %v3799_v27 = vrot.slane %v3797_v62, 4  ;;  %v9580_v4 = vld [vmem:[#allocation4 + $0x38] sm:$0xff] }
 0x20f   : > { %v3741_v48 = vor.u32 %v3740_v28, %v3736_v13  ;;  %v3744_v29 = vshll.u32 %v3618_v9, 16  ;;  %v3790_v60 = vrot.slane %v3789_v43, 4  ;;  %v3888_v9 = vld [vmem:[#allocation2 + $0x7c] sm:$0xf] }
 0x210   : > { %3820 = vrot.lane.b32.xlu2 %v3641_v17, %s9650_s10  ;;  %v3286_v53 = vpop.permute.xlu1 %3285  ;;  %v3760_v17 = vrot.slane %v3758_v40, 5  ;;  %v3803_v47 = vor.u32 %v3802_v63, %v3799_v27 }
 0x211   : > { %3328 = vst.msk [vmem:[#allocation4 + $0x54] sm:$0xf] %vm1338_vm7, %v3286_v53  ;;  %v3732_v53 = vrot.slane %v3731_v59, 4  ;;  %v3742_v49 = vrot.slane %v3741_v48, 4  ;;  %v3746_v23 = vrot.slane %v3744_v29, 5 }
 0x212   : > { %3828 = vrot.lane.b32.xlu0 %v3689_v51, %s9650_s10  ;;  %v3306_v37 = vpop.permute.xlu2 %3305  ;;  %v3624_v51 = vld [vmem:[#allocation2 + $0xbc] sm:$0x1]  ;;  %v3761_v14 = vsel %vm9782_vm13, %v3756_v6, %v3760_v17  ;;  %v3765_v22 = vor.u32 %v3764_v56, %v3760_v17  ;;  %v3627_v6 = vld [vmem:[#allocation2 + $0xc8] sm:$0x1]  ;;  %v3804_v48 = vrot.slane %v3803_v47, 4 }
 0x213   : > { %3338 = vst.msk [vmem:[#allocation4 + $0x7c] sm:$0xf] %vm1338_vm7, %v3306_v37  ;;  %9318 = vmatmul.msk.bf16.gmra.mxu0 %vm2696_vm14, %v9576_v7  ;;  %v3773_v7 = vshrl.u32 %v3622_v35, 16  ;;  %v3792_v16 = vshll.u32 %v3624_v51, 16  ;;  %v3621_v37 = vld [vmem:[#allocation2 + $0xb0] sm:$0x1]  ;;  %v3737_v38 = vsel %vm9782_vm13, %v3732_v53, %v3736_v13  ;;  %v3747_v50 = vsel %vm9782_vm13, %v3742_v49, %v3746_v23 }
 0x214   : > { %v3296_v32 = vpop.permute.xlu0 %3295  ;;  %v3768_v57 = vshll.u32 %v3621_v37, 16  ;;  %v3766_v0 = vrot.slane %v3765_v22, 4  ;;  %v3816_v59 = vshll.u32 %v3627_v6, 16  ;;  %v3886_v49 = vld [vmem:[#allocation2 + $0x74] sm:$0x1] }
 0x215   : > { %3333 = vst.msk [vmem:[#allocation4 + $0x68] sm:$0xf] %vm1338_vm7, %v3296_v32  ;;  %v3775_v58 = vrot.slane %v3773_v7, 4  ;;  %v3794_v32 = vrot.slane %v3792_v16, 5  ;;  %v3887_v56 = vld [vmem:[#allocation2 + $0x78] sm:$0xe] }
 0x216   : > { %3824 = vrot.lane.b32.xlu1 %v3665_v42, %s9650_s10  ;;  %v3626_v42 = vld [vmem:[#allocation2 + $0xc4] sm:$0xf]  ;;  %v3770_v39 = vrot.slane %v3768_v57, 5  ;;  %v3818_v7 = vrot.slane %v3816_v59, 5  ;;  %v3937_v37 = vrot.slane %v3886_v49, 5 }
 0x217   : > { %v3806_v45 = vshll.u32 %v3626_v42, 16  ;;  %v3810_v21 = vshrl.u32 %v3626_v42, 16  ;;  %v3795_v40 = vsel %vm9782_vm13, %v3790_v60, %v3794_v32  ;;  %v3897_v22 = vld [vmem:[#allocation2 + $0xa0] sm:$0xf]  ;;  %v3896_v6 = vld [vmem:[#allocation2 + $0x9c] sm:$0xe] }
 0x218   : > { %3826 = vrot.lane.b32.xlu2 %v3675_v12, %s9650_s10  ;;  %v3292_v18 = vpop.permute.xlu1 %3291  ;;  %v3779_v12 = vor.u32 %v3778_v30, %v3775_v58  ;;  %v3894_v58 = vld [vmem:[#allocation2 + $0x94] sm:$0xf]  ;;  %v471_v49 = vld [vmem:[#allocation3 + $0x14] sm:$0x1] }
 0x219   : > { %3331 = vst.msk [vmem:[#allocation4 + $0x60] sm:$0xf] %vm1338_vm7, %v3292_v18  ;;  %9321 = vmatmul.msk.bf16.gmra.mxu1 %vm2696_vm14, %v9579_v10  ;;  %v3808_v13 = vrot.slane %v3806_v45, 5  ;;  %v3812_v28 = vrot.slane %v3810_v21, 4  ;;  %v9331_v10 = vrot.slane %v3884_v26, 9  ;;  %v3955_v42 = vrot.slane %v3894_v58, 5 }
 0x21a   : > { %3834 = vrot.lane.b32.xlu0 %v3723_v20, %s9650_s10  ;;  %v3448_v3 = vpop.permute.xlu2 %3447  ;;  %v3885_v20 = vld [vmem:[#allocation2 + $0x70] sm:$0xf]  ;;  %v3780_v46 = vrot.slane %v3779_v12, 4  ;;  %v3892_v45 = vld [vmem:[#allocation2 + $0x8c] sm:$0x1]  ;;  %v3962_v21 = vrot.slane %v3897_v22, 5 }
 0x21b   : > { %3493 = vst.msk [vmem:[#allocation4 + $0x48] sm:$0xf] %vm1510_vm9, %v3448_v3  ;;  %v3934_v41 = vrot.slane %v3885_v20, 5  ;;  %v3771_v3 = vsel %vm9782_vm13, %v3766_v0, %v3770_v39  ;;  %v3809_v16 = vsel %vm9782_vm13, %v3804_v48, %v3808_v13  ;;  %v3951_v39 = vrot.slane %v3892_v45, 5 }
 0x21c   : > { %v3302_v8 = vpop.permute.xlu0 %3301  ;;  %v3785_v35 = vsel %vm9782_vm13, %v3780_v46, %v11039_v2  ;;  %v3964_v63 = vrot.slane %v3962_v21, 4  ;;  %v416_v46 = vld [vmem:[#allocation3 + $0xc] sm:$0x1] }
 0x21d   : > { %3336 = vst.msk [vmem:[#allocation4 + $0x74] sm:$0xf] %vm1338_vm7, %v3302_v8  ;;  %v3813_v8 = vor.u32 %v3812_v28, %v3808_v13  ;;  %v3935_v51 = vsel %vm9959_vm1, %v9331_v10, %v3934_v41  ;;  %v3936_v30 = vrot.slane %v3934_v41, 4  ;;  %v417_v28 = vsel %vm10849_vm3, 0, %v416_v46  ;;  %v3895_v10 = vld [vmem:[#allocation2 + $0x98] sm:$0x1] }
 0x21e   : > { %3830 = vrot.lane.b32.xlu1 %v3699_v52, %s9650_s10  ;;  %v3941_v52 = vrot.slane %v3888_v9, 5  ;;  %418 = vst [vmem:[#allocation3 + $0xc] sm:$0x1] %v417_v28  ;;  %v3903_v9 = vld [vmem:[#allocation2 + $0xb8] sm:$0xf]  ;;  %v3958_v47 = vrot.slane %v3895_v10, 5 }
 0x21f   : > { %v3938_v57 = vsel %vm9959_vm1, %v3936_v30, %v3937_v37  ;;  %v474_v46 = vld [vmem:[#allocation3 + $0x20] sm:$0x1] }
 0x220   : > { %3832 = vrot.lane.b32.xlu2 %v3713_v36, %s9650_s10  ;;  %v3298_v11 = vpop.permute.xlu1 %3297  ;;  %v3814_v36 = vrot.slane %v3813_v8, 4  ;;  %v3943_v2 = vrot.slane %v3941_v52, 4  ;;  %v9335_v8 = vrot.slane %v3896_v6, 9  ;;  %v475_v28 = vsel %vm11124_vm12, 0, %v474_v46  ;;  %v4059_v46 = vld [vmem:[#allocation2 + $0x9c] sm:$0xf] }
 0x221   : > { %3334 = vst.msk [vmem:[#allocation4 + $0x6c] sm:$0xf] %vm1338_vm7, %v3298_v11  ;;  %v3893_v11 = vld [vmem:[#allocation2 + $0x90] sm:$0xe] }
 0x222   : > { %3840 = vrot.lane.b32.xlu0 %v3761_v14, %s9650_s10  ;;  %v3454_v25 = vpop.permute.xlu2 %3453  ;;  %v3944_v14 = vrot.slane %v3889_v54, 5  ;;  %v3819_v53 = vsel %vm9782_vm13, %v3814_v36, %v3818_v7  ;;  %v9334_v32 = vrot.slane %v3893_v11, 9  ;;  %v3900_v54 = vld [vmem:[#allocation2 + $0xac] sm:$0xf]  ;;  %476 = vst [vmem:[#allocation3 + $0x20] sm:$0x1] %v475_v28 }
 0x223   : > { %3496 = vst.msk [vmem:[#allocation4 + $0x54] sm:$0xf] %vm1510_vm9, %v3454_v25  ;;  %v9332_v25 = vrot.slane %v3887_v56, 9  ;;  %v472_v56 = vsel %vm11124_vm12, 0, %v471_v49  ;;  %v4060_v28 = vld [vmem:[#allocation2 + $0xa0] sm:$0xf] }
 0x224   : > { %v3444_v24 = vpop.permute.xlu0 %3443  ;;  %v3945_v23 = vsel %vm9959_vm1, %v3943_v2, %v3944_v14  ;;  %v3956_v12 = vsel %vm9959_vm1, %v9334_v32, %v3955_v42  ;;  %v3969_v2 = vrot.slane %v3900_v54, 5  ;;  %v3899_v14 = vld [vmem:[#allocation2 + $0xa8] sm:$0xe]  ;;  %473 = vst [vmem:[#allocation3 + $0x14] sm:$0x1] %v472_v56 }
 0x225   : > { %3491 = vst.msk [vmem:[#allocation4 + $0x40] sm:$0xf] %vm1510_vm9, %v3444_v24  ;;  %v3891_v24 = vld [vmem:[#allocation2 + $0x88] sm:$0xf]  ;;  %v3942_v62 = vsel %vm9959_vm1, %v9332_v25, %v3941_v52  ;;  %v3976_v52 = vrot.slane %v3903_v9, 5  ;;  %v9336_v11 = vrot.slane %v3899_v14, 9 }
 0x226   : > { %3836 = vrot.lane.b32.xlu1 %v3737_v38, %s9650_s10  ;;  %v3948_v34 = vrot.slane %v3891_v24, 5  ;;  %v3971_v30 = vrot.slane %v3969_v2, 4  ;;  %v4053_v9 = vld [vmem:[#allocation2 + $0x78] sm:$0xf]  ;;  %v4150_v54 = vld [vmem:[#allocation2 + $0x7c] sm:$0xf] }
 0x227   : > { %v4056_v56 = vld [vmem:[#allocation2 + $0x88] sm:$0xf] }
 0x228   : > { %3838 = vrot.lane.b32.xlu2 %v3747_v50, %s9650_s10  ;;  %v3304_v15 = vpop.permute.xlu1 %3303  ;;  %v3890_v50 = vld [vmem:[#allocation2 + $0x84] sm:$0xe]  ;;  %v3950_v0 = vrot.slane %v3948_v34, 4 }
 0x229   : > { %3337 = vst.msk [vmem:[#allocation4 + $0x78] sm:$0xf] %vm1338_vm7, %v3304_v15  ;;  %9322 = vmatmul.msk.bf16.gmra.mxu1 %vm2696_vm14, %v9580_v4  ;;  %v9333_v26 = vrot.slane %v3890_v50, 9  ;;  %v3978_v50 = vrot.slane %v3976_v52, 4  ;;  %vm13313_vm7 = vcmask 158848  }
 0x22a   : > { %3846 = vrot.lane.b32.xlu0 %v3795_v40, %s9650_s10  ;;  %v3460_v18 = vpop.permute.xlu2 %3459  ;;  %v3898_v40 = vld [vmem:[#allocation2 + $0xa4] sm:$0x1] }
 0x22b   : > { %3499 = vst.msk [vmem:[#allocation4 + $0x60] sm:$0xf] %vm1510_vm9, %v3460_v18  ;;  %v3965_v15 = vrot.slane %v3898_v40, 5  ;;  %v3949_v13 = vsel %vm9959_vm1, %v9333_v26, %v3948_v34  ;;  %v3952_v18 = vsel %vm9959_vm1, %v3950_v0, %v3951_v39  ;;  %v11164_v39 = vld [vmem:[%s13282_s2] ss:$0 sm:$0xff] }
 0x22c   : > { %v3450_v17 = vpop.permute.xlu0 %3449 }
 0x22d   : > { %3494 = vst.msk [vmem:[#allocation4 + $0x4c] sm:$0xf] %vm1510_vm9, %v3450_v17  ;;  %v3966_v41 = vsel %vm9959_vm1, %v3964_v63, %v3965_v15  ;;  %v3902_v17 = vld [vmem:[#allocation2 + $0xb4] sm:$0xe]  ;;  %v343_v63 = vld [vmem:[#allocation2 + $0xcc] sm:$0x1] }
 0x22e   : > { %3842 = vrot.lane.b32.xlu1 %v3771_v3, %s9650_s10  ;;  %v3957_v3 = vrot.slane %v3955_v42, 4  ;;  %v3970_v42 = vsel %vm9959_vm1, %v9336_v11, %v3969_v2  ;;  %v4055_v15 = vld [vmem:[#allocation2 + $0x84] sm:$0xf]  ;;  %v4187_v11 = vshrl.u32 %v4150_v54, 16 }
 0x230   : > { %3844 = vrot.lane.b32.xlu2 %v3785_v35, %s9650_s10  ;;  %v3446_v29 = vpop.permute.xlu1 %3445  ;;  %v3959_v7 = vsel %vm9959_vm1, %v3957_v3, %v3958_v47  ;;  %v4054_v3 = vld [vmem:[#allocation2 + $0x7c] sm:$0xf] }
 0x231   : > { %3492 = vst.msk [vmem:[#allocation4 + $0x44] sm:$0xf] %vm1510_vm9, %v3446_v29  ;;  %v3906_v29 = vld [vmem:[#allocation2 + $0xc4] sm:$0xf]  ;;  %v483_v47 = vld [vmem:[#allocation3 + $0x44] sm:$0x1] }
 0x232   : > { %3988 = vrot.lane.b32.xlu0 %v3935_v51, %s9651_s11  ;;  %v3466_v55 = vpop.permute.xlu2 %3465  ;;  %v9337_v51 = vrot.slane %v3902_v17, 9 }
 0x233   : > { %3502 = vst.msk [vmem:[#allocation4 + $0x6c] sm:$0xf] %vm1510_vm9, %v3466_v55  ;;  %v3963_v55 = vsel %vm9959_vm1, %v9335_v8, %v3962_v21  ;;  %v4058_v8 = vld [vmem:[#allocation2 + $0x94] sm:$0xf] }
 0x234   : > { %v3456_v43 = vpop.permute.xlu0 %3455 }
 0x235   : > { %3497 = vst.msk [vmem:[#allocation4 + $0x58] sm:$0xf] %vm1510_vm9, %v3456_v43  ;;  %v3977_v43 = vsel %vm9959_vm1, %v9337_v51, %v3976_v52  ;;  %v422_v51 = vld [vmem:[#allocation3 + $0x24] sm:$0x1] }
 0x236   : > { %3848 = vrot.lane.b32.xlu1 %v3809_v16, %s9650_s10  ;;  %v3901_v16 = vld [vmem:[#allocation2 + $0xb0] sm:$0x1]  ;;  %v423_v52 = vsel %vm10849_vm3, 0, %v422_v51 }
 0x237   : > { %v3972_v37 = vrot.slane %v3901_v16, 5  ;;  %424 = vst [vmem:[#allocation3 + $0x24] sm:$0x1] %v423_v52 }
 0x238   : > { %3850 = vrot.lane.b32.xlu2 %v3819_v53, %s9650_s10  ;;  %v3452_v31 = vpop.permute.xlu1 %3451  ;;  %v3983_v53 = vrot.slane %v3906_v29, 5  ;;  %v2969_v29 = vld [vmem:[#allocation3 + $0xc] sm:$0xf] }
 0x239   : > { %3495 = vst.msk [vmem:[#allocation4 + $0x50] sm:$0xf] %vm1510_vm9, %v3452_v31  ;;  %v3973_v24 = vsel %vm9959_vm1, %v3971_v30, %v3972_v37  ;;  %v4149_v37 = vld [vmem:[#allocation2 + $0x78] sm:$0xf] }
 0x23a   : > { %3994 = vrot.lane.b32.xlu0 %v3945_v23, %s9651_s11  ;;  %v3472_v60 = vpop.permute.xlu2 %3471  ;;  %v3907_v23 = vld [vmem:[#allocation2 + $0xc8] sm:$0x1]  ;;  %v3985_v25 = vrot.slane %v3983_v53, 4 }
 0x23b   : > { %3505 = vst.msk [vmem:[#allocation4 + $0x78] sm:$0xf] %vm1510_vm9, %v3472_v60  ;;  %v3986_v60 = vrot.slane %v3907_v23, 5 }
 0x23c   : > { %v3462_v38 = vpop.permute.xlu0 %3461 }
 0x23d   : > { %3500 = vst.msk [vmem:[#allocation4 + $0x64] sm:$0xf] %vm1510_vm9, %v3462_v38  ;;  %v3904_v38 = vld [vmem:[#allocation2 + $0xbc] sm:$0x1]  ;;  %v3987_v22 = vsel %vm9959_vm1, %v3985_v25, %v3986_v60  ;;  %v4061_v25 = vld [vmem:[#allocation2 + $0xa8] sm:$0xf] }
 0x23e   : > { %3990 = vrot.lane.b32.xlu1 %v3938_v57, %s9651_s11  ;;  %v3905_v57 = vld [vmem:[#allocation2 + $0xc0] sm:$0xe]  ;;  %v431_v60 = vld [vmem:[#allocation3 + $0x48] sm:$0x1] }
 0x23f   : > { %v9338_v21 = vrot.slane %v3905_v57, 9 }
 0x240   : > { %3992 = vrot.lane.b32.xlu2 %v3942_v62, %s9651_s11  ;;  %v3458_v20 = vpop.permute.xlu1 %3457  ;;  %v419_v62 = vld [vmem:[#allocation3 + $0x18] sm:$0x1] }
 0x241   : > { %3498 = vst.msk [vmem:[#allocation4 + $0x5c] sm:$0xf] %vm1510_vm9, %v3458_v20  ;;  %v420_v34 = vsel %vm10849_vm3, 0, %v419_v62  ;;  %v3984_v0 = vsel %vm9959_vm1, %v9338_v21, %v3983_v53  ;;  %v4183_v53 = vshll.u32 %v4150_v54, 16  ;;  %v2973_v21 = vld [vmem:[#allocation3 + $0x14] sm:$0x1] }
 0x242   : > { %4000 = vrot.lane.b32.xlu0 %v3956_v12, %s9651_s11  ;;  %v3543_v27 = vpop.permute.xlu2 %3542  ;;  %v3979_v12 = vrot.slane %v3904_v38, 5  ;;  %421 = vst [vmem:[#allocation3 + $0x18] sm:$0x1] %v420_v34  ;;  %v477_v38 = vld [vmem:[#allocation3 + $0x2c] sm:$0x1]  ;;  %v4189_v34 = vrot.slane %v4187_v11, 4 }
 0x243   : > { %3589 = vst.msk [vmem:[#allocation4 + $0x44] sm:$0xf] %vm1607_vm10, %v3543_v27  ;;  %v428_v27 = vld [vmem:[#allocation3 + $0x3c] sm:$0x1]  ;;  %v11203_v57 = vrot.slane %v4183_v53, 5  ;;  %v478_v62 = vsel %vm11124_vm12, 0, %v477_v38 }
 0x244   : > { %v3468_v4 = vpop.permute.xlu0 %3467  ;;  %v3980_v20 = vsel %vm9959_vm1, %v3978_v50, %v3979_v12  ;;  %v4174_v50 = vshrl.u32 %v4149_v37, 16  ;;  %v4177_v12 = vshll.u32 %v4149_v37, 16  ;;  %479 = vst [vmem:[#allocation3 + $0x2c] sm:$0x1] %v478_v62  ;;  %v4152_v11 = vld [vmem:[#allocation2 + $0x84] sm:$0xf] }
 0x245   : > { %3503 = vst.msk [vmem:[#allocation4 + $0x70] sm:$0xf] %vm1510_vm9, %v3468_v4  ;;  %v429_v4 = vsel %vm10849_vm3, 0, %v428_v27  ;;  %v4062_v62 = vld [vmem:[#allocation2 + $0xac] sm:$0xf] }
 0x246   : > { %3996 = vrot.lane.b32.xlu1 %v3949_v13, %s9651_s11  ;;  %v344_v13 = vsel %vm9712_vm4, 0, %v343_v63  ;;  %430 = vst [vmem:[#allocation3 + $0x3c] sm:$0x1] %v429_v4  ;;  %vm13310_vm4 = vmmov %vm13307_vm0 }
 0x247   : > { %345 = vst [vmem:[#allocation2 + $0xcc] sm:$0x1] %v344_v13  ;;  %vm11192_vm6 = vmand %vm402_vm5, %vm13310_vm4 }
 0x248   : > { %3998 = vrot.lane.b32.xlu2 %v3952_v18, %s9651_s11  ;;  %v3464_v35 = vpop.permute.xlu1 %3463  ;;  %vm13315_vm0 = vmmov %vm13313_vm7 }
 0x249   : > { %3501 = vst.msk [vmem:[#allocation4 + $0x68] sm:$0xf] %vm1510_vm9, %v3464_v35  ;;  %vm13316_vm4 = vmmov %vm13315_vm0 }
 0x24a   : > { %4006 = vrot.lane.b32.xlu0 %v3966_v41, %s9651_s11  ;;  %v3549_v59 = vpop.permute.xlu2 %3548 }
 0x24b   : > { %3592 = vst.msk [vmem:[#allocation4 + $0x50] sm:$0xf] %vm1607_vm10, %v3549_v59  ;;  %v484_v59 = vsel %vm11124_vm12, 0, %v483_v47 }
 0x24c   : > { %v3474_v48 = vpop.permute.xlu0 %3473  ;;  %485 = vst [vmem:[#allocation3 + $0x44] sm:$0x1] %v484_v59 }
 0x24d   : > { %3506 = vst.msk [vmem:[#allocation4 + $0x7c] sm:$0xf] %vm1510_vm9, %v3474_v48 }
 0x24e   : > { %4002 = vrot.lane.b32.xlu1 %v3959_v7, %s9651_s11 }
 0x250   : > { %4004 = vrot.lane.b32.xlu2 %v3963_v55, %s9651_s11  ;;  %v3470_v58 = vpop.permute.xlu1 %3469 }
 0x251   : > { %3504 = vst.msk [vmem:[#allocation4 + $0x74] sm:$0xf] %vm1510_vm9, %v3470_v58  ;;  %vm13314_vm9 = vmmov %vm13313_vm7 }
 0x252   : > { %4012 = vrot.lane.b32.xlu0 %v3977_v43, %s9651_s11  ;;  %v3555_v31 = vpop.permute.xlu2 %3554 }
 0x253   : > { %3595 = vst.msk [vmem:[#allocation4 + $0x5c] sm:$0xf] %vm1607_vm10, %v3555_v31  ;;  %v4057_v31 = vld [vmem:[#allocation2 + $0x90] sm:$0xf] }
 0x254   : > { %v3545_v32 = vpop.permute.xlu0 %3544 }
 0x255   : > { %3590 = vst.msk [vmem:[#allocation4 + $0x48] sm:$0xf] %vm1607_vm10, %v3545_v32 }
 0x256   : > { %4008 = vrot.lane.b32.xlu1 %v3970_v42, %s9651_s11 }
 0x258   : > { %4010 = vrot.lane.b32.xlu2 %v3973_v24, %s9651_s11  ;;  %v3541_v45 = vpop.permute.xlu1 %3540  ;;  %v432_v24 = vsel %vm10849_vm3, 0, %v431_v60 }
 0x259   : > { %3588 = vst.msk [vmem:[#allocation4 + $0x40] sm:$0xf] %vm1607_vm10, %v3541_v45 }
 0x25a   : > { %4018 = vrot.lane.b32.xlu0 %v3987_v22, %s9651_s11  ;;  %v3561_v40 = vpop.permute.xlu2 %3560  ;;  %v4151_v22 = vld [vmem:[#allocation2 + $0x80] sm:$0x1]  ;;  %433 = vst [vmem:[#allocation3 + $0x48] sm:$0x1] %v432_v24 }
 0x25b   : > { %3598 = vst.msk [vmem:[#allocation4 + $0x68] sm:$0xf] %vm1607_vm10, %v3561_v40 }
 0x25c   : > { %v3551_v26 = vpop.permute.xlu0 %3550 }
 0x25d   : > { %3593 = vst.msk [vmem:[#allocation4 + $0x54] sm:$0xf] %vm1607_vm10, %v3551_v26 }
 0x25e   : > { %4014 = vrot.lane.b32.xlu1 %v3980_v20, %s9651_s11  ;;  %v4193_v20 = vshll.u32 %v4151_v22, 16 }
 0x260   : > { %4016 = vrot.lane.b32.xlu2 %v3984_v0, %s9651_s11  ;;  %v2734_v18 = vpop.f32.mrf.mxu0  ;;  %v3547_v10 = vpop.permute.xlu1 %3546  ;;  %v4155_v0 = vld [vmem:[#allocation2 + $0x90] sm:$0xf] }
 0x261   : > { %v2735_v6 = vadd.f32 %v11164_v39, %v2734_v18  ;;  %3591 = vst.msk [vmem:[#allocation4 + $0x4c] sm:$0xf] %vm1607_vm10, %v3547_v10  ;;  %v4222_v13 = vshrl.u32 %v4155_v0, 16  ;;  %v4190_v10 = vor.u32 %v4189_v34, %v11203_v57 }
 0x262   : > { %4089 = vrot.lane.b32.xlu0 %v4055_v15, %s9652_s12  ;;  %v3567_v41 = vpop.permute.xlu2 %3566 }
 0x263   : > { %3601 = vst.msk [vmem:[#allocation4 + $0x74] sm:$0xf] %vm1607_vm10, %v3567_v41  ;;  %v2774_v17 = vmax.f32 %v2735_v6, 0.0  ;;  %v4176_v41 = vrot.slane %v4174_v50, 4  ;;  %v4179_v6 = vrot.slane %v4177_v12, 5  ;;  %v4224_v59 = vrot.slane %v4222_v13, 4 }
 0x264   : > { %v3557_v1 = vpop.permute.xlu0 %3556  ;;  %v4063_v12 = vld [vmem:[#allocation2 + $0xb4] sm:$0xf] }
 0x265   : > { %3596 = vst.msk [vmem:[#allocation4 + $0x60] sm:$0xf] %vm1607_vm10, %v3557_v1  ;;  %v2790_v35 = vpack.c.bf16 %v2774_v17, %v2774_v17  ;;  %v4225_v1 = vshll.u32 %v4155_v0, 16 }
 0x266   : > { %4085 = vrot.lane.b32.xlu1 %v4053_v9, %s9652_s12 }
 0x267   : > { %v2807_v48 = vshrl.u32 %v2790_v35, 16  ;;  %v2810_v14 = vshll.u32 %v2790_v35, 16  ;;  %v486_v35 = vld [vmem:[#allocation3 + $0x50] sm:$0x1]  ;;  %v4227_v51 = vrot.slane %v4225_v1, 5 }
 0x268   : > { %4087 = vrot.lane.b32.xlu2 %v4054_v3, %s9652_s12  ;;  %v2736_v7 = vpop.f32.mrf.mxu0  ;;  %v3553_v55 = vpop.permute.xlu1 %3552  ;;  %v434_v1 = vld [vmem:[#allocation3 + $0x54] sm:$0x1] }
 0x269   : > { %v11186_v2 = vrot.slane %v2807_v48, 7  ;;  %v2737_v16 = vadd.f32 %v11164_v39, %v2736_v7  ;;  %3594 = vst.msk [vmem:[#allocation4 + $0x58] sm:$0xf] %vm1607_vm10, %v3553_v55  ;;  %v425_v7 = vld [vmem:[#allocation3 + $0x30] sm:$0x1]  ;;  %v4228_v60 = vor.u32 %v4227_v51, %v4224_v59 }
 0x26a   : > { %4095 = vrot.lane.b32.xlu0 %v4058_v8, %s9652_s12  ;;  %v3821_v43 = vpop.permute.xlu2 %3820  ;;  %v11216_v8 = vld [vmem:[#allocation2 + $0x94] sm:$0xf]  ;;  %v4153_v55 = vld [vmem:[#allocation2 + $0x88] sm:$0xf]  ;;  %v4159_v59 = vld [vmem:[#allocation2 + $0xa0] sm:$0xf] }
 0x26b   : > { %3868 = vst.msk [vmem:[#allocation4 + $0x40] sm:$0xf] %vm13313_vm7, %v3821_v43  ;;  %v2812_v58 = vor.u32 %v2810_v14, %v11186_v2  ;;  %v2775_v30 = vmax.f32 %v2737_v16, 0.0  ;;  %v2813_v17 = vrot.slane %v11186_v2, 4  ;;  %v11224_v2 = vrot.slane %v4190_v10, 4  ;;  %vm13317_vm7 = vmmov %vm13315_vm0 }
 0x26c   : > { %v3563_v23 = vpop.permute.xlu0 %3562  ;;  %v11226_v14 = vrot.slane %v4193_v20, 5  ;;  %v4180_v43 = vor.u32 %v4179_v6, %v4176_v41  ;;  %v487_v16 = vsel %vm11124_vm12, 0, %v486_v35  ;;  %v4211_v34 = vshrl.u32 %v4153_v55, 16 }
 0x26d   : > { %3599 = vst.msk [vmem:[#allocation4 + $0x6c] sm:$0xf] %vm1607_vm10, %v3563_v23  ;;  %v2970_v32 = vsel %vm11192_vm6, %v2812_v58, %v2969_v29  ;;  %v2791_v42 = vpack.c.bf16 %v2775_v30, %v2775_v30  ;;  %v4064_v29 = vld [vmem:[#allocation2 + $0xb8] sm:$0xf]  ;;  %v2976_v58 = vld [vmem:[#allocation3 + $0x18] sm:$0xf] }
 0x26e   : > { %2971 = vst [vmem:[#allocation3 + $0xc] sm:$0xf] %v2970_v32  ;;  %4091 = vrot.lane.b32.xlu1 %v4056_v56, %s9652_s12  ;;  %v4231_v56 = vshll.u32 %v11216_v8, 16  ;;  %v4207_v32 = vshll.u32 %v4153_v55, 16  ;;  %v435_v35 = vsel %vm10849_vm3, 0, %v434_v1 }
 0x26f   : > { %v2815_v45 = vshrl.u32 %v2791_v42, 16  ;;  %v2818_v63 = vshll.u32 %v2791_v42, 16  ;;  %488 = vst [vmem:[#allocation3 + $0x50] sm:$0x1] %v487_v16 }
 0x270   : > { %4093 = vrot.lane.b32.xlu2 %v4057_v31, %s9652_s12  ;;  %v3559_v40 = vpop.permute.xlu1 %3558  ;;  %v2739_v26 = vpop.f32.mrf.mxu0  ;;  %v11251_v13 = vrot.slane %v4207_v32, 5  ;;  %436 = vst [vmem:[#allocation3 + $0x54] sm:$0x1] %v435_v35 }
 0x271   : > { %v2817_v27 = vrot.slane %v2815_v45, 7  ;;  %3597 = vst.msk [vmem:[#allocation4 + $0x64] sm:$0xf] %vm1607_vm10, %v3559_v40  ;;  %v2740_v4 = vadd.f32 %v11164_v39, %v2739_v26  ;;  %v4198_v40 = vshrl.u32 %v4152_v11, 16  ;;  %v4201_v26 = vshll.u32 %v4152_v11, 16 }
 0x272   : > { %4101 = vrot.lane.b32.xlu0 %v4061_v25, %s9652_s12  ;;  %v3827_v15 = vpop.permute.xlu2 %3826  ;;  %v426_v25 = vsel %vm10849_vm3, 0, %v425_v7 }
 0x273   : > { %3871 = vst.msk [vmem:[#allocation4 + $0x4c] sm:$0xf] %vm13314_vm9, %v3827_v15  ;;  %v2820_v9 = vor.u32 %v2818_v63, %v2817_v27  ;;  %v2822_v3 = vrot.slane %v2817_v27, 4  ;;  %v2776_v47 = vmax.f32 %v2740_v4, 0.0  ;;  %v4067_v27 = vld [vmem:[#allocation2 + $0xcc] sm:$0xf]  ;;  %vm13319_vm9 = vmmov %vm13315_vm0 }
 0x274   : > { %v3569_v18 = vpop.permute.xlu0 %3568  ;;  %v11245_v63 = vrot.slane %v4231_v56, 5  ;;  %v11247_v15 = vld [vmem:[#allocation2 + $0x8c] sm:$0x1]  ;;  %427 = vst [vmem:[#allocation3 + $0x30] sm:$0x1] %v426_v25  ;;  %v4200_v41 = vrot.slane %v4198_v40, 4 }
 0x275   : > { %3602 = vst.msk [vmem:[#allocation4 + $0x78] sm:$0xf] %vm1607_vm10, %v3569_v18  ;;  %v2821_v52 = vsel %vm9764_vm11, %v2813_v17, %v2820_v9  ;;  %v2974_v54 = vsel %vm10849_vm3, %v2822_v3, %v2973_v21  ;;  %v2792_v48 = vpack.c.bf16 %v2776_v47, %v2776_v47  ;;  %v11241_v21 = vrot.slane %v4180_v43, 4  ;;  %v480_v17 = vld [vmem:[#allocation3 + $0x38] sm:$0x1] }
 0x276   : > { %2972 = vst.msk [vmem:[#allocation3 + $0x10] sm:$0xf] %vm402_vm5, %v2821_v52  ;;  %4097 = vrot.lane.b32.xlu1 %v4059_v46, %s9652_s12  ;;  %v2754_v23 = vpop.f32.mrf.mxu1  ;;  %v11249_v46 = vrot.slane %v4228_v60, 4  ;;  %v4203_v6 = vrot.slane %v4201_v26, 5  ;;  %v4196_v3 = vsel %vm9782_vm13, %v11224_v2, %v11226_v14  ;;  %v2997_v52 = vld [vmem:[#allocation3 + $0x3c] sm:$0xf] }
 0x277   : > { %2975 = vst [vmem:[#allocation3 + $0x14] sm:$0x1] %v2974_v54  ;;  %v2824_v53 = vshrl.u32 %v2792_v48, 16  ;;  %v2755_v30 = vadd.f32 %v11164_v39, %v2754_v23  ;;  %v2827_v24 = vshll.u32 %v2792_v48, 16  ;;  %v4186_v47 = vsel %vm9782_vm13, %v11241_v21, %v11203_v57  ;;  %v4160_v40 = vld [vmem:[#allocation2 + $0xa4] sm:$0x1] }
 0x278   : > { %4099 = vrot.lane.b32.xlu2 %v4060_v28, %s9652_s12  ;;  %v3565_v37 = vpop.permute.xlu1 %3564  ;;  %v2741_v31 = vpop.f32.mrf.mxu0  ;;  %v11253_v28 = vrot.slane %v4211_v34, 4  ;;  %v4217_v7 = vshll.u32 %v11247_v15, 16  ;;  %v4255_v25 = vshll.u32 %v4159_v59, 16  ;;  %v4158_v15 = vld [vmem:[#allocation2 + $0x9c] sm:$0xf] }
 0x279   : > { %v11236_v42 = vrot.slane %v2824_v53, 7  ;;  %3600 = vst.msk [vmem:[#allocation4 + $0x70] sm:$0xf] %vm1607_vm10, %v3565_v37  ;;  %v2742_v22 = vadd.f32 %v11164_v39, %v2741_v31  ;;  %v2782_v50 = vmax.f32 %v2755_v30, 0.0  ;;  %v2980_v53 = vld [vmem:[#allocation3 + $0x20] sm:$0x1] }
 0x27a   : > { %4107 = vrot.lane.b32.xlu0 %v4064_v29, %s9652_s12  ;;  %v3833_v38 = vpop.permute.xlu2 %3832  ;;  %v4235_v29 = vshrl.u32 %v11216_v8, 16  ;;  %v481_v31 = vsel %vm11124_vm12, 0, %v480_v17 }
 0x27b   : > { %3874 = vst.msk [vmem:[#allocation4 + $0x58] sm:$0xf] %vm13315_vm0, %v3833_v38  ;;  %v2829_v20 = vor.u32 %v2827_v24, %v11236_v42  ;;  %v2777_v0 = vmax.f32 %v2742_v22, 0.0  ;;  %v2798_v4 = vpack.c.bf16 %v2782_v50, %v2782_v50  ;;  %v2830_v51 = vrot.slane %v11236_v42, 4  ;;  %v4066_v42 = vld [vmem:[#allocation2 + $0xc4] sm:$0xf] }
 0x27c   : > { %v3823_v45 = vpop.permute.xlu0 %3822  ;;  %v4065_v38 = vld [vmem:[#allocation2 + $0xc0] sm:$0xf]  ;;  %v4214_v22 = vor.u32 %v11253_v28, %v11251_v13  ;;  %482 = vst [vmem:[#allocation3 + $0x38] sm:$0x1] %v481_v31  ;;  %v4249_v31 = vshll.u32 %v4158_v15, 16 }
 0x27d   : > { %3869 = vst.msk [vmem:[#allocation4 + $0x44] sm:$0xf] %vm13316_vm4, %v3823_v45  ;;  %v2977_v18 = vsel %vm11192_vm6, %v2829_v20, %v2976_v58  ;;  %v2793_v10 = vpack.c.bf16 %v2777_v0, %v2777_v0  ;;  %v2875_v9 = vshrl.u32 %v2798_v4, 16  ;;  %v2878_v43 = vshll.u32 %v2798_v4, 16  ;;  %vm13320_vm4 = vmmov %vm13315_vm0 }
 0x27e   : > { %2978 = vst [vmem:[#allocation3 + $0x18] sm:$0xf] %v2977_v18  ;;  %4103 = vrot.lane.b32.xlu1 %v4062_v62, %s9652_s12  ;;  %v2756_v48 = vpop.f32.mrf.mxu1  ;;  %v4204_v62 = vor.u32 %v4203_v6, %v4200_v41  ;;  %v4234_v45 = vsel %vm9782_vm13, %v11249_v46, %v11245_v63  ;;  %v11291_v0 = vrot.slane %v4255_v25, 5  ;;  %v11301_v6 = vrot.slane %v4214_v22, 4  ;;  %v4157_v25 = vld [vmem:[#allocation2 + $0x98] sm:$0x1] }
 0x27f   : > { %v2832_v54 = vshrl.u32 %v2793_v10, 16  ;;  %v11272_v55 = vrot.slane %v2875_v9, 7  ;;  %v2835_v16 = vshll.u32 %v2793_v10, 16  ;;  %v2757_v23 = vadd.f32 %v11164_v39, %v2756_v48 }
 0x280   : > { %4105 = vrot.lane.b32.xlu2 %v4063_v12, %s9652_s12  ;;  %v3571_v56 = vpop.permute.xlu1 %3570  ;;  %v2744_v11 = vpop.f32.mrf.mxu0  ;;  %v11297_v10 = vrot.slane %v4217_v7, 5  ;;  %v11303_v1 = vrot.slane %v4204_v62, 4  ;;  %v3001_v7 = vld [vmem:[#allocation3 + $0x44] sm:$0x1] }
 0x281   : > { %v2834_v58 = vrot.slane %v2832_v54, 7  ;;  %3603 = vst.msk [vmem:[#allocation4 + $0x7c] sm:$0xf] %vm1607_vm10, %v3571_v56  ;;  %v2745_v37 = vadd.f32 %v11164_v39, %v2744_v11  ;;  %v2880_v60 = vor.u32 %v2878_v43, %v11272_v55  ;;  %v2783_v32 = vmax.f32 %v2757_v23, 0.0  ;;  %vm13318_vm10 = vmmov %vm13315_vm0  ;;  %v2983_v43 = vld [vmem:[#allocation3 + $0x24] sm:$0xf] }
 0x282   : > { %4113 = vrot.lane.b32.xlu0 %v4067_v27, %s9652_s12  ;;  %v3839_v30 = vpop.permute.xlu2 %3838  ;;  %v4259_v27 = vshrl.u32 %v4159_v59, 16  ;;  %v2881_v9 = vrot.slane %v11272_v55, 4  ;;  %v4220_v14 = vsel %vm9782_vm13, %v11301_v6, %v11297_v10 }
 0x283   : > { %3877 = vst.msk [vmem:[#allocation4 + $0x64] sm:$0xf] %vm13317_vm7, %v3839_v30  ;;  %v2837_v34 = vor.u32 %v2835_v16, %v2834_v58  ;;  %v2839_v50 = vrot.slane %v2834_v58, 4  ;;  %v2778_v12 = vmax.f32 %v2745_v37, 0.0  ;;  %v2998_v26 = vsel %vm11192_vm6, %v2880_v60, %v2997_v52  ;;  %v4068_v37 = vld [vmem:[#allocation2 + $0xd0] sm:$0xf]  ;;  %vm13321_vm7 = vmmov %vm13315_vm0 }
 0x284   : > { %v3829_v24 = vpop.permute.xlu0 %3828  ;;  %v2799_v20 = vpack.c.bf16 %v2783_v32, %v2783_v32  ;;  %2999 = vst [vmem:[#allocation3 + $0x3c] sm:$0xf] %v2998_v26  ;;  %v4261_v17 = vrot.slane %v4259_v27, 4  ;;  %v4246_v52 = vshrl.u32 %v4158_v15, 16  ;;  %v4251_v27 = vrot.slane %v4249_v31, 5 }
 0x285   : > { %3872 = vst.msk [vmem:[#allocation4 + $0x50] sm:$0xf] %vm13318_vm10, %v3829_v24  ;;  %v2838_v4 = vsel %vm9764_vm11, %v2830_v51, %v2837_v34  ;;  %v2981_v28 = vsel %vm10849_vm3, %v2839_v50, %v2980_v53  ;;  %v2794_v18 = vpack.c.bf16 %v2778_v12, %v2778_v12  ;;  %v4265_v51 = vshll.u32 %v4160_v40, 16  ;;  %vm13322_vm10 = vmmov %vm13315_vm0 }
 0x286   : > { %2979 = vst.msk [vmem:[#allocation3 + $0x1c] sm:$0xf] %vm402_vm5, %v2838_v4  ;;  %v2883_v41 = vshrl.u32 %v2799_v20, 16  ;;  %4109 = vrot.lane.b32.xlu1 %v4065_v38, %s9652_s12  ;;  %v2759_v59 = vpop.f32.mrf.mxu1  ;;  %v2886_v48 = vshll.u32 %v2799_v20, 16  ;;  %v4262_v55 = vor.u32 %v4261_v17, %v11291_v0  ;;  %v4248_v62 = vrot.slane %v4246_v52, 4 }
 0x287   : > { %2982 = vst [vmem:[#allocation3 + $0x20] sm:$0x1] %v2981_v28  ;;  %v2841_v35 = vshrl.u32 %v2794_v18, 16  ;;  %v2760_v16 = vadd.f32 %v11164_v39, %v2759_v59  ;;  %v2844_v11 = vshll.u32 %v2794_v18, 16  ;;  %v11326_v22 = vrot.slane %v4265_v51, 5 }
 0x288   : > { %4111 = vrot.lane.b32.xlu2 %v4066_v42, %s9652_s12  ;;  %v2885_v54 = vrot.slane %v2883_v41, 7  ;;  %v3825_v53 = vpop.permute.xlu1 %3824  ;;  %v2746_v23 = vpop.f32.mrf.mxu0  ;;  %v11332_v40 = vrot.slane %v4262_v55, 4  ;;  %v4237_v15 = vrot.slane %v4235_v29, 4  ;;  %v4164_v4 = vld [vmem:[#allocation2 + $0xb4] sm:$0xf]  ;;  %v4210_v18 = vsel %vm9782_vm13, %v11303_v1, %v11251_v13 }
 0x289   : > { %v11315_v56 = vrot.slane %v2841_v35, 7  ;;  %3870 = vst.msk [vmem:[#allocation4 + $0x48] sm:$0xf] %vm13319_vm9, %v3825_v53  ;;  %v2747_v30 = vadd.f32 %v11164_v39, %v2746_v23  ;;  %v2784_v42 = vmax.f32 %v2760_v16, 0.0  ;;  %v4241_v41 = vshll.u32 %v4157_v25, 16  ;;  %vm13323_vm9 = vmmov %vm13315_vm0 }
 0x28a   : > { %4367 = vrot.lane.b32.xlu0 %v4196_v3, %s9653_s13  ;;  %v3845_v58 = vpop.permute.xlu2 %3844  ;;  %v2888_v60 = vor.u32 %v2886_v48, %v2885_v54  ;;  %v2890_v32 = vrot.slane %v2885_v54, 4  ;;  %v489_v3 = vld [vmem:[#allocation3 + $0x5c] sm:$0x1]  ;;  %v3004_v35 = vld [vmem:[#allocation3 + $0x48] sm:$0xf]  ;;  %v4252_v59 = vor.u32 %v4251_v27, %v4248_v62  ;;  %v4238_v13 = vor.u32 %v4237_v15, %v11245_v63 }
 0x28b   : > { %3880 = vst.msk [vmem:[#allocation4 + $0x70] sm:$0xf] %vm13315_vm0, %v3845_v58  ;;  %v2846_v24 = vor.u32 %v2844_v11, %v11315_v56  ;;  %v2779_v38 = vmax.f32 %v2747_v30, 0.0  ;;  %v2800_v12 = vpack.c.bf16 %v2784_v42, %v2784_v42  ;;  %v490_v17 = vsel %vm11124_vm12, 0, %v489_v3  ;;  %v2987_v52 = vld [vmem:[#allocation3 + $0x2c] sm:$0x1] }
 0x28c   : > { %v3835_v2 = vpop.permute.xlu0 %3834  ;;  %v2889_v34 = vsel %vm9764_vm11, %v2881_v9, %v2888_v60  ;;  %v3002_v50 = vsel %vm10849_vm3, %v2890_v32, %v3001_v7  ;;  %v2847_v9 = vrot.slane %v11315_v56, 4  ;;  %491 = vst [vmem:[#allocation3 + $0x5c] sm:$0x1] %v490_v17  ;;  %v4294_v57 = vshrl.u32 %v4164_v4, 16  ;;  %v11369_v23 = vld [vmem:[#allocation2 + $0xb8] sm:$0xf] }
 0x28d   : > { %3875 = vst.msk [vmem:[#allocation4 + $0x5c] sm:$0xf] %vm13320_vm4, %v3835_v2  ;;  %v2984_v26 = vsel %vm11192_vm6, %v2846_v24, %v2983_v43  ;;  %v2795_v20 = vpack.c.bf16 %v2779_v38, %v2779_v38  ;;  %v2892_v28 = vshrl.u32 %v2800_v12, 16  ;;  %v2895_v51 = vshll.u32 %v2800_v12, 16  ;;  %v4162_v38 = vld [vmem:[#allocation2 + $0xac] sm:$0xf] }
 0x28e   : > { %3000 = vst.msk [vmem:[#allocation3 + $0x40] sm:$0xf] %vm402_vm5, %v2889_v34  ;;  %4115 = vrot.lane.b32.xlu1 %v4068_v37, %s9652_s12  ;;  %v2761_v29 = vpop.f32.mrf.mxu1  ;;  %v4268_v53 = vsel %vm9782_vm13, %v11332_v40, %v11326_v22  ;;  %v11375_v56 = vrot.slane %v4241_v41, 5  ;;  %v11378_v37 = vrot.slane %v4238_v13, 4  ;;  %v4296_v60 = vrot.slane %v4294_v57, 4 }
 0x28f   : > { %3003 = vst [vmem:[#allocation3 + $0x44] sm:$0x1] %v3002_v50  ;;  %v2849_v8 = vshrl.u32 %v2795_v20, 16  ;;  %v11354_v1 = vrot.slane %v2892_v28, 7  ;;  %v2762_v54 = vadd.f32 %v11164_v39, %v2761_v29  ;;  %v4297_v32 = vshll.u32 %v4164_v4, 16 }
 0x290   : > { %2985 = vst [vmem:[#allocation3 + $0x24] sm:$0xf] %v2984_v26  ;;  %4365 = vrot.lane.b32.xlu2 %v4186_v47, %s9653_s13  ;;  %v3831_v48 = vpop.permute.xlu1 %3830  ;;  %v2749_v7 = vpop.f32.mrf.mxu0  ;;  %v2852_v47 = vshll.u32 %v2795_v20, 16  ;;  %v4303_v24 = vshll.u32 %v11369_v23, 16  ;;  %v3008_v40 = vld [vmem:[#allocation3 + $0x50] sm:$0x1]  ;;  %v4244_v15 = vsel %vm9782_vm13, %v11378_v37, %v11375_v56 }
 0x291   : > { %v2851_v21 = vrot.slane %v2849_v8, 7  ;;  %3873 = vst.msk [vmem:[#allocation4 + $0x54] sm:$0xf] %vm13321_vm7, %v3831_v48  ;;  %v2750_v16 = vadd.f32 %v11164_v39, %v2749_v7  ;;  %v2897_v55 = vor.u32 %v2895_v51, %v11354_v1  ;;  %v2785_v63 = vmax.f32 %v2762_v54, 0.0  ;;  %v2990_v4 = vld [vmem:[#allocation3 + $0x30] sm:$0xf]  ;;  %vm13325_vm7 = vmmov %vm13315_vm0 }
 0x292   : > { %4373 = vrot.lane.b32.xlu0 %v4234_v45, %s9653_s13  ;;  %v3851_v43 = vpop.permute.xlu2 %3850  ;;  %v11373_v45 = vrot.slane %v4252_v59, 4  ;;  %v2898_v22 = vrot.slane %v11354_v1, 4  ;;  %v4299_v50 = vrot.slane %v4297_v32, 5  ;;  %v4279_v8 = vshll.u32 %v4162_v38, 16  ;;  %v4161_v59 = vld [vmem:[#allocation2 + $0xa8] sm:$0xf] }
 0x293   : > { %3883 = vst.msk [vmem:[#allocation4 + $0x7c] sm:$0xf] %vm13322_vm10, %v3851_v43  ;;  %v2854_v11 = vor.u32 %v2852_v47, %v2851_v21  ;;  %v2856_v58 = vrot.slane %v2851_v21, 4  ;;  %v2780_v30 = vmax.f32 %v2750_v16, 0.0  ;;  %v3005_v31 = vsel %vm11192_vm6, %v2897_v55, %v3004_v35  ;;  %v4163_v35 = vld [vmem:[#allocation2 + $0xb0] sm:$0x1]  ;;  %vm13326_vm10 = vmmov %vm13315_vm0 }
 0x294   : > { %v3841_v46 = vpop.permute.xlu0 %3840  ;;  %v2801_v25 = vpack.c.bf16 %v2785_v63, %v2785_v63  ;;  %3006 = vst [vmem:[#allocation3 + $0x48] sm:$0xf] %v3005_v31  ;;  %v4258_v34 = vsel %vm9782_vm13, %v11373_v45, %v11291_v0  ;;  %v4300_v17 = vor.u32 %v4299_v50, %v4296_v60  ;;  %v4283_v29 = vshrl.u32 %v4162_v38, 16  ;;  %v437_v55 = vld [vmem:[#allocation3 + $0x60] sm:$0x1] }
 0x295   : > { %3878 = vst.msk [vmem:[#allocation4 + $0x68] sm:$0xf] %vm13323_vm9, %v3841_v46  ;;  %v2855_v42 = vsel %vm9764_vm11, %v2847_v9, %v2854_v11  ;;  %v2988_v2 = vsel %vm10849_vm3, %v2856_v58, %v2987_v52  ;;  %v2796_v3 = vpack.c.bf16 %v2780_v30, %v2780_v30  ;;  %v11406_v9 = vrot.slane %v4303_v24, 5  ;;  %v4168_v11 = vld [vmem:[#allocation2 + $0xc4] sm:$0xf] }
 0x296   : > { %2986 = vst.msk [vmem:[#allocation3 + $0x28] sm:$0xf] %vm402_vm5, %v2855_v42  ;;  %v2900_v62 = vshrl.u32 %v2801_v25, 16  ;;  %4369 = vrot.lane.b32.xlu1 %v4210_v18, %s9653_s13  ;;  %v2903_v12 = vshll.u32 %v2801_v25, 16  ;;  %v2764_v27 = vpop.f32.mrf.mxu1  ;;  %vm13324_vm4 = vcmask 191648   ;;  %v4301_v54 = vrot.slane %v4300_v17, 4 }
 0x297   : > { %2989 = vst [vmem:[#allocation3 + $0x2c] sm:$0x1] %v2988_v2  ;;  %v2858_v26 = vshrl.u32 %v2796_v3, 16  ;;  %v2861_v20 = vshll.u32 %v2796_v3, 16  ;;  %v2765_v28 = vadd.f32 %v11164_v39, %v2764_v27  ;;  %v4307_v57 = vshrl.u32 %v11369_v23, 16  ;;  %vm13327_vm9 = vmmov %vm13324_vm4 }
 0x298   : > { %4371 = vrot.lane.b32.xlu2 %v4220_v14, %s9653_s13  ;;  %v2902_v0 = vrot.slane %v2900_v62, 7  ;;  %v3837_v18 = vpop.permute.xlu1 %3836  ;;  %v2751_v41 = vpop.f32.mrf.mxu0  ;;  %v11416_v21 = vrot.slane %v4279_v8, 5  ;;  %v4285_v45 = vrot.slane %v4283_v29, 4  ;;  %v4289_v56 = vshll.u32 %v4163_v35, 16  ;;  %v3011_v25 = vld [vmem:[#allocation3 + $0x54] sm:$0xf] }
 0x299   : > { %v11408_v10 = vrot.slane %v2858_v26, 7  ;;  %3876 = vst.msk [vmem:[#allocation4 + $0x60] sm:$0xf] %vm13315_vm0, %v3837_v18  ;;  %v2752_v14 = vadd.f32 %v11164_v39, %v2751_v41  ;;  %v2786_v51 = vmax.f32 %v2765_v28, 0.0  ;;  %v4270_v37 = vshrl.u32 %v4161_v59, 16  ;;  %vm13328_vm0 = vmmov %vm13324_vm4 }
 0x29a   : > { %4379 = vrot.lane.b32.xlu0 %v4268_v53, %s9653_s13  ;;  %v3993_v6 = vpop.permute.xlu2 %3992  ;;  %v2905_v13 = vor.u32 %v2903_v12, %v2902_v0  ;;  %v2907_v1 = vrot.slane %v2902_v0, 4  ;;  %v4306_v53 = vsel %vm9782_vm13, %v4301_v54, %v11406_v9  ;;  %v4273_v31 = vshll.u32 %v4161_v59, 16  ;;  %v2994_v38 = vld [vmem:[#allocation3 + $0x38] sm:$0x1]  ;;  %v4167_v17 = vld [vmem:[#allocation2 + $0xc0] sm:$0xf] }
 0x29b   : > { %4038 = vst.msk [vmem:[#allocation4 + $0x48] sm:$0xf] %vm13324_vm4, %v3993_v6  ;;  %v2863_v48 = vor.u32 %v2861_v20, %v11408_v10  ;;  %v2781_v7 = vmax.f32 %v2752_v14, 0.0  ;;  %v2802_v16 = vpack.c.bf16 %v2786_v51, %v2786_v51  ;;  %v4286_v2 = vor.u32 %v4285_v45, %v11416_v21  ;;  %vm13329_vm4 = vmmov %vm13325_vm7 }
 0x29c   : > { %v3847_v52 = vpop.permute.xlu0 %3846  ;;  %v2906_v47 = vsel %vm9764_vm11, %v2898_v22, %v2905_v13  ;;  %v3009_v43 = vsel %vm10849_vm3, %v2907_v1, %v3008_v40  ;;  %v4291_v3 = vrot.slane %v4289_v56, 5  ;;  %v4272_v50 = vrot.slane %v4270_v37, 4  ;;  %v4169_v40 = vld [vmem:[#allocation2 + $0xc8] sm:$0x1]  ;;  %v4166_v1 = vld [vmem:[#allocation2 + $0xbc] sm:$0x1] }
 0x29d   : > { %3881 = vst.msk [vmem:[#allocation4 + $0x74] sm:$0xf] %vm13325_vm7, %v3847_v52  ;;  %v2991_v63 = vsel %vm11192_vm6, %v2863_v48, %v2990_v4  ;;  %v2797_v46 = vpack.c.bf16 %v2781_v7, %v2781_v7  ;;  %v2909_v58 = vshrl.u32 %v2802_v16, 16  ;;  %v2912_v30 = vshll.u32 %v2802_v16, 16  ;;  %v492_v7 = vld [vmem:[#allocation3 + $0x68] sm:$0x1]  ;;  %vm13330_vm7 = vmmov %vm13328_vm0 }
 0x29e   : > { %3007 = vst.msk [vmem:[#allocation3 + $0x4c] sm:$0xf] %vm402_vm5, %v2906_v47  ;;  %4375 = vrot.lane.b32.xlu1 %v4244_v15, %s9653_s13  ;;  %v2766_v42 = vpop.f32.mrf.mxu1  ;;  %v4275_v12 = vrot.slane %v4273_v31, 5  ;;  %v438_v27 = vsel %vm10849_vm3, 0, %v437_v55  ;;  %v4327_v15 = vshll.u32 %v4168_v11, 16  ;;  %v2864_v0 = vrot.slane %v11408_v10, 4 }
 0x29f   : > { %3010 = vst [vmem:[#allocation3 + $0x50] sm:$0x1] %v3009_v43  ;;  %v2866_v60 = vshrl.u32 %v2797_v46, 16  ;;  %v2869_v32 = vshll.u32 %v2797_v46, 16  ;;  %v11431_v24 = vrot.slane %v2909_v58, 7  ;;  %v2767_v22 = vadd.f32 %v11164_v39, %v2766_v42 }
 0x2a0   : > { %2992 = vst [vmem:[#allocation3 + $0x30] sm:$0xf] %v2991_v63  ;;  %4377 = vrot.lane.b32.xlu2 %v4258_v34, %s9653_s13  ;;  %v3843_v62 = vpop.permute.xlu1 %3842  ;;  %v4287_v34 = vrot.slane %v4286_v2, 4  ;;  %v4276_v41 = vor.u32 %v4275_v12, %v4272_v50  ;;  %v11444_v8 = vrot.slane %v4327_v15, 5  ;;  %v4331_v13 = vshrl.u32 %v4168_v11, 16 }
 0x2a1   : > { %v2868_v26 = vrot.slane %v2866_v60, 7  ;;  %3879 = vst.msk [vmem:[#allocation4 + $0x6c] sm:$0xf] %vm13326_vm10, %v3843_v62  ;;  %v2914_v4 = vor.u32 %v2912_v30, %v11431_v24  ;;  %v2787_v28 = vmax.f32 %v2767_v22, 0.0  ;;  %v4337_v54 = vshll.u32 %v4169_v40, 16  ;;  %vm13331_vm10 = vmmov %vm13328_vm0 }
 0x2a2   : > { %4385 = vrot.lane.b32.xlu0 %v4306_v53, %s9653_s13  ;;  %v3999_v20 = vpop.permute.xlu2 %3998  ;;  %v4292_v14 = vsel %vm9782_vm13, %v4287_v34, %v4291_v3  ;;  %v4277_v59 = vrot.slane %v4276_v41, 4  ;;  %439 = vst [vmem:[#allocation3 + $0x60] sm:$0x1] %v438_v27  ;;  %v4318_v48 = vshrl.u32 %v4167_v17, 16  ;;  %v4333_v53 = vrot.slane %v4331_v13, 4 }
 0x2a3   : > { %4041 = vst.msk [vmem:[#allocation4 + $0x54] sm:$0xf] %vm13327_vm9, %v3999_v20  ;;  %v2871_v35 = vor.u32 %v2869_v32, %v2868_v26  ;;  %v2873_v6 = vrot.slane %v2868_v26, 4  ;;  %v3012_v10 = vsel %vm11192_vm6, %v2914_v4, %v3011_v25  ;;  %v2803_v29 = vpack.c.bf16 %v2787_v28, %v2787_v28  ;;  %v3015_v58 = vld [vmem:[#allocation3 + $0x5c] sm:$0x1]  ;;  %vm13333_vm9 = vmmov %vm13328_vm0 }
 0x2a4   : > { %v3989_v18 = vpop.permute.xlu0 %3988  ;;  %3013 = vst [vmem:[#allocation3 + $0x54] sm:$0xf] %v3012_v10  ;;  %v4282_v16 = vsel %vm9782_vm13, %v4277_v59, %v11416_v21  ;;  %v4339_v63 = vrot.slane %v4337_v54, 5  ;;  %v4320_v46 = vrot.slane %v4318_v48, 4  ;;  %v4321_v45 = vshll.u32 %v4167_v17, 16 }
 0x2a5   : > { %4036 = vst.msk [vmem:[#allocation4 + $0x40] sm:$0xf] %vm13328_vm0, %v3989_v18  ;;  %v2872_v51 = vsel %vm9764_vm11, %v2864_v0, %v2871_v35  ;;  %v2995_v52 = vsel %vm10849_vm3, %v2873_v6, %v2994_v38  ;;  %v2917_v47 = vshrl.u32 %v2803_v29, 16  ;;  %v2920_v43 = vshll.u32 %v2803_v29, 16  ;;  %v4429_v25 = vld [vmem:[#allocation2 + $0x78] sm:$0xe] }
 0x2a6   : > { %2993 = vst.msk [vmem:[#allocation3 + $0x34] sm:$0xf] %vm402_vm5, %v2872_v51  ;;  %4381 = vrot.lane.b32.xlu1 %v4282_v16, %s9653_s13  ;;  %v2769_v55 = vpop.f32.mrf.mxu1  ;;  %v4309_v56 = vrot.slane %v4307_v57, 4  ;;  %v4334_v21 = vor.u32 %v4333_v53, %v11444_v8  ;;  %v4313_v31 = vshll.u32 %v4166_v1, 16  ;;  %v399_v60 = vld [vmem:[#allocation2 + $0xd4] sm:$0x1] }
 0x2a7   : > { %2996 = vst [vmem:[#allocation3 + $0x38] sm:$0x1] %v2995_v52  ;;  %v2919_v11 = vrot.slane %v2917_v47, 7  ;;  %v2770_v30 = vadd.f32 %v11164_v39, %v2769_v55  ;;  %v2915_v32 = vrot.slane %v11431_v24, 4  ;;  %v4323_v2 = vrot.slane %v4321_v45, 5 }
 0x2a8   : > { %4383 = vrot.lane.b32.xlu2 %v4292_v14, %s9653_s13  ;;  %v3849_v37 = vpop.permute.xlu1 %3848  ;;  %v4310_v3 = vor.u32 %v4309_v56, %v11406_v9  ;;  %v493_v23 = vsel %vm11124_vm12, 0, %v492_v7  ;;  %v11467_v57 = vld [vmem:[#allocation2 + $0x7c] sm:$0xf]  ;;  %v4335_v50 = vrot.slane %v4334_v21, 4  ;;  %v4315_v26 = vrot.slane %v4313_v31, 5 }
 0x2a9   : > { %3882 = vst.msk [vmem:[#allocation4 + $0x78] sm:$0xf] %vm13329_vm4, %v3849_v37  ;;  %v2922_v38 = vor.u32 %v2920_v43, %v2919_v11  ;;  %v2924_v22 = vrot.slane %v2919_v11, 4  ;;  %v2788_v62 = vmax.f32 %v2770_v30, 0.0  ;;  %v4324_v40 = vor.u32 %v4323_v2, %v4320_v46  ;;  %v4171_v20 = vld [vmem:[#allocation2 + $0xd0] sm:$0xf]  ;;  %vm13334_vm4 = vmmov %vm13328_vm0 }
 0x2aa   : > { %v4005_v42 = vpop.permute.xlu2 %4004  ;;  %v4311_v24 = vrot.slane %v4310_v3, 4  ;;  %v4340_v15 = vsel %vm9782_vm13, %v4335_v50, %v4339_v63  ;;  %494 = vst [vmem:[#allocation3 + $0x68] sm:$0x1] %v493_v23  ;;  %v4170_v0 = vld [vmem:[#allocation2 + $0xcc] sm:$0xf]  ;;  %v9339_v18 = vrot.slane %v4429_v25, 9 }
 0x2ab   : > { %4044 = vst.msk [vmem:[#allocation4 + $0x60] sm:$0xf] %vm13330_vm7, %v4005_v42  ;;  %v2923_v9 = vsel %vm9764_vm11, %v2915_v32, %v2922_v38  ;;  %v3016_v34 = vsel %vm10849_vm3, %v2924_v22, %v3015_v58  ;;  %v2804_v27 = vpack.c.bf16 %v2788_v62, %v2788_v62  ;;  %4391 = vrot.lane.b32.xlu0 %v4340_v15, %s9653_s13  ;;  %v4325_v4 = vrot.slane %v4324_v40, 4  ;;  %v11483_v17 = vld [vmem:[#allocation2 + $0x88] sm:$0xf]  ;;  %vm13335_vm7 = vmmov %vm13328_vm0 }
 0x2ac   : > { %v3995_v12 = vpop.permute.xlu0 %3994  ;;  %3014 = vst.msk [vmem:[#allocation3 + $0x58] sm:$0xf] %vm402_vm5, %v2923_v9  ;;  %v4316_v28 = vsel %vm9782_vm13, %v4311_v24, %v4315_v26  ;;  %v400_v41 = vsel %vm9723_vm8, 0, %v399_v60  ;;  %v4479_v6 = vrot.slane %v11467_v57, 5  ;;  %v4351_v14 = vshll.u32 %v4171_v20, 16  ;;  %vm13332_vm8 = vmmov %vm13328_vm0 }
 0x2ad   : > { %4039 = vst.msk [vmem:[#allocation4 + $0x4c] sm:$0xf] %vm13331_vm10, %v3995_v12  ;;  %v2926_v35 = vshrl.u32 %v2804_v27, 16  ;;  %v4355_v10 = vshrl.u32 %v4171_v20, 16  ;;  %v2929_v29 = vshll.u32 %v2804_v27, 16  ;;  %v4330_v59 = vsel %vm9782_vm13, %v4325_v4, %v11444_v8  ;;  %vm13336_vm10 = vmmov %vm13328_vm0 }
 0x2ae   : > { %3017 = vst [vmem:[#allocation3 + $0x5c] sm:$0x1] %v3016_v34  ;;  %4387 = vrot.lane.b32.xlu1 %v4316_v28, %s9653_s13  ;;  %v2771_v13 = vpop.f32.mrf.mxu1  ;;  %v4342_v1 = vshrl.u32 %v4170_v0, 16  ;;  %v4345_v5 = vshll.u32 %v4170_v0, 16  ;;  %v4353_v48 = vrot.slane %v4351_v14, 5  ;;  %v4480_v63 = vsel %vm9959_vm1, %v9339_v18, %v4479_v6 }
 0x2af   : > { %401 = vst [vmem:[#allocation2 + $0xd4] sm:$0x1] %v400_v41  ;;  %v2928_v51 = vrot.slane %v2926_v35, 7  ;;  %v2772_v52 = vadd.f32 %v11164_v39, %v2771_v13  ;;  %v4357_v7 = vrot.slane %v4355_v10, 4  ;;  %v3018_v47 = vld [vmem:[#allocation3 + $0x60] sm:$0xf] }
 0x2b0   : > { %4389 = vrot.lane.b32.xlu2 %v4330_v59, %s9653_s13  ;;  %v3991_v54 = vpop.permute.xlu1 %3990  ;;  %v4344_v16 = vrot.slane %v4342_v1, 4  ;;  %v4347_v8 = vrot.slane %v4345_v5, 5  ;;  %v4486_v45 = vrot.slane %v11483_v17, 5  ;;  %v4434_v11 = vld [vmem:[#allocation2 + $0x8c] sm:$0x1]  ;;  %v4481_v12 = vrot.slane %v4479_v6, 4 }
 0x2b1   : > { %4037 = vst.msk [vmem:[#allocation4 + $0x44] sm:$0xf] %vm13332_vm8, %v3991_v54  ;;  %v2931_v53 = vor.u32 %v2929_v29, %v2928_v51  ;;  %v2789_v55 = vmax.f32 %v2772_v52, 0.0  ;;  %v4358_v39 = vor.u32 %v4357_v7, %v4353_v48  ;;  %v4431_v21 = vld [vmem:[#allocation2 + $0x80] sm:$0x1]  ;;  %v4489_v32 = vrot.slane %v4434_v11, 5  ;;  %vm13337_vm8 = vmmov %vm13328_vm0 }
 0x2b2   : > { %v4011_v43 = vpop.permute.xlu2 %4010  ;;  %v4348_v56 = vor.u32 %v4347_v8, %v4344_v16  ;;  %v4488_v60 = vrot.slane %v4486_v45, 4  ;;  %v3022_v38 = vld [vmem:[#allocation3 + $0x68] sm:$0x1]  ;;  %v4482_v40 = vrot.slane %v4431_v21, 5  ;;  %v2932_v24 = vrot.slane %v2928_v51, 4 }
 0x2b3   : > { %4047 = vst.msk [vmem:[#allocation4 + $0x6c] sm:$0xf] %vm13333_vm9, %v4011_v43  ;;  %v3019_v58 = vsel %vm11192_vm6, %v2931_v53, %v3018_v47  ;;  %v2805_v30 = vpack.c.bf16 %v2789_v55, %v2789_v55  ;;  %4533 = vrot.lane.b32.xlu0 %v4480_v63, %s9654_s14  ;;  %v4359_v42 = vrot.slane %v4358_v39, 4  ;;  %v4432_v34 = vld [vmem:[#allocation2 + $0x84] sm:$0xe]  ;;  %vm13338_vm9 = vcmask 224448  }
 0x2b4   : > { %v4001_v46 = vpop.permute.xlu0 %4000  ;;  %3020 = vst [vmem:[#allocation3 + $0x60] sm:$0xf] %v3019_v58  ;;  %v4349_v37 = vrot.slane %v4348_v56, 4  ;;  %v4490_v9 = vsel %vm9959_vm1, %v4488_v60, %v4489_v32  ;;  %v4438_v0 = vld [vmem:[#allocation2 + $0x9c] sm:$0xe]  ;;  %v9340_v41 = vrot.slane %v4432_v34, 9  ;;  %v4483_v17 = vsel %vm9959_vm1, %v4481_v12, %v4482_v40 }
 0x2b5   : > { %4042 = vst.msk [vmem:[#allocation4 + $0x58] sm:$0xf] %vm13328_vm0, %v4001_v46  ;;  %v2934_v31 = vshrl.u32 %v2805_v30, 16  ;;  %v2937_v57 = vshll.u32 %v2805_v30, 16  ;;  %v4439_v4 = vld [vmem:[#allocation2 + $0xa0] sm:$0xf] }
 0x2b6   : > { %v4172_v25 = vld [vmem:[#allocation2 + $0xd4] sm:$0x1]  ;;  %v4354_v3 = vsel %vm9782_vm13, %v4349_v37, %v4353_v48  ;;  %v9342_v6 = vrot.slane %v4438_v0, 9  ;;  %v4500_v14 = vrot.slane %v4439_v4, 5  ;;  %v4435_v10 = vld [vmem:[#allocation2 + $0x90] sm:$0xe]  ;;  %v4487_v13 = vsel %vm9959_vm1, %v9340_v41, %v4486_v45 }
 0x2b7   : > { %v4361_v2 = vshll.u32 %v4172_v25, 16  ;;  %v2936_v23 = vrot.slane %v2934_v31, 7  ;;  %4393 = vrot.lane.b32.xlu1 %v4354_v3, %s9653_s13  ;;  %v4436_v35 = vld [vmem:[#allocation2 + $0x94] sm:$0xf]  ;;  %v4442_v29 = vld [vmem:[#allocation2 + $0xac] sm:$0xf] }
 0x2b8   : > { %v3997_v22 = vpop.permute.xlu1 %3996  ;;  %v4493_v5 = vrot.slane %v4436_v35, 5  ;;  %v9341_v51 = vrot.slane %v4435_v10, 9  ;;  %v4501_v52 = vsel %vm9959_vm1, %v9342_v6, %v4500_v14  ;;  %v4437_v54 = vld [vmem:[#allocation2 + $0x98] sm:$0x1]  ;;  %v4507_v7 = vrot.slane %v4442_v29, 5 }
 0x2b9   : > { %v4363_v62 = vrot.slane %v4361_v2, 5  ;;  %4040 = vst.msk [vmem:[#allocation4 + $0x50] sm:$0xf] %vm13334_vm4, %v3997_v22  ;;  %v2939_v26 = vor.u32 %v2937_v57, %v2936_v23  ;;  %v2941_v20 = vrot.slane %v2936_v23, 4  ;;  %v4443_v47 = vld [vmem:[#allocation2 + $0xb0] sm:$0x1]  ;;  %vm13339_vm4 = vmmov %vm13328_vm0 }
 0x2ba   : > { %v4017_v50 = vpop.permute.xlu2 %4016  ;;  %v4495_v43 = vrot.slane %v4493_v5, 4  ;;  %v4496_v16 = vrot.slane %v4437_v54, 5  ;;  %v4494_v8 = vsel %vm9959_vm1, %v9341_v51, %v4493_v5  ;;  %v468_v53 = vld [vmem:[#allocation3 + $0x8] sm:$0x1]  ;;  %v4509_v55 = vrot.slane %v4507_v7, 4 }
 0x2bb   : > { %4050 = vst.msk [vmem:[#allocation4 + $0x78] sm:$0xf] %vm13335_vm7, %v4017_v50  ;;  %v4364_v15 = vsel %vm9782_vm13, %v4359_v42, %v4363_v62  ;;  %v2940_v28 = vsel %vm9764_vm11, %v2932_v24, %v2939_v26  ;;  %v3023_v18 = vsel %vm10849_vm3, %v2941_v20, %v3022_v38  ;;  %4539 = vrot.lane.b32.xlu0 %v4490_v9, %s9654_s14  ;;  %v4510_v63 = vrot.slane %v4443_v47, 5  ;;  %v4440_v46 = vld [vmem:[#allocation2 + $0xa4] sm:$0x1]  ;;  %vm13340_vm7 = vmmov %vm13338_vm9 }
 0x2bc   : > { %v4007_v27 = vpop.permute.xlu0 %4006  ;;  %4395 = vrot.lane.b32.xlu2 %v4364_v15, %s9653_s13  ;;  %3021 = vst.msk [vmem:[#allocation3 + $0x64] sm:$0xf] %vm402_vm5, %v2940_v28  ;;  %v469_v45 = vsel %vm11124_vm12, 0, %v468_v53  ;;  %v4497_v56 = vsel %vm9959_vm1, %v4495_v43, %v4496_v16  ;;  %v4502_v58 = vrot.slane %v4500_v14, 4  ;;  %v4503_v30 = vrot.slane %v4440_v46, 5 }
 0x2bd   : > { %4045 = vst.msk [vmem:[#allocation4 + $0x64] sm:$0xf] %vm13336_vm10, %v4007_v27  ;;  %v4511_v37 = vsel %vm9959_vm1, %v4509_v55, %v4510_v63  ;;  %v4441_v21 = vld [vmem:[#allocation2 + $0xa8] sm:$0xe]  ;;  %vm13341_vm10 = vmmov %vm13328_vm0  ;;  %v4447_v25 = vld [vmem:[#allocation2 + $0xc0] sm:$0xe] }
 0x2be   : > { %3024 = vst [vmem:[#allocation3 + $0x68] sm:$0x1] %v3023_v18  ;;  %v4448_v60 = vld [vmem:[#allocation2 + $0xc4] sm:$0xf]  ;;  %v9343_v32 = vrot.slane %v4441_v21, 9  ;;  %v4504_v42 = vsel %vm9959_vm1, %v4502_v58, %v4503_v30  ;;  %v9345_v3 = vrot.slane %v4447_v25, 9 }
 0x2bf   : > { %4535 = vrot.lane.b32.xlu1 %v4483_v17, %s9654_s14  ;;  %470 = vst [vmem:[#allocation3 + $0x8] sm:$0x1] %v469_v45  ;;  %v4445_v2 = vld [vmem:[#allocation2 + $0xb8] sm:$0xf]  ;;  %v4521_v23 = vrot.slane %v4448_v60, 5 }
 0x2c0   : > { %v4003_v59 = vpop.permute.xlu1 %4002  ;;  %v4444_v57 = vld [vmem:[#allocation2 + $0xb4] sm:$0xe]  ;;  %v11546_v38 = vld [vmem:[#allocation2 + $0xd0] sm:$0xf]  ;;  %v4514_v62 = vrot.slane %v4445_v2, 5  ;;  %v4508_v50 = vsel %vm9959_vm1, %v9343_v32, %v4507_v7 }
 0x2c1   : > { %4043 = vst.msk [vmem:[#allocation4 + $0x5c] sm:$0xf] %vm13337_vm8, %v4003_v59  ;;  %vm13342_vm8 = vmmov %vm13328_vm0  ;;  %v4446_v40 = vld [vmem:[#allocation2 + $0xbc] sm:$0x1]  ;;  %v9344_v24 = vrot.slane %v4444_v57, 9  ;;  %v4522_v26 = vsel %vm9959_vm1, %v9345_v3, %v4521_v23  ;;  %v4528_v9 = vrot.slane %v11546_v38, 5 }
 0x2c2   : > { %v4088_v1 = vpop.permute.xlu2 %4087  ;;  %v5007_v34 = vld [vmem:[#allocation3] sm:$0xf]  ;;  %v4452_v27 = vld [vmem:[#allocation2 + $0xd4] sm:$0x1]  ;;  %v5010_v15 = vld [vmem:[#allocation3 + $0xc] sm:$0xf] }
 0x2c3   : > { %4134 = vst.msk [vmem:[#allocation4 + $0x44] sm:$0xf] %vm13338_vm9, %v4088_v1  ;;  %4545 = vrot.lane.b32.xlu0 %v4501_v52, %s9654_s14  ;;  %vm13343_vm9 = vmmov %vm13340_vm7  ;;  %v4516_v0 = vrot.slane %v4514_v62, 4  ;;  %v4517_v4 = vrot.slane %v4446_v40, 5  ;;  %v4515_v28 = vsel %vm9959_vm1, %v9344_v24, %v4514_v62  ;;  %v4449_v18 = vld [vmem:[#allocation2 + $0xc8] sm:$0x1] }
 0x2c4   : > { %v4013_v48 = vpop.permute.xlu0 %4012  ;;  %4537 = vrot.lane.b32.xlu2 %v4487_v13, %s9654_s14  ;;  %v5032_v41 = vshrl.u32 %v5007_v34, 16  ;;  %v5035_v17 = vshll.u32 %v5007_v34, 16  ;;  %v4530_v35 = vrot.slane %v4528_v9, 4  ;;  %v4531_v6 = vrot.slane %v4452_v27, 5  ;;  %v5008_v29 = vld [vmem:[#allocation3 + $0x4] sm:$0xf] }
 0x2c5   : > { %4048 = vst.msk [vmem:[#allocation4 + $0x70] sm:$0xf] %vm13328_vm0, %v4013_v48  ;;  %vm13344_vm0 = vmmov %vm13340_vm7  ;;  %v5056_v14 = vshrl.u32 %v5010_v15, 16  ;;  %v5059_v10 = vshll.u32 %v5010_v15, 16  ;;  %v5011_v59 = vld [vmem:[#allocation3 + $0x10] sm:$0xf]  ;;  %v4518_v13 = vsel %vm9959_vm1, %v4516_v0, %v4517_v4 }
 0x2c6   : > { %v4450_v5 = vld [vmem:[#allocation2 + $0xcc] sm:$0xe]  ;;  %v4523_v51 = vrot.slane %v4521_v23, 4  ;;  %v4524_v52 = vrot.slane %v4449_v18, 5  ;;  %v5014_v54 = vld [vmem:[#allocation3 + $0x1c] sm:$0xf] }
 0x2c7   : > { %4541 = vrot.lane.b32.xlu1 %v4494_v8, %s9654_s14  ;;  %v5041_v7 = vshll.u32 %v5008_v29, 16  ;;  %v5045_v47 = vshrl.u32 %v5008_v29, 16  ;;  %v5034_v43 = vrot.slane %v5032_v41, 4  ;;  %v5037_v16 = vrot.slane %v5035_v17, 5  ;;  %v5009_v25 = vld [vmem:[#allocation3 + $0x8] sm:$0x1] }
 0x2c8   : > { %v4009_v39 = vpop.permute.xlu1 %4008  ;;  %v4532_v8 = vsel %vm9959_vm1, %v4530_v35, %v4531_v6  ;;  %v5058_v55 = vrot.slane %v5056_v14, 4  ;;  %v5061_v63 = vrot.slane %v5059_v10, 5  ;;  %v5089_v46 = vshll.u32 %v5014_v54, 16  ;;  %v5015_v60 = vld [vmem:[#allocation3 + $0x20] sm:$0x1] }
 0x2c9   : > { %4046 = vst.msk [vmem:[#allocation4 + $0x68] sm:$0xf] %vm13339_vm4, %v4009_v39  ;;  %vm13345_vm4 = vmmov %vm13344_vm0  ;;  %v5093_v45 = vshrl.u32 %v5014_v54, 16  ;;  %v9346_v39 = vrot.slane %v4450_v5, 9  ;;  %v4525_v58 = vsel %vm9959_vm1, %v4523_v51, %v4524_v52  ;;  %v5043_v30 = vrot.slane %v5041_v7, 5 }
 0x2ca   : > { %v4094_v11 = vpop.permute.xlu2 %4093  ;;  %v5038_v21 = vor.u32 %v5037_v16, %v5034_v43  ;;  %v11573_v32 = vrot.slane %v5089_v46, 5  ;;  %v5013_v57 = vld [vmem:[#allocation3 + $0x18] sm:$0xf]  ;;  %v5019_v40 = vld [vmem:[#allocation3 + $0x30] sm:$0xf] }
 0x2cb   : > { %4137 = vst.msk [vmem:[#allocation4 + $0x50] sm:$0xf] %vm13340_vm7, %v4094_v11  ;;  %4551 = vrot.lane.b32.xlu0 %v4511_v37, %s9654_s14  ;;  %vm13346_vm7 = vmmov %vm13344_vm0  ;;  %v5069_v11 = vshrl.u32 %v5011_v59, 16  ;;  %v5047_v37 = vrot.slane %v5045_v47, 4  ;;  %v4529_v38 = vsel %vm9959_vm1, %v9346_v39, %v4528_v9  ;;  %v5012_v34 = vld [vmem:[#allocation3 + $0x14] sm:$0x1] }
 0x2cc   : > { %v4019_v31 = vpop.permute.xlu0 %4018  ;;  %4543 = vrot.lane.b32.xlu2 %v4497_v56, %s9654_s14  ;;  %v5065_v56 = vshll.u32 %v5011_v59, 16  ;;  %v5080_v15 = vshrl.u32 %v5013_v57, 16  ;;  %v5083_v0 = vshll.u32 %v5013_v57, 16  ;;  %v5016_v9 = vld [vmem:[#allocation3 + $0x24] sm:$0xf]  ;;  %v5128_v18 = vshrl.u32 %v5019_v40, 16 }
 0x2cd   : > { %4051 = vst.msk [vmem:[#allocation4 + $0x7c] sm:$0xf] %vm13341_vm10, %v4019_v31  ;;  %vm13347_vm10 = vmmov %vm13344_vm0  ;;  %v5062_v31 = vor.u32 %v5061_v63, %v5058_v55  ;;  %v5071_v23 = vrot.slane %v5069_v11, 4  ;;  %v5048_v62 = vor.u32 %v5047_v37, %v5043_v30  ;;  %v5131_v41 = vshll.u32 %v5019_v40, 16  ;;  %v5017_v14 = vld [vmem:[#allocation3 + $0x28] sm:$0xf] }
 0x2ce   : > { %v5067_v3 = vrot.slane %v5065_v56, 5  ;;  %v5075_v10 = vshll.u32 %v5012_v34, 16  ;;  %v5104_v29 = vshrl.u32 %v5016_v9, 16  ;;  %v5107_v59 = vshll.u32 %v5016_v9, 16  ;;  %v5024_v34 = vld [vmem:[#allocation3 + $0x44] sm:$0x1] }
 0x2cf   : > { %4547 = vrot.lane.b32.xlu1 %v4504_v42, %s9654_s14  ;;  %v5095_v42 = vrot.slane %v5093_v45, 4  ;;  %v5063_v24 = vrot.slane %v5062_v31, 4  ;;  %v5049_v17 = vrot.slane %v5048_v62, 4  ;;  %v5082_v5 = vrot.slane %v5080_v15, 4  ;;  %v4979_v45 = vld [vmem:[#allocation3 + $0x18] sm:$0xf] }
 0x2d0   : > { %v4015_v22 = vpop.permute.xlu1 %4014  ;;  %v5085_v51 = vrot.slane %v5083_v0, 5  ;;  %v5133_v7 = vrot.slane %v5131_v41, 5  ;;  %v5113_v47 = vshll.u32 %v5017_v14, 16  ;;  %v5106_v63 = vrot.slane %v5104_v29, 4  ;;  %4995 = vst.msk [vmem:[#allocation4 + $0x10] sm:$0xf] %vm402_vm5, %v4979_v45 }
 0x2d1   : > { %4049 = vst.msk [vmem:[#allocation4 + $0x74] sm:$0xf] %vm13342_vm8, %v4015_v22  ;;  %vm13348_vm8 = vmmov %vm13344_vm0  ;;  %v5096_v27 = vor.u32 %v5095_v42, %v11573_v32  ;;  %v5068_v4 = vsel %vm9782_vm13, %v5063_v24, %v5067_v3  ;;  %v5109_v46 = vrot.slane %v5107_v59, 5  ;;  %v5077_v56 = vrot.slane %v5075_v10, 5  ;;  %v4977_v15 = vld [vmem:[#allocation3 + $0xc] sm:$0xf] }
 0x2d2   : > { %v4100_v12 = vpop.permute.xlu2 %4099  ;;  %v5086_v11 = vor.u32 %v5085_v51, %v5082_v5  ;;  %v5021_v9 = vld [vmem:[#allocation3 + $0x38] sm:$0x1]  ;;  %4993 = vst.msk [vmem:[#allocation4 + $0x8] sm:$0xf] %vm402_vm5, %v4977_v15  ;;  %v4978_v59 = vld [vmem:[#allocation3 + $0x10] sm:$0xf] }
 0x2d3   : > { %4140 = vst.msk [vmem:[#allocation4 + $0x5c] sm:$0xf] %vm13343_vm9, %v4100_v12  ;;  %4557 = vrot.lane.b32.xlu0 %v4522_v26, %s9654_s14  ;;  %v5039_v12 = vrot.slane %v5038_v21, 4  ;;  %vm13349_vm9 = vmmov %vm13344_vm0  ;;  %v5029_v45 = vld [vmem:[#allocation3 + $0x58] sm:$0xf] }
 0x2d4   : > { %v4090_v20 = vpop.permute.xlu0 %4089  ;;  %4549 = vrot.lane.b32.xlu2 %v4508_v50, %s9654_s14  ;;  %v5051_v50 = vshll.u32 %v5009_v25, 16  ;;  %4994 = vst.msk [vmem:[#allocation4 + $0xc] sm:$0xf] %vm402_vm5, %v4978_v59 }
 0x2d5   : > { %4135 = vst.msk [vmem:[#allocation4 + $0x48] sm:$0xf] %vm13344_vm0, %v4090_v20  ;;  %v5099_v20 = vshll.u32 %v5015_v60, 16  ;;  %v5044_v6 = vsel %vm9782_vm13, %v5039_v12, %v5043_v30  ;;  %v5018_v30 = vld [vmem:[#allocation3 + $0x2c] sm:$0x1] }
 0x2d6   : > { %v5053_v35 = vrot.slane %v5051_v50, 5  ;;  %v4982_v60 = vld [vmem:[#allocation3 + $0x28] sm:$0xf] }
 0x2d7   : > { %4553 = vrot.lane.b32.xlu1 %v4515_v28, %s9654_s14  ;;  %v5072_v28 = vor.u32 %v5071_v23, %v5067_v3  ;;  %v5115_v3 = vrot.slane %v5113_v47, 5  ;;  %4998 = vst.msk [vmem:[#allocation4 + $0x1c] sm:$0xf] %vm402_vm5, %v4982_v60  ;;  %v5087_v23 = vrot.slane %v5086_v11, 4 }
 0x2d8   : > { %v4086_v1 = vpop.permute.xlu1 %4085  ;;  %v5054_v43 = vsel %vm9782_vm13, %v5049_v17, %v5053_v35  ;;  %v4980_v35 = vld [vmem:[#allocation3 + $0x1c] sm:$0xf] }
 0x2d9   : > { %4133 = vst.msk [vmem:[#allocation4 + $0x40] sm:$0xf] %vm13345_vm4, %v4086_v1  ;;  %v5101_v1 = vrot.slane %v5099_v20, 5  ;;  %v5073_v54 = vrot.slane %v5072_v28, 4  ;;  %vm13350_vm4 = vmmov %vm13344_vm0  ;;  %v5092_v28 = vsel %vm9782_vm13, %v5087_v23, %v11573_v32 }
 0x2da   : > { %v4106_v48 = vpop.permute.xlu2 %4105  ;;  %4996 = vst.msk [vmem:[#allocation4 + $0x14] sm:$0xf] %vm402_vm5, %v4980_v35 }
 0x2db   : > { %4143 = vst.msk [vmem:[#allocation4 + $0x68] sm:$0xf] %vm13346_vm7, %v4106_v48  ;;  %4563 = vrot.lane.b32.xlu0 %v4532_v8, %s9654_s14  ;;  %v5130_v48 = vrot.slane %v5128_v18, 4  ;;  %v5020_v8 = vld [vmem:[#allocation3 + $0x34] sm:$0xf]  ;;  %vm13351_vm7 = vmmov %vm13344_vm0  ;;  %v5078_v42 = vsel %vm9782_vm13, %v5073_v54, %v5077_v56 }
 0x2dc   : > { %v4096_v53 = vpop.permute.xlu0 %4095  ;;  %4555 = vrot.lane.b32.xlu2 %v4518_v13, %s9654_s14  ;;  %v5097_v13 = vrot.slane %v5096_v27, 4  ;;  %v5137_v21 = vshll.u32 %v5020_v8, 16  ;;  %v5141_v57 = vshrl.u32 %v5020_v8, 16  ;;  %v5028_v27 = vld [vmem:[#allocation3 + $0x54] sm:$0xf] }
 0x2dd   : > { %4138 = vst.msk [vmem:[#allocation4 + $0x54] sm:$0xf] %vm13347_vm10, %v4096_v53  ;;  %v5023_v53 = vld [vmem:[#allocation3 + $0x40] sm:$0xf]  ;;  %v5134_v37 = vor.u32 %v5133_v7, %v5130_v48  ;;  %vm13352_vm10 = vmmov %vm13344_vm0  ;;  %v5200_v32 = vshrl.u32 %v5028_v27, 16  ;;  %v5147_v7 = vshll.u32 %v5021_v9, 16 }
 0x2de   : > { %v5102_v39 = vsel %vm9782_vm13, %v5097_v13, %v5101_v1  ;;  %v5161_v31 = vshll.u32 %v5023_v53, 16  ;;  %v5165_v25 = vshrl.u32 %v5023_v53, 16  ;;  %v5139_v12 = vrot.slane %v5137_v21, 5  ;;  %v5025_v1 = vld [vmem:[#allocation3 + $0x48] sm:$0xf] }
 0x2df   : > { %4559 = vrot.lane.b32.xlu1 %v4525_v58, %s9654_s14  ;;  %v5117_v58 = vshrl.u32 %v5017_v14, 16  ;;  %v5135_v50 = vrot.slane %v5134_v37, 4  ;;  %v5143_v41 = vrot.slane %v5141_v57, 4  ;;  %v5203_v13 = vshll.u32 %v5028_v27, 16  ;;  %v5026_v53 = vld [vmem:[#allocation3 + $0x4c] sm:$0xf] }
 0x2e0   : > { %v4092_v2 = vpop.permute.xlu1 %4091  ;;  %v11603_v40 = vrot.slane %v5161_v31, 5  ;;  %v5167_v24 = vrot.slane %v5165_v25, 4  ;;  %v5185_v21 = vshll.u32 %v5026_v53, 16  ;;  %v5189_v31 = vshrl.u32 %v5026_v53, 16 }
 0x2e1   : > { %4136 = vst.msk [vmem:[#allocation4 + $0x4c] sm:$0xf] %vm13348_vm8, %v4092_v2  ;;  %v5110_v2 = vor.u32 %v5109_v46, %v5106_v63  ;;  %vm13353_vm8 = vmmov %vm13344_vm0  ;;  %v5144_v48 = vor.u32 %v5143_v41, %v5139_v12  ;;  %v5179_v63 = vshll.u32 %v5025_v1, 16  ;;  %v5205_v56 = vrot.slane %v5203_v13, 5  ;;  %v4986_v41 = vld [vmem:[#allocation3 + $0x40] sm:$0xf] }
 0x2e2   : > { %v4112_v22 = vpop.permute.xlu2 %4111  ;;  %v5168_v10 = vor.u32 %v5167_v24, %v11603_v40  ;;  %v5149_v60 = vrot.slane %v5147_v7, 5  ;;  %v5191_v24 = vrot.slane %v5189_v31, 4  ;;  %5002 = vst.msk [vmem:[#allocation4 + $0x2c] sm:$0xf] %vm402_vm5, %v4986_v41  ;;  %v5030_v13 = vld [vmem:[#allocation3 + $0x5c] sm:$0x1] }
 0x2e3   : > { %4146 = vst.msk [vmem:[#allocation4 + $0x74] sm:$0xf] %vm13349_vm9, %v4112_v22  ;;  %5227 = vrot.lane.b32.xlu0 %v5068_v4, %s9648_s8  ;;  %v5123_v22 = vshll.u32 %v5018_v30, 16  ;;  %v4985_v4 = vld [vmem:[#allocation3 + $0x3c] sm:$0xf]  ;;  %v5111_v14 = vrot.slane %v5110_v2, 4  ;;  %vm13354_vm9 = vmmov %vm13344_vm0 }
 0x2e4   : > { %v4102_v26 = vpop.permute.xlu0 %4101  ;;  %4561 = vrot.lane.b32.xlu2 %v4529_v38, %s9654_s14  ;;  %v5119_v38 = vrot.slane %v5117_v58, 4  ;;  %5001 = vst.msk [vmem:[#allocation4 + $0x28] sm:$0xf] %vm402_vm5, %v4985_v4  ;;  %v5145_v37 = vrot.slane %v5144_v48, 4  ;;  %v5181_v57 = vrot.slane %v5179_v63, 5  ;;  %v5219_v7 = vshll.u32 %v5030_v13, 16 }
 0x2e5   : > { %4141 = vst.msk [vmem:[#allocation4 + $0x60] sm:$0xf] %vm13344_vm0, %v4102_v26  ;;  %v5022_v26 = vld [vmem:[#allocation3 + $0x3c] sm:$0xf]  ;;  %v5116_v5 = vsel %vm9782_vm13, %v5111_v14, %v5115_v3  ;;  %v5125_v51 = vrot.slane %v5123_v22, 5 }
 0x2e6   : > { %v5120_v18 = vor.u32 %v5119_v38, %v5115_v3  ;;  %v5152_v17 = vshrl.u32 %v5022_v26, 16  ;;  %v5155_v29 = vshll.u32 %v5022_v26, 16  ;;  %v4981_v38 = vld [vmem:[#allocation3 + $0x24] sm:$0xf]  ;;  %v4987_v63 = vld [vmem:[#allocation3 + $0x48] sm:$0xf] }
 0x2e7   : > { %5223 = vrot.lane.b32.xlu1 %v5044_v6, %s9648_s8  ;;  %v5140_v6 = vsel %vm9782_vm13, %v5135_v50, %v5139_v12  ;;  %v11632_v22 = vld [vmem:[#allocation3 + $0x4] sm:$0xf]  ;;  %4997 = vst.msk [vmem:[#allocation4 + $0x18] sm:$0xf] %vm402_vm5, %v4981_v38  ;;  %v5213_v50 = vshrl.u32 %v5029_v45, 16  ;;  %v5187_v12 = vrot.slane %v5185_v21, 5 }
 0x2e8   : > { %v4098_v52 = vpop.permute.xlu1 %4097  ;;  %v5121_v54 = vrot.slane %v5120_v18, 4  ;;  %v5154_v47 = vrot.slane %v5152_v17, 4  ;;  %v5157_v8 = vrot.slane %v5155_v29, 5  ;;  %v5338_v4 = vrot.slane %v11632_v22, 5  ;;  %v4988_v18 = vld [vmem:[#allocation3 + $0x4c] sm:$0xf] }
 0x2e9   : > { %4139 = vst.msk [vmem:[#allocation4 + $0x58] sm:$0xf] %vm13350_vm4, %v4098_v52  ;;  %v5171_v52 = vshll.u32 %v5024_v34, 16  ;;  %v5027_v34 = vld [vmem:[#allocation3 + $0x50] sm:$0x1]  ;;  %v5192_v35 = vor.u32 %v5191_v24, %v5187_v12  ;;  %v5215_v14 = vrot.slane %v5213_v50, 4 }
 0x2ea   : > { %v4366_v16 = vpop.permute.xlu2 %4365  ;;  %v5126_v30 = vsel %vm9782_vm13, %v5121_v54, %v5125_v51  ;;  %v5158_v2 = vor.u32 %v5157_v8, %v5154_v47  ;;  %5004 = vst.msk [vmem:[#allocation4 + $0x34] sm:$0xf] %vm402_vm5, %v4988_v18  ;;  %v5195_v59 = vshll.u32 %v5027_v34, 16  ;;  %v4983_v54 = vld [vmem:[#allocation3 + $0x30] sm:$0xf]  ;;  %vm5537_vm4 = vcmask 257216  }
 0x2eb   : > { %4413 = vst.msk [vmem:[#allocation4 + $0x40] sm:$0xf] %vm2436_vm15, %v4366_v16  ;;  %5233 = vrot.lane.b32.xlu0 %v5102_v39, %s9648_s8  ;;  %v5169_v16 = vrot.slane %v5168_v10, 4  ;;  %v5202_v39 = vrot.slane %v5200_v32, 4  ;;  %v5173_v11 = vrot.slane %v5171_v52, 5  ;;  %v5340_v32 = vrot.slane %v5338_v4, 4 }
 0x2ec   : > { %v4108_v55 = vpop.permute.xlu0 %4107  ;;  %5225 = vrot.lane.b32.xlu2 %v5054_v43, %s9648_s8  ;;  %v5159_v27 = vrot.slane %v5158_v2, 4  ;;  %v5197_v48 = vrot.slane %v5195_v59, 5  ;;  %v5288_v8 = vld [vmem:[#allocation3] sm:$0xe]  ;;  %4999 = vst.msk [vmem:[#allocation4 + $0x20] sm:$0xf] %vm402_vm5, %v4983_v54 }
 0x2ed   : > { %4144 = vst.msk [vmem:[#allocation4 + $0x6c] sm:$0xf] %vm13351_vm7, %v4108_v55  ;;  %v5176_v55 = vshrl.u32 %v5025_v1, 16  ;;  %v5174_v25 = vsel %vm9782_vm13, %v5169_v16, %v5173_v11  ;;  %v5206_v3 = vor.u32 %v5205_v56, %v5202_v39  ;;  %v5295_v39 = vld [vmem:[#allocation3 + $0x1c] sm:$0xf]  ;;  %vm5987_vm7 = vcmask 388416  }
 0x2ee   : > { %v5164_v17 = vsel %vm9782_vm13, %v5159_v27, %v11603_v40  ;;  %5003 = vst.msk [vmem:[#allocation4 + $0x30] sm:$0xf] %vm402_vm5, %v4987_v63  ;;  %v5294_v11 = vld [vmem:[#allocation3 + $0x18] sm:$0xe]  ;;  %v5352_v21 = vrot.slane %v5295_v39, 5 }
 0x2ef   : > { %5229 = vrot.lane.b32.xlu1 %v5078_v42, %s9648_s8  ;;  %v5209_v42 = vshll.u32 %v5029_v45, 16  ;;  %v5178_v23 = vrot.slane %v5176_v55, 4  ;;  %v9387_v45 = vrot.slane %v5288_v8, 9  ;;  %v4984_v31 = vld [vmem:[#allocation3 + $0x34] sm:$0xf] }
 0x2f0   : > { %v4104_v62 = vpop.permute.xlu1 %4103  ;;  %5000 = vst.msk [vmem:[#allocation4 + $0x24] sm:$0xf] %vm402_vm5, %v4984_v31  ;;  %v5293_v50 = vld [vmem:[#allocation3 + $0x14] sm:$0x1]  ;;  %v5308_v63 = vld [vmem:[#allocation3 + $0x50] sm:$0x1] }
 0x2f1   : > { %4142 = vst.msk [vmem:[#allocation4 + $0x64] sm:$0xf] %vm13352_vm10, %v4104_v62  ;;  %v5150_v62 = vsel %vm9782_vm13, %v5145_v37, %v5149_v60  ;;  %v5182_v9 = vor.u32 %v5181_v57, %v5178_v23  ;;  %v5298_v60 = vld [vmem:[#allocation3 + $0x28] sm:$0xf]  ;;  %v5348_v27 = vrot.slane %v5293_v50, 5  ;;  %vm6085_vm10 = vcmask 454016  }
 0x2f2   : > { %v4372_v20 = vpop.permute.xlu2 %4371  ;;  %v5359_v38 = vrot.slane %v5298_v60, 5 }
 0x2f3   : > { %4416 = vst.msk [vmem:[#allocation4 + $0x4c] sm:$0xf] %vm2436_vm15, %v4372_v20  ;;  %5239 = vrot.lane.b32.xlu0 %v5140_v6, %s9648_s8  ;;  %v5211_v20 = vrot.slane %v5209_v42, 5  ;;  %v5290_v6 = vld [vmem:[#allocation3 + $0x8] sm:$0x1]  ;;  %v5183_v29 = vrot.slane %v5182_v9, 4 }
 0x2f4   : > { %v4114_v0 = vpop.permute.xlu0 %4113  ;;  %5231 = vrot.lane.b32.xlu2 %v5092_v28, %s9648_s8  ;;  %v5341_v40 = vrot.slane %v5290_v6, 5  ;;  %v9389_v42 = vrot.slane %v5294_v11, 9  ;;  %v5361_v34 = vrot.slane %v5359_v38, 4  ;;  %v5296_v9 = vld [vmem:[#allocation3 + $0x20] sm:$0x1] }
 0x2f5   : > { %4147 = vst.msk [vmem:[#allocation4 + $0x78] sm:$0xf] %vm13353_vm8, %v4114_v0  ;;  %v5207_v0 = vrot.slane %v5206_v3, 4  ;;  %v5188_v1 = vsel %vm9782_vm13, %v5183_v29, %v5187_v12  ;;  %v5216_v51 = vor.u32 %v5215_v14, %v5211_v20  ;;  %v5291_v3 = vld [vmem:[#allocation3 + $0xc] sm:$0xe]  ;;  %v5355_v41 = vrot.slane %v5296_v9, 5 }
 0x2f6   : > { %v5353_v57 = vsel %vm9959_vm1, %v9389_v42, %v5352_v21  ;;  %v9388_v22 = vrot.slane %v5291_v3, 9  ;;  %v5297_v6 = vld [vmem:[#allocation3 + $0x24] sm:$0xe]  ;;  %v5303_v29 = vld [vmem:[#allocation3 + $0x3c] sm:$0xe]  ;;  %vm6535_vm8 = vcmask 585216  }
 0x2f7   : > { %5235 = vrot.lane.b32.xlu1 %v5116_v5, %s9648_s8  ;;  %v5212_v10 = vsel %vm9782_vm13, %v5207_v0, %v5211_v20  ;;  %v5193_v5 = vrot.slane %v5192_v35, 4  ;;  %v5217_v55 = vrot.slane %v5216_v51, 4  ;;  %v4990_v20 = vld [vmem:[#allocation3 + $0x58] sm:$0xf]  ;;  %v5300_v51 = vld [vmem:[#allocation3 + $0x30] sm:$0xe] }
 0x2f8   : > { %v4110_v43 = vpop.permute.xlu1 %4109  ;;  %5006 = vst.msk [vmem:[#allocation4 + $0x3c] sm:$0xf] %vm402_vm5, %v4990_v20  ;;  %v5305_v11 = vld [vmem:[#allocation3 + $0x44] sm:$0x1]  ;;  %v7103_v42 = vld [vmem:[#allocation3 + $0x60] sm:$0xf] }
 0x2f9   : > { %4145 = vst.msk [vmem:[#allocation4 + $0x70] sm:$0xf] %vm13354_vm9, %v4110_v43  ;;  %v5342_v43 = vsel %vm9959_vm1, %v5340_v32, %v5341_v40  ;;  %v5198_v53 = vsel %vm9782_vm13, %v5193_v5, %v5197_v48  ;;  %v5301_v32 = vld [vmem:[#allocation3 + $0x34] sm:$0xf]  ;;  %v9390_v40 = vrot.slane %v5297_v6, 9  ;;  %v9392_v5 = vrot.slane %v5303_v29, 9 }
 0x2fa   : > { %v4378_v46 = vpop.permute.xlu2 %4377  ;;  %v5366_v54 = vrot.slane %v5301_v32, 5  ;;  %v5311_v20 = vld [vmem:[#allocation3 + $0x5c] sm:$0x1]  ;;  %v7104_v9 = vld [vmem:[#allocation3 + $0x64] sm:$0xf]  ;;  %vm6638_vm9 = vcmask 588800  }
 0x2fb   : > { %4419 = vst.msk [vmem:[#allocation4 + $0x58] sm:$0xf] %vm2436_vm15, %v4378_v46  ;;  %5245 = vrot.lane.b32.xlu0 %v5174_v25, %s9648_s8  ;;  %v5221_v46 = vrot.slane %v5219_v7, 5  ;;  %v5339_v25 = vsel %vm9959_vm1, %v9387_v45, %v5338_v4  ;;  %v5459_v29 = vld [vmem:[#allocation3 + $0x18] sm:$0xf] }
 0x2fc   : > { %v4368_v58 = vpop.permute.xlu0 %4367  ;;  %5237 = vrot.lane.b32.xlu2 %v5126_v30, %s9648_s8  ;;  %v4989_v30 = vld [vmem:[#allocation3 + $0x54] sm:$0xf] }
 0x2fd   : > { %4414 = vst.msk [vmem:[#allocation4 + $0x44] sm:$0xf] %vm2436_vm15, %v4368_v58  ;;  %v5222_v56 = vsel %vm9782_vm13, %v5217_v55, %v5221_v46  ;;  %v5292_v58 = vld [vmem:[#allocation3 + $0x10] sm:$0xf]  ;;  %v5368_v55 = vrot.slane %v5366_v54, 4 }
 0x2fe   : > { %5005 = vst.msk [vmem:[#allocation4 + $0x38] sm:$0xf] %vm402_vm5, %v4989_v30  ;;  %v5345_v23 = vrot.slane %v5292_v58, 5 }
 0x2ff   : > { %5241 = vrot.lane.b32.xlu1 %v5150_v62, %s9648_s8 }
 0x300   : > { %v4116_v26 = vpop.permute.xlu1 %4115  ;;  %v5347_v12 = vrot.slane %v5345_v23, 4  ;;  %v5346_v24 = vsel %vm9959_vm1, %v9388_v22, %v5345_v23  ;;  %v5310_v23 = vld [vmem:[#allocation3 + $0x58] sm:$0xf]  ;;  %v5309_v22 = vld [vmem:[#allocation3 + $0x54] sm:$0xe] }
 0x301   : > { %4148 = vst.msk [vmem:[#allocation4 + $0x7c] sm:$0xf] %vm13344_vm0, %v4116_v26  ;;  %v5299_v26 = vld [vmem:[#allocation3 + $0x2c] sm:$0x1]  ;;  %v5387_v50 = vrot.slane %v5310_v23, 5  ;;  %vm13355_vm0 = vcmask 1041408  }
 0x302   : > { %v4384_v15 = vpop.permute.xlu2 %4383  ;;  %v5362_v0 = vrot.slane %v5299_v26, 5  ;;  %v5349_v4 = vsel %vm9959_vm1, %v5347_v12, %v5348_v27  ;;  %v5457_v12 = vld [vmem:[#allocation3 + $0xc] sm:$0xf] }
 0x303   : > { %4422 = vst.msk [vmem:[#allocation4 + $0x64] sm:$0xf] %vm2436_vm15, %v4384_v15  ;;  %5251 = vrot.lane.b32.xlu0 %v5212_v10, %s9648_s8 }
 0x304   : > { %v4374_v28 = vpop.permute.xlu0 %4373  ;;  %5243 = vrot.lane.b32.xlu2 %v5164_v17, %s9648_s8  ;;  %v5363_v18 = vsel %vm9959_vm1, %v5361_v34, %v5362_v0  ;;  %v5304_v17 = vld [vmem:[#allocation3 + $0x40] sm:$0xf]  ;;  %v5390_v0 = vrot.slane %v5311_v20, 5 }
 0x305   : > { %4417 = vst.msk [vmem:[#allocation4 + $0x50] sm:$0xf] %vm2436_vm15, %v4374_v28  ;;  %v5354_v28 = vrot.slane %v5352_v21, 4  ;;  %v5373_v59 = vrot.slane %v5304_v17, 5  ;;  %v5376_v21 = vrot.slane %v5305_v11, 5 }
 0x306   : > { %v5460_v17 = vld [vmem:[#allocation3 + $0x1c] sm:$0xf]  ;;  %v5561_v11 = vld [vmem:[#allocation3 + $0x28] sm:$0xf] }
 0x307   : > { %5247 = vrot.lane.b32.xlu1 %v5188_v1, %s9648_s8  ;;  %v5356_v10 = vsel %vm9959_vm1, %v5354_v28, %v5355_v41  ;;  %v5307_v1 = vld [vmem:[#allocation3 + $0x4c] sm:$0xf]  ;;  %v5374_v48 = vsel %vm9959_vm1, %v9392_v5, %v5373_v59  ;;  %v5375_v30 = vrot.slane %v5373_v59, 4  ;;  %v5463_v59 = vld [vmem:[#allocation3 + $0x30] sm:$0xf] }
 0x308   : > { %v4370_v52 = vpop.permute.xlu1 %4369  ;;  %v5380_v7 = vrot.slane %v5307_v1, 5  ;;  %v5462_v5 = vld [vmem:[#allocation3 + $0x28] sm:$0xf] }
 0x309   : > { %4415 = vst.msk [vmem:[#allocation4 + $0x48] sm:$0xf] %vm2436_vm15, %v4370_v52  ;;  %v5360_v52 = vsel %vm9959_vm1, %v9390_v40, %v5359_v38  ;;  %v5377_v3 = vsel %vm9959_vm1, %v5375_v30, %v5376_v21 }
 0x30a   : > { %v4390_v47 = vpop.permute.xlu2 %4389  ;;  %v5382_v46 = vrot.slane %v5380_v7, 4 }
 0x30b   : > { %4425 = vst.msk [vmem:[#allocation4 + $0x70] sm:$0xf] %vm2436_vm15, %v4390_v47  ;;  %5394 = vrot.lane.b32.xlu0 %v5342_v43, %s9650_s10  ;;  %v9391_v47 = vrot.slane %v5300_v51, 9 }
 0x30c   : > { %v4380_v16 = vpop.permute.xlu0 %4379  ;;  %5249 = vrot.lane.b32.xlu2 %v5198_v53, %s9648_s8 }
 0x30d   : > { %4420 = vst.msk [vmem:[#allocation4 + $0x5c] sm:$0xf] %vm2436_vm15, %v4380_v16  ;;  %v5302_v16 = vld [vmem:[#allocation3 + $0x38] sm:$0x1]  ;;  %v5367_v53 = vsel %vm9959_vm1, %v9391_v47, %v5366_v54 }
 0x30e   : > { %v5369_v45 = vrot.slane %v5302_v16, 5  ;;  %v5465_v16 = vld [vmem:[#allocation3 + $0x3c] sm:$0xf] }
 0x30f   : > { %5253 = vrot.lane.b32.xlu1 %v5222_v56, %s9648_s8  ;;  %v5383_v56 = vrot.slane %v5308_v63, 5 }
 0x310   : > { %v4376_v37 = vpop.permute.xlu1 %4375  ;;  %v5370_v58 = vsel %vm9959_vm1, %v5368_v55, %v5369_v45  ;;  %v5555_v45 = vld [vmem:[#allocation3 + $0x10] sm:$0xf] }
 0x311   : > { %4418 = vst.msk [vmem:[#allocation4 + $0x54] sm:$0xf] %vm2436_vm15, %v4376_v37  ;;  %v5384_v37 = vsel %vm9959_vm1, %v5382_v46, %v5383_v56  ;;  %v5554_v46 = vld [vmem:[#allocation3 + $0xc] sm:$0xf]  ;;  %v5467_v56 = vld [vmem:[#allocation3 + $0x48] sm:$0xf] }
 0x312   : > { %v5579_v21 = vshrl.u32 %v5554_v46, 16 }
 0x313   : > { %5400 = vrot.lane.b32.xlu0 %v5353_v57, %s9650_s10 }
 0x314   : > { %v4386_v2 = vpop.permute.xlu0 %4385  ;;  %5392 = vrot.lane.b32.xlu2 %v5339_v25, %s9650_s10  ;;  %v5306_v25 = vld [vmem:[#allocation3 + $0x48] sm:$0xe] }
 0x315   : > { %4423 = vst.msk [vmem:[#allocation4 + $0x68] sm:$0xf] %vm2436_vm15, %v4386_v2  ;;  %v9393_v57 = vrot.slane %v5306_v25, 9 }
 0x316   : > { %v4396_v62 = vpop.permute.xlu2 %4395 }
 0x317   : > { %4428 = vst.msk [vmem:[#allocation4 + $0x7c] sm:$0xf] %vm2436_vm15, %v4396_v62  ;;  %5396 = vrot.lane.b32.xlu1 %v5346_v24, %s9650_s10  ;;  %v5381_v62 = vsel %vm9959_vm1, %v9393_v57, %v5380_v7  ;;  %v9394_v24 = vrot.slane %v5309_v22, 9  ;;  %v5464_v7 = vld [vmem:[#allocation3 + $0x34] sm:$0xf]  ;;  %v5640_v57 = vshrl.u32 %v5561_v11, 16 }
 0x318   : > { %v4382_v15 = vpop.permute.xlu1 %4381 }
 0x319   : > { %4421 = vst.msk [vmem:[#allocation4 + $0x60] sm:$0xf] %vm2436_vm15, %v4382_v15  ;;  %v5388_v27 = vsel %vm9959_vm1, %v9394_v24, %v5387_v50  ;;  %v5389_v15 = vrot.slane %v5387_v50, 4  ;;  %v5581_v50 = vrot.slane %v5579_v21, 4  ;;  %v5570_v21 = vld [vmem:[#allocation3 + $0x4c] sm:$0xf] }
 0x31b   : > { %5406 = vrot.lane.b32.xlu0 %v5363_v18, %s9650_s10  ;;  %v5391_v18 = vsel %vm9959_vm1, %v5389_v15, %v5390_v0  ;;  %v5470_v15 = vld [vmem:[#allocation3 + $0x58] sm:$0xf] }
 0x31c   : > { %5398 = vrot.lane.b32.xlu2 %v5349_v4, %s9650_s10 }
 0x31d   : > { %v4392_v14 = vpop.permute.xlu0 %4391 }
 0x31e   : > { %v4538_v35 = vpop.permute.xlu2 %4537  ;;  %4426 = vst.msk [vmem:[#allocation4 + $0x74] sm:$0xf] %vm2436_vm15, %v4392_v14  ;;  %v5458_v14 = vld [vmem:[#allocation3 + $0x10] sm:$0xf] }
 0x31f   : > { %4583 = vst.msk [vmem:[#allocation4 + $0x48] sm:$0xf] %vm2605_vm2, %v4538_v35  ;;  %5402 = vrot.lane.b32.xlu1 %v5356_v10, %s9650_s10 }
 0x320   : > { %v4388_v13 = vpop.permute.xlu1 %4387 }
 0x321   : > { %4424 = vst.msk [vmem:[#allocation4 + $0x6c] sm:$0xf] %vm2436_vm15, %v4388_v13  ;;  %v5461_v13 = vld [vmem:[#allocation3 + $0x24] sm:$0xf] }
 0x323   : > { %5412 = vrot.lane.b32.xlu0 %v5374_v48, %s9650_s10 }
 0x324   : > { %5404 = vrot.lane.b32.xlu2 %v5360_v52, %s9650_s10  ;;  %v5466_v52 = vld [vmem:[#allocation3 + $0x40] sm:$0xf] }
 0x325   : > { %v4534_v8 = vpop.permute.xlu0 %4533 }
 0x326   : > { %v4544_v43 = vpop.permute.xlu2 %4543  ;;  %4581 = vst.msk [vmem:[#allocation4 + $0x40] sm:$0xf] %vm2605_vm2, %v4534_v8  ;;  %v5469_v8 = vld [vmem:[#allocation3 + $0x54] sm:$0xf] }
 0x327   : > { %4586 = vst.msk [vmem:[#allocation4 + $0x54] sm:$0xf] %vm2605_vm2, %v4544_v43  ;;  %5408 = vrot.lane.b32.xlu1 %v5367_v53, %s9650_s10  ;;  %v5557_v43 = vld [vmem:[#allocation3 + $0x18] sm:$0xf] }
 0x328   : > { %v5603_v53 = vshrl.u32 %v5557_v43, 16  ;;  %v5606_v55 = vshll.u32 %v5557_v43, 16 }
 0x329   : > { %v4394_v39 = vpop.permute.xlu1 %4393 }
 0x32a   : > { %4427 = vst.msk [vmem:[#allocation4 + $0x78] sm:$0xf] %vm2436_vm15, %v4394_v39  ;;  %vm5271_vm15 = vcmask 126016   ;;  %v5605_v30 = vrot.slane %v5603_v53, 4 }
 0x32b   : > { %5418 = vrot.lane.b32.xlu0 %v5384_v37, %s9650_s10  ;;  %v5608_v37 = vrot.slane %v5606_v55, 5 }
 0x32c   : > { %5410 = vrot.lane.b32.xlu2 %v5370_v58, %s9650_s10  ;;  %v5558_v58 = vld [vmem:[#allocation3 + $0x1c] sm:$0xf] }
 0x32d   : > { %v9349_v60 = vld [vmem:[#allocation4 + $0x40] sm:$0xf]  ;;  %v4540_v2 = vpop.permute.xlu0 %4539  ;;  %v5612_v22 = vshll.u32 %v5558_v58, 16 }
 0x32e   : > { %v4550_v31 = vpop.permute.xlu2 %4549  ;;  %7119 = vst.msk [vmem:[#allocation4 + $0x40] sm:$0xf] %vm402_vm5, %v7103_v42  ;;  %v5592_v42 = vshrl.u32 %v5555_v45, 16 }
 0x32f   : > { %4589 = vst.msk [vmem:[#allocation4 + $0x60] sm:$0xf] %vm2605_vm2, %v4550_v31  ;;  %5414 = vrot.lane.b32.xlu1 %v5377_v3, %s9650_s10  ;;  %v5582_v31 = vshll.u32 %v5554_v46, 16  ;;  %v5468_v3 = vld [vmem:[#allocation3 + $0x4c] sm:$0xf] }
 0x330   : > { %4584 = vst.msk [vmem:[#allocation4 + $0x4c] sm:$0xf] %vm2605_vm2, %v4540_v2  ;;  %v5636_v2 = vshll.u32 %v5561_v11, 16 }
 0x331   : > { %v4536_v38 = vpop.permute.xlu1 %4535 }
 0x332   : > { %4582 = vst.msk [vmem:[#allocation4 + $0x44] sm:$0xf] %vm2605_vm2, %v4536_v38  ;;  %v5472_v38 = vld [vmem:[#allocation3 + $0x64] sm:$0xf] }
 0x333   : > { %5489 = vrot.lane.b32.xlu0 %v5457_v12, %s9652_s12  ;;  %v5584_v12 = vrot.slane %v5582_v31, 5 }
 0x334   : > { %5416 = vrot.lane.b32.xlu2 %v5381_v62, %s9650_s10  ;;  %v5609_v62 = vor.u32 %v5608_v37, %v5605_v30 }
 0x335   : > { %v4546_v34 = vpop.permute.xlu0 %4545 }
 0x336   : > { %v4556_v26 = vpop.permute.xlu2 %4555  ;;  %4587 = vst.msk [vmem:[#allocation4 + $0x58] sm:$0xf] %vm2605_vm2, %v4546_v34  ;;  %v5556_v34 = vld [vmem:[#allocation3 + $0x14] sm:$0x1] }
 0x337   : > { %4592 = vst.msk [vmem:[#allocation4 + $0x6c] sm:$0xf] %vm2605_vm2, %v4556_v26  ;;  %5420 = vrot.lane.b32.xlu1 %v5388_v27, %s9650_s10  ;;  %v9582_v51 = vld [vmem:[#allocation4 + $0x48] sm:$0xff]  ;;  %v5616_v26 = vshrl.u32 %v5558_v58, 16  ;;  %v5594_v27 = vrot.slane %v5592_v42, 4 }
 0x339   : > { %v9581_v4 = vld [vmem:[#allocation4 + $0x40] sm:$0xf0]  ;;  %v4542_v28 = vpop.permute.xlu1 %4541 }
 0x33a   : > { %7120 = vst.msk [vmem:[#allocation4 + $0x44] sm:$0xf] %vm402_vm5, %v7104_v9  ;;  %v9350_v41 = vor.u32 %v9581_v4, %v9349_v60  ;;  %v5588_v60 = vshll.u32 %v5555_v45, 16  ;;  %v11764_v9 = vrot.slane %v5636_v2, 5  ;;  %v5642_v4 = vrot.slane %v5640_v57, 4 }
 0x33b   : > { %4585 = vst.msk [vmem:[#allocation4 + $0x50] sm:$0xf] %vm2605_vm2, %v4542_v28  ;;  %5495 = vrot.lane.b32.xlu0 %v5460_v17, %s9652_s12  ;;  %v5614_v28 = vrot.slane %v5612_v22, 5  ;;  %v5559_v17 = vld [vmem:[#allocation3 + $0x20] sm:$0x1] }
 0x33c   : > { %5422 = vrot.lane.b32.xlu2 %v5391_v18, %s9650_s10  ;;  %9379 = vmatmul.msk.bf16.vlgmr.msrb.gmra.mxu1 %vm2696_vm14, %v9350_v41  ;;  %v5590_v20 = vrot.slane %v5588_v60, 5  ;;  %v5610_v18 = vrot.slane %v5609_v62, 4  ;;  %v5585_v41 = vor.u32 %v5584_v12, %v5581_v50  ;;  %v5708_v50 = vshll.u32 %v5570_v21, 16 }
 0x33d   : > { %v4552_v6 = vpop.permute.xlu0 %4551  ;;  %v5712_v12 = vshrl.u32 %v5570_v21, 16  ;;  %v5573_v21 = vld [vmem:[#allocation3 + $0x58] sm:$0xf] }
 0x33e   : > { %v4562_v35 = vpop.permute.xlu2 %4561  ;;  %4590 = vst.msk [vmem:[#allocation4 + $0x64] sm:$0xf] %vm2605_vm2, %v4552_v6  ;;  %v5598_v6 = vshll.u32 %v5556_v34, 16 }
 0x33f   : > { %4595 = vst.msk [vmem:[#allocation4 + $0x78] sm:$0xf] %vm2605_vm2, %v4562_v35  ;;  %5491 = vrot.lane.b32.xlu1 %v5458_v14, %s9652_s12  ;;  %v5562_v14 = vld [vmem:[#allocation3 + $0x2c] sm:$0x1] }
 0x341   : > { %v4548_v10 = vpop.permute.xlu1 %4547 }
 0x342   : > { %4588 = vst.msk [vmem:[#allocation4 + $0x5c] sm:$0xf] %vm2605_vm2, %v4548_v10  ;;  %v9583_v23 = vld [vmem:[#allocation4 + $0x50] sm:$0xff]  ;;  %v5618_v10 = vrot.slane %v5616_v26, 4 }
 0x343   : > { %5501 = vrot.lane.b32.xlu0 %v5463_v59, %s9652_s12  ;;  %v5471_v59 = vld [vmem:[#allocation3 + $0x60] sm:$0xf] }
 0x344   : > { %5493 = vrot.lane.b32.xlu2 %v5459_v29, %s9652_s12  ;;  %v5560_v29 = vld [vmem:[#allocation3 + $0x24] sm:$0xf]  ;;  %v5619_v45 = vor.u32 %v5618_v10, %v5614_v28 }
 0x345   : > { %v4558_v40 = vpop.permute.xlu0 %4557 }
 0x346   : > { %v5226_v32 = vpop.permute.xlu2 %5225  ;;  %4593 = vst.msk [vmem:[#allocation4 + $0x70] sm:$0xf] %vm2605_vm2, %v4558_v40  ;;  %v5643_v40 = vor.u32 %v5642_v4, %v11764_v9 }
 0x347   : > { %5273 = vst.msk [vmem:[#allocation4 + $0x4] sm:$0xf] %vm5271_vm15, %v5226_v32  ;;  %5497 = vrot.lane.b32.xlu1 %v5461_v13, %s9652_s12  ;;  %v5595_v32 = vor.u32 %v5594_v27, %v5590_v20  ;;  %v5566_v13 = vld [vmem:[#allocation3 + $0x3c] sm:$0xf] }
 0x348   : > { %v5675_v43 = vshrl.u32 %v5566_v13, 16  ;;  %v5644_v46 = vrot.slane %v5643_v40, 4  ;;  %v5571_v40 = vld [vmem:[#allocation3 + $0x50] sm:$0x1] }
 0x349   : > { %v4554_v1 = vpop.permute.xlu1 %4553 }
 0x34a   : > { %4591 = vst.msk [vmem:[#allocation4 + $0x68] sm:$0xf] %vm2605_vm2, %v4554_v1  ;;  %v5615_v1 = vsel %vm9782_vm13, %v5610_v18, %v5614_v28  ;;  %v5677_v60 = vrot.slane %v5675_v43, 4 }
 0x34b   : > { %5507 = vrot.lane.b32.xlu0 %v5466_v52, %s9652_s12  ;;  %v5627_v52 = vshrl.u32 %v5560_v29, 16 }
 0x34c   : > { %5499 = vrot.lane.b32.xlu2 %v5462_v5, %s9652_s12  ;;  %9380 = vmatmul.msk.bf16.gmra.mxu1 %vm2696_vm14, %v9582_v51  ;;  %v5586_v5 = vrot.slane %v5585_v41, 4  ;;  %v5622_v51 = vshll.u32 %v5559_v17, 16 }
 0x34d   : > { %v4564_v48 = vpop.permute.xlu0 %4563  ;;  %v5629_v11 = vrot.slane %v5627_v52, 4  ;;  %v5575_v52 = vld [vmem:[#allocation3 + $0x60] sm:$0xf] }
 0x34e   : > { %v5232_v54 = vpop.permute.xlu2 %5231  ;;  %4596 = vst.msk [vmem:[#allocation4 + $0x7c] sm:$0xf] %vm2605_vm2, %v4564_v48  ;;  %v5591_v53 = vsel %vm9782_vm13, %v5586_v5, %v5590_v20 }
 0x34f   : > { %5276 = vst.msk [vmem:[#allocation4 + $0x10] sm:$0xf] %vm5271_vm15, %v5232_v54  ;;  %5503 = vrot.lane.b32.xlu1 %v5464_v7, %s9652_s12  ;;  %v5630_v54 = vshll.u32 %v5560_v29, 16  ;;  %v5600_v7 = vrot.slane %v5598_v6, 5  ;;  %v5714_v6 = vrot.slane %v5712_v12, 4  ;;  %v5732_v12 = vshll.u32 %v5573_v21, 16 }
 0x350   : > { %v5565_v29 = vld [vmem:[#allocation3 + $0x38] sm:$0x1] }
 0x351   : > { %v4560_v47 = vpop.permute.xlu1 %4559  ;;  %v5632_v58 = vrot.slane %v5630_v54, 5 }
 0x352   : > { %4594 = vst.msk [vmem:[#allocation4 + $0x74] sm:$0xf] %vm2605_vm2, %v4560_v47  ;;  %v5646_v47 = vshll.u32 %v5562_v14, 16  ;;  %vm5440_vm2 = vcmask 191616  }
 0x353   : > { %5513 = vrot.lane.b32.xlu0 %v5469_v8, %s9652_s12  ;;  %v5563_v8 = vld [vmem:[#allocation3 + $0x30] sm:$0xf]  ;;  %v5633_v26 = vor.u32 %v5632_v58, %v5629_v11 }
 0x354   : > { %5505 = vrot.lane.b32.xlu2 %v5465_v16, %s9652_s12  ;;  %v5678_v16 = vshll.u32 %v5566_v13, 16  ;;  %v5651_v30 = vshrl.u32 %v5563_v8, 16  ;;  %v5654_v37 = vshll.u32 %v5563_v8, 16  ;;  %v5569_v13 = vld [vmem:[#allocation3 + $0x48] sm:$0xf] }
 0x355   : > { %v5228_v39 = vpop.permute.xlu0 %5227  ;;  %v5634_v14 = vrot.slane %v5633_v26, 4  ;;  %v5702_v8 = vshll.u32 %v5569_v13, 16 }
 0x356   : > { %v5238_v63 = vpop.permute.xlu2 %5237  ;;  %5274 = vst.msk [vmem:[#allocation4 + $0x8] sm:$0xf] %vm5271_vm15, %v5228_v39  ;;  %v5567_v39 = vld [vmem:[#allocation3 + $0x40] sm:$0xf]  ;;  %v5680_v42 = vrot.slane %v5678_v16, 5  ;;  %v5653_v20 = vrot.slane %v5651_v30, 4 }
 0x357   : > { %5279 = vst.msk [vmem:[#allocation4 + $0x1c] sm:$0xf] %vm5271_vm15, %v5238_v63  ;;  %5509 = vrot.lane.b32.xlu1 %v5467_v56, %s9652_s12  ;;  %v5596_v63 = vrot.slane %v5595_v32, 4  ;;  %v5564_v56 = vld [vmem:[#allocation3 + $0x34] sm:$0xf]  ;;  %v5684_v62 = vshll.u32 %v5567_v39, 16 }
 0x358   : > { %v5660_v57 = vshll.u32 %v5564_v56, 16  ;;  %v5656_v34 = vrot.slane %v5654_v37, 5  ;;  %v5688_v28 = vshrl.u32 %v5567_v39, 16  ;;  %v5699_v16 = vshrl.u32 %v5569_v13, 16 }
 0x359   : > { %v5224_v25 = vpop.permute.xlu1 %5223  ;;  %v5601_v2 = vsel %vm9782_vm13, %v5596_v63, %v5600_v7  ;;  %v5686_v17 = vrot.slane %v5684_v62, 5  ;;  %v5750_v63 = vshll.u32 %v5575_v52, 16  ;;  %v9585_v62 = vld [vmem:[#allocation4 + $0x60] sm:$0xff] }
 0x35a   : > { %5272 = vst.msk [vmem:[#allocation4] sm:$0xf] %vm5271_vm15, %v5224_v25  ;;  %v5648_v25 = vrot.slane %v5646_v47, 5  ;;  %v5662_v18 = vrot.slane %v5660_v57, 5  ;;  %v5657_v10 = vor.u32 %v5656_v34, %v5653_v20  ;;  %v5568_v47 = vld [vmem:[#allocation3 + $0x44] sm:$0x1] }
 0x35b   : > { %5519 = vrot.lane.b32.xlu0 %v5472_v38, %s9652_s12  ;;  %v5664_v38 = vshrl.u32 %v5564_v56, 16  ;;  %v5694_v58 = vshll.u32 %v5568_v47, 16 }
 0x35c   : > { %5511 = vrot.lane.b32.xlu2 %v5468_v3, %s9652_s12  ;;  %9381 = vmatmul.msk.bf16.gmra.mxu1 %vm2696_vm14, %v9583_v23  ;;  %v9584_v3 = vld [vmem:[#allocation4 + $0x58] sm:$0xff]  ;;  %v5620_v23 = vrot.slane %v5619_v45, 4  ;;  %v5649_v22 = vsel %vm9782_vm13, %v5644_v46, %v5648_v25  ;;  %v5658_v43 = vrot.slane %v5657_v10, 4  ;;  %v5704_v25 = vrot.slane %v5702_v8, 5 }
 0x35d   : > { %v5234_v0 = vpop.permute.xlu0 %5233  ;;  %v5666_v41 = vrot.slane %v5664_v38, 4  ;;  %v5572_v46 = vld [vmem:[#allocation3 + $0x54] sm:$0xf]  ;;  %v5752_v38 = vrot.slane %v5750_v63, 5  ;;  %v5696_v34 = vrot.slane %v5694_v58, 5  ;;  %v9586_v58 = vld [vmem:[#allocation4 + $0x68] sm:$0xff] }
 0x35e   : > { %v5244_v24 = vpop.permute.xlu2 %5243  ;;  %5277 = vst.msk [vmem:[#allocation4 + $0x14] sm:$0xf] %vm5271_vm15, %v5234_v0  ;;  %v5663_v45 = vsel %vm9782_vm13, %v5658_v43, %v5662_v18 }
 0x35f   : > { %5282 = vst.msk [vmem:[#allocation4 + $0x28] sm:$0xf] %vm5271_vm15, %v5244_v24  ;;  %5515 = vrot.lane.b32.xlu1 %v5470_v15, %s9652_s12  ;;  %v5624_v24 = vrot.slane %v5622_v51, 5  ;;  %v5681_v15 = vor.u32 %v5680_v42, %v5677_v60  ;;  %v5667_v5 = vor.u32 %v5666_v41, %v5662_v18  ;;  %v5690_v51 = vrot.slane %v5688_v28, 4  ;;  %v5576_v60 = vld [vmem:[#allocation3 + $0x64] sm:$0xf] }
 0x360   : > { %v5723_v42 = vshrl.u32 %v5572_v46, 16  ;;  %v5756_v20 = vshll.u32 %v5576_v60, 16 }
 0x361   : > { %v5230_v35 = vpop.permute.xlu1 %5229  ;;  %v5625_v0 = vsel %vm9782_vm13, %v5620_v23, %v5624_v24  ;;  %v5682_v32 = vrot.slane %v5681_v15, 4  ;;  %v5668_v56 = vrot.slane %v5667_v5, 4  ;;  %v5691_v11 = vor.u32 %v5690_v51, %v5686_v17 }
 0x362   : > { %5275 = vst.msk [vmem:[#allocation4 + $0xc] sm:$0xf] %vm5271_vm15, %v5230_v35  ;;  %v11792_v35 = vrot.slane %v5708_v50, 5  ;;  %v5736_v24 = vshrl.u32 %v5573_v21, 16  ;;  %v5725_v15 = vrot.slane %v5723_v42, 4  ;;  %v5758_v10 = vrot.slane %v5756_v20, 5 }
 0x363   : > { %5774 = vrot.lane.b32.xlu0 %v5615_v1, %s9654_s14  ;;  %v5639_v1 = vsel %vm9782_vm13, %v5634_v14, %v11764_v9  ;;  %v5687_v54 = vsel %vm9782_vm13, %v5682_v32, %v5686_v17  ;;  %v5692_v50 = vrot.slane %v5691_v11, 4  ;;  %v5760_v17 = vshrl.u32 %v5576_v60, 16  ;;  %v5836_v32 = vld [vmem:[#allocation3 + $0x10] sm:$0xf]  ;;  %v5835_v60 = vld [vmem:[#allocation3 + $0xc] sm:$0xe] }
 0x364   : > { %5517 = vrot.lane.b32.xlu2 %v5471_v59, %s9652_s12  ;;  %v5715_v7 = vor.u32 %v5714_v6, %v11792_v35  ;;  %v5734_v6 = vrot.slane %v5732_v12, 5  ;;  %v5738_v14 = vrot.slane %v5736_v24, 4  ;;  %v5838_v12 = vld [vmem:[#allocation3 + $0x18] sm:$0xe] }
 0x365   : > { %v5240_v55 = vpop.permute.xlu0 %5239  ;;  %v5697_v18 = vsel %vm9782_vm13, %v5692_v50, %v5696_v34 }
 0x366   : > { %v5250_v48 = vpop.permute.xlu2 %5249  ;;  %5280 = vst.msk [vmem:[#allocation4 + $0x20] sm:$0xf] %vm5271_vm15, %v5240_v55  ;;  %v5747_v55 = vshrl.u32 %v5575_v52, 16  ;;  %v5716_v37 = vrot.slane %v5715_v7, 4  ;;  %v5739_v51 = vor.u32 %v5738_v14, %v5734_v6  ;;  %v5762_v52 = vrot.slane %v5760_v17, 4 }
 0x367   : > { %5285 = vst.msk [vmem:[#allocation4 + $0x34] sm:$0xf] %vm5271_vm15, %v5250_v48  ;;  %5770 = vrot.lane.b32.xlu1 %v5591_v53, %s9654_s14  ;;  %v5670_v48 = vshll.u32 %v5565_v29, 16  ;;  %v5718_v53 = vshll.u32 %v5571_v40, 16 }
 0x368   : > { %v5749_v57 = vrot.slane %v5747_v55, 4  ;;  %v5763_v55 = vor.u32 %v5762_v52, %v5758_v10 }
 0x369   : > { %v5236_v31 = vpop.permute.xlu1 %5235  ;;  %v5672_v30 = vrot.slane %v5670_v48, 5  ;;  %v5720_v23 = vrot.slane %v5718_v53, 5  ;;  %v5885_v48 = vrot.slane %v5836_v32, 5  ;;  %v5837_v53 = vld [vmem:[#allocation3 + $0x14] sm:$0x1]  ;;  %v9587_v32 = vld [vmem:[#allocation4 + $0x70] sm:$0xff] }
 0x36a   : > { %5278 = vst.msk [vmem:[#allocation4 + $0x18] sm:$0xf] %vm5271_vm15, %v5236_v31  ;;  %v5701_v31 = vrot.slane %v5699_v16, 4  ;;  %v5753_v28 = vor.u32 %v5752_v38, %v5749_v57  ;;  %v5577_v16 = vld [vmem:[#allocation3 + $0x68] sm:$0x1]  ;;  %v9395_v38 = vrot.slane %v5835_v60, 9 }
 0x36b   : > { %5780 = vrot.lane.b32.xlu0 %v5649_v22, %s9654_s14  ;;  %v5673_v22 = vsel %vm9782_vm13, %v5668_v56, %v5672_v30  ;;  %v5721_v26 = vsel %vm9782_vm13, %v5716_v37, %v5720_v23  ;;  %v5887_v63 = vrot.slane %v5885_v48, 4  ;;  %v5888_v56 = vrot.slane %v5837_v53, 5  ;;  %v5839_v57 = vld [vmem:[#allocation3 + $0x1c] sm:$0xf] }
 0x36c   : > { %5772 = vrot.lane.b32.xlu2 %v5601_v2, %s9654_s14  ;;  %9382 = vmatmul.msk.bf16.gmra.mxu1 %vm2696_vm14, %v9584_v3  ;;  %v5726_v2 = vshll.u32 %v5572_v46, 16  ;;  %v5754_v13 = vrot.slane %v5753_v28, 4  ;;  %v5764_v30 = vrot.slane %v5763_v55, 4  ;;  %v5886_v24 = vsel %vm9959_vm1, %v9395_v38, %v5885_v48  ;;  %v5844_v48 = vld [vmem:[#allocation3 + $0x30] sm:$0xe] }
 0x36d   : > { %v5246_v4 = vpop.permute.xlu0 %5245  ;;  %v5889_v37 = vsel %vm9959_vm1, %v5887_v63, %v5888_v56  ;;  %v5847_v63 = vld [vmem:[#allocation3 + $0x3c] sm:$0xe]  ;;  %v5852_v38 = vld [vmem:[#allocation3 + $0x50] sm:$0x1] }
 0x36e   : > { %v5393_v27 = vpop.permute.xlu2 %5392  ;;  %5283 = vst.msk [vmem:[#allocation4 + $0x2c] sm:$0xf] %vm5271_vm15, %v5246_v4 }
 0x36f   : > { %5441 = vst.msk [vmem:[#allocation4] sm:$0xf] %vm5440_vm2, %v5393_v27  ;;  %5776 = vrot.lane.b32.xlu1 %v5625_v0, %s9654_s14  ;;  %v5705_v27 = vor.u32 %v5704_v25, %v5701_v31  ;;  %v5728_v0 = vrot.slane %v5726_v2, 5  ;;  %v5842_v31 = vld [vmem:[#allocation3 + $0x28] sm:$0xf] }
 0x370   : > { %v5899_v23 = vrot.slane %v5842_v31, 5 }
 0x371   : > { %v5242_v59 = vpop.permute.xlu1 %5241  ;;  %v5706_v29 = vrot.slane %v5705_v27, 4  ;;  %v9396_v27 = vrot.slane %v5838_v12, 9 }
 0x372   : > { %5281 = vst.msk [vmem:[#allocation4 + $0x24] sm:$0xf] %vm5271_vm15, %v5242_v59  ;;  %v5729_v59 = vor.u32 %v5728_v0, %v5725_v15  ;;  %v5840_v0 = vld [vmem:[#allocation3 + $0x20] sm:$0x1] }
 0x373   : > { %5786 = vrot.lane.b32.xlu0 %v5687_v54, %s9654_s14  ;;  %v5711_v5 = vsel %vm9782_vm13, %v5706_v29, %v11792_v35  ;;  %v5759_v54 = vsel %vm9782_vm13, %v5754_v13, %v5758_v10  ;;  %v5843_v29 = vld [vmem:[#allocation3 + $0x2c] sm:$0x1] }
 0x374   : > { %5778 = vrot.lane.b32.xlu2 %v5639_v1, %s9654_s14  ;;  %v5574_v1 = vld [vmem:[#allocation3 + $0x5c] sm:$0x1]  ;;  %v5730_v7 = vrot.slane %v5729_v59, 4 }
 0x375   : > { %v5252_v39 = vpop.permute.xlu0 %5251  ;;  %v5742_v47 = vshll.u32 %v5574_v1, 16  ;;  %v440_v1 = vld [vmem:[#allocation3 + $0x6c] sm:$0x1] }
 0x376   : > { %v5399_v9 = vpop.permute.xlu2 %5398  ;;  %5286 = vst.msk [vmem:[#allocation4 + $0x38] sm:$0xf] %vm5271_vm15, %v5252_v39  ;;  %v5735_v35 = vsel %vm9782_vm13, %v5730_v7, %v5734_v6  ;;  %v5895_v6 = vrot.slane %v5840_v0, 5  ;;  %v441_v52 = vsel %vm10849_vm3, 0, %v440_v1  ;;  %v498_v1 = vld [vmem:[#allocation3 + $0x80] sm:$0x1] }
 0x377   : > { %5444 = vst.msk [vmem:[#allocation4 + $0xc] sm:$0xf] %vm5440_vm2, %v5399_v9  ;;  %5782 = vrot.lane.b32.xlu1 %v5663_v45, %s9654_s14  ;;  %v5740_v9 = vrot.slane %v5739_v51, 4  ;;  %v5744_v46 = vrot.slane %v5742_v47, 5  ;;  %v5766_v45 = vshll.u32 %v5577_v16, 16 }
 0x378   : > { %v5851_v51 = vld [vmem:[#allocation3 + $0x4c] sm:$0xf]  ;;  %442 = vst [vmem:[#allocation3 + $0x6c] sm:$0x1] %v441_v52 }
 0x379   : > { %v5248_v3 = vpop.permute.xlu1 %5247  ;;  %v5745_v11 = vsel %vm9782_vm13, %v5740_v9, %v5744_v46  ;;  %v5768_v21 = vrot.slane %v5766_v45, 5  ;;  %v5920_v16 = vrot.slane %v5851_v51, 5  ;;  %v5854_v9 = vld [vmem:[#allocation3 + $0x58] sm:$0xf]  ;;  %v499_v51 = vsel %vm11124_vm12, 0, %v498_v1 }
 0x37a   : > { %5284 = vst.msk [vmem:[#allocation4 + $0x30] sm:$0xf] %vm5271_vm15, %v5248_v3  ;;  %v5841_v3 = vld [vmem:[#allocation3 + $0x24] sm:$0xe]  ;;  %v5927_v56 = vrot.slane %v5854_v9, 5 }
 0x37b   : > { %5792 = vrot.lane.b32.xlu0 %v5721_v26, %s9654_s14  ;;  %v5769_v42 = vsel %vm9782_vm13, %v5764_v30, %v5768_v21  ;;  %v9397_v50 = vrot.slane %v5841_v3, 9  ;;  %v5892_v26 = vrot.slane %v5839_v57, 5  ;;  %v5849_v30 = vld [vmem:[#allocation3 + $0x44] sm:$0x1]  ;;  %500 = vst [vmem:[#allocation3 + $0x80] sm:$0x1] %v499_v51 }
 0x37c   : > { %5784 = vrot.lane.b32.xlu2 %v5673_v22, %s9654_s14  ;;  %9383 = vmatmul.msk.bf16.gmra.mxu1 %vm2696_vm14, %v9585_v62  ;;  %v5845_v22 = vld [vmem:[#allocation3 + $0x34] sm:$0xf]  ;;  %v5929_v60 = vrot.slane %v5927_v56, 4  ;;  %v6006_v9 = vld [vmem:[#allocation3 + $0x1c] sm:$0xf] }
 0x37d   : > { %v5395_v41 = vpop.permute.xlu0 %5394  ;;  %v5900_v20 = vsel %vm9959_vm1, %v9397_v50, %v5899_v23  ;;  %v5906_v34 = vrot.slane %v5845_v22, 5  ;;  %v5922_v50 = vrot.slane %v5920_v16, 4 }
 0x37e   : > { %v5405_v4 = vpop.permute.xlu2 %5404  ;;  %5442 = vst.msk [vmem:[#allocation4 + $0x4] sm:$0xf] %vm5440_vm2, %v5395_v41  ;;  %v5846_v41 = vld [vmem:[#allocation3 + $0x38] sm:$0x1] }
 0x37f   : > { %5447 = vst.msk [vmem:[#allocation4 + $0x18] sm:$0xf] %vm5440_vm2, %v5405_v4  ;;  %5788 = vrot.lane.b32.xlu1 %v5697_v18, %s9654_s14  ;;  %v5893_v4 = vsel %vm9959_vm1, %v9396_v27, %v5892_v26  ;;  %v5894_v18 = vrot.slane %v5892_v26, 4  ;;  %v5908_v17 = vrot.slane %v5906_v34, 4  ;;  %v5909_v10 = vrot.slane %v5846_v41, 5 }
 0x381   : > { %v5254_v40 = vpop.permute.xlu1 %5253  ;;  %v5896_v59 = vsel %vm9959_vm1, %v5894_v18, %v5895_v6  ;;  %v5910_v13 = vsel %vm9959_vm1, %v5908_v17, %v5909_v10  ;;  %v5856_v18 = vld [vmem:[#allocation3 + $0x60] sm:$0xe] }
 0x382   : > { %5287 = vst.msk [vmem:[#allocation4 + $0x3c] sm:$0xf] %vm5271_vm15, %v5254_v40  ;;  %v5901_v40 = vrot.slane %v5899_v23, 4  ;;  %v9402_v10 = vrot.slane %v5856_v18, 9 }
 0x383   : > { %5798 = vrot.lane.b32.xlu0 %v5759_v54, %s9654_s14 }
 0x384   : > { %5790 = vrot.lane.b32.xlu2 %v5711_v5, %s9654_s14  ;;  %v5902_v5 = vrot.slane %v5843_v29, 5 }
 0x385   : > { %v5401_v8 = vpop.permute.xlu0 %5400 }
 0x386   : > { %v5411_v43 = vpop.permute.xlu2 %5410  ;;  %5445 = vst.msk [vmem:[#allocation4 + $0x10] sm:$0xf] %vm5440_vm2, %v5401_v8  ;;  %v5903_v7 = vsel %vm9959_vm1, %v5901_v40, %v5902_v5  ;;  %v9398_v8 = vrot.slane %v5844_v48, 9 }
 0x387   : > { %5450 = vst.msk [vmem:[#allocation4 + $0x24] sm:$0xf] %vm5440_vm2, %v5411_v43  ;;  %5794 = vrot.lane.b32.xlu1 %v5735_v35, %s9654_s14  ;;  %v5850_v43 = vld [vmem:[#allocation3 + $0x48] sm:$0xe]  ;;  %v5848_v35 = vld [vmem:[#allocation3 + $0x40] sm:$0xf] }
 0x388   : > { %v9400_v55 = vrot.slane %v5850_v43, 9  ;;  %v5907_v46 = vsel %vm9959_vm1, %v9398_v8, %v5906_v34  ;;  %v5913_v45 = vrot.slane %v5848_v35, 5  ;;  %v6008_v43 = vld [vmem:[#allocation3 + $0x28] sm:$0xf] }
 0x389   : > { %v5397_v39 = vpop.permute.xlu1 %5396 }
 0x38a   : > { %5443 = vst.msk [vmem:[#allocation4 + $0x8] sm:$0xf] %vm5440_vm2, %v5397_v39  ;;  %v5921_v39 = vsel %vm9959_vm1, %v9400_v55, %v5920_v16  ;;  %v5915_v31 = vrot.slane %v5913_v45, 4 }
 0x38b   : > { %5941 = vrot.lane.b32.xlu0 %v5889_v37, %s9655_s23 }
 0x38c   : > { %5796 = vrot.lane.b32.xlu2 %v5745_v11, %s9654_s14  ;;  %9384 = vmatmul.msk.bf16.gmra.mxu1 %vm2696_vm14, %v9586_v58  ;;  %v9399_v11 = vrot.slane %v5847_v63, 9  ;;  %v446_v63 = vld [vmem:[#allocation3 + $0x84] sm:$0x1] }
 0x38d   : > { %v5407_v2 = vpop.permute.xlu0 %5406 }
 0x38e   : > { %v5417_v25 = vpop.permute.xlu2 %5416  ;;  %5448 = vst.msk [vmem:[#allocation4 + $0x1c] sm:$0xf] %vm5440_vm2, %v5407_v2  ;;  %v5914_v37 = vsel %vm9959_vm1, %v9399_v11, %v5913_v45  ;;  %v5916_v2 = vrot.slane %v5849_v30, 5 }
 0x38f   : > { %5453 = vst.msk [vmem:[#allocation4 + $0x30] sm:$0xf] %vm5440_vm2, %v5417_v25  ;;  %5800 = vrot.lane.b32.xlu1 %v5769_v42, %s9654_s14  ;;  %v5855_v25 = vld [vmem:[#allocation3 + $0x5c] sm:$0x1]  ;;  %v495_v42 = vld [vmem:[#allocation3 + $0x74] sm:$0x1] }
 0x390   : > { %v496_v3 = vsel %vm11124_vm12, 0, %v495_v42  ;;  %v5930_v57 = vrot.slane %v5855_v25, 5  ;;  %v5917_v22 = vsel %vm9959_vm1, %v5915_v31, %v5916_v2  ;;  %v6009_v42 = vld [vmem:[#allocation3 + $0x30] sm:$0xf] }
 0x391   : > { %v5403_v62 = vpop.permute.xlu1 %5402  ;;  %497 = vst [vmem:[#allocation3 + $0x74] sm:$0x1] %v496_v3 }
 0x392   : > { %5446 = vst.msk [vmem:[#allocation4 + $0x14] sm:$0xf] %vm5440_vm2, %v5403_v62  ;;  %v9588_v62 = vld [vmem:[#allocation4 + $0x78] sm:$0xff]  ;;  %v5931_v12 = vsel %vm9959_vm1, %v5929_v60, %v5930_v57  ;;  %v6105_v57 = vld [vmem:[#allocation3 + $0x24] sm:$0xf] }
 0x393   : > { %5947 = vrot.lane.b32.xlu0 %v5900_v20, %s9655_s23  ;;  %v5853_v20 = vld [vmem:[#allocation3 + $0x54] sm:$0xe] }
 0x394   : > { %5939 = vrot.lane.b32.xlu2 %v5886_v24, %s9655_s23  ;;  %v5923_v24 = vrot.slane %v5852_v38, 5  ;;  %v9401_v0 = vrot.slane %v5853_v20, 9  ;;  %v6106_v38 = vld [vmem:[#allocation3 + $0x28] sm:$0xf]  ;;  %v6151_v20 = vshrl.u32 %v6105_v57, 16 }
 0x395   : > { %v5413_v28 = vpop.permute.xlu0 %5412 }
 0x396   : > { %v5423_v15 = vpop.permute.xlu2 %5422  ;;  %5451 = vst.msk [vmem:[#allocation4 + $0x28] sm:$0xf] %vm5440_vm2, %v5413_v28  ;;  %v5924_v34 = vsel %vm9959_vm1, %v5922_v50, %v5923_v24  ;;  %v5928_v17 = vsel %vm9959_vm1, %v9401_v0, %v5927_v56  ;;  %v447_v56 = vsel %vm10849_vm3, 0, %v446_v63  ;;  %v6153_v1 = vrot.slane %v6151_v20, 4 }
 0x397   : > { %5456 = vst.msk [vmem:[#allocation4 + $0x3c] sm:$0xf] %vm5440_vm2, %v5423_v15  ;;  %5943 = vrot.lane.b32.xlu1 %v5893_v4, %s9655_s23  ;;  %v5857_v15 = vld [vmem:[#allocation3 + $0x64] sm:$0xf]  ;;  %v443_v4 = vld [vmem:[#allocation3 + $0x78] sm:$0x1] }
 0x398   : > { %v444_v41 = vsel %vm10849_vm3, 0, %v443_v4  ;;  %v5934_v6 = vrot.slane %v5857_v15, 5  ;;  %448 = vst [vmem:[#allocation3 + $0x84] sm:$0x1] %v447_v56  ;;  %v6164_v15 = vshrl.u32 %v6106_v38, 16 }
 0x399   : > { %v5409_v14 = vpop.permute.xlu1 %5408  ;;  %445 = vst [vmem:[#allocation3 + $0x78] sm:$0x1] %v444_v41  ;;  %v4923_v41 = vld [vmem:[#allocation3 + $0x74] sm:$0x1]  ;;  %v6104_v56 = vld [vmem:[#allocation3 + $0x20] sm:$0x1] }
 0x39a   : > { %5449 = vst.msk [vmem:[#allocation4 + $0x20] sm:$0xf] %vm5440_vm2, %v5409_v14  ;;  %v6005_v14 = vld [vmem:[#allocation3 + $0x18] sm:$0xf] }
 0x39b   : > { %5953 = vrot.lane.b32.xlu0 %v5910_v13, %s9655_s23  ;;  %v5936_v13 = vrot.slane %v5934_v6, 4 }
 0x39c   : > { %5945 = vrot.lane.b32.xlu2 %v5896_v59, %s9655_s23  ;;  %9385 = vmatmul.msk.bf16.gmra.mxu1 %vm2696_vm14, %v9587_v32  ;;  %v5858_v59 = vld [vmem:[#allocation3 + $0x68] sm:$0x1]  ;;  %v5935_v32 = vsel %vm9959_vm1, %v9402_v10, %v5934_v6 }
 0x39d   : > { %v5419_v47 = vpop.permute.xlu0 %5418  ;;  %v5937_v5 = vrot.slane %v5858_v59, 5 }
 0x39e   : > { %v5494_v54 = vpop.permute.xlu2 %5493  ;;  %5454 = vst.msk [vmem:[#allocation4 + $0x34] sm:$0xf] %vm5440_vm2, %v5419_v47 }
 0x39f   : > { %5540 = vst.msk [vmem:[#allocation4 + $0x8] sm:$0xf] %vm5537_vm4, %v5494_v54  ;;  %5949 = vrot.lane.b32.xlu1 %v5903_v7, %s9655_s23  ;;  %v5938_v48 = vsel %vm9959_vm1, %v5936_v13, %v5937_v5  ;;  %v11920_v7 = vld [vmem:[%s13282_s2] ss:$0 sm:$0xff] }
 0x3a1   : > { %v5415_v53 = vpop.permute.xlu1 %5414 }
 0x3a2   : > { %5452 = vst.msk [vmem:[#allocation4 + $0x2c] sm:$0xf] %vm5440_vm2, %v5415_v53 }
 0x3a3   : > { %5959 = vrot.lane.b32.xlu0 %v5921_v39, %s9655_s23 }
 0x3a4   : > { %5951 = vrot.lane.b32.xlu2 %v5907_v46, %s9655_s23  ;;  %v6007_v46 = vld [vmem:[#allocation3 + $0x24] sm:$0xf] }
 0x3a5   : > { %v5490_v21 = vpop.permute.xlu0 %5489 }
 0x3a6   : > { %v5500_v58 = vpop.permute.xlu2 %5499  ;;  %5538 = vst.msk [vmem:[#allocation4] sm:$0xf] %vm5537_vm4, %v5490_v21  ;;  %v4919_v21 = vld [vmem:[#allocation3 + $0x6c] sm:$0xf] }
 0x3a7   : > { %5543 = vst.msk [vmem:[#allocation4 + $0x14] sm:$0xf] %vm5537_vm4, %v5500_v58  ;;  %5955 = vrot.lane.b32.xlu1 %v5914_v37, %s9655_s23  ;;  %v6011_v37 = vld [vmem:[#allocation3 + $0x3c] sm:$0xf] }
 0x3a9   : > { %v5421_v23 = vpop.permute.xlu1 %5420 }
 0x3aa   : > { %5455 = vst.msk [vmem:[#allocation4 + $0x38] sm:$0xf] %vm5440_vm2, %v5421_v23 }
 0x3ab   : > { %5965 = vrot.lane.b32.xlu0 %v5931_v12, %s9655_s23  ;;  %v6102_v12 = vld [vmem:[#allocation3 + $0x18] sm:$0xf] }
 0x3ac   : > { %5957 = vrot.lane.b32.xlu2 %v5917_v22, %s9655_s23  ;;  %9386 = vmatmul.msk.bf16.gmra.mxu1 %vm2696_vm14, %v9588_v62  ;;  %vm5818_vm14 = vcmask 322816   ;;  %v501_v22 = vld [vmem:[#allocation3 + $0x8c] sm:$0x1]  ;;  %v6127_v6 = vshrl.u32 %v6102_v12, 16 }
 0x3ad   : > { %v5496_v27 = vpop.permute.xlu0 %5495  ;;  %v502_v50 = vsel %vm11124_vm12, 0, %v501_v22  ;;  %v6015_v22 = vld [vmem:[#allocation3 + $0x54] sm:$0xf] }
 0x3ae   : > { %v5506_v26 = vpop.permute.xlu2 %5505  ;;  %5541 = vst.msk [vmem:[#allocation4 + $0xc] sm:$0xf] %vm5537_vm4, %v5496_v27  ;;  %v6160_v27 = vshll.u32 %v6106_v38, 16 }
 0x3af   : > { %5546 = vst.msk [vmem:[#allocation4 + $0x20] sm:$0xf] %vm5537_vm4, %v5506_v26  ;;  %5961 = vrot.lane.b32.xlu1 %v5924_v34, %s9655_s23  ;;  %v6154_v34 = vshll.u32 %v6105_v57, 16  ;;  %v6109_v57 = vld [vmem:[#allocation3 + $0x34] sm:$0xf] }
 0x3b0   : > { %503 = vst [vmem:[#allocation3 + $0x8c] sm:$0x1] %v502_v50  ;;  %v11946_v51 = vrot.slane %v6160_v27, 5  ;;  %v6146_v50 = vshll.u32 %v6104_v56, 16  ;;  %v6108_v27 = vld [vmem:[#allocation3 + $0x30] sm:$0xf] }
 0x3b1   : > { %v5492_v28 = vpop.permute.xlu1 %5491  ;;  %v6156_v5 = vrot.slane %v6154_v34, 5  ;;  %v6107_v34 = vld [vmem:[#allocation3 + $0x2c] sm:$0x1] }
 0x3b2   : > { %5539 = vst.msk [vmem:[#allocation4 + $0x4] sm:$0xf] %vm5537_vm4, %v5492_v28  ;;  %v6010_v28 = vld [vmem:[#allocation3 + $0x34] sm:$0xf] }
 0x3b3   : > { %6037 = vrot.lane.b32.xlu0 %v6005_v14, %s9656_s26  ;;  %v6130_v14 = vshll.u32 %v6102_v12, 16 }
 0x3b4   : > { %5963 = vrot.lane.b32.xlu2 %v5928_v17, %s9655_s23  ;;  %v6014_v17 = vld [vmem:[#allocation3 + $0x4c] sm:$0xf] }
 0x3b5   : > { %v5502_v40 = vpop.permute.xlu0 %5501 }
 0x3b6   : > { %v5512_v29 = vpop.permute.xlu2 %5511  ;;  %5544 = vst.msk [vmem:[#allocation4 + $0x18] sm:$0xf] %vm5537_vm4, %v5502_v40  ;;  %v6103_v40 = vld [vmem:[#allocation3 + $0x1c] sm:$0xf] }
 0x3b7   : > { %5549 = vst.msk [vmem:[#allocation4 + $0x2c] sm:$0xf] %vm5537_vm4, %v5512_v29  ;;  %5967 = vrot.lane.b32.xlu1 %v5935_v32, %s9655_s23  ;;  %v6140_v63 = vshrl.u32 %v6103_v40, 16 }
 0x3b9   : > { %v4686_v52 = vpop.f32.mrf.mxu1  ;;  %v5498_v54 = vpop.permute.xlu1 %5497 }
 0x3ba   : > { %v4687_v47 = vadd.f32 %v11920_v7, %v4686_v52  ;;  %5542 = vst.msk [vmem:[#allocation4 + $0x10] sm:$0xf] %vm5537_vm4, %v5498_v54  ;;  %v6166_v52 = vrot.slane %v6164_v15, 4  ;;  %v6184_v15 = vshll.u32 %v6109_v57, 16 }
 0x3bb   : > { %6043 = vrot.lane.b32.xlu0 %v6008_v43, %s9656_s26  ;;  %v6012_v43 = vld [vmem:[#allocation3 + $0x40] sm:$0xf] }
 0x3bc   : > { %5969 = vrot.lane.b32.xlu2 %v5938_v48, %s9655_s23  ;;  %v4726_v16 = vmax.f32 %v4687_v47, 0.0 }
 0x3bd   : > { %v5508_v53 = vpop.permute.xlu0 %5507 }
 0x3be   : > { %v5518_v35 = vpop.permute.xlu2 %5517  ;;  %v4742_v8 = vpack.c.bf16 %v4726_v16, %v4726_v16  ;;  %5547 = vst.msk [vmem:[#allocation4 + $0x24] sm:$0xf] %vm5537_vm4, %v5508_v53  ;;  %v11955_v53 = vrot.slane %v6127_v6, 4 }
 0x3bf   : > { %5552 = vst.msk [vmem:[#allocation4 + $0x38] sm:$0xf] %vm5537_vm4, %v5518_v35  ;;  %6039 = vrot.lane.b32.xlu1 %v6006_v9, %s9656_s26  ;;  %v6136_v35 = vshll.u32 %v6103_v40, 16  ;;  %v6013_v9 = vld [vmem:[#allocation3 + $0x48] sm:$0xf] }
 0x3c0   : > { %v4759_v55 = vshrl.u32 %v4742_v8, 16  ;;  %v4762_v58 = vshll.u32 %v4742_v8, 16 }
 0x3c1   : > { %v4688_v45 = vpop.f32.mrf.mxu1  ;;  %v5504_v39 = vpop.permute.xlu1 %5503 }
 0x3c2   : > { %v4761_v11 = vrot.slane %v4759_v55, 7  ;;  %v4689_v30 = vadd.f32 %v11920_v7, %v4688_v45  ;;  %5545 = vst.msk [vmem:[#allocation4 + $0x1c] sm:$0xf] %vm5537_vm4, %v5504_v39  ;;  %v11957_v55 = vrot.slane %v6130_v14, 5  ;;  %v6157_v39 = vor.u32 %v6156_v5, %v6153_v1  ;;  %v6016_v1 = vld [vmem:[#allocation3 + $0x58] sm:$0xf] }
 0x3c3   : > { %6049 = vrot.lane.b32.xlu0 %v6011_v37, %s9656_s26 }
 0x3c4   : > { %6041 = vrot.lane.b32.xlu2 %v6007_v46, %s9656_s26  ;;  %v4764_v31 = vor.u32 %v4762_v58, %v4761_v11  ;;  %v4727_v25 = vmax.f32 %v4689_v30, 0.0  ;;  %v4765_v10 = vrot.slane %v4761_v11, 4  ;;  %v449_v11 = vld [vmem:[#allocation3 + $0x90] sm:$0x1]  ;;  %v6167_v58 = vor.u32 %v6166_v52, %v11946_v51  ;;  %v6114_v52 = vld [vmem:[#allocation3 + $0x48] sm:$0xf] }
 0x3c5   : > { %v5514_v23 = vpop.permute.xlu0 %5513 }
 0x3c6   : > { %v5773_v60 = vpop.permute.xlu2 %5772  ;;  %v4920_v2 = vsel %vm11192_vm6, %v4764_v31, %v4919_v21  ;;  %v4743_v3 = vpack.c.bf16 %v4727_v25, %v4727_v25  ;;  %5550 = vst.msk [vmem:[#allocation4 + $0x30] sm:$0xf] %vm5537_vm4, %v5514_v23  ;;  %v450_v31 = vsel %vm10849_vm3, 0, %v449_v11  ;;  %v4926_v25 = vld [vmem:[#allocation3 + $0x78] sm:$0xf]  ;;  %v6142_v23 = vrot.slane %v6140_v63, 4 }
 0x3c7   : > { %5820 = vst.msk [vmem:[#allocation4 + $0x4] sm:$0xf] %vm5818_vm14, %v5773_v60  ;;  %6045 = vrot.lane.b32.xlu1 %v6009_v42, %s9656_s26  ;;  %v6017_v60 = vld [vmem:[#allocation3 + $0x60] sm:$0xf]  ;;  %v11974_v12 = vrot.slane %v6167_v58, 4 }
 0x3c8   : > { %4921 = vst [vmem:[#allocation3 + $0x6c] sm:$0xf] %v4920_v2  ;;  %v4767_v62 = vshrl.u32 %v4743_v3, 16  ;;  %v4770_v4 = vshll.u32 %v4743_v3, 16  ;;  %v11970_v3 = vrot.slane %v6136_v35, 5 }
 0x3c9   : > { %v4691_v24 = vpop.f32.mrf.mxu1  ;;  %v5510_v26 = vpop.permute.xlu1 %5509  ;;  %451 = vst [vmem:[#allocation3 + $0x90] sm:$0x1] %v450_v31 }
 0x3ca   : > { %v4769_v0 = vrot.slane %v4767_v62, 7  ;;  %v4692_v18 = vadd.f32 %v11920_v7, %v4691_v24  ;;  %5548 = vst.msk [vmem:[#allocation4 + $0x28] sm:$0xf] %vm5537_vm4, %v5510_v26  ;;  %v11972_v62 = vrot.slane %v6157_v39, 4 }
 0x3cb   : > { %6055 = vrot.lane.b32.xlu0 %v6014_v17, %s9656_s26 }
 0x3cc   : > { %6047 = vrot.lane.b32.xlu2 %v6010_v28, %s9656_s26  ;;  %v4772_v29 = vor.u32 %v4770_v4, %v4769_v0  ;;  %v4774_v59 = vrot.slane %v4769_v0, 4  ;;  %v4728_v32 = vmax.f32 %v4692_v18, 0.0  ;;  %v6188_v0 = vshrl.u32 %v6109_v57, 16  ;;  %v504_v4 = vld [vmem:[#allocation3 + $0x98] sm:$0x1] }
 0x3cd   : > { %v5520_v16 = vpop.permute.xlu0 %5519  ;;  %v6133_v18 = vor.u32 %v11957_v55, %v11955_v53  ;;  %v505_v17 = vsel %vm11124_vm12, 0, %v504_v4  ;;  %v6110_v53 = vld [vmem:[#allocation3 + $0x38] sm:$0x1]  ;;  %v6111_v57 = vld [vmem:[#allocation3 + $0x3c] sm:$0xf]  ;;  %v6163_v4 = vsel %vm9782_vm13, %v11972_v62, %v11946_v51 }
 0x3ce   : > { %v5779_v13 = vpop.permute.xlu2 %5778  ;;  %v4773_v54 = vsel %vm9764_vm11, %v4765_v10, %v4772_v29  ;;  %v4924_v48 = vsel %vm10849_vm3, %v4774_v59, %v4923_v41  ;;  %v4744_v47 = vpack.c.bf16 %v4728_v32, %v4728_v32  ;;  %5553 = vst.msk [vmem:[#allocation4 + $0x3c] sm:$0xf] %vm5537_vm4, %v5520_v16  ;;  %v6143_v41 = vor.u32 %v6142_v23, %v11970_v3 }
 0x3cf   : > { %5823 = vst.msk [vmem:[#allocation4 + $0x10] sm:$0xf] %vm5818_vm14, %v5779_v13  ;;  %6051 = vrot.lane.b32.xlu1 %v6012_v43, %s9656_s26  ;;  %v11986_v10 = vrot.slane %v6146_v50, 5  ;;  %v6170_v29 = vshll.u32 %v6107_v34, 16  ;;  %v6175_v59 = vshrl.u32 %v6108_v27, 16  ;;  %v6178_v32 = vshll.u32 %v6108_v27, 16 }
 0x3d0   : > { %4922 = vst.msk [vmem:[#allocation3 + $0x70] sm:$0xf] %vm402_vm5, %v4773_v54  ;;  %v4776_v8 = vshrl.u32 %v4744_v47, 16  ;;  %v4779_v37 = vshll.u32 %v4744_v47, 16  ;;  %v4930_v54 = vld [vmem:[#allocation3 + $0x80] sm:$0x1] }
 0x3d1   : > { %4925 = vst [vmem:[#allocation3 + $0x74] sm:$0x1] %v4924_v48  ;;  %v4693_v46 = vpop.f32.mrf.mxu1  ;;  %v5516_v45 = vpop.permute.xlu1 %5515  ;;  %v11991_v47 = vrot.slane %v6184_v15, 5  ;;  %v6190_v43 = vrot.slane %v6188_v0, 4  ;;  %v6134_v63 = vrot.slane %v6133_v18, 4  ;;  %v11999_v39 = vrot.slane %v6175_v59, 4 }
 0x3d2   : > { %v11961_v30 = vrot.slane %v4776_v8, 7  ;;  %v4694_v21 = vadd.f32 %v11920_v7, %v4693_v46  ;;  %5551 = vst.msk [vmem:[#allocation4 + $0x34] sm:$0xf] %vm5537_vm4, %v5516_v45  ;;  %v11995_v46 = vrot.slane %v6143_v41, 4  ;;  %v11997_v45 = vrot.slane %v6170_v29, 5 }
 0x3d3   : > { %6061 = vrot.lane.b32.xlu0 %v6017_v60, %s9656_s26  ;;  %506 = vst [vmem:[#allocation3 + $0x98] sm:$0x1] %v505_v17  ;;  %v6194_v31 = vshll.u32 %v6110_v53, 16  ;;  %v6223_v60 = vshrl.u32 %v6114_v52, 16  ;;  %v6191_v23 = vor.u32 %v6190_v43, %v11991_v47  ;;  %v4933_v0 = vld [vmem:[#allocation3 + $0x84] sm:$0xf]  ;;  %v6139_v59 = vsel %vm9782_vm13, %v6134_v63, %v11970_v3 }
 0x3d4   : > { %6053 = vrot.lane.b32.xlu2 %v6013_v9, %s9656_s26  ;;  %v4781_v42 = vor.u32 %v4779_v37, %v11961_v30  ;;  %v4729_v2 = vmax.f32 %v4694_v21, 0.0  ;;  %v4782_v16 = vrot.slane %v11961_v30, 4  ;;  %v6018_v30 = vld [vmem:[#allocation3 + $0x64] sm:$0xf]  ;;  %v12006_v21 = vld [vmem:[#allocation3 + $0x4c] sm:$0xf]  ;;  %v6149_v3 = vsel %vm9782_vm13, %v11995_v46, %v11986_v10 }
 0x3d5   : > { %v5775_v20 = vpop.permute.xlu0 %5774  ;;  %v6232_v18 = vshll.u32 %v12006_v21, 16  ;;  %v6202_v51 = vshll.u32 %v6111_v57, 16  ;;  %v6116_v63 = vld [vmem:[#allocation3 + $0x50] sm:$0x1] }
 0x3d6   : > { %v5785_v38 = vpop.permute.xlu2 %5784  ;;  %v4927_v24 = vsel %vm11192_vm6, %v4781_v42, %v4926_v25  ;;  %v4745_v26 = vpack.c.bf16 %v4729_v2, %v4729_v2  ;;  %5821 = vst.msk [vmem:[#allocation4 + $0x8] sm:$0xf] %vm5818_vm14, %v5775_v20  ;;  %v12010_v25 = vrot.slane %v6178_v32, 5  ;;  %v6226_v42 = vshll.u32 %v6114_v52, 16 }
 0x3d7   : > { %5826 = vst.msk [vmem:[#allocation4 + $0x1c] sm:$0xf] %vm5818_vm14, %v5785_v38  ;;  %6057 = vrot.lane.b32.xlu1 %v6015_v22, %s9656_s26  ;;  %v6020_v48 = vld [vmem:[#allocation3 + $0x70] sm:$0xf]  ;;  %v12013_v38 = vld [vmem:[#allocation3 + $0x40] sm:$0xf] }
 0x3d8   : > { %4928 = vst [vmem:[#allocation3 + $0x78] sm:$0xf] %v4927_v24  ;;  %v4784_v28 = vshrl.u32 %v4745_v26, 16  ;;  %v4787_v13 = vshll.u32 %v4745_v26, 16  ;;  %v6019_v22 = vld [vmem:[#allocation3 + $0x6c] sm:$0xf] }
 0x3d9   : > { %v4696_v6 = vpop.f32.mrf.mxu1  ;;  %v5771_v14 = vpop.permute.xlu1 %5770  ;;  %v452_v26 = vld [vmem:[#allocation3 + $0x9c] sm:$0x1]  ;;  %v6199_v32 = vshrl.u32 %v6111_v57, 16  ;;  %v6208_v62 = vshll.u32 %v12013_v38, 16  ;;  %v6236_v52 = vshrl.u32 %v12006_v21, 16  ;;  %v12047_v43 = vrot.slane %v6232_v18, 5 }
 0x3da   : > { %v4786_v40 = vrot.slane %v4784_v28, 7  ;;  %v4697_v5 = vadd.f32 %v11920_v7, %v4696_v6  ;;  %5819 = vst.msk [vmem:[#allocation4] sm:$0xf] %vm5818_vm14, %v5771_v14  ;;  %v453_v15 = vsel %vm10849_vm3, 0, %v452_v26  ;;  %v12027_v28 = vrot.slane %v6223_v60, 4 }
 0x3db   : > { %6067 = vrot.lane.b32.xlu0 %v6020_v48, %s9656_s26  ;;  %454 = vst [vmem:[#allocation3 + $0x9c] sm:$0x1] %v453_v15  ;;  %v6192_v6 = vrot.slane %v6191_v23, 4  ;;  %v6228_v14 = vrot.slane %v6226_v42, 5  ;;  %v6181_v48 = vor.u32 %v12010_v25, %v11999_v39  ;;  %v6238_v25 = vrot.slane %v6236_v52, 4 }
 0x3dc   : > { %6059 = vrot.lane.b32.xlu2 %v6016_v1, %s9656_s26  ;;  %v4789_v35 = vor.u32 %v4787_v13, %v4786_v40  ;;  %v4791_v8 = vrot.slane %v4786_v40, 4  ;;  %v4730_v9 = vmax.f32 %v4697_v5, 0.0  ;;  %v6196_v5 = vrot.slane %v6194_v31, 5  ;;  %v4937_v60 = vld [vmem:[#allocation3 + $0x8c] sm:$0x1] }
 0x3dd   : > { %v5781_v37 = vpop.permute.xlu0 %5780  ;;  %v6229_v53 = vor.u32 %v6228_v14, %v12027_v28  ;;  %v6173_v26 = vsel %vm9782_vm13, %v11974_v12, %v11997_v45  ;;  %v6242_v15 = vshll.u32 %v6116_v63, 16  ;;  %v6239_v14 = vor.u32 %v6238_v25, %v12047_v43 }
 0x3de   : > { %v5791_v55 = vpop.permute.xlu2 %5790  ;;  %v4790_v56 = vsel %vm9764_vm11, %v4782_v16, %v4789_v35  ;;  %v4931_v11 = vsel %vm10849_vm3, %v4791_v8, %v4930_v54  ;;  %v4746_v58 = vpack.c.bf16 %v4730_v9, %v4730_v9  ;;  %5824 = vst.msk [vmem:[#allocation4 + $0x14] sm:$0xf] %vm5818_vm14, %v5781_v37  ;;  %v6113_v54 = vld [vmem:[#allocation3 + $0x44] sm:$0x1]  ;;  %v6212_v16 = vshrl.u32 %v12013_v38, 16 }
 0x3df   : > { %5829 = vst.msk [vmem:[#allocation4 + $0x28] sm:$0xf] %vm5818_vm14, %v5791_v55  ;;  %6063 = vrot.lane.b32.xlu1 %v6018_v30, %s9656_s26  ;;  %v507_v35 = vld [vmem:[#allocation3 + $0xa4] sm:$0x1]  ;;  %v6197_v9 = vsel %vm9782_vm13, %v6192_v6, %v6196_v5  ;;  %v6118_v55 = vld [vmem:[#allocation3 + $0x58] sm:$0xf] }
 0x3e0   : > { %4929 = vst.msk [vmem:[#allocation3 + $0x7c] sm:$0xf] %vm402_vm5, %v4790_v56  ;;  %v4793_v2 = vshrl.u32 %v4746_v58, 16  ;;  %v4796_v34 = vshll.u32 %v4746_v58, 16  ;;  %v508_v10 = vsel %vm11124_vm12, 0, %v507_v35  ;;  %v6201_v56 = vrot.slane %v6199_v32, 4 }
 0x3e1   : > { %4932 = vst [vmem:[#allocation3 + $0x80] sm:$0x1] %v4931_v11  ;;  %v4698_v50 = vpop.f32.mrf.mxu1  ;;  %v5777_v24 = vpop.permute.xlu1 %5776  ;;  %v6204_v11 = vrot.slane %v6202_v51, 5  ;;  %v12056_v58 = vrot.slane %v6208_v62, 5  ;;  %v6218_v30 = vshll.u32 %v6113_v54, 16  ;;  %v6214_v42 = vrot.slane %v6212_v16, 4 }
 0x3e2   : > { %v12016_v20 = vrot.slane %v4793_v2, 7  ;;  %v4699_v27 = vadd.f32 %v11920_v7, %v4698_v50  ;;  %5822 = vst.msk [vmem:[#allocation4 + $0xc] sm:$0xf] %vm5818_vm14, %v5777_v24  ;;  %v6256_v2 = vshll.u32 %v6118_v55, 16  ;;  %v6260_v23 = vshrl.u32 %v6118_v55, 16 }
 0x3e3   : > { %6322 = vrot.lane.b32.xlu0 %v6163_v4, %s9657_s29  ;;  %509 = vst [vmem:[#allocation3 + $0xa4] sm:$0x1] %v508_v10  ;;  %v12074_v12 = vrot.slane %v6218_v30, 5  ;;  %v12080_v51 = vld [vmem:[#allocation3 + $0x60] sm:$0xf]  ;;  %v12083_v5 = vrot.slane %v6242_v15, 5 }
 0x3e4   : > { %6065 = vrot.lane.b32.xlu2 %v6019_v22, %s9656_s26  ;;  %v4798_v41 = vor.u32 %v4796_v34, %v12016_v20  ;;  %v4731_v17 = vmax.f32 %v4699_v27, 0.0  ;;  %v4799_v57 = vrot.slane %v12016_v20, 4  ;;  %v6182_v34 = vrot.slane %v6181_v48, 4  ;;  %v6123_v35 = vld [vmem:[#allocation3 + $0x6c] sm:$0xf] }
 0x3e5   : > { %v5787_v1 = vpop.permute.xlu0 %5786  ;;  %v6205_v27 = vor.u32 %v6204_v11, %v6201_v56  ;;  %v12076_v45 = vrot.slane %v6256_v2, 5  ;;  %v6262_v6 = vrot.slane %v6260_v23, 4  ;;  %v12097_v55 = vrot.slane %v6239_v14, 4  ;;  %v455_v10 = vld [vmem:[#allocation3 + $0xa8] sm:$0x1] }
 0x3e6   : > { %v5797_v29 = vpop.permute.xlu2 %5796  ;;  %v4934_v40 = vsel %vm11192_vm6, %v4798_v41, %v4933_v0  ;;  %v4747_v13 = vpack.c.bf16 %v4731_v17, %v4731_v17  ;;  %5827 = vst.msk [vmem:[#allocation4 + $0x20] sm:$0xf] %vm5818_vm14, %v5787_v1  ;;  %v6117_v0 = vld [vmem:[#allocation3 + $0x54] sm:$0xf]  ;;  %v6230_v41 = vrot.slane %v6229_v53, 4  ;;  %v6187_v48 = vsel %vm9782_vm13, %v6182_v34, %v11991_v47 }
 0x3e7   : > { %5832 = vst.msk [vmem:[#allocation4 + $0x34] sm:$0xf] %vm5818_vm14, %v5797_v29  ;;  %6318 = vrot.lane.b32.xlu1 %v6139_v59, %s9657_s29  ;;  %v6119_v17 = vld [vmem:[#allocation3 + $0x5c] sm:$0x1]  ;;  %v6215_v59 = vor.u32 %v6214_v42, %v12056_v58  ;;  %v6247_v32 = vshrl.u32 %v6117_v0, 16  ;;  %v6250_v52 = vshll.u32 %v6117_v0, 16  ;;  %v6263_v53 = vor.u32 %v6262_v6, %v12076_v45 }
 0x3e8   : > { %4935 = vst [vmem:[#allocation3 + $0x84] sm:$0xf] %v4934_v40  ;;  %v4801_v8 = vshrl.u32 %v4747_v13, 16  ;;  %v4804_v21 = vshll.u32 %v4747_v13, 16  ;;  %v6206_v13 = vrot.slane %v6205_v27, 4  ;;  %v6266_v1 = vshll.u32 %v6119_v17, 16 }
 0x3e9   : > { %v4701_v46 = vpop.f32.mrf.mxu1  ;;  %v5783_v39 = vpop.permute.xlu1 %5782  ;;  %v6271_v63 = vshrl.u32 %v12080_v51, 16  ;;  %v6216_v56 = vrot.slane %v6215_v59, 4  ;;  %v6121_v11 = vld [vmem:[#allocation3 + $0x64] sm:$0xf]  ;;  %v456_v23 = vsel %vm10849_vm3, 0, %v455_v10 }
 0x3ea   : > { %v4803_v37 = vrot.slane %v4801_v8, 7  ;;  %v4702_v31 = vadd.f32 %v11920_v7, %v4701_v46  ;;  %5825 = vst.msk [vmem:[#allocation4 + $0x18] sm:$0xf] %vm5818_vm14, %v5783_v39  ;;  %v4940_v8 = vld [vmem:[#allocation3 + $0x90] sm:$0xf]  ;;  %v6211_v39 = vsel %vm9782_vm13, %v6206_v13, %v12056_v58  ;;  %v6268_v2 = vrot.slane %v6266_v1, 5 }
 0x3eb   : > { %6328 = vrot.lane.b32.xlu0 %v6197_v9, %s9657_s29  ;;  %v6235_v9 = vsel %vm9782_vm13, %v6230_v41, %v12047_v43  ;;  %v6249_v43 = vrot.slane %v6247_v32, 4  ;;  %v6264_v58 = vrot.slane %v6263_v53, 4  ;;  %v6221_v34 = vsel %vm9782_vm13, %v6216_v56, %v12074_v12  ;;  %457 = vst [vmem:[#allocation3 + $0xa8] sm:$0x1] %v456_v23  ;;  %v4944_v6 = vld [vmem:[#allocation3 + $0x98] sm:$0x1] }
 0x3ec   : > { %6320 = vrot.lane.b32.xlu2 %v6149_v3, %s9657_s29  ;;  %v4806_v38 = vor.u32 %v4804_v21, %v4803_v37  ;;  %v4808_v22 = vrot.slane %v4803_v37, 4  ;;  %v4732_v50 = vmax.f32 %v4702_v31, 0.0  ;;  %v6252_v37 = vrot.slane %v6250_v52, 5 }
 0x3ed   : > { %v5793_v18 = vpop.permute.xlu0 %5792  ;;  %v6295_v21 = vshrl.u32 %v6123_v35, 16  ;;  %v6298_v31 = vshll.u32 %v6123_v35, 16  ;;  %v6269_v12 = vsel %vm9782_vm13, %v6264_v58, %v6268_v2  ;;  %v4947_v2 = vld [vmem:[#allocation3 + $0x9c] sm:$0xf] }
 0x3ee   : > { %v5940_v24 = vpop.permute.xlu2 %5939  ;;  %v4807_v4 = vsel %vm9764_vm11, %v4799_v57, %v4806_v38  ;;  %v4938_v20 = vsel %vm10849_vm3, %v4808_v22, %v4937_v60  ;;  %v4748_v28 = vpack.c.bf16 %v4732_v50, %v4732_v50  ;;  %5830 = vst.msk [vmem:[#allocation4 + $0x2c] sm:$0xf] %vm5818_vm14, %v5793_v18  ;;  %v12111_v57 = vrot.slane %v6271_v63, 4 }
 0x3ef   : > { %5988 = vst.msk [vmem:[#allocation4] sm:$0xf] %vm5987_vm7, %v5940_v24  ;;  %6324 = vrot.lane.b32.xlu1 %v6173_v26, %s9657_s29  ;;  %v6274_v38 = vshll.u32 %v12080_v51, 16  ;;  %v6280_v22 = vshll.u32 %v6121_v11, 16  ;;  %v6124_v24 = vld [vmem:[#allocation3 + $0x70] sm:$0xf]  ;;  %v6253_v14 = vor.u32 %v6252_v37, %v6249_v43 }
 0x3f0   : > { %4936 = vst.msk [vmem:[#allocation3 + $0x88] sm:$0xf] %vm402_vm5, %v4807_v4  ;;  %v4810_v29 = vshrl.u32 %v4748_v28, 16  ;;  %v4813_v3 = vshll.u32 %v4748_v28, 16  ;;  %v6284_v26 = vshrl.u32 %v6121_v11, 16  ;;  %v6297_v0 = vrot.slane %v6295_v21, 4 }
 0x3f1   : > { %4939 = vst [vmem:[#allocation3 + $0x8c] sm:$0x1] %v4938_v20  ;;  %v4703_v62 = vpop.f32.mrf.mxu1  ;;  %v5789_v40 = vpop.permute.xlu1 %5788  ;;  %v6300_v4 = vrot.slane %v6298_v31, 5  ;;  %v510_v20 = vld [vmem:[#allocation3 + $0xb0] sm:$0x1]  ;;  %v6276_v59 = vrot.slane %v6274_v38, 5 }
 0x3f2   : > { %v12085_v54 = vrot.slane %v4810_v29, 7  ;;  %v4704_v16 = vadd.f32 %v11920_v7, %v4703_v62  ;;  %5828 = vst.msk [vmem:[#allocation4 + $0x24] sm:$0xf] %vm5818_vm14, %v5789_v40  ;;  %v511_v17 = vsel %vm11124_vm12, 0, %v510_v20  ;;  %v6304_v29 = vshll.u32 %v6124_v24, 16 }
 0x3f3   : > { %6334 = vrot.lane.b32.xlu0 %v6235_v9, %s9657_s29  ;;  %512 = vst [vmem:[#allocation3 + $0xb0] sm:$0x1] %v511_v17  ;;  %v6301_v1 = vor.u32 %v6300_v4, %v6297_v0  ;;  %v6308_v52 = vshrl.u32 %v6124_v24, 16  ;;  %v6254_v63 = vrot.slane %v6253_v14, 4  ;;  %v458_v21 = vld [vmem:[#allocation3 + $0xb4] sm:$0x1] }
 0x3f4   : > { %6326 = vrot.lane.b32.xlu2 %v6187_v48, %s9657_s29  ;;  %v4815_v47 = vor.u32 %v4813_v3, %v12085_v54  ;;  %v4733_v46 = vmax.f32 %v4704_v16, 0.0  ;;  %v4816_v32 = vrot.slane %v12085_v54, 4  ;;  %v6282_v3 = vrot.slane %v6280_v22, 5  ;;  %v12127_v16 = vld [vmem:[#allocation3 + $0x1c] sm:$0xf] }
 0x3f5   : > { %v5799_v42 = vpop.permute.xlu0 %5798  ;;  %v6286_v48 = vrot.slane %v6284_v26, 4  ;;  %v6245_v54 = vsel %vm9782_vm13, %v12097_v55, %v12083_v5  ;;  %v6306_v10 = vrot.slane %v6304_v29, 5  ;;  %v6433_v56 = vrot.slane %v12127_v16, 5  ;;  %v6125_v22 = vld [vmem:[#allocation3 + $0x74] sm:$0x1] }
 0x3f6   : > { %v5946_v30 = vpop.permute.xlu2 %5945  ;;  %v4941_v25 = vsel %vm11192_vm6, %v4815_v47, %v4940_v8  ;;  %v4749_v60 = vpack.c.bf16 %v4733_v46, %v4733_v46  ;;  %5833 = vst.msk [vmem:[#allocation4 + $0x38] sm:$0xf] %vm5818_vm14, %v5799_v42  ;;  %v6277_v46 = vor.u32 %v6276_v59, %v12111_v57  ;;  %v6259_v5 = vsel %vm9782_vm13, %v6254_v63, %v12076_v45  ;;  %v6385_v4 = vld [vmem:[#allocation3 + $0x20] sm:$0x1] }
 0x3f7   : > { %5991 = vst.msk [vmem:[#allocation4 + $0xc] sm:$0xf] %vm5987_vm7, %v5946_v30  ;;  %6330 = vrot.lane.b32.xlu1 %v6211_v39, %s9657_s29  ;;  %v6122_v39 = vld [vmem:[#allocation3 + $0x68] sm:$0x1]  ;;  %v6302_v30 = vrot.slane %v6301_v1, 4  ;;  %v6287_v43 = vor.u32 %v6286_v48, %v6282_v3  ;;  %v6310_v37 = vrot.slane %v6308_v52, 4 }
 0x3f8   : > { %4942 = vst [vmem:[#allocation3 + $0x90] sm:$0xf] %v4941_v25  ;;  %v4818_v50 = vshrl.u32 %v4749_v60, 16  ;;  %v4821_v18 = vshll.u32 %v4749_v60, 16  ;;  %v459_v42 = vsel %vm10849_vm3, 0, %v458_v21  ;;  %v6290_v23 = vshll.u32 %v6122_v39, 16 }
 0x3f9   : > { %v4706_v27 = vpop.f32.mrf.mxu1  ;;  %v5795_v15 = vpop.permute.xlu1 %5794  ;;  %v6307_v45 = vsel %vm9782_vm13, %v6302_v30, %v6306_v10  ;;  %460 = vst [vmem:[#allocation3 + $0xb4] sm:$0x1] %v459_v42  ;;  %v6278_v38 = vrot.slane %v6277_v46, 4  ;;  %v6288_v24 = vrot.slane %v6287_v43, 4  ;;  %v6435_v26 = vrot.slane %v6433_v56, 4 }
 0x3fa   : > { %v4820_v28 = vrot.slane %v4818_v50, 7  ;;  %v4707_v41 = vadd.f32 %v11920_v7, %v4706_v27  ;;  %5831 = vst.msk [vmem:[#allocation4 + $0x30] sm:$0xf] %vm5818_vm14, %v5795_v15  ;;  %v6311_v20 = vor.u32 %v6310_v37, %v6306_v10  ;;  %v6436_v59 = vrot.slane %v6385_v4, 5  ;;  %v6386_v43 = vld [vmem:[#allocation3 + $0x24] sm:$0xe] }
 0x3fb   : > { %6340 = vrot.lane.b32.xlu0 %v6269_v12, %s9657_s29  ;;  %v6283_v15 = vsel %vm9782_vm13, %v6278_v38, %v6282_v3  ;;  %v6383_v3 = vld [vmem:[#allocation3 + $0x18] sm:$0xe]  ;;  %v12185_v21 = vld [vmem:[#allocation3 + $0x40] sm:$0xf] }
 0x3fc   : > { %6332 = vrot.lane.b32.xlu2 %v6221_v34, %s9657_s29  ;;  %v4823_v51 = vor.u32 %v4821_v18, %v4820_v28  ;;  %v4825_v62 = vrot.slane %v4820_v28, 4  ;;  %v4734_v40 = vmax.f32 %v4707_v41, 0.0  ;;  %v6292_v28 = vrot.slane %v6290_v23, 5  ;;  %v513_v41 = vld [vmem:[#allocation3 + $0xbc] sm:$0x1] }
 0x3fd   : > { %v5942_v53 = vpop.permute.xlu0 %5941  ;;  %v6314_v18 = vshll.u32 %v6125_v22, 16  ;;  %v6437_v1 = vsel %vm9959_vm1, %v6435_v26, %v6436_v59  ;;  %v4954_v22 = vld [vmem:[#allocation3 + $0xa8] sm:$0xf]  ;;  %v9404_v26 = vrot.slane %v6386_v43, 9  ;;  %v6398_v43 = vld [vmem:[#allocation3 + $0x54] sm:$0xe] }
 0x3fe   : > { %v5952_v13 = vpop.permute.xlu2 %5951  ;;  %v4824_v35 = vsel %vm9764_vm11, %v4816_v32, %v4823_v51  ;;  %v4945_v8 = vsel %vm10849_vm3, %v4825_v62, %v4944_v6  ;;  %v4750_v9 = vpack.c.bf16 %v4734_v40, %v4734_v40  ;;  %5989 = vst.msk [vmem:[#allocation4 + $0x4] sm:$0xf] %vm5987_vm7, %v5942_v53  ;;  %v514_v6 = vsel %vm11124_vm12, 0, %v513_v41 }
 0x3ff   : > { %5994 = vst.msk [vmem:[#allocation4 + $0x18] sm:$0xf] %vm5987_vm7, %v5952_v13  ;;  %6336 = vrot.lane.b32.xlu1 %v6245_v54, %s9657_s29  ;;  %v6293_v12 = vsel %vm9782_vm13, %v6288_v24, %v6292_v28  ;;  %v6312_v40 = vrot.slane %v6311_v20, 4  ;;  %v4951_v13 = vld [vmem:[#allocation3 + $0xa4] sm:$0x1]  ;;  %v6316_v52 = vrot.slane %v6314_v18, 5 }
 0x400   : > { %4943 = vst.msk [vmem:[#allocation3 + $0x94] sm:$0xf] %vm402_vm5, %v4824_v35  ;;  %v4827_v47 = vshrl.u32 %v4750_v9, 16  ;;  %v4830_v25 = vshll.u32 %v4750_v9, 16  ;;  %v12173_v54 = vld [vmem:[#allocation3 + $0x34] sm:$0xf] }
 0x401   : > { %4946 = vst [vmem:[#allocation3 + $0x98] sm:$0x1] %v4945_v8  ;;  %v4708_v55 = vpop.f32.mrf.mxu1  ;;  %v5801_v11 = vpop.permute.xlu1 %5800  ;;  %v6317_v46 = vsel %vm9782_vm13, %v6312_v40, %v6316_v52  ;;  %v6447_v30 = vrot.slane %v12173_v54, 5  ;;  %v6394_v18 = vld [vmem:[#allocation3 + $0x44] sm:$0x1] }
 0x402   : > { %v4829_v31 = vrot.slane %v4827_v47, 7  ;;  %v4709_v60 = vadd.f32 %v11920_v7, %v4708_v55  ;;  %5834 = vst.msk [vmem:[#allocation4 + $0x3c] sm:$0xf] %vm5818_vm14, %v5801_v11  ;;  %v6387_v55 = vld [vmem:[#allocation3 + $0x28] sm:$0xf]  ;;  %v9403_v11 = vrot.slane %v6383_v3, 9 }
 0x403   : > { %6346 = vrot.lane.b32.xlu0 %v6307_v45, %s9657_s29  ;;  %515 = vst [vmem:[#allocation3 + $0xbc] sm:$0x1] %v514_v6  ;;  %v461_v45 = vld [vmem:[#allocation3 + $0xc0] sm:$0x1]  ;;  %v516_v6 = vld [vmem:[#allocation3 + $0xc8] sm:$0x1] }
 0x404   : > { %6338 = vrot.lane.b32.xlu2 %v6259_v5, %s9657_s29  ;;  %v4832_v58 = vor.u32 %v4830_v25, %v4829_v31  ;;  %v4735_v57 = vmax.f32 %v4709_v60, 0.0  ;;  %v4833_v48 = vrot.slane %v4829_v31, 4  ;;  %v6389_v5 = vld [vmem:[#allocation3 + $0x30] sm:$0xe]  ;;  %v6434_v31 = vsel %vm9959_vm1, %v9403_v11, %v6433_v56  ;;  %v6392_v40 = vld [vmem:[#allocation3 + $0x3c] sm:$0xe] }
 0x405   : > { %v5948_v0 = vpop.permute.xlu0 %5947  ;;  %v9405_v42 = vrot.slane %v6389_v5, 9  ;;  %v462_v38 = vsel %vm10849_vm3, 0, %v461_v45  ;;  %v6454_v56 = vrot.slane %v12185_v21, 5  ;;  %v6449_v3 = vrot.slane %v6447_v30, 4 }
 0x406   : > { %v5958_v50 = vpop.permute.xlu2 %5957  ;;  %v4948_v34 = vsel %vm11192_vm6, %v4832_v58, %v4947_v2  ;;  %v4751_v27 = vpack.c.bf16 %v4735_v57, %v4735_v57  ;;  %5992 = vst.msk [vmem:[#allocation4 + $0x10] sm:$0xf] %vm5987_vm7, %v5948_v0  ;;  %v6440_v2 = vrot.slane %v6387_v55, 5 }
 0x407   : > { %5997 = vst.msk [vmem:[#allocation4 + $0x24] sm:$0xf] %vm5987_vm7, %v5958_v50  ;;  %6342 = vrot.lane.b32.xlu1 %v6283_v15, %s9657_s29  ;;  %v6448_v16 = vsel %vm9959_vm1, %v9405_v42, %v6447_v30 }
 0x408   : > { %4949 = vst [vmem:[#allocation3 + $0x9c] sm:$0xf] %v4948_v34  ;;  %v4835_v17 = vshrl.u32 %v4751_v27, 16  ;;  %v4838_v51 = vshll.u32 %v4751_v27, 16  ;;  %v6388_v34 = vld [vmem:[#allocation3 + $0x2c] sm:$0x1]  ;;  %v6441_v20 = vsel %vm9959_vm1, %v9404_v26, %v6440_v2 }
 0x409   : > { %v4711_v14 = vpop.f32.mrf.mxu1  ;;  %v5944_v29 = vpop.permute.xlu1 %5943  ;;  %463 = vst [vmem:[#allocation3 + $0xc0] sm:$0x1] %v462_v38  ;;  %v6442_v15 = vrot.slane %v6440_v2, 4  ;;  %v6443_v41 = vrot.slane %v6388_v34, 5  ;;  %v6395_v2 = vld [vmem:[#allocation3 + $0x48] sm:$0xe] }
 0x40a   : > { %v4837_v32 = vrot.slane %v4835_v17, 7  ;;  %v4712_v62 = vadd.f32 %v11920_v7, %v4711_v14  ;;  %5990 = vst.msk [vmem:[#allocation4 + $0x8] sm:$0xf] %vm5987_vm7, %v5944_v29  ;;  %v6456_v17 = vrot.slane %v6454_v56, 4  ;;  %v6391_v14 = vld [vmem:[#allocation3 + $0x38] sm:$0x1] }
 0x40b   : > { %6489 = vrot.lane.b32.xlu0 %v6437_v1, %s9658_s30  ;;  %v517_v29 = vsel %vm11124_vm12, 0, %v516_v6  ;;  %v6444_v59 = vsel %vm9959_vm1, %v6442_v15, %v6443_v41  ;;  %v4961_v26 = vld [vmem:[#allocation3 + $0xb4] sm:$0xf]  ;;  %v6403_v41 = vld [vmem:[#allocation3 + $0x68] sm:$0x1] }
 0x40c   : > { %6344 = vrot.lane.b32.xlu2 %v6293_v12, %s9657_s29  ;;  %v4840_v35 = vor.u32 %v4838_v51, %v4837_v32  ;;  %v4842_v8 = vrot.slane %v4837_v32, 4  ;;  %v4736_v9 = vmax.f32 %v4712_v62, 0.0  ;;  %v6457_v62 = vrot.slane %v6394_v18, 5  ;;  %518 = vst [vmem:[#allocation3 + $0xc8] sm:$0x1] %v517_v29 }
 0x40d   : > { %v5954_v39 = vpop.permute.xlu0 %5953 }
 0x40e   : > { %v5964_v53 = vpop.permute.xlu2 %5963  ;;  %v4841_v63 = vsel %vm9764_vm11, %v4833_v48, %v4840_v35  ;;  %v4952_v10 = vsel %vm10849_vm3, %v4842_v8, %v4951_v13  ;;  %v4752_v47 = vpack.c.bf16 %v4736_v9, %v4736_v9  ;;  %5995 = vst.msk [vmem:[#allocation4 + $0x1c] sm:$0xf] %vm5987_vm7, %v5954_v39  ;;  %v4958_v48 = vld [vmem:[#allocation3 + $0xb0] sm:$0x1]  ;;  %v6458_v35 = vsel %vm9959_vm1, %v6456_v17, %v6457_v62 }
 0x40f   : > { %6000 = vst.msk [vmem:[#allocation4 + $0x30] sm:$0xf] %vm5987_vm7, %v5964_v53  ;;  %6348 = vrot.lane.b32.xlu1 %v6317_v46, %s9657_s29  ;;  %v6450_v8 = vrot.slane %v6391_v14, 5  ;;  %v6396_v46 = vld [vmem:[#allocation3 + $0x4c] sm:$0xf] }
 0x410   : > { %4950 = vst.msk [vmem:[#allocation3 + $0xa0] sm:$0xf] %vm402_vm5, %v4841_v63  ;;  %v4844_v37 = vshrl.u32 %v4752_v47, 16  ;;  %v4847_v58 = vshll.u32 %v4752_v47, 16  ;;  %v9406_v47 = vrot.slane %v6392_v40, 9 }
 0x411   : > { %4953 = vst [vmem:[#allocation3 + $0xa4] sm:$0x1] %v4952_v10  ;;  %v4713_v25 = vpop.f32.mrf.mxu1  ;;  %v5950_v60 = vpop.permute.xlu1 %5949  ;;  %v12220_v10 = vld [vmem:[#allocation3 + $0x58] sm:$0xf]  ;;  %v6451_v11 = vsel %vm9959_vm1, %v6449_v3, %v6450_v8  ;;  %v7139_v3 = vld [vmem:[#allocation3 + $0x70] sm:$0xf] }
 0x412   : > { %v4846_v23 = vrot.slane %v4844_v37, 7  ;;  %v4714_v57 = vadd.f32 %v11920_v7, %v4713_v25  ;;  %5993 = vst.msk [vmem:[#allocation4 + $0x14] sm:$0xf] %vm5987_vm7, %v5950_v60  ;;  %v7135_v37 = vld [vmem:[#allocation3 + $0x60] sm:$0xf]  ;;  %v6455_v42 = vsel %vm9959_vm1, %v9406_v47, %v6454_v56 }
 0x413   : > { %6495 = vrot.lane.b32.xlu0 %v6448_v16, %s9658_s30  ;;  %v12232_v25 = vld [vmem:[#allocation3 + $0x64] sm:$0xf]  ;;  %v7160_v38 = vshrl.u32 %v7135_v37, 16 }
 0x414   : > { %6487 = vrot.lane.b32.xlu2 %v6434_v31, %s9658_s30  ;;  %v4849_v50 = vor.u32 %v4847_v58, %v4846_v23  ;;  %v4737_v24 = vmax.f32 %v4714_v57, 0.0  ;;  %v4850_v9 = vrot.slane %v4846_v23, 4  ;;  %v6468_v31 = vrot.slane %v12220_v10, 5 }
 0x415   : > { %v5960_v28 = vpop.permute.xlu0 %5959  ;;  %v9408_v58 = vrot.slane %v6398_v43, 9  ;;  %v6461_v57 = vrot.slane %v6396_v46, 5  ;;  %v6475_v56 = vrot.slane %v12232_v25, 5  ;;  %v7162_v17 = vrot.slane %v7160_v38, 4  ;;  %v4965_v46 = vld [vmem:[#allocation3 + $0xbc] sm:$0x1] }
 0x416   : > { %v5970_v27 = vpop.permute.xlu2 %5969  ;;  %v4955_v0 = vsel %vm11192_vm6, %v4849_v50, %v4954_v22  ;;  %v4753_v4 = vpack.c.bf16 %v4737_v24, %v4737_v24  ;;  %5998 = vst.msk [vmem:[#allocation4 + $0x28] sm:$0xf] %vm5987_vm7, %v5960_v28  ;;  %v7163_v22 = vshll.u32 %v7135_v37, 16  ;;  %v12244_v24 = vld [vmem:[%s13282_s2] ss:$0 sm:$0xff] }
 0x417   : > { %6003 = vst.msk [vmem:[#allocation4 + $0x3c] sm:$0xf] %vm5987_vm7, %v5970_v27  ;;  %6491 = vrot.lane.b32.xlu1 %v6441_v20, %s9658_s30  ;;  %v6469_v34 = vsel %vm9959_vm1, %v9408_v58, %v6468_v31  ;;  %v7136_v20 = vld [vmem:[#allocation3 + $0x64] sm:$0xf]  ;;  %v6463_v18 = vrot.slane %v6461_v57, 4 }
 0x418   : > { %4956 = vst [vmem:[#allocation3 + $0xa8] sm:$0xf] %v4955_v0  ;;  %v4852_v12 = vshrl.u32 %v4753_v4, 16  ;;  %v4855_v1 = vshll.u32 %v4753_v4, 16  ;;  %v9407_v0 = vrot.slane %v6395_v2, 9  ;;  %v7165_v6 = vrot.slane %v7163_v22, 5 }
 0x419   : > { %v4716_v32 = vpop.f32.mrf.mxu1  ;;  %v5956_v51 = vpop.permute.xlu1 %5955  ;;  %v6397_v4 = vld [vmem:[#allocation3 + $0x50] sm:$0x1]  ;;  %v7169_v40 = vshll.u32 %v7136_v20, 16  ;;  %v6401_v2 = vld [vmem:[#allocation3 + $0x60] sm:$0xe] }
 0x41a   : > { %v4854_v13 = vrot.slane %v4852_v12, 7  ;;  %v4717_v52 = vadd.f32 %v11920_v7, %v4716_v32  ;;  %5996 = vst.msk [vmem:[#allocation4 + $0x20] sm:$0xf] %vm5987_vm7, %v5956_v51  ;;  %v6462_v29 = vsel %vm9959_vm1, %v9407_v0, %v6461_v57  ;;  %v6477_v32 = vrot.slane %v6475_v56, 4  ;;  %v6400_v51 = vld [vmem:[#allocation3 + $0x5c] sm:$0x1] }
 0x41b   : > { %6501 = vrot.lane.b32.xlu0 %v6458_v35, %s9658_s30  ;;  %v6464_v62 = vrot.slane %v6397_v4, 5  ;;  %v9409_v4 = vrot.slane %v6401_v2, 9 }
 0x41c   : > { %6493 = vrot.lane.b32.xlu2 %v6444_v59, %s9658_s30  ;;  %v4857_v54 = vor.u32 %v4855_v1, %v4854_v13  ;;  %v4859_v53 = vrot.slane %v4854_v13, 4  ;;  %v4738_v63 = vmax.f32 %v4717_v52, 0.0  ;;  %v7173_v13 = vshrl.u32 %v7136_v20, 16 }
 0x41d   : > { %v5966_v30 = vpop.permute.xlu0 %5965  ;;  %v6478_v52 = vrot.slane %v6403_v41, 5 }
 0x41e   : > { %v6042_v7 = vpop.permute.xlu2 %6041  ;;  %v4858_v39 = vsel %vm9764_vm11, %v4850_v9, %v4857_v54  ;;  %v4959_v5 = vsel %vm10849_vm3, %v4859_v53, %v4958_v48  ;;  %v4754_v55 = vpack.c.bf16 %v4738_v63, %v4738_v63  ;;  %6001 = vst.msk [vmem:[#allocation4 + $0x34] sm:$0xf] %vm5987_vm7, %v5966_v30  ;;  %v6465_v48 = vsel %vm9959_vm1, %v6463_v18, %v6464_v62  ;;  %v7144_v62 = vld [vmem:[#allocation3 + $0x84] sm:$0xf] }
 0x41f   : > { %6088 = vst.msk [vmem:[#allocation4 + $0x8] sm:$0xf] %vm6085_vm10, %v6042_v7  ;;  %6497 = vrot.lane.b32.xlu1 %v6451_v11, %s9658_s30  ;;  %v6470_v9 = vrot.slane %v6468_v31, 4  ;;  %v6471_v54 = vrot.slane %v6400_v51, 5  ;;  %v7166_v53 = vor.u32 %v7165_v6, %v7162_v17  ;;  %v6479_v47 = vsel %vm9959_vm1, %v6477_v32, %v6478_v52 }
 0x420   : > { %4957 = vst.msk [vmem:[#allocation3 + $0xac] sm:$0xf] %vm402_vm5, %v4858_v39  ;;  %v4861_v60 = vshrl.u32 %v4754_v55, 16  ;;  %v4864_v50 = vshll.u32 %v4754_v55, 16  ;;  %v7171_v39 = vrot.slane %v7169_v40, 5  ;;  %v7197_v55 = vshrl.u32 %v7139_v3, 16 }
 0x421   : > { %4960 = vst [vmem:[#allocation3 + $0xb0] sm:$0x1] %v4959_v5  ;;  %v4718_v45 = vpop.f32.mrf.mxu1  ;;  %v5962_v23 = vpop.permute.xlu1 %5961  ;;  %v7193_v5 = vshll.u32 %v7139_v3, 16  ;;  %v7175_v11 = vrot.slane %v7173_v13, 4  ;;  %v6472_v22 = vsel %vm9959_vm1, %v6470_v9, %v6471_v54  ;;  %v7167_v20 = vrot.slane %v7166_v53, 4 }
 0x422   : > { %v12239_v16 = vrot.slane %v4861_v60, 7  ;;  %v4719_v21 = vadd.f32 %v12244_v24, %v4718_v45  ;;  %5999 = vst.msk [vmem:[#allocation4 + $0x2c] sm:$0xf] %vm5987_vm7, %v5962_v23  ;;  %v7137_v60 = vld [vmem:[#allocation3 + $0x68] sm:$0x1]  ;;  %v6476_v32 = vsel %vm9959_vm1, %v9409_v4, %v6475_v56 }
 0x423   : > { %6507 = vrot.lane.b32.xlu0 %v6469_v34, %s9658_s30  ;;  %v6404_v45 = vld [vmem:[#allocation3 + $0x6c] sm:$0xe]  ;;  %v6405_v23 = vld [vmem:[#allocation3 + $0x70] sm:$0xf]  ;;  %v7199_v34 = vrot.slane %v7197_v55, 4  ;;  %v7172_v13 = vsel %vm9782_vm13, %v7167_v20, %v7171_v39 }
 0x424   : > { %6499 = vrot.lane.b32.xlu2 %v6455_v42, %s9658_s30  ;;  %v4866_v27 = vor.u32 %v4864_v50, %v12239_v16  ;;  %v4739_v15 = vmax.f32 %v4719_v21, 0.0  ;;  %v4867_v30 = vrot.slane %v12239_v16, 4  ;;  %v7140_v50 = vld [vmem:[#allocation3 + $0x74] sm:$0x1]  ;;  %v7138_v21 = vld [vmem:[#allocation3 + $0x6c] sm:$0xf] }
 0x425   : > { %v6038_v59 = vpop.permute.xlu0 %6037  ;;  %v9410_v17 = vrot.slane %v6404_v45, 9  ;;  %v7203_v6 = vshll.u32 %v7140_v50, 16  ;;  %v4968_v40 = vld [vmem:[#allocation3 + $0xc0] sm:$0xf]  ;;  %v7145_v55 = vld [vmem:[#allocation3 + $0x88] sm:$0xf] }
 0x426   : > { %v6048_v28 = vpop.permute.xlu2 %6047  ;;  %v4962_v12 = vsel %vm11192_vm6, %v4866_v27, %v4961_v26  ;;  %v4755_v14 = vpack.c.bf16 %v4739_v15, %v4739_v15  ;;  %6086 = vst.msk [vmem:[#allocation4] sm:$0xf] %vm6085_vm10, %v6038_v59  ;;  %v12281_v26 = vrot.slane %v7193_v5, 5  ;;  %v7176_v27 = vor.u32 %v7175_v11, %v7171_v39  ;;  %v4972_v50 = vld [vmem:[#allocation3 + $0xc8] sm:$0x1] }
 0x427   : > { %6091 = vst.msk [vmem:[#allocation4 + $0x14] sm:$0xf] %vm6085_vm10, %v6048_v28  ;;  %6503 = vrot.lane.b32.xlu1 %v6462_v29, %s9658_s30  ;;  %v7179_v15 = vshll.u32 %v7137_v60, 16  ;;  %v6482_v28 = vrot.slane %v6405_v23, 5  ;;  %v7205_v5 = vrot.slane %v7203_v6, 5 }
 0x428   : > { %4963 = vst [vmem:[#allocation3 + $0xb4] sm:$0xf] %v4962_v12  ;;  %v4869_v1 = vshrl.u32 %v4755_v14, 16  ;;  %v4872_v10 = vshll.u32 %v4755_v14, 16  ;;  %v7184_v12 = vshrl.u32 %v7138_v21, 16  ;;  %v7187_v14 = vshll.u32 %v7138_v21, 16 }
 0x429   : > { %v4721_v35 = vpop.f32.mrf.mxu1  ;;  %v5968_v8 = vpop.permute.xlu1 %5967  ;;  %v7200_v52 = vor.u32 %v7199_v34, %v12281_v26  ;;  %v12296_v3 = vrot.slane %v7176_v27, 4  ;;  %v7181_v25 = vrot.slane %v7179_v15, 5  ;;  %v7148_v60 = vld [vmem:[#allocation3 + $0x94] sm:$0xf] }
 0x42a   : > { %v4871_v63 = vrot.slane %v4869_v1, 7  ;;  %v4722_v7 = vadd.f32 %v12244_v24, %v4721_v35  ;;  %6002 = vst.msk [vmem:[#allocation4 + $0x38] sm:$0xf] %vm5987_vm7, %v5968_v8  ;;  %v6406_v1 = vld [vmem:[#allocation3 + $0x74] sm:$0x1]  ;;  %v6484_v35 = vrot.slane %v6482_v28, 4 }
 0x42b   : > { %6513 = vrot.lane.b32.xlu0 %v6479_v47, %s9658_s30  ;;  %v7141_v8 = vld [vmem:[#allocation3 + $0x78] sm:$0xf]  ;;  %v7186_v54 = vrot.slane %v7184_v12, 4  ;;  %v7189_v53 = vrot.slane %v7187_v14, 5  ;;  %v6485_v39 = vrot.slane %v6406_v1, 5  ;;  %v7201_v11 = vrot.slane %v7200_v52, 4 }
 0x42c   : > { %6505 = vrot.lane.b32.xlu2 %v6465_v48, %s9658_s30  ;;  %v4874_v43 = vor.u32 %v4872_v10, %v4871_v63  ;;  %v4876_v37 = vrot.slane %v4871_v63, 4  ;;  %v4740_v31 = vmax.f32 %v4722_v7, 0.0  ;;  %v7232_v63 = vshrl.u32 %v7144_v62, 16  ;;  %v7149_v52 = vld [vmem:[#allocation3 + $0x98] sm:$0x1] }
 0x42d   : > { %v6044_v16 = vpop.permute.xlu0 %6043  ;;  %v7235_v10 = vshll.u32 %v7144_v62, 16  ;;  %v6486_v49 = vsel %vm9959_vm1, %v6484_v35, %v6485_v39  ;;  %v7190_v2 = vor.u32 %v7189_v53, %v7186_v54  ;;  %v7206_v21 = vsel %vm9782_vm13, %v7201_v11, %v7205_v5  ;;  %v7143_v62 = vld [vmem:[#allocation3 + $0x80] sm:$0x1] }
 0x42e   : > { %v6054_v42 = vpop.permute.xlu2 %6053  ;;  %v4875_v58 = vsel %vm9764_vm11, %v4867_v30, %v4874_v43  ;;  %v4966_v57 = vsel %vm10849_vm3, %v4876_v37, %v4965_v46  ;;  %v4756_v38 = vpack.c.bf16 %v4740_v31, %v4740_v31  ;;  %6089 = vst.msk [vmem:[#allocation4 + $0xc] sm:$0xf] %vm6085_vm10, %v6044_v16  ;;  %v7142_v30 = vld [vmem:[#allocation3 + $0x7c] sm:$0xf]  ;;  %v7208_v43 = vshrl.u32 %v7141_v8, 16 }
 0x42f   : > { %6094 = vst.msk [vmem:[#allocation4 + $0x20] sm:$0xf] %vm6085_vm10, %v6054_v42  ;;  %6509 = vrot.lane.b32.xlu1 %v6472_v22, %s9658_s30  ;;  %v7211_v31 = vshll.u32 %v7141_v8, 16  ;;  %v7234_v45 = vrot.slane %v7232_v63, 4  ;;  %v7237_v23 = vrot.slane %v7235_v10, 5  ;;  %v7217_v22 = vshll.u32 %v7142_v30, 16 }
 0x430   : > { %4964 = vst.msk [vmem:[#allocation3 + $0xb8] sm:$0xf] %vm402_vm5, %v4875_v58  ;;  %v4878_v0 = vshrl.u32 %v4756_v38, 16  ;;  %v4881_v59 = vshll.u32 %v4756_v38, 16  ;;  %v7241_v58 = vshll.u32 %v7145_v55, 16  ;;  %v7221_v16 = vshrl.u32 %v7142_v30, 16 }
 0x431   : > { %4967 = vst [vmem:[#allocation3 + $0xbc] sm:$0x1] %v4966_v57  ;;  %v4723_v18 = vpop.f32.mrf.mxu1  ;;  %v6040_v41 = vpop.permute.xlu1 %6039  ;;  %v7210_v34 = vrot.slane %v7208_v43, 4  ;;  %v7265_v27 = vshll.u32 %v7148_v60, 16  ;;  %v7269_v15 = vshrl.u32 %v7148_v60, 16  ;;  %v7245_v12 = vshrl.u32 %v7145_v55, 16 }
 0x432   : > { %v12284_v29 = vrot.slane %v4878_v0, 7  ;;  %v4724_v51 = vadd.f32 %v12244_v24, %v4723_v18  ;;  %6087 = vst.msk [vmem:[#allocation4 + $0x4] sm:$0xf] %vm6085_vm10, %v6040_v41  ;;  %v6483_v24 = vsel %vm9959_vm1, %v9410_v17, %v6482_v28  ;;  %v7213_v28 = vrot.slane %v7211_v31, 5  ;;  %v7146_v10 = vld [vmem:[#allocation3 + $0x8c] sm:$0x1] }
 0x433   : > { %7351 = vrot.lane.b32.xlu0 %v7172_v13, %s9648_s8  ;;  %v7182_v41 = vsel %vm9782_vm13, %v12296_v3, %v7181_v25  ;;  %v7238_v17 = vor.u32 %v7237_v23, %v7234_v45  ;;  %v12318_v6 = vrot.slane %v7241_v58, 5  ;;  %v7271_v13 = vrot.slane %v7269_v15, 4  ;;  %v7150_v55 = vld [vmem:[#allocation3 + $0x9c] sm:$0xf]  ;;  %v7154_v31 = vld [vmem:[#allocation3 + $0xac] sm:$0xf] }
 0x434   : > { %6511 = vrot.lane.b32.xlu2 %v6476_v32, %s9658_s30  ;;  %v4883_v48 = vor.u32 %v4881_v59, %v12284_v29  ;;  %v4741_v56 = vmax.f32 %v4724_v51, 0.0  ;;  %v4884_v0 = vrot.slane %v12284_v29, 4  ;;  %v7219_v32 = vrot.slane %v7217_v22, 5 }
 0x435   : > { %v6050_v46 = vpop.permute.xlu0 %6049  ;;  %v7223_v51 = vrot.slane %v7221_v16, 4  ;;  %v7191_v1 = vrot.slane %v7190_v2, 4  ;;  %v7214_v44 = vor.u32 %v7213_v28, %v7210_v34  ;;  %v7239_v25 = vrot.slane %v7238_v17, 4  ;;  %v7151_v2 = vld [vmem:[#allocation3 + $0xa0] sm:$0xf] }
 0x436   : > { %v6060_v9 = vpop.permute.xlu2 %6059  ;;  %v4969_v7 = vsel %vm11192_vm6, %v4883_v48, %v4968_v40  ;;  %v4757_v47 = vpack.c.bf16 %v4741_v56, %v4741_v56  ;;  %6092 = vst.msk [vmem:[#allocation4 + $0x18] sm:$0xf] %vm6085_vm10, %v6050_v46  ;;  %v12327_v40 = vrot.slane %v7265_v27, 5  ;;  %v7147_v48 = vld [vmem:[#allocation3 + $0x90] sm:$0xf]  ;;  %v7227_v35 = vshll.u32 %v7143_v62, 16 }
 0x437   : > { %6097 = vst.msk [vmem:[#allocation4 + $0x2c] sm:$0xf] %vm6085_vm10, %v6060_v9  ;;  %6515 = vrot.lane.b32.xlu1 %v6483_v24, %s9658_s30  ;;  %v7196_v56 = vsel %vm9782_vm13, %v7191_v1, %v12281_v26  ;;  %v7224_v24 = vor.u32 %v7223_v51, %v7219_v32  ;;  %v7247_v8 = vrot.slane %v7245_v12, 4  ;;  %v7153_v9 = vld [vmem:[#allocation3 + $0xa8] sm:$0xf]  ;;  %v7244_v54 = vsel %vm9782_vm13, %v7239_v25, %v12318_v6 }
 0x438   : > { %4970 = vst [vmem:[#allocation3 + $0xc0] sm:$0xf] %v4969_v7  ;;  %v4886_v37 = vshrl.u32 %v4757_v47, 16  ;;  %v4889_v38 = vshll.u32 %v4757_v47, 16  ;;  %v7272_v53 = vor.u32 %v7271_v13, %v12327_v40  ;;  %v7215_v63 = vrot.slane %v7214_v44, 4 }
 0x439   : > { %v6046_v42 = vpop.permute.xlu1 %6045  ;;  %v7256_v26 = vshrl.u32 %v7147_v48, 16  ;;  %v7259_v7 = vshll.u32 %v7147_v48, 16  ;;  %v7275_v46 = vshll.u32 %v7149_v52, 16  ;;  %v7304_v39 = vshrl.u32 %v7153_v9, 16  ;;  %v7152_v48 = vld [vmem:[#allocation3 + $0xa4] sm:$0x1] }
 0x43a   : > { %v4888_v57 = vrot.slane %v4886_v37, 7  ;;  %6090 = vst.msk [vmem:[#allocation4 + $0x10] sm:$0xf] %vm6085_vm10, %v6046_v42  ;;  %v7307_v5 = vshll.u32 %v7153_v9, 16  ;;  %v7220_v11 = vsel %vm9782_vm13, %v7215_v63, %v7219_v32  ;;  %v7225_v43 = vrot.slane %v7224_v24, 4 }
 0x43b   : > { %7357 = vrot.lane.b32.xlu0 %v7206_v21, %s9648_s8  ;;  %v7229_v37 = vrot.slane %v7227_v35, 5  ;;  %v7273_v60 = vrot.slane %v7272_v53, 4  ;;  %v7251_v42 = vshll.u32 %v7146_v10, 16  ;;  %v7258_v45 = vrot.slane %v7256_v26, 4  ;;  %v7156_v35 = vld [vmem:[#allocation3 + $0xb4] sm:$0xf] }
 0x43c   : > { %6517 = vrot.lane.b32.xlu2 %v6486_v49, %s9658_s30  ;;  %v4891_v4 = vor.u32 %v4889_v38, %v4888_v57  ;;  %v4893_v20 = vrot.slane %v4888_v57, 4  ;;  %v7248_v49 = vor.u32 %v7247_v8, %v12318_v6  ;;  %v7261_v23 = vrot.slane %v7259_v7, 5  ;;  %v7157_v38 = vld [vmem:[#allocation3 + $0xb8] sm:$0xf] }
 0x43d   : > { %v6056_v59 = vpop.permute.xlu0 %6055  ;;  %v7280_v58 = vshrl.u32 %v7150_v55, 16  ;;  %v7283_v57 = vshll.u32 %v7150_v55, 16  ;;  %v7277_v16 = vrot.slane %v7275_v46, 5  ;;  %v7309_v21 = vrot.slane %v7307_v5, 5  ;;  %v7155_v5 = vld [vmem:[#allocation3 + $0xb0] sm:$0x1] }
 0x43e   : > { %v6066_v18 = vpop.permute.xlu2 %6065  ;;  %v4892_v14 = vsel %vm9764_vm11, %v4884_v0, %v4891_v4  ;;  %v4973_v29 = vsel %vm10849_vm3, %v4893_v20, %v4972_v50  ;;  %6095 = vst.msk [vmem:[#allocation4 + $0x24] sm:$0xf] %vm6085_vm10, %v6056_v59  ;;  %vm6366_vm11 = vcmask 519616   ;;  %v7306_v50 = vrot.slane %v7304_v39, 4 }
 0x43f   : > { %6100 = vst.msk [vmem:[#allocation4 + $0x38] sm:$0xf] %vm6085_vm10, %v6066_v18  ;;  %7353 = vrot.lane.b32.xlu1 %v7182_v41, %s9648_s8  ;;  %v7230_v34 = vsel %vm9782_vm13, %v7225_v43, %v7229_v37  ;;  %v7249_v27 = vrot.slane %v7248_v49, 4  ;;  %v7289_v15 = vshll.u32 %v7151_v2, 16  ;;  %v7293_v0 = vshrl.u32 %v7151_v2, 16 }
 0x440   : > { %4971 = vst.msk [vmem:[#allocation3 + $0xc4] sm:$0xf] %vm402_vm5, %v4892_v14  ;;  %v7278_v4 = vsel %vm9782_vm13, %v7273_v60, %v7277_v16  ;;  %v7313_v20 = vshll.u32 %v7154_v31, 16  ;;  %v7337_v28 = vshll.u32 %v7157_v38, 16  ;;  %v7341_v18 = vshrl.u32 %v7157_v38, 16 }
 0x441   : > { %4974 = vst [vmem:[#allocation3 + $0xc8] sm:$0x1] %v4973_v29  ;;  %v6052_v3 = vpop.permute.xlu1 %6051  ;;  %v7253_v41 = vrot.slane %v7251_v42, 5  ;;  %v7262_v17 = vor.u32 %v7261_v23, %v7258_v45  ;;  %v7282_v6 = vrot.slane %v7280_v58, 4  ;;  %v7285_v12 = vrot.slane %v7283_v57, 5 }
 0x442   : > { %6093 = vst.msk [vmem:[#allocation4 + $0x1c] sm:$0xf] %vm6085_vm10, %v6052_v3  ;;  %v7310_v29 = vor.u32 %v7309_v21, %v7306_v50  ;;  %v7317_v51 = vshrl.u32 %v7154_v31, 16  ;;  %v7291_v62 = vrot.slane %v7289_v15, 5  ;;  %v7295_v13 = vrot.slane %v7293_v0, 4 }
 0x443   : > { %7363 = vrot.lane.b32.xlu0 %v7244_v54, %s9648_s8  ;;  %v7254_v59 = vsel %vm9782_vm13, %v7249_v27, %v7253_v41  ;;  %v7315_v1 = vrot.slane %v7313_v20, 5  ;;  %v12358_v44 = vrot.slane %v7337_v28, 5  ;;  %v7343_v52 = vrot.slane %v7341_v18, 4  ;;  %v7158_v54 = vld [vmem:[#allocation3 + $0xbc] sm:$0x1]  ;;  %v12393_v28 = vld [vmem:[%s13283_s3 + $0x18] sm:$0xff] }
 0x444   : > { %7355 = vrot.lane.b32.xlu2 %v7196_v56, %s9648_s8  ;;  %v7263_v3 = vrot.slane %v7262_v17, 4  ;;  %v7286_v25 = vor.u32 %v7285_v12, %v7282_v6  ;;  %v7311_v24 = vrot.slane %v7310_v29, 4  ;;  %v7296_v9 = vor.u32 %v7295_v13, %v7291_v62  ;;  %v1037_v37 = vld [vmem:[%s13283_s3 + $0x20] sm:$0xf]  ;;  %v7419_v27 = vld [vmem:[#allocation3 + $0x70] sm:$0xf] }
 0x445   : > { %v6062_v30 = vpop.permute.xlu0 %6061  ;;  %v7319_v53 = vrot.slane %v7317_v51, 4  ;;  %v7299_v10 = vshll.u32 %v7152_v48, 16  ;;  %v7344_v26 = vor.u32 %v7343_v52, %v12358_v44  ;;  %v7331_v46 = vshll.u32 %v7156_v35, 16  ;;  %v7418_v20 = vld [vmem:[#allocation3 + $0x6c] sm:$0xe]  ;;  %v12401_v12 = vld [vmem:[%s13283_s3 + $0x10] sm:$0xff] }
 0x446   : > { %v6321_v47 = vpop.permute.xlu2 %6320  ;;  %6098 = vst.msk [vmem:[#allocation4 + $0x30] sm:$0xf] %vm6085_vm10, %v6062_v30  ;;  %v7268_v8 = vsel %vm9782_vm13, %v7263_v3, %v12327_v40  ;;  %v7316_v63 = vsel %vm9782_vm13, %v7311_v24, %v7315_v1  ;;  %v7287_v7 = vrot.slane %v7286_v25, 4  ;;  %v7347_v40 = vshll.u32 %v7158_v54, 16  ;;  %v7416_v41 = vld [vmem:[#allocation3 + $0x64] sm:$0xf] }
 0x447   : > { %6368 = vst.msk [vmem:[#allocation4 + $0x4] sm:$0xf] %vm6366_vm11, %v6321_v47  ;;  %7359 = vrot.lane.b32.xlu1 %v7220_v11, %s9648_s8  ;;  %v7328_v47 = vshrl.u32 %v7156_v35, 16  ;;  %v7297_v30 = vrot.slane %v7296_v9, 4  ;;  %v7320_v43 = vor.u32 %v7319_v53, %v7315_v1  ;;  %v7301_v49 = vrot.slane %v7299_v10, 5  ;;  %v12418_v24 = vld [vmem:[%s13283_s3 + $0x8] sm:$0xff] }
 0x448   : > { %v7292_v55 = vsel %vm9782_vm13, %v7287_v7, %v7291_v62  ;;  %v7345_v31 = vrot.slane %v7344_v26, 4  ;;  %v6628_v60 = vunpack.c.l.b16 %v1037_v37  ;;  %v7323_v42 = vshll.u32 %v7155_v5, 16  ;;  %v7422_v6 = vld [vmem:[#allocation3 + $0x7c] sm:$0xf]  ;;  %v7417_v3 = vld [vmem:[#allocation3 + $0x68] sm:$0x1] }
 0x449   : > { %v6058_v22 = vpop.permute.xlu1 %6057  ;;  %v7330_v2 = vrot.slane %v7328_v47, 4  ;;  %v7333_v45 = vrot.slane %v7331_v46, 5  ;;  %vm6663_vm6 = vcmask 1043456   ;;  %v7349_v58 = vrot.slane %v7347_v40, 5  ;;  %v7680_v9 = vld [vmem:[#allocation3 + $0x70] sm:$0xf] }
 0x44a   : > { %6096 = vst.msk [vmem:[#allocation4 + $0x28] sm:$0xf] %vm6085_vm10, %v6058_v22  ;;  %v6633_v57 = vpack.c.b16 %v6628_v60, %v6628_v60  ;;  %v7302_v38 = vsel %vm9782_vm13, %v7297_v30, %v7301_v49  ;;  %v7321_v22 = vrot.slane %v7320_v43, 4  ;;  %v7325_v21 = vrot.slane %v7323_v42, 5  ;;  %v12426_v54 = vld [vmem:[%s13283_s3] sm:$0xff] }
 0x44b   : > { %7369 = vrot.lane.b32.xlu0 %v7278_v4, %s9648_s8  ;;  %v7350_v16 = vsel %vm9782_vm13, %v7345_v31, %v7349_v58  ;;  %v7472_v18 = vrot.slane %v7419_v27, 5  ;;  %v9476_v29 = vrot.slane %v7418_v20, 9  ;;  %v7465_v51 = vrot.slane %v7416_v41, 5  ;;  %v7420_v10 = vld [vmem:[#allocation3 + $0x74] sm:$0x1] }
 0x44c   : > { %7361 = vrot.lane.b32.xlu2 %v7230_v34, %s9648_s8  ;;  %v12383_v50 = vsel %vm6663_vm6, %v6633_v57, 0  ;;  %v7334_v34 = vor.u32 %v7333_v45, %v7330_v2  ;;  %v7326_v0 = vsel %vm9782_vm13, %v7321_v22, %v7325_v21  ;;  %v7479_v13 = vrot.slane %v7422_v6, 5  ;;  %v7425_v43 = vld [vmem:[#allocation3 + $0x88] sm:$0xf]  ;;  %v7424_v42 = vld [vmem:[#allocation3 + $0x84] sm:$0xe] }
 0x44d   : > { %v6068_v32 = vpop.permute.xlu0 %6067  ;;  %6670 = vmatpush.bf16.msra.mxu2 %v12383_v50  ;;  %v7473_v62 = vsel %vm9959_vm1, %v9476_v29, %v7472_v18  ;;  %v7467_v48 = vrot.slane %v7465_v51, 4  ;;  %v7474_v7 = vrot.slane %v7472_v18, 4  ;;  %v7713_v46 = vshll.u32 %v7680_v9, 16  ;;  %v7679_v2 = vld [vmem:[#allocation3 + $0x6c] sm:$0xf] }
 0x44e   : > { %v6327_v14 = vpop.permute.xlu2 %6326  ;;  %6101 = vst.msk [vmem:[#allocation4 + $0x3c] sm:$0xf] %vm6085_vm10, %v6068_v32  ;;  %v7335_v17 = vrot.slane %v7334_v34, 4  ;;  %v7481_v35 = vrot.slane %v7479_v13, 4  ;;  %v7475_v40 = vrot.slane %v7420_v10, 5  ;;  %v9478_v22 = vrot.slane %v7424_v42, 9 }
 0x44f   : > { %6371 = vst.msk [vmem:[#allocation4 + $0x10] sm:$0xf] %vm6366_vm11, %v6327_v14  ;;  %7365 = vrot.lane.b32.xlu1 %v7254_v59, %s9648_s8  ;;  %v7415_v59 = vld [vmem:[#allocation3 + $0x60] sm:$0xe]  ;;  %v7715_v37 = vrot.slane %v7713_v46, 5  ;;  %v7704_v21 = vshrl.u32 %v7679_v2, 16 }
 0x450   : > { %v7340_v32 = vsel %vm9782_vm13, %v7335_v17, %v12358_v44  ;;  %v9475_v1 = vrot.slane %v7415_v59, 9  ;;  %v7681_v58 = vld [vmem:[#allocation3 + $0x74] sm:$0x1]  ;;  %v7583_v57 = vld [vmem:[#allocation3 + $0x6c] sm:$0xf]  ;;  %v7707_v34 = vshll.u32 %v7679_v2, 16 }
 0x451   : > { %v6064_v56 = vpop.permute.xlu1 %6063  ;;  %6671 = vmatpush.bf16.msra.mxu2 %v12393_v28  ;;  %v7706_v17 = vrot.slane %v7704_v21, 4  ;;  %v7105_v29 = vld [vmem:[#allocation3 + $0x6c] sm:$0xf]  ;;  %v8224_v10 = vld [vmem:[#allocation3 + $0x78] sm:$0xf]  ;;  %vm6961_vm6 = vcmask 31744  }
 0x452   : > { %6099 = vst.msk [vmem:[#allocation4 + $0x34] sm:$0xf] %vm6085_vm10, %v6064_v56  ;;  %v7466_v44 = vsel %vm9959_vm1, %v9475_v1, %v7465_v51  ;;  %v7423_v56 = vld [vmem:[#allocation3 + $0x80] sm:$0x1]  ;;  %v7709_v6 = vrot.slane %v7707_v34, 5 }
 0x453   : > { %7375 = vrot.lane.b32.xlu0 %v7316_v63, %s9648_s8  ;;  %v7482_v63 = vrot.slane %v7423_v56, 5  ;;  %7121 = vst.msk [vmem:[#allocation4 + $0x48] sm:$0xf] %vm402_vm5, %v7105_v29  ;;  %v8128_v46 = vld [vmem:[#allocation3 + $0x78] sm:$0xf] }
 0x454   : > { %7367 = vrot.lane.b32.xlu2 %v7268_v8, %s9648_s8  ;;  %v7468_v8 = vrot.slane %v7417_v3, 5 }
 0x455   : > { %v6323_v11 = vpop.permute.xlu0 %6322  ;;  %6672 = vmatpush.bf16.msra.mxu2 %v12401_v12  ;;  %v7483_v47 = vsel %vm9959_vm1, %v7481_v35, %v7482_v63  ;;  %v7959_v63 = vld [vmem:[#allocation3 + $0x6c] sm:$0xe] }
 0x456   : > { %v6333_v39 = vpop.permute.xlu2 %6332  ;;  %6369 = vst.msk [vmem:[#allocation4 + $0x8] sm:$0xf] %vm6366_vm11, %v6323_v11  ;;  %v7469_v26 = vsel %vm9959_vm1, %v7467_v48, %v7468_v8  ;;  %v7476_v11 = vsel %vm9959_vm1, %v7474_v7, %v7475_v40  ;;  %v7960_v48 = vld [vmem:[#allocation3 + $0x70] sm:$0xf]  ;;  %v7108_v40 = vld [vmem:[#allocation3 + $0x7c] sm:$0xf] }
 0x457   : > { %6374 = vst.msk [vmem:[#allocation4 + $0x1c] sm:$0xf] %vm6366_vm11, %v6333_v39  ;;  %7371 = vrot.lane.b32.xlu1 %v7292_v55, %s9648_s8  ;;  %v7717_v39 = vshrl.u32 %v7680_v9, 16  ;;  %v7421_v55 = vld [vmem:[#allocation3 + $0x78] sm:$0xe]  ;;  %v8009_v7 = vrot.slane %v7960_v48, 5 }
 0x458   : > { %v9477_v31 = vrot.slane %v7421_v55, 9  ;;  %v7106_v9 = vld [vmem:[#allocation3 + $0x70] sm:$0xf]  ;;  %v8249_v55 = vshrl.u32 %v8224_v10, 16  ;;  %7124 = vst.msk [vmem:[#allocation4 + $0x54] sm:$0xf] %vm402_vm5, %v7108_v40 }
 0x459   : > { %v6319_v23 = vpop.permute.xlu1 %6318  ;;  %6673 = vmatpush.bf16.msra.mxu2 %v12418_v24  ;;  %v7719_v49 = vrot.slane %v7717_v39, 4  ;;  %7122 = vst.msk [vmem:[#allocation4 + $0x4c] sm:$0xf] %vm402_vm5, %v7106_v9  ;;  %v7114_v48 = vld [vmem:[#allocation3 + $0xa0] sm:$0xf] }
 0x45a   : > { %6367 = vst.msk [vmem:[#allocation4] sm:$0xf] %vm6366_vm11, %v6319_v23  ;;  %v7480_v45 = vsel %vm9959_vm1, %v9477_v31, %v7479_v13  ;;  %v7486_v23 = vrot.slane %v7425_v43, 5  ;;  %v7961_v43 = vld [vmem:[#allocation3 + $0x74] sm:$0x1] }
 0x45b   : > { %7381 = vrot.lane.b32.xlu0 %v7350_v16, %s9648_s8  ;;  %v7426_v16 = vld [vmem:[#allocation3 + $0x8c] sm:$0x1]  ;;  %7130 = vst.msk [vmem:[#allocation4 + $0x6c] sm:$0xf] %vm402_vm5, %v7114_v48 }
 0x45c   : > { %7373 = vrot.lane.b32.xlu2 %v7302_v38, %s9648_s8  ;;  %v7720_v38 = vor.u32 %v7719_v49, %v7715_v37  ;;  %v7488_v20 = vrot.slane %v7486_v23, 4  ;;  %v7489_v18 = vrot.slane %v7426_v16, 5  ;;  %v7107_v16 = vld [vmem:[#allocation3 + $0x78] sm:$0xf] }
 0x45d   : > { %v6329_v4 = vpop.permute.xlu0 %6328  ;;  %6674 = vmatpush.bf16.msra.mxu2 %v12426_v54  ;;  %7123 = vst.msk [vmem:[#allocation4 + $0x50] sm:$0xf] %vm402_vm5, %v7107_v16 }
 0x45e   : > { %v6339_v15 = vpop.permute.xlu2 %6338  ;;  %6372 = vst.msk [vmem:[#allocation4 + $0x14] sm:$0xf] %vm6366_vm11, %v6329_v4  ;;  %v7721_v41 = vrot.slane %v7720_v38, 4  ;;  %v7490_v51 = vsel %vm9959_vm1, %v7488_v20, %v7489_v18  ;;  %v8129_v18 = vld [vmem:[#allocation3 + $0x7c] sm:$0xf] }
 0x45f   : > { %6377 = vst.msk [vmem:[#allocation4 + $0x28] sm:$0xf] %vm6366_vm11, %v6339_v15  ;;  %7377 = vrot.lane.b32.xlu1 %v7326_v0, %s9648_s8  ;;  %v7723_v15 = vshll.u32 %v7681_v58, 16  ;;  %v7487_v0 = vsel %vm9959_vm1, %v9478_v22, %v7486_v23  ;;  %v8251_v23 = vrot.slane %v8249_v55, 4 }
 0x461   : > { %v6325_v14 = vpop.permute.xlu1 %6324 }
 0x462   : > { %6370 = vst.msk [vmem:[#allocation4 + $0xc] sm:$0xf] %vm6366_vm11, %v6325_v14  ;;  %v8225_v14 = vld [vmem:[#allocation3 + $0x7c] sm:$0xf] }
 0x463   : > { %7523 = vrot.lane.b32.xlu0 %v7473_v62, %s9650_s10  ;;  %v8258_v13 = vshll.u32 %v8225_v14, 16  ;;  %v8262_v1 = vshrl.u32 %v8225_v14, 16 }
 0x464   : > { %7379 = vrot.lane.b32.xlu2 %v7340_v32, %s9648_s8  ;;  %v7725_v32 = vrot.slane %v7723_v15, 5  ;;  %s12909_s8 = scalar_lea.vmem %s13287_s7, %s9566_s18 }
 0x465   : > { %v6335_v25 = vpop.permute.xlu0 %6334  ;;  %v12462_v56 = vrot.slane %v8258_v13, 5  ;;  %v8264_v35 = vrot.slane %v8262_v1, 4 }
 0x466   : > { %v6345_v52 = vpop.permute.xlu2 %6344  ;;  %6375 = vst.msk [vmem:[#allocation4 + $0x20] sm:$0xf] %vm6366_vm11, %v6335_v25  ;;  %v7726_v62 = vsel %vm9782_vm13, %v7721_v41, %v7725_v32 }
 0x467   : > { %6380 = vst.msk [vmem:[#allocation4 + $0x34] sm:$0xf] %vm6366_vm11, %v6345_v52  ;;  %7519 = vrot.lane.b32.xlu1 %v7466_v44, %s9650_s10  ;;  %v7710_v52 = vor.u32 %v7709_v6, %v7706_v17  ;;  %v7584_v44 = vld [vmem:[#allocation3 + $0x70] sm:$0xf]  ;;  %v8265_v39 = vor.u32 %v8264_v35, %v12462_v56  ;;  %v7682_v17 = vld [vmem:[#allocation3 + $0x78] sm:$0xf] }
 0x468   : > { %v8505_v6 = vld [vmem:[#allocation3 + $0x7c] sm:$0xf]  ;;  %v7731_v13 = vshll.u32 %v7682_v17, 16 }
 0x469   : > { %v6331_v53 = vpop.permute.xlu1 %6330  ;;  %v7711_v8 = vrot.slane %v7710_v52, 4  ;;  %v8266_v2 = vrot.slane %v8265_v39, 4  ;;  %v8554_v52 = vrot.slane %v8505_v6, 5  ;;  %v6932_v39 = vld [vmem:[%s13285_s5] sm:$0x3] }
 0x46a   : > { %6373 = vst.msk [vmem:[#allocation4 + $0x18] sm:$0xf] %vm6366_vm11, %v6331_v53  ;;  %v8229_v6 = vld [vmem:[#allocation3 + $0x8c] sm:$0x1] }
 0x46b   : > { %7529 = vrot.lane.b32.xlu0 %v7483_v47, %s9650_s10  ;;  %v8226_v47 = vld [vmem:[#allocation3 + $0x80] sm:$0x1]  ;;  %v8292_v48 = vshll.u32 %v8229_v6, 16 }
 0x46c   : > { %7521 = vrot.lane.b32.xlu2 %v7469_v26, %s9650_s10  ;;  %v7716_v26 = vsel %vm9782_vm13, %v7711_v8, %v7715_v37  ;;  %v8268_v37 = vshll.u32 %v8226_v47, 16  ;;  %v8506_v8 = vld [vmem:[#allocation3 + $0x80] sm:$0x1]  ;;  %v8556_v47 = vrot.slane %v8554_v52, 4 }
 0x46d   : > { %v6341_v30 = vpop.permute.xlu0 %6340  ;;  %v8557_v55 = vrot.slane %v8506_v8, 5 }
 0x46e   : > { %v6488_v5 = vpop.permute.xlu2 %6487  ;;  %6378 = vst.msk [vmem:[#allocation4 + $0x2c] sm:$0xf] %vm6366_vm11, %v6341_v30  ;;  %v8270_v22 = vrot.slane %v8268_v37, 5 }
 0x46f   : > { %6536 = vst.msk [vmem:[#allocation4] sm:$0xf] %vm6535_vm8, %v6488_v5  ;;  %7525 = vrot.lane.b32.xlu1 %v7476_v11, %s9650_s10  ;;  %v9483_v5 = vrot.slane %v7959_v63, 9  ;;  %v8252_v11 = vshll.u32 %v8224_v10, 16  ;;  %v8228_v10 = vld [vmem:[#allocation3 + $0x88] sm:$0xf] }
 0x470   : > { %v8271_v34 = vsel %vm9782_vm13, %v8266_v2, %v8270_v22 }
 0x471   : > { %v6337_v60 = vpop.permute.xlu1 %6336  ;;  %v8010_v49 = vsel %vm9959_vm1, %v9483_v5, %v8009_v7  ;;  %v8254_v58 = vrot.slane %v8252_v11, 5  ;;  %v6987_v5 = vsel %vm13355_vm0, %v6932_v39, 0  ;;  %v7109_v11 = vld [vmem:[#allocation3 + $0x84] sm:$0xf] }
 0x472   : > { %6376 = vst.msk [vmem:[#allocation4 + $0x24] sm:$0xf] %vm6366_vm11, %v6337_v60  ;;  %v8011_v60 = vrot.slane %v8009_v7, 4  ;;  %9608 = vmatpush.bf16.msra.mxu3 %v6987_v5  ;;  %6996 = vmatpush.bf16.msrb.mxu2 %v6987_v5  ;;  %v7686_v5 = vld [vmem:[#allocation3 + $0x88] sm:$0xf] }
 0x473   : > { %7615 = vrot.lane.b32.xlu0 %v7583_v57, %s9652_s12  ;;  %v7683_v57 = vld [vmem:[#allocation3 + $0x7c] sm:$0xf]  ;;  %7125 = vst.msk [vmem:[#allocation4 + $0x58] sm:$0xf] %vm402_vm5, %v7109_v11 }
 0x474   : > { %7527 = vrot.lane.b32.xlu2 %v7480_v45, %s9650_s10  ;;  %v8012_v45 = vrot.slane %v7961_v43, 5  ;;  %v7741_v15 = vshrl.u32 %v7683_v57, 16 }
 0x475   : > { %v6347_v4 = vpop.permute.xlu0 %6346 }
 0x476   : > { %v6494_v27 = vpop.permute.xlu2 %6493  ;;  %6381 = vst.msk [vmem:[#allocation4 + $0x38] sm:$0xf] %vm6366_vm11, %v6347_v4  ;;  %v8013_v21 = vsel %vm9959_vm1, %v8011_v60, %v8012_v45  ;;  %v8255_v4 = vor.u32 %v8254_v58, %v8251_v23  ;;  %v7743_v29 = vrot.slane %v7741_v15, 4  ;;  %8755 = vmatpush.bf16.msrb.mxu3 %v12383_v50  ;;  %v8558_v60 = vsel %vm9959_vm1, %v8556_v47, %v8557_v55  ;;  %v7117_v45 = vld [vmem:[#allocation3 + $0xb4] sm:$0xf] }
 0x477   : > { %6539 = vst.msk [vmem:[#allocation4 + $0xc] sm:$0xf] %vm6535_vm8, %v6494_v27  ;;  %7531 = vrot.lane.b32.xlu1 %v7487_v0, %s9650_s10  ;;  %v7737_v27 = vshll.u32 %v7683_v57, 16  ;;  %v7111_v0 = vld [vmem:[#allocation3 + $0x90] sm:$0xf] }
 0x478   : > { %7127 = vst.msk [vmem:[#allocation4 + $0x60] sm:$0xf] %vm402_vm5, %v7111_v0  ;;  %v7586_v58 = vld [vmem:[#allocation3 + $0x7c] sm:$0xf]  ;;  %v6727_v0 = vld [vmem:[#allocation2 + $0x38] sm:$0x1] }
 0x479   : > { %v6343_v59 = vpop.permute.xlu1 %6342  ;;  %v12490_v14 = vrot.slane %v7737_v27, 5  ;;  %7133 = vst.msk [vmem:[#allocation4 + $0x78] sm:$0xf] %vm402_vm5, %v7117_v45  ;;  %v6726_v15 = vld [vmem:[#allocation2 + $0x34] sm:$0xf]  ;;  %v7761_v45 = vshll.u32 %v7686_v5, 16 }
 0x47a   : > { %6379 = vst.msk [vmem:[#allocation4 + $0x30] sm:$0xf] %vm6366_vm11, %v6343_v59  ;;  %v8256_v59 = vrot.slane %v8255_v4, 4  ;;  %8756 = vmatpush.bf16.msrb.mxu3 %v12393_v28  ;;  %v7962_v4 = vld [vmem:[#allocation3 + $0x78] sm:$0xe]  ;;  %v6826_v28 = vshrl.u32 %v6726_v15, 16 }
 0x47b   : > { %7897 = vrot.lane.b32.xlu0 %v7726_v62, %s9654_s14  ;;  %v7728_v62 = vshrl.u32 %v7682_v17, 16  ;;  %v7115_v55 = vld [vmem:[#allocation3 + $0xa8] sm:$0xf] }
 0x47c   : > { %7533 = vrot.lane.b32.xlu2 %v7490_v51, %s9650_s10  ;;  %v8504_v51 = vld [vmem:[#allocation3 + $0x78] sm:$0xe]  ;;  %v8261_v1 = vsel %vm9782_vm13, %v8256_v59, %v12462_v56  ;;  %v7733_v56 = vrot.slane %v7731_v13, 5  ;;  %7131 = vst.msk [vmem:[#allocation4 + $0x70] sm:$0xf] %vm402_vm5, %v7115_v55 }
 0x47d   : > { %v6490_v25 = vpop.permute.xlu0 %6489  ;;  %v9491_v35 = vrot.slane %v8504_v51, 9  ;;  %v7730_v63 = vrot.slane %v7728_v62, 4  ;;  %v6832_v51 = vshll.u32 %v6727_v0, 16 }
 0x47e   : > { %v6500_v3 = vpop.permute.xlu2 %6499  ;;  %6537 = vst.msk [vmem:[#allocation4 + $0x4] sm:$0xf] %vm6535_vm8, %v6490_v25  ;;  %v7744_v25 = vor.u32 %v7743_v29, %v12490_v14  ;;  %8757 = vmatpush.bf16.msrb.mxu3 %v12401_v12 }
 0x47f   : > { %6542 = vst.msk [vmem:[#allocation4 + $0x18] sm:$0xf] %vm6535_vm8, %v6500_v3  ;;  %7617 = vrot.lane.b32.xlu1 %v7584_v44, %s9652_s12  ;;  %v7684_v3 = vld [vmem:[#allocation3 + $0x80] sm:$0x1]  ;;  %v7585_v44 = vld [vmem:[#allocation3 + $0x78] sm:$0xf]  ;;  %v7734_v37 = vor.u32 %v7733_v56, %v7730_v63 }
 0x480   : > { %v7745_v40 = vrot.slane %v7744_v25, 4  ;;  %v7964_v25 = vld [vmem:[#allocation3 + $0x80] sm:$0x1] }
 0x481   : > { %v6349_v53 = vpop.permute.xlu1 %6348  ;;  %v7735_v50 = vrot.slane %v7734_v37, 4  ;;  %v8019_v11 = vrot.slane %v7964_v25, 5  ;;  %v8294_v37 = vrot.slane %v8292_v48, 5 }
 0x482   : > { %6382 = vst.msk [vmem:[#allocation4 + $0x3c] sm:$0xf] %vm6366_vm11, %v6349_v53  ;;  %v7747_v53 = vshll.u32 %v7684_v3, 16  ;;  %v9484_v3 = vrot.slane %v7962_v4, 9  ;;  %8758 = vmatpush.bf16.msrb.mxu3 %v12418_v24  ;;  %v6728_v4 = vld [vmem:[#allocation2 + $0x3c] sm:$0xf] }
 0x483   : > { %8160 = vrot.lane.b32.xlu0 %v8128_v46, %s9656_s26  ;;  %v7740_v27 = vsel %vm9782_vm13, %v7735_v50, %v12490_v14 }
 0x484   : > { %7895 = vrot.lane.b32.xlu2 %v7716_v26, %s9654_s14  ;;  %v8555_v26 = vsel %vm9959_vm1, %v9491_v35, %v8554_v52  ;;  %v7749_v43 = vrot.slane %v7747_v53, 5  ;;  %v8130_v52 = vld [vmem:[#allocation3 + $0x84] sm:$0xf]  ;;  %v7112_v53 = vld [vmem:[#allocation3 + $0x94] sm:$0xf] }
 0x485   : > { %v6496_v31 = vpop.permute.xlu0 %6495  ;;  %v9589_v42 = vld [vmem:[#allocation4] sm:$0xff]  ;;  %7128 = vst.msk [vmem:[#allocation4 + $0x64] sm:$0xf] %vm402_vm5, %v7112_v53 }
 0x486   : > { %v6506_v30 = vpop.permute.xlu2 %6505  ;;  %6540 = vst.msk [vmem:[#allocation4 + $0x10] sm:$0xf] %vm6535_vm8, %v6496_v31  ;;  %9459 = vmatmul.msk.bf16.vlgmr.msra.gmra.mxu2 %vm6638_vm9, %v9589_v42  ;;  %v8286_v31 = vshrl.u32 %v8228_v10, 16  ;;  %v7963_v42 = vld [vmem:[#allocation3 + $0x7c] sm:$0xf]  ;;  %v7750_v2 = vsel %vm9782_vm13, %v7745_v40, %v7749_v43  ;;  %8759 = vmatpush.bf16.msrb.mxu3 %v12426_v54 }
 0x487   : > { %6545 = vst.msk [vmem:[#allocation4 + $0x24] sm:$0xf] %vm6535_vm8, %v6506_v30  ;;  %8063 = vrot.lane.b32.xlu1 %v8010_v49, %s9655_s23  ;;  %v8282_v49 = vshll.u32 %v8228_v10, 16  ;;  %v8016_v57 = vrot.slane %v7963_v42, 5  ;;  %v7110_v10 = vld [vmem:[#allocation3 + $0x88] sm:$0xf] }
 0x488   : > { %v8288_v22 = vrot.slane %v8286_v31, 4  ;;  %7126 = vst.msk [vmem:[#allocation4 + $0x5c] sm:$0xf] %vm402_vm5, %v7110_v10  ;;  %v12547_v31 = vld [vmem:[#allocation3 + $0x88] sm:$0xf] }
 0x489   : > { %v6492_v38 = vpop.permute.xlu1 %6491 }
 0x48a   : > { %6538 = vst.msk [vmem:[#allocation4 + $0x8] sm:$0xf] %vm6535_vm8, %v6492_v38  ;;  %v12520_v38 = vrot.slane %v8282_v49, 5 }
 0x48b   : > { %8442 = vrot.lane.b32.xlu0 %v8271_v34, %s9657_s29  ;;  %v6725_v34 = vld [vmem:[#allocation2 + $0x30] sm:$0xf] }
 0x48c   : > { %8065 = vrot.lane.b32.xlu2 %v8013_v21, %s9655_s23  ;;  %v8227_v21 = vld [vmem:[#allocation3 + $0x84] sm:$0xf]  ;;  %v8289_v29 = vor.u32 %v8288_v22, %v12520_v38  ;;  %v8131_v22 = vld [vmem:[#allocation3 + $0x88] sm:$0xf] }
 0x48d   : > { %v6502_v41 = vpop.permute.xlu0 %6501  ;;  %v8273_v59 = vshrl.u32 %v8227_v21, 16 }
 0x48e   : > { %v6512_v20 = vpop.permute.xlu2 %6511  ;;  %6543 = vst.msk [vmem:[#allocation4 + $0x1c] sm:$0xf] %vm6535_vm8, %v6502_v41  ;;  %v6822_v41 = vshll.u32 %v6726_v15, 16  ;;  %v12562_v15 = vrot.slane %v7761_v45, 5 }
 0x48f   : > { %6548 = vst.msk [vmem:[#allocation4 + $0x30] sm:$0xf] %vm6535_vm8, %v6512_v20  ;;  %8162 = vrot.lane.b32.xlu1 %v8129_v18, %s9656_s26  ;;  %v6813_v20 = vshrl.u32 %v6725_v34, 16  ;;  %v6816_v18 = vshll.u32 %v6725_v34, 16  ;;  %v8275_v63 = vrot.slane %v8273_v59, 4 }
 0x490   : > { %v6824_v13 = vrot.slane %v6822_v41, 5  ;;  %v7685_v41 = vld [vmem:[#allocation3 + $0x84] sm:$0xf] }
 0x491   : > { %v6498_v32 = vpop.permute.xlu1 %6497  ;;  %v9590_v46 = vld [vmem:[#allocation4 + $0x8] sm:$0xff]  ;;  %v6815_v62 = vrot.slane %v6813_v20, 4  ;;  %v6818_v14 = vrot.slane %v6816_v18, 5  ;;  %v6729_v20 = vld [vmem:[#allocation2 + $0x40] sm:$0xf] }
 0x492   : > { %6541 = vst.msk [vmem:[#allocation4 + $0x14] sm:$0xf] %vm6535_vm8, %v6498_v32  ;;  %v8276_v32 = vshll.u32 %v8227_v21, 16  ;;  %v8561_v21 = vrot.slane %v12547_v31, 5  ;;  %v6730_v18 = vld [vmem:[#allocation2 + $0x44] sm:$0x1] }
 0x493   : > { %7619 = vrot.lane.b32.xlu0 %v7585_v44, %s9652_s12  ;;  %v8018_v44 = vrot.slane %v8016_v57, 4  ;;  %v6819_v35 = vor.u32 %v6818_v14, %v6815_v62  ;;  %v6846_v6 = vshll.u32 %v6729_v20, 16  ;;  %v6856_v62 = vshll.u32 %v6730_v18, 16 }
 0x494   : > { %8440 = vrot.lane.b32.xlu2 %v8261_v1, %s9657_s29  ;;  %v6828_v1 = vrot.slane %v6826_v28, 4  ;;  %v8278_v56 = vrot.slane %v8276_v32, 5  ;;  %v6837_v28 = vshrl.u32 %v6728_v4, 16  ;;  %v8563_v25 = vrot.slane %v8561_v21, 4 }
 0x495   : > { %v6508_v7 = vpop.permute.xlu0 %6507  ;;  %v6820_v39 = vrot.slane %v6819_v35, 4  ;;  %v7752_v35 = vshrl.u32 %v7685_v41, 16  ;;  %v9592_v10 = vld [vmem:[#allocation4 + $0x18] sm:$0xff] }
 0x496   : > { %v6518_v9 = vpop.permute.xlu2 %6517  ;;  %6546 = vst.msk [vmem:[#allocation4 + $0x28] sm:$0xf] %vm6535_vm8, %v6508_v7  ;;  %9460 = vmatmul.msk.bf16.gmra.mxu2 %vm6638_vm9, %v9590_v46  ;;  %v6829_v8 = vor.u32 %v6828_v1, %v6824_v13  ;;  %v8290_v46 = vrot.slane %v8289_v29, 4  ;;  %v8279_v49 = vor.u32 %v8278_v56, %v8275_v63  ;;  %v6850_v29 = vshrl.u32 %v6729_v20, 16  ;;  %v7118_v63 = vld [vmem:[#allocation3 + $0xb8] sm:$0xf] }
 0x497   : > { %6551 = vst.msk [vmem:[#allocation4 + $0x3c] sm:$0xf] %vm6535_vm8, %v6518_v9  ;;  %8608 = vrot.lane.b32.xlu1 %v8555_v26, %s9658_s30  ;;  %v6834_v9 = vrot.slane %v6832_v51, 5  ;;  %v8017_v26 = vsel %vm9959_vm1, %v9484_v3, %v8016_v57  ;;  %v6825_v24 = vsel %vm9782_vm13, %v6820_v39, %v6824_v13  ;;  %v7113_v57 = vld [vmem:[#allocation3 + $0x9c] sm:$0xf]  ;;  %v6839_v14 = vrot.slane %v6837_v28, 4 }
 0x498   : > { %v6830_v40 = vrot.slane %v6829_v8, 4  ;;  %7129 = vst.msk [vmem:[#allocation4 + $0x68] sm:$0xf] %vm402_vm5, %v7113_v57  ;;  %v7687_v51 = vld [vmem:[#allocation3 + $0x8c] sm:$0x1]  ;;  %v6848_v1 = vrot.slane %v6846_v6, 5 }
 0x499   : > { %v6504_v30 = vpop.permute.xlu1 %6503  ;;  %v9591_v47 = vld [vmem:[#allocation4 + $0x10] sm:$0xff]  ;;  %v7587_v3 = vld [vmem:[#allocation3 + $0x84] sm:$0xf]  ;;  %v7755_v8 = vshll.u32 %v7685_v41, 16  ;;  %7134 = vst.msk [vmem:[#allocation4 + $0x7c] sm:$0xf] %vm402_vm5, %v7118_v63 }
 0x49a   : > { %6544 = vst.msk [vmem:[#allocation4 + $0x20] sm:$0xf] %vm6535_vm8, %v6504_v30  ;;  %v6835_v30 = vsel %vm9782_vm13, %v6830_v40, %v6834_v9  ;;  %v7588_v57 = vld [vmem:[#allocation3 + $0x88] sm:$0xf] }
 0x49b   : > { %7901 = vrot.lane.b32.xlu0 %v7750_v2, %s9654_s14  ;;  %v6944_v42 = vunpack.c.l.b16 %v6835_v30  ;;  %v8020_v2 = vsel %vm9959_vm1, %v8018_v44, %v8019_v11  ;;  %v7757_v30 = vrot.slane %v7755_v8, 5 }
 0x49c   : > { %8610 = vrot.lane.b32.xlu2 %v8558_v60, %s9658_s30  ;;  %v6943_v60 = vunpack.c.l.b16 %v6825_v24  ;;  %v7754_v24 = vrot.slane %v7752_v35, 4 }
 0x49d   : > { %v6514_v16 = vpop.permute.xlu0 %6513 }
 0x49e   : > { %v7356_v23 = vpop.permute.xlu2 %7355  ;;  %6549 = vst.msk [vmem:[#allocation4 + $0x34] sm:$0xf] %vm6535_vm8, %v6514_v16  ;;  %v6956_v50 = vpack.c.b16 %v6944_v42, %v6943_v60  ;;  %v8280_v16 = vrot.slane %v8279_v49, 4 }
 0x49f   : > { %7401 = vst.msk [vmem:[#allocation4 + $0x48] sm:$0xf] %vm5271_vm15, %v7356_v23  ;;  %7621 = vrot.lane.b32.xlu1 %v7586_v58, %s9652_s12  ;;  %v7765_v23 = vshrl.u32 %v7686_v5, 16  ;;  %v8295_v58 = vsel %vm9782_vm13, %v8290_v46, %v8294_v37  ;;  %v8231_v5 = vld [vmem:[#allocation3 + $0x94] sm:$0xf] }
 0x4a0   : > { %9470 = vmatmul.msk.bf16.vlgmr.msra.gmra.mxu3 %vm6961_vm6, %v6956_v50  ;;  %v8285_v59 = vsel %vm9782_vm13, %v8280_v16, %v12520_v38  ;;  %v8509_v38 = vld [vmem:[#allocation3 + $0x8c] sm:$0x1]  ;;  %v8310_v50 = vshrl.u32 %v8231_v5, 16  ;;  %v7966_v16 = vld [vmem:[#allocation3 + $0x88] sm:$0xf] }
 0x4a1   : > { %v6510_v17 = vpop.permute.xlu1 %6509  ;;  %v7767_v0 = vrot.slane %v7765_v23, 4  ;;  %v8564_v55 = vrot.slane %v8509_v38, 5 }
 0x4a2   : > { %6547 = vst.msk [vmem:[#allocation4 + $0x2c] sm:$0xf] %vm6535_vm8, %v6510_v17  ;;  %v6840_v17 = vshll.u32 %v6728_v4, 16  ;;  %v6733_v4 = vld [vmem:[#allocation2 + $0x50] sm:$0x1]  ;;  %v8312_v41 = vrot.slane %v8310_v50, 4 }
 0x4a3   : > { %8164 = vrot.lane.b32.xlu0 %v8130_v52, %s9656_s26  ;;  %v6852_v52 = vrot.slane %v6850_v29, 4  ;;  %v7768_v48 = vor.u32 %v7767_v0, %v12562_v15  ;;  %v8565_v45 = vsel %vm9959_vm1, %v8563_v25, %v8564_v55  ;;  %v6880_v6 = vshll.u32 %v6733_v4, 16  ;;  %v8133_v50 = vld [vmem:[#allocation3 + $0x94] sm:$0xf] }
 0x4a4   : > { %7899 = vrot.lane.b32.xlu2 %v7740_v27, %s9654_s14  ;;  %v8507_v27 = vld [vmem:[#allocation3 + $0x84] sm:$0xe]  ;;  %v6842_v13 = vrot.slane %v6840_v17, 5 }
 0x4a5   : > { %v7352_v7 = vpop.permute.xlu0 %7351  ;;  %v9492_v44 = vrot.slane %v8507_v27, 9  ;;  %v6853_v53 = vor.u32 %v6852_v52, %v6848_v1  ;;  %v7769_v11 = vrot.slane %v7768_v48, 4  ;;  %v6732_v27 = vld [vmem:[#allocation2 + $0x4c] sm:$0xf]  ;;  %v8132_v48 = vld [vmem:[#allocation3 + $0x90] sm:$0xf] }
 0x4a6   : > { %v7362_v12 = vpop.permute.xlu2 %7361  ;;  %7399 = vst.msk [vmem:[#allocation4 + $0x40] sm:$0xf] %vm5271_vm15, %v7352_v7  ;;  %9461 = vmatmul.msk.bf16.gmra.mxu2 %vm6638_vm9, %v9591_v47  ;;  %v6843_v9 = vor.u32 %v6842_v13, %v6839_v14  ;;  %v7116_v7 = vld [vmem:[#allocation3 + $0xac] sm:$0xf]  ;;  %v6870_v28 = vshll.u32 %v6732_v27, 16  ;;  %v6874_v17 = vshrl.u32 %v6732_v27, 16 }
 0x4a7   : > { %7404 = vst.msk [vmem:[#allocation4 + $0x54] sm:$0xf] %vm5271_vm15, %v7362_v12  ;;  %8067 = vrot.lane.b32.xlu1 %v8017_v26, %s9655_s23  ;;  %v6858_v12 = vrot.slane %v6856_v62, 5  ;;  %v7771_v26 = vshll.u32 %v7687_v51, 16  ;;  %v8562_v47 = vsel %vm9959_vm1, %v9492_v44, %v8561_v21  ;;  %v6854_v40 = vrot.slane %v6853_v53, 4 }
 0x4a8   : > { %v6844_v39 = vrot.slane %v6843_v9, 4  ;;  %7132 = vst.msk [vmem:[#allocation4 + $0x74] sm:$0xf] %vm402_vm5, %v7116_v7  ;;  %v7965_v62 = vld [vmem:[#allocation3 + $0x84] sm:$0xe]  ;;  %v6872_v13 = vrot.slane %v6870_v28, 5 }
 0x4a9   : > { %v6516_v43 = vpop.permute.xlu1 %6515  ;;  %v6859_v37 = vsel %vm9782_vm13, %v6854_v40, %v6858_v12  ;;  %v7773_v31 = vrot.slane %v7771_v26, 5  ;;  %v8230_v14 = vld [vmem:[#allocation3 + $0x90] sm:$0xf]  ;;  %v8232_v44 = vld [vmem:[#allocation3 + $0x98] sm:$0x1]  ;;  %v6882_v8 = vrot.slane %v6880_v6, 5 }
 0x4aa   : > { %6550 = vst.msk [vmem:[#allocation4 + $0x38] sm:$0xf] %vm6535_vm8, %v6516_v43  ;;  %v6849_v43 = vsel %vm9782_vm13, %v6844_v39, %v6848_v1  ;;  %v6946_v42 = vunpack.c.l.b16 %v6859_v37  ;;  %v6876_v1 = vrot.slane %v6874_v17, 4  ;;  %v9485_v9 = vrot.slane %v7965_v62, 9  ;;  %v9593_v39 = vld [vmem:[#allocation4 + $0x20] sm:$0xff] }
 0x4ab   : > { %8446 = vrot.lane.b32.xlu0 %v8295_v58, %s9657_s29  ;;  %v6945_v60 = vunpack.c.l.b16 %v6849_v43  ;;  %v7774_v23 = vsel %vm9782_vm13, %v7769_v11, %v7773_v31  ;;  %v8297_v53 = vshrl.u32 %v8230_v14, 16  ;;  %v8300_v12 = vshll.u32 %v8230_v14, 16  ;;  %v6734_v27 = vld [vmem:[#allocation2 + $0x54] sm:$0xf]  ;;  %v8510_v14 = vld [vmem:[#allocation3 + $0x90] sm:$0xe] }
 0x4ac   : > { %8069 = vrot.lane.b32.xlu2 %v8020_v2, %s9655_s23  ;;  %v8306_v2 = vshll.u32 %v8231_v5, 16  ;;  %v6877_v38 = vor.u32 %v6876_v1, %v6872_v13  ;;  %v7689_v5 = vld [vmem:[#allocation3 + $0x94] sm:$0xf] }
 0x4ad   : > { %v7358_v34 = vpop.permute.xlu0 %7357  ;;  %v6957_v58 = vpack.c.b16 %v6946_v42, %v6945_v60  ;;  %v8299_v43 = vrot.slane %v8297_v53, 4  ;;  %v8302_v37 = vrot.slane %v8300_v12, 5  ;;  %v7785_v42 = vshll.u32 %v7689_v5, 16 }
 0x4ae   : > { %v7368_v54 = vpop.permute.xlu2 %7367  ;;  %7402 = vst.msk [vmem:[#allocation4 + $0x4c] sm:$0xf] %vm5271_vm15, %v7358_v34  ;;  %v12593_v21 = vrot.slane %v8306_v2, 5  ;;  %v6731_v34 = vld [vmem:[#allocation2 + $0x48] sm:$0xf]  ;;  %v6878_v26 = vrot.slane %v6877_v38, 4 }
 0x4af   : > { %7407 = vst.msk [vmem:[#allocation4 + $0x60] sm:$0xf] %vm5271_vm15, %v7368_v54  ;;  %8166 = vrot.lane.b32.xlu1 %v8131_v22, %s9656_s26  ;;  %v7758_v54 = vor.u32 %v7757_v30, %v7754_v24  ;;  %v6861_v20 = vshrl.u32 %v6731_v34, 16  ;;  %v6864_v18 = vshll.u32 %v6731_v34, 16  ;;  %v7688_v34 = vld [vmem:[#allocation3 + $0x90] sm:$0xf] }
 0x4b0   : > { %9471 = vmatmul.msk.bf16.gmra.mxu3 %vm6961_vm6, %v6957_v58  ;;  %v8313_v35 = vor.u32 %v8312_v41, %v12593_v21  ;;  %v6883_v11 = vsel %vm9782_vm13, %v6878_v26, %v6882_v8  ;;  %v7789_v58 = vshrl.u32 %v7689_v5, 16  ;;  %v6888_v41 = vshll.u32 %v6734_v27, 16 }
 0x4b1   : > { %v7354_v32 = vpop.permute.xlu1 %7353  ;;  %v7759_v29 = vrot.slane %v7758_v54, 4  ;;  %v7779_v8 = vshll.u32 %v7688_v34, 16  ;;  %v9493_v12 = vrot.slane %v8510_v14, 9 }
 0x4b2   : > { %7400 = vst.msk [vmem:[#allocation4 + $0x44] sm:$0xf] %vm5271_vm15, %v7354_v32  ;;  %v6866_v32 = vrot.slane %v6864_v18, 5  ;;  %v8314_v55 = vrot.slane %v8313_v35, 4  ;;  %v6885_v18 = vshrl.u32 %v6734_v27, 16  ;;  %v7791_v28 = vrot.slane %v7789_v58, 4 }
 0x4b3   : > { %7623 = vrot.lane.b32.xlu0 %v7587_v3, %s9652_s12  ;;  %v7764_v52 = vsel %vm9782_vm13, %v7759_v29, %v12562_v15  ;;  %v8023_v3 = vrot.slane %v7966_v16, 5  ;;  %v7967_v15 = vld [vmem:[#allocation3 + $0x8c] sm:$0x1]  ;;  %v12623_v16 = vrot.slane %v7785_v42, 5  ;;  %v7589_v35 = vld [vmem:[#allocation3 + $0x90] sm:$0xf] }
 0x4b4   : > { %8444 = vrot.lane.b32.xlu2 %v8285_v59, %s9657_s29  ;;  %v6863_v59 = vrot.slane %v6861_v20, 4  ;;  %v8026_v30 = vrot.slane %v7967_v15, 5  ;;  %v6736_v20 = vld [vmem:[#allocation2 + $0x5c] sm:$0x1]  ;;  %v6738_v27 = vld [vmem:[#allocation2 + $0x64] sm:$0xf] }
 0x4b5   : > { %v7364_v46 = vpop.permute.xlu0 %7363  ;;  %v8024_v7 = vsel %vm9959_vm1, %v9485_v9, %v8023_v3  ;;  %v6904_v29 = vshll.u32 %v6736_v20, 16  ;;  %v7792_v38 = vor.u32 %v7791_v28, %v12623_v16  ;;  %v6922_v28 = vshrl.u32 %v6738_v27, 16 }
 0x4b6   : > { %v7374_v56 = vpop.permute.xlu2 %7373  ;;  %7405 = vst.msk [vmem:[#allocation4 + $0x58] sm:$0xf] %vm5271_vm15, %v7364_v46  ;;  %9462 = vmatmul.msk.bf16.gmra.mxu2 %vm6638_vm9, %v9592_v10  ;;  %v6867_v25 = vor.u32 %v6866_v32, %v6863_v59  ;;  %v8316_v10 = vshll.u32 %v8232_v44, 16  ;;  %v8025_v46 = vrot.slane %v8023_v3, 4  ;;  %v6887_v32 = vrot.slane %v6885_v18, 4 }
 0x4b7   : > { %7410 = vst.msk [vmem:[#allocation4 + $0x6c] sm:$0xf] %vm5271_vm15, %v7374_v56  ;;  %8612 = vrot.lane.b32.xlu1 %v8562_v47, %s9658_s30  ;;  %v7690_v44 = vld [vmem:[#allocation3 + $0x98] sm:$0x1]  ;;  %v6906_v53 = vrot.slane %v6904_v29, 5  ;;  %v7793_v5 = vrot.slane %v7792_v38, 4 }
 0x4b8   : > { %v6868_v63 = vrot.slane %v6867_v25, 4  ;;  %v8318_v60 = vrot.slane %v8316_v10, 5  ;;  %v8027_v2 = vsel %vm9959_vm1, %v8025_v46, %v8026_v30  ;;  %v7776_v25 = vshrl.u32 %v7688_v34, 16  ;;  %v9594_v46 = vld [vmem:[#allocation4 + $0x28] sm:$0xff]  ;;  %v6737_v34 = vld [vmem:[#allocation2 + $0x60] sm:$0xf] }
 0x4b9   : > { %v7360_v49 = vpop.permute.xlu1 %7359  ;;  %v7795_v15 = vshll.u32 %v7690_v44, 16  ;;  %v6909_v20 = vshrl.u32 %v6737_v34, 16  ;;  %v6912_v18 = vshll.u32 %v6737_v34, 16  ;;  %v8235_v44 = vld [vmem:[#allocation3 + $0xa4] sm:$0x1] }
 0x4ba   : > { %7403 = vst.msk [vmem:[#allocation4 + $0x50] sm:$0xf] %vm5271_vm15, %v7360_v49  ;;  %v6873_v40 = vsel %vm9782_vm13, %v6868_v63, %v6872_v13  ;;  %v6948_v49 = vunpack.c.l.b16 %v6883_v11 }
 0x4bb   : > { %7905 = vrot.lane.b32.xlu0 %v7774_v23, %s9654_s14  ;;  %v6947_v24 = vunpack.c.l.b16 %v6873_v40  ;;  %v8319_v23 = vsel %vm9782_vm13, %v8314_v55, %v8318_v60  ;;  %v7781_v55 = vrot.slane %v7779_v8, 5  ;;  %v8134_v8 = vld [vmem:[#allocation3 + $0x9c] sm:$0xf] }
 0x4bc   : > { %8614 = vrot.lane.b32.xlu2 %v8565_v45, %s9658_s30 }
 0x4bd   : > { %v7370_v0 = vpop.permute.xlu0 %7369  ;;  %v6958_v45 = vpack.c.b16 %v6948_v49, %v6947_v24 }
 0x4be   : > { %v7380_v22 = vpop.permute.xlu2 %7379  ;;  %7408 = vst.msk [vmem:[#allocation4 + $0x64] sm:$0xf] %vm5271_vm15, %v7370_v0  ;;  %v6735_v0 = vld [vmem:[#allocation2 + $0x58] sm:$0xf] }
 0x4bf   : > { %7413 = vst.msk [vmem:[#allocation4 + $0x78] sm:$0xf] %vm5271_vm15, %v7380_v22  ;;  %7625 = vrot.lane.b32.xlu1 %v7588_v57, %s9652_s12  ;;  %v8303_v57 = vor.u32 %v8302_v37, %v8299_v43  ;;  %v8511_v22 = vld [vmem:[#allocation3 + $0x94] sm:$0xf]  ;;  %v6894_v17 = vshll.u32 %v6735_v0, 16  ;;  %v6898_v6 = vshrl.u32 %v6735_v0, 16 }
 0x4c0   : > { %9472 = vmatmul.msk.bf16.gmra.mxu3 %vm6961_vm6, %v6958_v45  ;;  %v8568_v3 = vrot.slane %v8511_v22, 5  ;;  %v8234_v37 = vld [vmem:[#allocation3 + $0xa0] sm:$0xf]  ;;  %v8233_v22 = vld [vmem:[#allocation3 + $0x9c] sm:$0xf] }
 0x4c1   : > { %v7366_v51 = vpop.permute.xlu1 %7365  ;;  %v8304_v59 = vrot.slane %v8303_v57, 4  ;;  %v6896_v13 = vrot.slane %v6894_v17, 5  ;;  %v6900_v1 = vrot.slane %v6898_v6, 4  ;;  %v8334_v58 = vshrl.u32 %v8234_v37, 16  ;;  %v7969_v57 = vld [vmem:[#allocation3 + $0x94] sm:$0xf] }
 0x4c2   : > { %7406 = vst.msk [vmem:[#allocation4 + $0x5c] sm:$0xf] %vm5271_vm15, %v7366_v51  ;;  %v6890_v51 = vrot.slane %v6888_v41, 5  ;;  %v8569_v26 = vsel %vm9959_vm1, %v9493_v12, %v8568_v3  ;;  %v6918_v41 = vshll.u32 %v6738_v27, 16  ;;  %v8324_v12 = vshll.u32 %v8233_v22, 16 }
 0x4c3   : > { %8168 = vrot.lane.b32.xlu0 %v8132_v48, %s9656_s26  ;;  %v6901_v9 = vor.u32 %v6900_v1, %v6896_v13  ;;  %v8336_v29 = vrot.slane %v8334_v58, 4  ;;  %v6716_v58 = vld [vmem:[#allocation2 + $0xc] sm:$0xf] }
 0x4c4   : > { %7903 = vrot.lane.b32.xlu2 %v7764_v52, %s9654_s14  ;;  %v8309_v52 = vsel %vm9782_vm13, %v8304_v59, %v12593_v21  ;;  %v6891_v48 = vor.u32 %v6890_v51, %v6887_v32  ;;  %v8512_v21 = vld [vmem:[#allocation3 + $0x98] sm:$0x1]  ;;  %v7968_v32 = vld [vmem:[#allocation3 + $0x90] sm:$0xe]  ;;  %v6911_v51 = vrot.slane %v6909_v20, 4  ;;  %v6920_v14 = vrot.slane %v6918_v41, 5 }
 0x4c5   : > { %v7376_v47 = vpop.permute.xlu0 %7375  ;;  %v6902_v10 = vrot.slane %v6901_v9, 4  ;;  %v8571_v30 = vrot.slane %v8512_v21, 5  ;;  %v9486_v9 = vrot.slane %v7968_v32, 9  ;;  %v6744_v34 = vshll.u32 %v6716_v58, 16 }
 0x4c6   : > { %v7522_v56 = vpop.permute.xlu2 %7521  ;;  %7411 = vst.msk [vmem:[#allocation4 + $0x70] sm:$0xf] %vm5271_vm15, %v7376_v47  ;;  %9463 = vmatmul.msk.bf16.gmra.mxu2 %vm6638_vm9, %v9593_v39  ;;  %v6892_v63 = vrot.slane %v6891_v48, 4  ;;  %v8570_v47 = vrot.slane %v8568_v3, 4  ;;  %v7778_v39 = vrot.slane %v7776_v25, 4  ;;  %v8030_v3 = vrot.slane %v7969_v57, 5 }
 0x4c7   : > { %7568 = vst.msk [vmem:[#allocation4 + $0x44] sm:$0xf] %vm5440_vm2, %v7522_v56  ;;  %8071 = vrot.lane.b32.xlu1 %v8024_v7, %s9655_s23  ;;  %v6907_v11 = vsel %vm9782_vm13, %v6902_v10, %v6906_v53  ;;  %v8321_v25 = vshrl.u32 %v8233_v22, 16  ;;  %v8340_v10 = vshll.u32 %v8235_v44, 16  ;;  %v8135_v57 = vld [vmem:[#allocation3 + $0xa0] sm:$0xf] }
 0x4c8   : > { %v6897_v40 = vsel %vm9782_vm13, %v6892_v63, %v6896_v13  ;;  %v6950_v43 = vunpack.c.l.b16 %v6907_v11  ;;  %v8572_v60 = vsel %vm9959_vm1, %v8570_v47, %v8571_v30  ;;  %v7782_v45 = vor.u32 %v7781_v55, %v7778_v39  ;;  %v9595_v47 = vld [vmem:[#allocation4 + $0x30] sm:$0xff] }
 0x4c9   : > { %v7372_v31 = vpop.permute.xlu1 %7371  ;;  %v6949_v24 = vunpack.c.l.b16 %v6897_v40  ;;  %v6924_v13 = vrot.slane %v6922_v28, 4  ;;  %v8031_v21 = vsel %vm9959_vm1, %v9486_v9, %v8030_v3  ;;  %v8326_v55 = vrot.slane %v8324_v12, 5  ;;  %v9596_v12 = vld [vmem:[#allocation4 + $0x38] sm:$0xff] }
 0x4ca   : > { %7409 = vst.msk [vmem:[#allocation4 + $0x68] sm:$0xf] %vm5271_vm15, %v7372_v31  ;;  %v7797_v31 = vrot.slane %v7795_v15, 5  ;;  %v7783_v17 = vrot.slane %v7782_v45, 4  ;;  %v7970_v15 = vld [vmem:[#allocation3 + $0x98] sm:$0x1] }
 0x4cb   : > { %8450 = vrot.lane.b32.xlu0 %v8319_v23, %s9657_s29  ;;  %v6959_v42 = vpack.c.b16 %v6950_v43, %v6949_v24  ;;  %v8330_v23 = vshll.u32 %v8234_v37, 16  ;;  %v8033_v30 = vrot.slane %v7970_v15, 5  ;;  %v8342_v37 = vrot.slane %v8340_v10, 5 }
 0x4cc   : > { %8073 = vrot.lane.b32.xlu2 %v8027_v2, %s9655_s23  ;;  %v7798_v2 = vsel %vm9782_vm13, %v7793_v5, %v7797_v31  ;;  %v7788_v1 = vsel %vm9782_vm13, %v7783_v17, %v12623_v16  ;;  %v6741_v22 = vshrl.u32 %v6716_v58, 16  ;;  %v6746_v28 = vrot.slane %v6744_v34, 5 }
 0x4cd   : > { %v7382_v4 = vpop.permute.xlu0 %7381  ;;  %v12655_v6 = vrot.slane %v8330_v23, 5  ;;  %v7427_v23 = vld [vmem:[#allocation3 + $0x90] sm:$0xe] }
 0x4ce   : > { %v7528_v54 = vpop.permute.xlu2 %7527  ;;  %7414 = vst.msk [vmem:[#allocation4 + $0x7c] sm:$0xf] %vm5271_vm15, %v7382_v4  ;;  %v6739_v4 = vld [vmem:[#allocation2 + $0x68] sm:$0x1]  ;;  %v6743_v41 = vrot.slane %v6741_v22, 4  ;;  %v9479_v32 = vrot.slane %v7427_v23, 9 }
 0x4cf   : > { %7571 = vst.msk [vmem:[#allocation4 + $0x50] sm:$0xf] %vm5440_vm2, %v7528_v54  ;;  %8170 = vrot.lane.b32.xlu1 %v8133_v50, %s9656_s26  ;;  %v7590_v50 = vld [vmem:[#allocation3 + $0x94] sm:$0xf]  ;;  %v6928_v59 = vshll.u32 %v6739_v4, 16  ;;  %v8337_v53 = vor.u32 %v8336_v29, %v12655_v6 }
 0x4d0   : > { %9473 = vmatmul.msk.bf16.gmra.mxu3 %vm6961_vm6, %v6959_v42  ;;  %v6747_v44 = vor.u32 %v6746_v28, %v6743_v41  ;;  %v6720_v22 = vld [vmem:[#allocation2 + $0x1c] sm:$0xf] }
 0x4d1   : > { %v7378_v62 = vpop.permute.xlu1 %7377  ;;  %v6930_v38 = vrot.slane %v6928_v59, 5  ;;  %v8338_v5 = vrot.slane %v8337_v53, 4 }
 0x4d2   : > { %7412 = vst.msk [vmem:[#allocation4 + $0x74] sm:$0xf] %vm5271_vm15, %v7378_v62  ;;  %v6914_v62 = vrot.slane %v6912_v18, 5  ;;  %v8514_v18 = vld [vmem:[#allocation3 + $0xa0] sm:$0xf]  ;;  %vm13356_vm15 = vmmov %vm13355_vm0 }
 0x4d3   : > { %7627 = vrot.lane.b32.xlu0 %v7589_v35, %s9652_s12  ;;  %v6925_v35 = vor.u32 %v6924_v13, %v6920_v14  ;;  %v8575_v13 = vrot.slane %v8514_v18, 5  ;;  %v8801_v18 = vld [vmem:[#allocation2 + $0x6c] sm:$0xf] }
 0x4d4   : > { %8448 = vrot.lane.b32.xlu2 %v8309_v52, %s9657_s29  ;;  %v6915_v48 = vor.u32 %v6914_v62, %v6911_v51  ;;  %v8513_v51 = vld [vmem:[#allocation3 + $0x9c] sm:$0xe]  ;;  %v6718_v62 = vld [vmem:[#allocation2 + $0x14] sm:$0x1] }
 0x4d5   : > { %v7524_v7 = vpop.permute.xlu0 %7523  ;;  %v6926_v16 = vrot.slane %v6925_v35, 4  ;;  %v8515_v35 = vld [vmem:[#allocation3 + $0xa4] sm:$0x1]  ;;  %v8577_v53 = vrot.slane %v8575_v13, 4 }
 0x4d6   : > { %v7534_v56 = vpop.permute.xlu2 %7533  ;;  %7569 = vst.msk [vmem:[#allocation4 + $0x48] sm:$0xf] %vm5440_vm2, %v7524_v7  ;;  %9464 = vmatmul.msk.bf16.gmra.mxu2 %vm6638_vm9, %v9594_v46  ;;  %v6916_v63 = vrot.slane %v6915_v48, 4  ;;  %v8032_v7 = vrot.slane %v8030_v3, 4  ;;  %v8323_v46 = vrot.slane %v8321_v25, 4  ;;  %v8578_v10 = vrot.slane %v8515_v35, 5 }
 0x4d7   : > { %7574 = vst.msk [vmem:[#allocation4 + $0x5c] sm:$0xf] %vm5440_vm2, %v7534_v56  ;;  %8616 = vrot.lane.b32.xlu1 %v8569_v26, %s9658_s30  ;;  %v6931_v40 = vsel %vm9782_vm13, %v6926_v16, %v6930_v38  ;;  %v7691_v3 = vld [vmem:[#allocation3 + $0x9c] sm:$0xf]  ;;  %v9017_v38 = vld [vmem:[%s13285_s5] sm:$0x3] }
 0x4d8   : > { %v6921_v39 = vsel %vm9782_vm13, %v6916_v63, %v6920_v14  ;;  %v6952_v24 = vunpack.c.l.b16 %v6931_v40  ;;  %v8034_v31 = vsel %vm9959_vm1, %v8032_v7, %v8033_v30  ;;  %v8327_v42 = vor.u32 %v8326_v55, %v8323_v46  ;;  %v7692_v63 = vld [vmem:[#allocation3 + $0xa0] sm:$0xf] }
 0x4d9   : > { %v7520_v49 = vpop.permute.xlu1 %7519  ;;  %v6951_v11 = vunpack.c.l.b16 %v6921_v39  ;;  %v9071_v16 = vsel %vm13356_vm15, %v9017_v38, 0  ;;  %v7803_v15 = vshll.u32 %v7691_v3, 16  ;;  %v6748_v7 = vrot.slane %v6747_v44, 4  ;;  %v7592_v30 = vld [vmem:[#allocation3 + $0xa0] sm:$0xf] }
 0x4da   : > { %7567 = vst.msk [vmem:[#allocation4 + $0x40] sm:$0xf] %vm5440_vm2, %v7520_v49  ;;  %v8328_v4 = vrot.slane %v8327_v42, 4  ;;  %9080 = vmatpush.bf16.msrb.mxu0 %v9071_v16  ;;  %v7809_v55 = vshll.u32 %v7692_v63, 16  ;;  %v6721_v44 = vld [vmem:[#allocation2 + $0x20] sm:$0x1] }
 0x4db   : > { %7909 = vrot.lane.b32.xlu0 %v7798_v2, %s9654_s14  ;;  %v6960_v49 = vpack.c.b16 %v6952_v24, %v6951_v11  ;;  %v7428_v2 = vld [vmem:[#allocation3 + $0x94] sm:$0xf]  ;;  %v7813_v11 = vshrl.u32 %v7692_v63, 16  ;;  %v8579_v24 = vsel %vm9959_vm1, %v8577_v53, %v8578_v10 }
 0x4dc   : > { %8618 = vrot.lane.b32.xlu2 %v8572_v60, %s9658_s30  ;;  %v8343_v60 = vsel %vm9782_vm13, %v8338_v5, %v8342_v37  ;;  %v7493_v20 = vrot.slane %v7428_v2, 5  ;;  %v8333_v14 = vsel %vm9782_vm13, %v8328_v4, %v12655_v6  ;;  %v6760_v6 = vshll.u32 %v6718_v62, 16  ;;  %v12708_v5 = vld [vmem:[#allocation3 + $0xa0] sm:$0xf] }
 0x4dd   : > { %v7530_v0 = vpop.permute.xlu0 %7529  ;;  %v6774_v4 = vshll.u32 %v6720_v22, 16 }
 0x4de   : > { %v7896_v54 = vpop.permute.xlu2 %7895  ;;  %7572 = vst.msk [vmem:[#allocation4 + $0x54] sm:$0xf] %vm5440_vm2, %v7530_v0  ;;  %v6762_v46 = vrot.slane %v6760_v6, 5  ;;  %v7495_v40 = vrot.slane %v7493_v20, 4  ;;  %v8829_v6 = vshll.u32 %v8801_v18, 16 }
 0x4df   : > { %7629 = vrot.lane.b32.xlu1 %v7590_v50, %s9652_s12  ;;  %v6717_v50 = vld [vmem:[#allocation2 + $0x10] sm:$0xf] }
 0x4e0   : > { %9474 = vmatmul.msk.bf16.gmra.mxu3 %vm6961_vm6, %v6960_v49  ;;  %v6750_v27 = vshll.u32 %v6717_v50, 16  ;;  %v6754_v0 = vshrl.u32 %v6717_v50, 16  ;;  %v7805_v49 = vrot.slane %v7803_v15, 5  ;;  %v7811_v50 = vrot.slane %v7809_v55, 5 }
 0x4e1   : > { %v7526_v52 = vpop.permute.xlu1 %7525  ;;  %v8831_v16 = vrot.slane %v8829_v6, 5 }
 0x4e2   : > { %7570 = vst.msk [vmem:[#allocation4 + $0x4c] sm:$0xf] %vm5440_vm2, %v7526_v52  ;;  %v12685_v17 = vrot.slane %v6750_v27, 5  ;;  %v6756_v29 = vrot.slane %v6754_v0, 4  ;;  %v9494_v52 = vrot.slane %v8513_v51, 9 }
 0x4e3   : > { %8172 = vrot.lane.b32.xlu0 %v8134_v8, %s9656_s26  ;;  %v7591_v51 = vld [vmem:[#allocation3 + $0x9c] sm:$0xf] }
 0x4e4   : > { %7907 = vrot.lane.b32.xlu2 %v7788_v1, %s9654_s14  ;;  %v7494_v1 = vsel %vm9959_vm1, %v9479_v32, %v7493_v20  ;;  %v6757_v25 = vor.u32 %v6756_v29, %v12685_v17  ;;  %v8576_v8 = vsel %vm9959_vm1, %v9494_v52, %v8575_v13  ;;  %v6753_v42 = vsel %vm9782_vm13, %v6748_v7, %v12685_v17  ;;  %v8802_v29 = vld [vmem:[#allocation2 + $0x70] sm:$0xf] }
 0x4e5   : > { %v7616_v26 = vpop.permute.xlu0 %7615  ;;  %v6778_v20 = vshrl.u32 %v6720_v22, 16  ;;  %v6937_v28 = vunpack.c.l.b16 %v6753_v42  ;;  %v8826_v32 = vshrl.u32 %v8801_v18, 16  ;;  %v12729_v13 = vrot.slane %v6774_v4, 5  ;;  %v8137_v4 = vld [vmem:[#allocation3 + $0xac] sm:$0xf] }
 0x4e6   : > { %v8066_v56 = vpop.permute.xlu2 %8065  ;;  %7663 = vst.msk [vmem:[#allocation4 + $0x40] sm:$0xf] %vm5537_vm4, %v7616_v26  ;;  %9465 = vmatmul.msk.bf16.gmra.mxu2 %vm6638_vm9, %v9595_v47  ;;  %v7971_v26 = vld [vmem:[#allocation3 + $0x9c] sm:$0xe]  ;;  %v6758_v47 = vrot.slane %v6757_v25, 4  ;;  %v8835_v35 = vshll.u32 %v8802_v29, 16 }
 0x4e7   : > { %8075 = vrot.lane.b32.xlu1 %v8031_v21, %s9655_s23  ;;  %7943 = vst.msk [vmem:[#allocation4 + $0x40] sm:$0xf] %vm5818_vm14, %v7896_v54  ;;  %v7800_v21 = vshrl.u32 %v7691_v3, 16  ;;  %v8828_v25 = vrot.slane %v8826_v32, 4 }
 0x4e8   : > { %v6763_v2 = vsel %vm9782_vm13, %v6758_v47, %v6762_v46 }
 0x4e9   : > { %v7532_v43 = vpop.permute.xlu1 %7531  ;;  %v7802_v37 = vrot.slane %v7800_v21, 4  ;;  %v6938_v17 = vunpack.c.l.b16 %v6763_v2  ;;  %v8236_v21 = vld [vmem:[#allocation3 + $0xa8] sm:$0xf]  ;;  %v8832_v46 = vor.u32 %v8831_v16, %v8828_v25 }
 0x4ea   : > { %7573 = vst.msk [vmem:[#allocation4 + $0x58] sm:$0xf] %vm5440_vm2, %v7532_v43 }
 0x4eb   : > { %8454 = vrot.lane.b32.xlu0 %v8343_v60, %s9657_s29  ;;  %v8037_v60 = vrot.slane %v12708_v5, 5  ;;  %v7806_v41 = vor.u32 %v7805_v49, %v7802_v37  ;;  %v6953_v63 = vpack.c.b16 %v6938_v17, %v6937_v28  ;;  %v8345_v37 = vshrl.u32 %v8236_v21, 16  ;;  %v12764_v28 = vld [vmem:[#allocation3 + $0xac] sm:$0xf] }
 0x4ec   : > { %8077 = vrot.lane.b32.xlu2 %v8034_v31, %s9655_s23  ;;  %v9487_v31 = vrot.slane %v7971_v26, 9  ;;  %v6784_v26 = vshll.u32 %v6721_v44, 16  ;;  %v8348_v49 = vshll.u32 %v8236_v21, 16  ;;  %v8516_v44 = vld [vmem:[#allocation3 + $0xa8] sm:$0xe] }
 0x4ed   : > { %v7898_v54 = vpop.permute.xlu0 %7897 }
 0x4ee   : > { %v12681_v45 = vpop.permute.xlu2 %8440  ;;  %v8038_v3 = vsel %vm9959_vm1, %v9487_v31, %v8037_v60  ;;  %v8833_v31 = vrot.slane %v8832_v46, 4  ;;  %v8350_v18 = vrot.slane %v8348_v49, 5  ;;  %v6724_v46 = vld [vmem:[#allocation2 + $0x2c] sm:$0x1] }
 0x4ef   : > { %8174 = vrot.lane.b32.xlu1 %v8135_v57, %s9656_s26  ;;  %v7693_v57 = vld [vmem:[#allocation3 + $0xa4] sm:$0x1] }
 0x4f1   : > { %v7618_v59 = vpop.permute.xlu1 %7617 }
 0x4f2   : > { %7664 = vst.msk [vmem:[#allocation4 + $0x44] sm:$0xf] %vm5537_vm4, %v7618_v59  ;;  %v8803_v59 = vld [vmem:[#allocation2 + $0x74] sm:$0x1] }
 0x4f3   : > { %7944 = vst.msk [vmem:[#allocation4 + $0x44] sm:$0xf] %vm5818_vm14, %v7898_v54  ;;  %7535 = vrot.lane.b32.xlu0 %v7494_v1, %s9650_s10  ;;  %v6719_v54 = vld [vmem:[#allocation2 + $0x18] sm:$0xf]  ;;  %v6780_v1 = vrot.slane %v6778_v20, 4  ;;  %v8845_v53 = vshll.u32 %v8803_v59, 16 }
 0x4f4   : > { %8452 = vrot.lane.b32.xlu2 %v8333_v14, %s9657_s29  ;;  %8112 = vst.msk [vmem:[#allocation4 + $0x44] sm:$0xf] %vm5987_vm7, %v8066_v56  ;;  %v7429_v56 = vld [vmem:[#allocation3 + $0x98] sm:$0x1]  ;;  %v6765_v27 = vshrl.u32 %v6719_v54, 16  ;;  %v6768_v0 = vshll.u32 %v6719_v54, 16 }
 0x4f5   : > { %v8161_v9 = vpop.permute.xlu0 %8160  ;;  %v7496_v43 = vrot.slane %v7429_v56, 5  ;;  %v8837_v56 = vrot.slane %v8835_v35, 5  ;;  %v6781_v10 = vor.u32 %v6780_v1, %v12729_v13  ;;  %v6722_v1 = vld [vmem:[#allocation2 + $0x24] sm:$0xf] }
 0x4f6   : > { %v12698_v48 = vpop.permute.xlu2 %8610  ;;  %9466 = vmatmul.msk.bf16.gmra.mxu2 %vm6638_vm9, %v9596_v12  ;;  %v6767_v62 = vrot.slane %v6765_v27, 4  ;;  %v6770_v14 = vrot.slane %v6768_v0, 5  ;;  %v7807_v12 = vrot.slane %v7806_v41, 4  ;;  %v6789_v25 = vshrl.u32 %v6722_v1, 16 }
 0x4f7   : > { %8620 = vrot.lane.b32.xlu1 %v8576_v8, %s9658_s30  ;;  %v7497_v58 = vsel %vm9959_vm1, %v7495_v40, %v7496_v43  ;;  %v7819_v8 = vshll.u32 %v7693_v57, 16  ;;  %v6782_v2 = vrot.slane %v6781_v10, 4  ;;  %v6792_v6 = vshll.u32 %v6722_v1, 16 }
 0x4f8   : > { %v6771_v15 = vor.u32 %v6770_v14, %v6767_v62  ;;  %v6791_v16 = vrot.slane %v6789_v25, 4 }
 0x4f9   : > { %v8064_v39 = vpop.permute.xlu1 %8063  ;;  %v7821_v43 = vrot.slane %v7819_v8, 5 }
 0x4fa   : > { %8111 = vst.msk [vmem:[#allocation4 + $0x40] sm:$0xf] %vm5987_vm7, %v8064_v39  ;;  %v7812_v39 = vsel %vm9782_vm13, %v7807_v12, %v7811_v50  ;;  %v6772_v42 = vrot.slane %v6771_v15, 4 }
 0x4fb   : > { %8208 = vst.msk [vmem:[#allocation4 + $0x40] sm:$0xf] %vm6085_vm10, %v8161_v9  ;;  %7633 = vrot.lane.b32.xlu0 %v7592_v30, %s9652_s12  ;;  %v8839_v9 = vshrl.u32 %v8802_v29, 16 }
 0x4fc   : > { %8622 = vrot.lane.b32.xlu2 %v8579_v24, %s9658_s30  ;;  %8488 = vst.msk [vmem:[#allocation4 + $0x40] sm:$0xf] %vm6366_vm11, %v12681_v45  ;;  %v7815_v45 = vrot.slane %v7813_v11, 4  ;;  %v7973_v11 = vld [vmem:[#allocation3 + $0xa4] sm:$0x1]  ;;  %v6777_v17 = vsel %vm9782_vm13, %v6772_v42, %v12729_v13  ;;  %v8582_v13 = vrot.slane %v12764_v28, 5 }
 0x4fd   : > { %v8443_v34 = vpop.permute.xlu0 %8442  ;;  %v8841_v7 = vrot.slane %v8839_v9, 4  ;;  %v8237_v24 = vld [vmem:[#allocation3 + $0xac] sm:$0xf]  ;;  %v8040_v5 = vrot.slane %v7973_v11, 5  ;;  %v8238_v9 = vld [vmem:[#allocation3 + $0xb0] sm:$0x1] }
 0x4fe   : > { %v12724_v23 = vpop.permute.xlu2 %7899  ;;  %v7816_v38 = vor.u32 %v7815_v45, %v7811_v50  ;;  %v8039_v45 = vrot.slane %v8037_v60, 4  ;;  %v8354_v54 = vshll.u32 %v8237_v24, 16  ;;  %v8358_v22 = vshrl.u32 %v8237_v24, 16  ;;  %v7430_v28 = vld [vmem:[#allocation3 + $0x9c] sm:$0xe] }
 0x4ff   : > { %7537 = vrot.lane.b32.xlu1 %v7497_v58, %s9650_s10  ;;  %v8842_v30 = vor.u32 %v8841_v7, %v8837_v56  ;;  %v6786_v58 = vrot.slane %v6784_v26, 5  ;;  %v8347_v60 = vrot.slane %v8345_v37, 4  ;;  %v9495_v7 = vrot.slane %v8516_v44, 9 }
 0x500   : > { %v7817_v55 = vrot.slane %v7816_v38, 4  ;;  %v8041_v32 = vsel %vm9959_vm1, %v8039_v45, %v8040_v5  ;;  %v8360_v62 = vrot.slane %v8358_v22, 4  ;;  %v6808_v42 = vshll.u32 %v6724_v46, 16  ;;  %v7432_v22 = vld [vmem:[#allocation3 + $0xa4] sm:$0x1] }
 0x501   : > { %v8163_v52 = vpop.permute.xlu1 %8162  ;;  %v8843_v50 = vrot.slane %v8842_v30, 4  ;;  %v6787_v29 = vsel %vm9782_vm13, %v6782_v2, %v6786_v58  ;;  %v8351_v8 = vor.u32 %v8350_v18, %v8347_v60  ;;  %v8583_v11 = vsel %vm9959_vm1, %v9495_v7, %v8582_v13  ;;  %v12823_v7 = vld [vmem:[#allocation3 + $0xac] sm:$0xf] }
 0x502   : > { %8209 = vst.msk [vmem:[#allocation4 + $0x44] sm:$0xf] %vm6085_vm10, %v8163_v52  ;;  %v7822_v27 = vsel %vm9782_vm13, %v7817_v55, %v7821_v43  ;;  %v6723_v52 = vld [vmem:[#allocation2 + $0x28] sm:$0xf]  ;;  %v6940_v12 = vunpack.c.l.b16 %v6787_v29  ;;  %v7694_v55 = vld [vmem:[#allocation3 + $0xa8] sm:$0xf] }
 0x503   : > { %8489 = vst.msk [vmem:[#allocation4 + $0x44] sm:$0xf] %vm6366_vm11, %v8443_v34  ;;  %8079 = vrot.lane.b32.xlu0 %v8038_v3, %s9655_s23  ;;  %v8838_v34 = vsel %vm9782_vm13, %v8833_v31, %v8837_v56  ;;  %v6798_v35 = vshll.u32 %v6723_v52, 16  ;;  %v6802_v38 = vshrl.u32 %v6723_v52, 16  ;;  %v6794_v56 = vrot.slane %v6792_v6, 5 }
 0x504   : > { %7631 = vrot.lane.b32.xlu2 %v7591_v51, %s9652_s12  ;;  %8657 = vst.msk [vmem:[#allocation4 + $0x44] sm:$0xf] %vm6535_vm8, %v12698_v48  ;;  %v8847_v48 = vrot.slane %v8845_v53, 5  ;;  %v9022_v0 = vunpack.c.l.b16 %v8838_v34  ;;  %v8356_v51 = vrot.slane %v8354_v54, 5  ;;  %v6939_v53 = vunpack.c.l.b16 %v6777_v17  ;;  %v8518_v34 = vld [vmem:[#allocation3 + $0xb0] sm:$0x1] }
 0x505   : > { %v7620_v40 = vpop.permute.xlu0 %7619  ;;  %v12780_v21 = vrot.slane %v6798_v35, 5  ;;  %v6804_v15 = vrot.slane %v6802_v38, 4  ;;  %v8352_v30 = vrot.slane %v8351_v8, 4  ;;  %v6795_v49 = vor.u32 %v6794_v56, %v6791_v16  ;;  %v8805_v8 = vld [vmem:[#allocation2 + $0x7c] sm:$0xf] }
 0x506   : > { %v12742_v47 = vpop.permute.xlu2 %8069  ;;  %7665 = vst.msk [vmem:[#allocation4 + $0x48] sm:$0xf] %vm5537_vm4, %v7620_v40  ;;  %9467 = vmatmul.msk.bf16.vlgmr.msrb.gmra.mxu2 %vm6961_vm6, %v6953_v63  ;;  %v12778_v63 = vld [vmem:[#allocation3 + $0xa0] sm:$0xf]  ;;  %v8361_v40 = vor.u32 %v8360_v62, %v8356_v51  ;;  %v6954_v37 = vpack.c.b16 %v6940_v12, %v6939_v53  ;;  %v7824_v58 = vshrl.u32 %v7694_v55, 16  ;;  %v6810_v5 = vrot.slane %v6808_v42, 5 }
 0x507   : > { %7911 = vrot.lane.b32.xlu1 %v7812_v39, %s9654_s14  ;;  %7945 = vst.msk [vmem:[#allocation4 + $0x48] sm:$0xf] %vm5818_vm14, %v12724_v23  ;;  %v8848_v23 = vsel %vm9782_vm13, %v8843_v50, %v8847_v48  ;;  %v8136_v39 = vld [vmem:[#allocation3 + $0xa8] sm:$0xf]  ;;  %v8364_v48 = vshll.u32 %v8238_v9, 16  ;;  %v7500_v43 = vrot.slane %v12778_v63, 5  ;;  %v6805_v31 = vor.u32 %v6804_v15, %v12780_v21 }
 0x508   : > { %v9023_v41 = vunpack.c.l.b16 %v8848_v23  ;;  %v7827_v50 = vshll.u32 %v7694_v55, 16  ;;  %v8362_v54 = vrot.slane %v8361_v40, 4  ;;  %v7695_v23 = vld [vmem:[#allocation3 + $0xac] sm:$0xf]  ;;  %v7503_v18 = vrot.slane %v7432_v22, 5 }
 0x509   : > { %v8609_v57 = vpop.permute.xlu1 %8608  ;;  %v12761_v20 = vpop.f32.mrf.mxu2  ;;  %v7826_v17 = vrot.slane %v7824_v58, 4  ;;  %v7833_v1 = vshll.u32 %v7695_v23, 16  ;;  %v9480_v52 = vrot.slane %v7430_v28, 9  ;;  %v8806_v9 = vld [vmem:[#allocation2 + $0x80] sm:$0x1]  ;;  %v8859_v16 = vshll.u32 %v8805_v8, 16 }
 0x50a   : > { %8656 = vst.msk [vmem:[#allocation4 + $0x40] sm:$0xf] %vm6535_vm8, %v8609_v57  ;;  %v9038_v14 = vpack.c.b16 %v9023_v41, %v9022_v0  ;;  %v8357_v57 = vsel %vm9782_vm13, %v8352_v30, %v8356_v51  ;;  %v6796_v0 = vrot.slane %v6795_v49, 4  ;;  %v8584_v41 = vrot.slane %v8582_v13, 4  ;;  %v8804_v13 = vld [vmem:[#allocation2 + $0x78] sm:$0xf] }
 0x50b   : > { %8178 = vrot.lane.b32.xlu0 %v8137_v4, %s9656_s26  ;;  %v6806_v4 = vrot.slane %v6805_v31, 4  ;;  %v7829_v29 = vrot.slane %v7827_v50, 5  ;;  %v8850_v53 = vshrl.u32 %v8804_v13, 16  ;;  %v8853_v12 = vshll.u32 %v8804_v13, 16  ;;  %v8239_v49 = vld [vmem:[#allocation3 + $0xb4] sm:$0xf] }
 0x50c   : > { %7913 = vrot.lane.b32.xlu2 %v7822_v27, %s9654_s14  ;;  %9539 = vmatmul.msk.bf16.vlgmr.msrb.gmra.mxu0 %vm6961_vm6, %v9038_v14  ;;  %v8366_v27 = vrot.slane %v8364_v48, 5  ;;  %v8585_v14 = vrot.slane %v8518_v34, 5  ;;  %v6801_v44 = vsel %vm9782_vm13, %v6796_v0, %v12780_v21  ;;  %v8863_v56 = vshrl.u32 %v8805_v8, 16  ;;  %v7974_v8 = vld [vmem:[#allocation3 + $0xa8] sm:$0xe] }
 0x50d   : > { %v7902_v3 = vpop.permute.xlu0 %7901  ;;  %v6811_v25 = vsel %vm9782_vm13, %v6806_v4, %v6810_v5  ;;  %v7830_v38 = vor.u32 %v7829_v29, %v7826_v17  ;;  %v7835_v15 = vrot.slane %v7833_v1, 5  ;;  %v6941_v21 = vunpack.c.l.b16 %v6801_v44  ;;  %v7976_v4 = vld [vmem:[#allocation3 + $0xb0] sm:$0x1]  ;;  %v8240_v29 = vld [vmem:[#allocation3 + $0xb8] sm:$0xf] }
 0x50e   : > { %v12771_v59 = vpop.permute.xlu2 %8444  ;;  %v8586_v35 = vsel %vm9959_vm1, %v8584_v41, %v8585_v14  ;;  %v8852_v46 = vrot.slane %v8850_v53, 4  ;;  %v8861_v40 = vrot.slane %v8859_v16, 5  ;;  %v8865_v55 = vrot.slane %v8863_v56, 4 }
 0x50f   : > { %8081 = vrot.lane.b32.xlu1 %v8041_v32, %s9655_s23  ;;  %v8367_v32 = vsel %vm9782_vm13, %v8362_v54, %v8366_v27  ;;  %v7831_v48 = vrot.slane %v7830_v38, 4  ;;  %v8369_v34 = vshrl.u32 %v8239_v49, 16  ;;  %v8372_v27 = vshll.u32 %v8239_v49, 16  ;;  %v8138_v49 = vld [vmem:[#allocation3 + $0xb4] sm:$0xf] }
 0x510   : > { %v8866_v42 = vor.u32 %v8865_v55, %v8861_v40  ;;  %v9488_v56 = vrot.slane %v7974_v8, 9 }
 0x511   : > { %v7622_v10 = vpop.permute.xlu1 %7621  ;;  %v9597_v26 = vld [vmem:[#allocation4 + $0x40] sm:$0xff]  ;;  %v12788_v24 = vpop.f32.mrf.mxu2  ;;  %v7836_v50 = vsel %vm9782_vm13, %v7831_v48, %v7835_v15  ;;  %v8371_v14 = vrot.slane %v8369_v34, 4  ;;  %v8374_v1 = vrot.slane %v8372_v27, 5  ;;  %v8519_v34 = vld [vmem:[#allocation3 + $0xb4] sm:$0xe] }
 0x512   : > { %7666 = vst.msk [vmem:[#allocation4 + $0x4c] sm:$0xf] %vm5537_vm4, %v7622_v10  ;;  %9531 = vmatmul.msk.bf16.vlgmr.msrb.gmra.mxu3 %vm6638_vm9, %v9597_v26  ;;  %v6942_v10 = vunpack.c.l.b16 %v6811_v25  ;;  %v8869_v26 = vshll.u32 %v8806_v9, 16  ;;  %v8867_v54 = vrot.slane %v8866_v42, 4  ;;  %v12879_v42 = vld [vmem:[%s13286_s6] ss:$0 sm:$0xff] }
 0x513   : > { %7946 = vst.msk [vmem:[#allocation4 + $0x4c] sm:$0xf] %vm5818_vm14, %v7902_v3  ;;  %8624 = vrot.lane.b32.xlu0 %v8583_v11, %s9658_s30  ;;  %v7837_v3 = vshrl.u32 %v7695_v23, 16  ;;  %v7501_v11 = vsel %vm9959_vm1, %v9480_v52, %v7500_v43  ;;  %v7593_v23 = vld [vmem:[#allocation3 + $0xa8] sm:$0xf]  ;;  %v8375_v9 = vor.u32 %v8374_v1, %v8371_v14 }
 0x514   : > { %8176 = vrot.lane.b32.xlu2 %v8136_v39, %s9656_s26  ;;  %8114 = vst.msk [vmem:[#allocation4 + $0x4c] sm:$0xf] %vm5987_vm7, %v12742_v47  ;;  %v7502_v47 = vrot.slane %v7500_v43, 4  ;;  %v8855_v39 = vrot.slane %v8853_v12, 5  ;;  %v8871_v58 = vrot.slane %v8869_v26, 5  ;;  %v8044_v43 = vrot.slane %v12823_v7, 5 }
 0x515   : > { %v8165_v45 = vpop.permute.xlu0 %8164  ;;  %v8376_v7 = vrot.slane %v8375_v9, 4  ;;  %v12887_v27 = vld [vmem:[%s13284_s4] ss:$0 sm:$0xff]  ;;  %v8808_v14 = vld [vmem:[#allocation2 + $0x88] sm:$0xf] }
 0x516   : > { %v12795_v2 = vpop.permute.xlu2 %8614  ;;  %9468 = vmatmul.msk.bf16.gmra.mxu2 %vm6961_vm6, %v6954_v37  ;;  %v7504_v51 = vsel %vm9959_vm1, %v7502_v47, %v7503_v18  ;;  %v7839_v37 = vrot.slane %v7837_v3, 4  ;;  %v8856_v31 = vor.u32 %v8855_v39, %v8852_v46  ;;  %v7696_v47 = vld [vmem:[#allocation3 + $0xb0] sm:$0x1]  ;;  %v8872_v18 = vsel %vm9782_vm13, %v8867_v54, %v8871_v58  ;;  %v7594_v3 = vld [vmem:[#allocation3 + $0xac] sm:$0xf] }
 0x517   : > { %8456 = vrot.lane.b32.xlu1 %v8357_v57, %s9657_s29  ;;  %v6955_v57 = vpack.c.b16 %v6942_v10, %v6941_v21  ;;  %v9025_v28 = vunpack.c.l.b16 %v8872_v18  ;;  %v7843_v17 = vshll.u32 %v7696_v47, 16  ;;  %v12859_v21 = vld [vmem:[#allocation3 + $0xb8] sm:$0xf]  ;;  %v8045_v39 = vsel %vm9959_vm1, %v9488_v56, %v8044_v43  ;;  %v8521_v58 = vld [vmem:[#allocation3 + $0xbc] sm:$0x1] }
 0x518   : > { %v7840_v5 = vor.u32 %v7839_v37, %v7835_v15  ;;  %v8809_v1 = vld [vmem:[#allocation2 + $0x8c] sm:$0x1]  ;;  %v8887_v9 = vshrl.u32 %v8808_v14, 16 }
 0x519   : > { %v8068_v60 = vpop.permute.xlu1 %8067  ;;  %v12810_v62 = vpop.f32.mrf.mxu2  ;;  %v7845_v38 = vrot.slane %v7843_v17, 5  ;;  %v7433_v17 = vld [vmem:[#allocation3 + $0xa8] sm:$0xe] }
 0x51a   : > { %8113 = vst.msk [vmem:[#allocation4 + $0x48] sm:$0xf] %vm5987_vm7, %v8068_v60  ;;  %v7841_v44 = vrot.slane %v7840_v5, 4 }
 0x51b   : > { %8210 = vst.msk [vmem:[#allocation4 + $0x48] sm:$0xf] %vm6085_vm10, %v8165_v45  ;;  %7541 = vrot.lane.b32.xlu0 %v7504_v51, %s9650_s10  ;;  %v8857_v45 = vrot.slane %v8856_v31, 4  ;;  %v8047_v51 = vrot.slane %v7976_v4, 5 }
 0x51c   : > { %8458 = vrot.lane.b32.xlu2 %v8367_v32, %s9657_s29  ;;  %8490 = vst.msk [vmem:[#allocation4 + $0x48] sm:$0xf] %vm6366_vm11, %v12771_v59  ;;  %v7846_v53 = vsel %vm9782_vm13, %v7841_v44, %v7845_v38  ;;  %v7434_v44 = vld [vmem:[#allocation3 + $0xac] sm:$0xf]  ;;  %v8883_v38 = vshll.u32 %v8808_v14, 16 }
 0x51d   : > { %v8447_v59 = vpop.permute.xlu0 %8446  ;;  %v8862_v60 = vsel %vm9782_vm13, %v8857_v45, %v8861_v40  ;;  %v7698_v45 = vld [vmem:[#allocation3 + $0xb8] sm:$0xf] }
 0x51e   : > { %v7904_v6 = vpop.permute.xlu2 %7903  ;;  %v9024_v41 = vunpack.c.l.b16 %v8862_v60  ;;  %v7857_v18 = vshll.u32 %v7698_v45, 16 }
 0x51f   : > { %8626 = vrot.lane.b32.xlu1 %v8586_v35, %s9658_s30 }
 0x520   : > { %v9039_v52 = vpack.c.b16 %v9025_v28, %v9024_v41  ;;  %v9496_v28 = vrot.slane %v8519_v34, 9 }
 0x521   : > { %v8167_v30 = vpop.permute.xlu1 %8166  ;;  %v12834_v63 = vpop.f32.mrf.mxu2 }
 0x522   : > { %8211 = vst.msk [vmem:[#allocation4 + $0x4c] sm:$0xf] %vm6085_vm10, %v8167_v30  ;;  %9540 = vmatmul.msk.bf16.gmra.mxu0 %vm6961_vm6, %v9039_v52  ;;  %v8241_v30 = vld [vmem:[#allocation3 + $0xbc] sm:$0x1] }
 0x523   : > { %8491 = vst.msk [vmem:[#allocation4 + $0x4c] sm:$0xf] %vm6366_vm11, %v8447_v59  ;;  %7915 = vrot.lane.b32.xlu0 %v7836_v50, %s9654_s14  ;;  %v8382_v59 = vshrl.u32 %v8240_v29, 16  ;;  %v7013_v15 = vpop.f32.mrf.mxu3 }
 0x524   : > { %7539 = vrot.lane.b32.xlu2 %v7501_v11, %s9650_s10  ;;  %8659 = vst.msk [vmem:[#allocation4 + $0x4c] sm:$0xf] %vm6535_vm8, %v12795_v2  ;;  %v8046_v2 = vrot.slane %v8044_v43, 4  ;;  %v8589_v11 = vrot.slane %v12859_v21, 5  ;;  %v8388_v43 = vshll.u32 %v8241_v30, 16 }
 0x525   : > { %v7624_v0 = vpop.permute.xlu0 %7623  ;;  %v8384_v46 = vrot.slane %v8382_v59, 4  ;;  %v8893_v59 = vshll.u32 %v8809_v1, 16 }
 0x526   : > { %v8074_v22 = vpop.permute.xlu2 %8073  ;;  %7667 = vst.msk [vmem:[#allocation4 + $0x50] sm:$0xf] %vm5537_vm4, %v7624_v0  ;;  %9469 = vmatmul.msk.bf16.gmra.mxu2 %vm6961_vm6, %v6955_v57  ;;  %v8048_v25 = vsel %vm9959_vm1, %v8046_v2, %v8047_v51  ;;  %v8591_v50 = vrot.slane %v8589_v11, 4  ;;  %v7014_v0 = vadd.f32 %v12879_v42, %v7013_v15  ;;  %v8390_v60 = vrot.slane %v8388_v43, 5  ;;  %v8807_v51 = vld [vmem:[#allocation2 + $0x84] sm:$0xf] }
 0x527   : > { %7635 = vrot.lane.b32.xlu1 %v7593_v23, %s9652_s12  ;;  %7947 = vst.msk [vmem:[#allocation4 + $0x50] sm:$0xf] %vm5818_vm14, %v7904_v6  ;;  %v8378_v6 = vshll.u32 %v8240_v29, 16  ;;  %v8139_v23 = vld [vmem:[#allocation3 + $0xb8] sm:$0xf]  ;;  %v7861_v2 = vshrl.u32 %v7698_v45, 16  ;;  %v8590_v30 = vsel %vm9959_vm1, %v9496_v28, %v8589_v11 }
 0x528   : > { %v7435_v43 = vld [vmem:[#allocation3 + $0xb0] sm:$0x1] }
 0x529   : > { %v8613_v32 = vpop.permute.xlu1 %8612  ;;  %v12852_v35 = vpop.f32.mrf.mxu2  ;;  %v8380_v16 = vrot.slane %v8378_v6, 5  ;;  %v8877_v6 = vshll.u32 %v8807_v51, 16  ;;  %v7863_v8 = vrot.slane %v7861_v2, 4  ;;  %v7510_v2 = vrot.slane %v7435_v43, 5  ;;  %v8242_v43 = vld [vmem:[#allocation3 + $0xc0] sm:$0xf] }
 0x52a   : > { %8658 = vst.msk [vmem:[#allocation4 + $0x48] sm:$0xf] %vm6535_vm8, %v8613_v32 }
 0x52b   : > { %8085 = vrot.lane.b32.xlu0 %v8048_v25, %s9655_s23  ;;  %v8381_v40 = vsel %vm9782_vm13, %v8376_v7, %v8380_v16  ;;  %v8385_v37 = vor.u32 %v8384_v46, %v8380_v16  ;;  %v7015_v57 = vpop.f32.mrf.mxu3  ;;  %v8874_v25 = vshrl.u32 %v8807_v51, 16  ;;  %v7697_v16 = vld [vmem:[#allocation3 + $0xb4] sm:$0xf]  ;;  %v8879_v15 = vrot.slane %v8877_v6, 5 }
 0x52c   : > { %7637 = vrot.lane.b32.xlu2 %v7594_v3, %s9652_s12  ;;  %v9481_v7 = vrot.slane %v7433_v17, 9  ;;  %v7507_v46 = vrot.slane %v7434_v44, 5 }
 0x52d   : > { %v7906_v12 = vpop.permute.xlu0 %7905  ;;  %v8386_v47 = vrot.slane %v8385_v37, 4  ;;  %v8876_v56 = vrot.slane %v8874_v25, 4  ;;  %v7016_v37 = vadd.f32 %v12879_v42, %v7015_v57  ;;  %v7851_v57 = vshll.u32 %v7697_v16, 16 }
 0x52e   : > { %v8449_v13 = vpop.permute.xlu2 %8448 }
 0x52f   : > { %7917 = vrot.lane.b32.xlu1 %v7846_v53, %s9654_s14  ;;  %v8391_v32 = vsel %vm9782_vm13, %v8386_v47, %v8390_v60  ;;  %v7853_v14 = vrot.slane %v7851_v57, 5  ;;  %v8140_v57 = vld [vmem:[#allocation3 + $0xc0] sm:$0xf] }
 0x531   : > { %v7626_v10 = vpop.permute.xlu1 %7625  ;;  %v9598_v26 = vld [vmem:[#allocation4 + $0x48] sm:$0xff]  ;;  %v12869_v55 = vpop.f32.mrf.mxu2 }
 0x532   : > { %7668 = vst.msk [vmem:[#allocation4 + $0x54] sm:$0xf] %vm5537_vm4, %v7626_v10  ;;  %9532 = vmatmul.msk.bf16.gmra.mxu3 %vm6638_vm9, %v9598_v26  ;;  %v8885_v10 = vrot.slane %v8883_v38, 5 }
 0x533   : > { %7948 = vst.msk [vmem:[#allocation4 + $0x54] sm:$0xf] %vm5818_vm14, %v7906_v12  ;;  %8460 = vrot.lane.b32.xlu0 %v8381_v40, %s9657_s29  ;;  %v7018_v12 = vpop.f32.mrf.mxu3 }
 0x534   : > { %8083 = vrot.lane.b32.xlu2 %v8045_v39, %s9655_s23  ;;  %8116 = vst.msk [vmem:[#allocation4 + $0x54] sm:$0xf] %vm5987_vm7, %v8074_v22  ;;  %v8592_v22 = vrot.slane %v8521_v58, 5  ;;  %v8889_v39 = vrot.slane %v8887_v9, 4  ;;  %v8880_v58 = vor.u32 %v8879_v15, %v8876_v56 }
 0x535   : > { %v8169_v31 = vpop.permute.xlu0 %8168 }
 0x536   : > { %v12874_v48 = vpop.permute.xlu2 %8618  ;;  %v8593_v4 = vsel %vm9959_vm1, %v8591_v50, %v8592_v22  ;;  %v8890_v21 = vor.u32 %v8889_v39, %v8885_v10  ;;  %v8895_v22 = vrot.slane %v8893_v59, 5  ;;  %v8881_v47 = vrot.slane %v8880_v58, 4 }
 0x537   : > { %8180 = vrot.lane.b32.xlu1 %v8138_v49, %s9656_s26  ;;  %v7595_v49 = vld [vmem:[#allocation3 + $0xb4] sm:$0xf] }
 0x539   : > { %v8072_v54 = vpop.permute.xlu1 %8071  ;;  %v6691_v5 = vpop.f32.mrf.mxu2 }
 0x53a   : > { %8115 = vst.msk [vmem:[#allocation4 + $0x50] sm:$0xf] %vm5987_vm7, %v8072_v54  ;;  %v6692_v41 = vadd.f32 %v12887_v27, %v6691_v5  ;;  %v7848_v54 = vshrl.u32 %v7697_v16, 16 }
 0x53b   : > { %8212 = vst.msk [vmem:[#allocation4 + $0x50] sm:$0xf] %vm6085_vm10, %v8169_v31  ;;  %8630 = vrot.lane.b32.xlu0 %v8593_v4, %s9658_s30  ;;  %v7699_v31 = vld [vmem:[#allocation3 + $0xbc] sm:$0x1]  ;;  %v8891_v4 = vrot.slane %v8890_v21, 4  ;;  %v7020_v1 = vpop.f32.mrf.mxu3 }
 0x53c   : > { %8182 = vrot.lane.b32.xlu2 %v8139_v23, %s9656_s26  ;;  %8492 = vst.msk [vmem:[#allocation4 + $0x50] sm:$0xf] %vm6366_vm11, %v8449_v13  ;;  %v7044_v52 = vadd.f32 %v7014_v0, %v6692_v41  ;;  %v12904_v13 = vrot.slane %v7857_v18, 5  ;;  %v7508_v23 = vsel %vm9959_vm1, %v9481_v7, %v7507_v46  ;;  %v7867_v0 = vshll.u32 %v7699_v31, 16 }
 0x53d   : > { %v8451_v3 = vpop.permute.xlu0 %8450  ;;  %v7509_v18 = vrot.slane %v7507_v46, 4  ;;  %v8886_v41 = vsel %vm9782_vm13, %v8881_v47, %v8885_v10  ;;  %v8896_v17 = vsel %vm9782_vm13, %v8891_v4, %v8895_v22  ;;  %v7978_v46 = vld [vmem:[#allocation3 + $0xb8] sm:$0xf]  ;;  %v7021_v21 = vadd.f32 %v12879_v42, %v7020_v1 }
 0x53e   : > { %v12898_v29 = vpop.permute.xlu2 %7907  ;;  %v7060_v53 = vmax.f32 %v7044_v52, 0.0  ;;  %v7864_v45 = vor.u32 %v7863_v8, %v12904_v13  ;;  %v9027_v52 = vunpack.c.l.b16 %v8896_v17  ;;  %v7869_v25 = vrot.slane %v7867_v0, 5 }
 0x53f   : > { %8462 = vrot.lane.b32.xlu1 %v8391_v32, %s9657_s29  ;;  %v9026_v32 = vunpack.c.l.b16 %v8886_v41  ;;  %v7511_v38 = vsel %vm9959_vm1, %v7509_v18, %v7510_v2  ;;  %v7019_v8 = vadd.f32 %v12879_v42, %v7018_v12  ;;  %v8051_v22 = vrot.slane %v7978_v46, 5  ;;  %v7979_v18 = vld [vmem:[#allocation3 + $0xbc] sm:$0x1] }
 0x540   : > { %v7076_v40 = vpack.c.bf16 %v7060_v53, %v7060_v53  ;;  %v7865_v28 = vrot.slane %v7864_v45, 4  ;;  %v8393_v4 = vshrl.u32 %v8242_v43, 16 }
 0x541   : > { %v8171_v26 = vpop.permute.xlu1 %8170  ;;  %v6693_v50 = vpop.f32.mrf.mxu2  ;;  %v9040_v9 = vpack.c.b16 %v9027_v52, %v9026_v32  ;;  %v8053_v17 = vrot.slane %v8051_v22, 4 }
 0x542   : > { %8213 = vst.msk [vmem:[#allocation4 + $0x54] sm:$0xf] %vm6085_vm10, %v8171_v26  ;;  %v6694_v11 = vadd.f32 %v12887_v27, %v6693_v50  ;;  %v7596_v26 = vld [vmem:[#allocation3 + $0xb8] sm:$0xf]  ;;  %v7977_v50 = vld [vmem:[#allocation3 + $0xb4] sm:$0xe] }
 0x543   : > { %8493 = vst.msk [vmem:[#allocation4 + $0x54] sm:$0xf] %vm6366_vm11, %v8451_v3  ;;  %7639 = vrot.lane.b32.xlu0 %v7595_v49, %s9652_s12  ;;  %v8243_v3 = vld [vmem:[#allocation3 + $0xc4] sm:$0xf]  ;;  %9541 = vmatmul.msk.bf16.gmra.mxu0 %vm6961_vm6, %v9040_v9  ;;  %v7023_v49 = vpop.f32.mrf.mxu3  ;;  %v9489_v0 = vrot.slane %v7977_v50, 9  ;;  %v8395_v1 = vrot.slane %v8393_v4, 4 }
 0x544   : > { %8628 = vrot.lane.b32.xlu2 %v8590_v30, %s9658_s30  ;;  %7092 = vst.msk [vmem:[%s12909_s8 + $0x18] sm:$0xf] %vm402_vm5, %v7076_v40  ;;  %v7045_v5 = vadd.f32 %v7016_v37, %v6694_v11  ;;  %v8402_v53 = vshll.u32 %v8243_v3, 16  ;;  %v8406_v16 = vshrl.u32 %v8243_v3, 16  ;;  %v8244_v11 = vld [vmem:[#allocation3 + $0xc8] sm:$0x1] }
 0x545   : > { %8661 = vst.msk [vmem:[#allocation4 + $0x54] sm:$0xf] %vm6535_vm8, %v12874_v48  ;;  %v7628_v60 = vpop.permute.xlu0 %7627  ;;  %v7850_v48 = vrot.slane %v7848_v54, 4  ;;  %v8412_v2 = vshll.u32 %v8244_v11, 16 }
 0x546   : > { %v12926_v34 = vpop.permute.xlu2 %8077  ;;  %7669 = vst.msk [vmem:[#allocation4 + $0x58] sm:$0xf] %vm5537_vm4, %v7628_v60  ;;  %v7061_v51 = vmax.f32 %v7045_v5, 0.0  ;;  %v12953_v39 = vrot.slane %v8402_v53, 5  ;;  %v8408_v40 = vrot.slane %v8406_v16, 4  ;;  %v8396_v5 = vshll.u32 %v8242_v43, 16 }
 0x547   : > { %7543 = vrot.lane.b32.xlu1 %v7508_v23, %s9650_s10  ;;  %7949 = vst.msk [vmem:[#allocation4 + $0x58] sm:$0xf] %vm5818_vm14, %v12898_v29  ;;  %v7870_v29 = vsel %vm9782_vm13, %v7865_v28, %v7869_v25  ;;  %v7854_v15 = vor.u32 %v7853_v14, %v7850_v48  ;;  %v8052_v28 = vsel %vm9959_vm1, %v9489_v0, %v8051_v22  ;;  %v8054_v14 = vrot.slane %v7979_v18, 5  ;;  %v8141_v53 = vld [vmem:[#allocation3 + $0xc4] sm:$0xf] }
 0x548   : > { %v7077_v6 = vpack.c.bf16 %v7061_v51, %v7061_v51  ;;  %v8409_v23 = vor.u32 %v8408_v40, %v12953_v39  ;;  %v8398_v52 = vrot.slane %v8396_v5, 5  ;;  %v8810_v40 = vld [vmem:[#allocation2 + $0x90] sm:$0xf]  ;;  %v8522_v22 = vld [vmem:[#allocation3 + $0xc0] sm:$0xe] }
 0x549   : > { %v8617_v44 = vpop.permute.xlu1 %8616  ;;  %v6696_v59 = vpop.f32.mrf.mxu2  ;;  %v7855_v37 = vrot.slane %v7854_v15, 4 }
 0x54a   : > { %8660 = vst.msk [vmem:[#allocation4 + $0x50] sm:$0xf] %vm6535_vm8, %v8617_v44  ;;  %v6697_v56 = vadd.f32 %v12887_v27, %v6696_v59  ;;  %v8410_v32 = vrot.slane %v8409_v23, 4  ;;  %v8414_v44 = vrot.slane %v8412_v2, 5  ;;  %v8399_v16 = vor.u32 %v8398_v52, %v8395_v1 }
 0x54b   : > { %7093 = vst.msk [vmem:[%s12909_s8 + $0x1c] sm:$0xf] %vm402_vm5, %v7077_v6  ;;  %7921 = vrot.lane.b32.xlu0 %v7870_v29, %s9654_s14  ;;  %v7860_v54 = vsel %vm9782_vm13, %v7855_v37, %v12904_v13  ;;  %v7025_v3 = vpop.f32.mrf.mxu3  ;;  %v8055_v6 = vsel %vm9959_vm1, %v8053_v17, %v8054_v14  ;;  %v8812_v37 = vld [vmem:[#allocation2 + $0x98] sm:$0x1]  ;;  %v9497_v17 = vrot.slane %v8522_v22, 9 }
 0x54c   : > { %7545 = vrot.lane.b32.xlu2 %v7511_v38, %s9650_s10  ;;  %v7046_v12 = vadd.f32 %v7019_v8, %v6697_v56  ;;  %v7024_v38 = vadd.f32 %v12879_v42, %v7023_v49  ;;  %v12979_v8 = vld [vmem:[#allocation3 + $0xb8] sm:$0xf]  ;;  %v8415_v9 = vsel %vm9782_vm13, %v8410_v32, %v8414_v44  ;;  %v7436_v56 = vld [vmem:[#allocation3 + $0xb4] sm:$0xe]  ;;  %v8898_v49 = vshrl.u32 %v8810_v40, 16 }
 0x54d   : > { %v7910_v7 = vpop.permute.xlu0 %7909  ;;  %v7026_v5 = vadd.f32 %v12879_v42, %v7025_v3  ;;  %v7700_v32 = vld [vmem:[#allocation3 + $0xc0] sm:$0xf]  ;;  %v464_v22 = vld [vmem:[#allocation3 + $0xcc] sm:$0x1] }
 0x54e   : > { %v12950_v10 = vpop.permute.xlu2 %8452  ;;  %v7062_v30 = vmax.f32 %v7046_v12, 0.0  ;;  %v7514_v12 = vrot.slane %v12979_v8, 5  ;;  %v7701_v8 = vld [vmem:[#allocation3 + $0xc4] sm:$0xf] }
 0x54f   : > { %7641 = vrot.lane.b32.xlu1 %v7596_v26, %s9652_s12  ;;  %v8523_v26 = vld [vmem:[#allocation3 + $0xc4] sm:$0xf] }
 0x550   : > { %v7078_v45 = vpack.c.bf16 %v7062_v30, %v7062_v30  ;;  %v8811_v30 = vld [vmem:[#allocation2 + $0x94] sm:$0xf]  ;;  %v8596_v11 = vrot.slane %v8523_v26, 5 }
 0x551   : > { %v7630_v31 = vpop.permute.xlu1 %7629  ;;  %v9599_v58 = vld [vmem:[#allocation4 + $0x50] sm:$0xff]  ;;  %v6698_v47 = vpop.f32.mrf.mxu2  ;;  %v8911_v50 = vshrl.u32 %v8811_v30, 16 }
 0x552   : > { %7670 = vst.msk [vmem:[#allocation4 + $0x5c] sm:$0xf] %vm5537_vm4, %v7630_v31  ;;  %9533 = vmatmul.msk.bf16.gmra.mxu3 %vm6638_vm9, %v9599_v58  ;;  %v6699_v13 = vadd.f32 %v12887_v27, %v6698_v47  ;;  %v8901_v31 = vshll.u32 %v8810_v40, 16  ;;  %v8907_v58 = vshll.u32 %v8811_v30, 16  ;;  %v8900_v47 = vrot.slane %v8898_v49, 4 }
 0x553   : > { %7950 = vst.msk [vmem:[#allocation4 + $0x5c] sm:$0xf] %vm5818_vm14, %v7910_v7  ;;  %8184 = vrot.lane.b32.xlu0 %v8140_v57, %s9656_s26  ;;  %v7028_v57 = vpop.f32.mrf.mxu3  ;;  %v8913_v18 = vrot.slane %v8911_v50, 4  ;;  %v8598_v52 = vrot.slane %v8596_v11, 4  ;;  %v8597_v44 = vsel %vm9959_vm1, %v9497_v17, %v8596_v11  ;;  %v7881_v49 = vshll.u32 %v7701_v8, 16 }
 0x554   : > { %7919 = vrot.lane.b32.xlu2 %v7860_v54, %s9654_s14  ;;  %7094 = vst.msk [vmem:[%s12909_s8 + $0x20] sm:$0xf] %vm402_vm5, %v7078_v45  ;;  %v7047_v41 = vadd.f32 %v7021_v21, %v6699_v13  ;;  %v8400_v45 = vrot.slane %v8399_v16, 4  ;;  %v9482_v54 = vrot.slane %v7436_v56, 9  ;;  %v8917_v21 = vshll.u32 %v8812_v37, 16 }
 0x555   : > { %8118 = vst.msk [vmem:[#allocation4 + $0x5c] sm:$0xf] %vm5987_vm7, %v12926_v34  ;;  %v8173_v48 = vpop.permute.xlu0 %8172  ;;  %v8903_v23 = vrot.slane %v8901_v31, 5  ;;  %v8909_v13 = vrot.slane %v8907_v58, 5  ;;  %v7029_v37 = vadd.f32 %v12879_v42, %v7028_v57  ;;  %v7885_v31 = vshrl.u32 %v7701_v8, 16 }
 0x556   : > { %v12970_v60 = vpop.permute.xlu2 %8622  ;;  %v7063_v51 = vmax.f32 %v7047_v41, 0.0  ;;  %v8405_v4 = vsel %vm9782_vm13, %v8400_v45, %v12953_v39  ;;  %v7515_v2 = vsel %vm9959_vm1, %v9482_v54, %v7514_v12  ;;  %v8919_v14 = vrot.slane %v8917_v21, 5 }
 0x557   : > { %8087 = vrot.lane.b32.xlu1 %v8052_v28, %s9655_s23  ;;  %v8524_v28 = vld [vmem:[#allocation3 + $0xc8] sm:$0x1]  ;;  %v465_v57 = vsel %vm10849_vm3, 0, %v464_v22  ;;  %v8526_v22 = vld [vmem:[#allocation3 + $0xd0] sm:$0xf] }
 0x558   : > { %v7079_v25 = vpack.c.bf16 %v7063_v51, %v7063_v51  ;;  %v8914_v51 = vor.u32 %v8913_v18, %v8909_v13  ;;  %466 = vst [vmem:[#allocation3 + $0xcc] sm:$0x1] %v465_v57 }
 0x559   : > { %v8076_v34 = vpop.permute.xlu1 %8075  ;;  %v6701_v29 = vpop.f32.mrf.mxu2 }
 0x55a   : > { %8117 = vst.msk [vmem:[#allocation4 + $0x58] sm:$0xf] %vm5987_vm7, %v8076_v34  ;;  %v6702_v59 = vadd.f32 %v12887_v27, %v6701_v29  ;;  %v7875_v29 = vshll.u32 %v7700_v32, 16 }
 0x55b   : > { %8214 = vst.msk [vmem:[#allocation4 + $0x58] sm:$0xf] %vm6085_vm10, %v8173_v48  ;;  %8466 = vrot.lane.b32.xlu0 %v8415_v9, %s9657_s29  ;;  %v8904_v48 = vor.u32 %v8903_v23, %v8900_v47  ;;  %v7872_v9 = vshrl.u32 %v7700_v32, 16  ;;  %v7030_v50 = vpop.f32.mrf.mxu3  ;;  %v7597_v32 = vld [vmem:[#allocation3 + $0xc0] sm:$0xf] }
 0x55c   : > { %8089 = vrot.lane.b32.xlu2 %v8055_v6, %s9655_s23  ;;  %7095 = vst.msk [vmem:[%s12909_s8 + $0x24] sm:$0xf] %vm402_vm5, %v7079_v25  ;;  %v7048_v7 = vadd.f32 %v7024_v38, %v6702_v59  ;;  %v8599_v6 = vrot.slane %v8524_v28, 5  ;;  %v8915_v38 = vrot.slane %v8914_v51, 4  ;;  %v7877_v54 = vrot.slane %v7875_v29, 5 }
 0x55d   : > { %8494 = vst.msk [vmem:[#allocation4 + $0x58] sm:$0xf] %vm6366_vm11, %v12950_v10  ;;  %v8455_v46 = vpop.permute.xlu0 %8454  ;;  %v8905_v3 = vrot.slane %v8904_v48, 4  ;;  %v7874_v45 = vrot.slane %v7872_v9, 4  ;;  %v7031_v51 = vadd.f32 %v12879_v42, %v7030_v50 }
 0x55e   : > { %v7632_v15 = vpop.permute.xlu2 %7631  ;;  %v7064_v43 = vmax.f32 %v7048_v7, 0.0  ;;  %v8600_v56 = vsel %vm9959_vm1, %v8598_v52, %v8599_v6  ;;  %v7438_v7 = vld [vmem:[#allocation3 + $0xbc] sm:$0x1]  ;;  %v519_v6 = vld [vmem:[#allocation3 + $0xd4] sm:$0x1] }
 0x55f   : > { %8186 = vrot.lane.b32.xlu1 %v8141_v53, %s9656_s26  ;;  %v8920_v53 = vsel %vm9782_vm13, %v8915_v38, %v8919_v14  ;;  %v8245_v29 = vld [vmem:[#allocation3 + $0xcc] sm:$0xf] }
 0x560   : > { %v7080_v0 = vpack.c.bf16 %v7064_v43, %v7064_v43  ;;  %v9029_v40 = vunpack.c.l.b16 %v8920_v53  ;;  %v13024_v43 = vld [vmem:[#allocation3 + $0xc4] sm:$0xf] }
 0x561   : > { %v8175_v10 = vpop.permute.xlu1 %8174  ;;  %v6703_v41 = vpop.f32.mrf.mxu2  ;;  %v8058_v18 = vrot.slane %v13024_v43, 5  ;;  %v8525_v43 = vld [vmem:[#allocation3 + $0xcc] sm:$0xe] }
 0x562   : > { %8215 = vst.msk [vmem:[#allocation4 + $0x5c] sm:$0xf] %vm6085_vm10, %v8175_v10  ;;  %v6704_v39 = vadd.f32 %v12887_v27, %v6703_v41  ;;  %v7517_v10 = vrot.slane %v7438_v7, 5 }
 0x563   : > { %8495 = vst.msk [vmem:[#allocation4 + $0x5c] sm:$0xf] %vm6366_vm11, %v8455_v46  ;;  %7547 = vrot.lane.b32.xlu0 %v7515_v2, %s9650_s10  ;;  %v7516_v46 = vrot.slane %v7514_v12, 4  ;;  %v7878_v2 = vor.u32 %v7877_v54, %v7874_v45  ;;  %v7033_v9 = vpop.f32.mrf.mxu3  ;;  %v8060_v50 = vrot.slane %v8058_v18, 4 }
 0x564   : > { %8464 = vrot.lane.b32.xlu2 %v8405_v4, %s9657_s29  ;;  %7096 = vst.msk [vmem:[%s12909_s8 + $0x28] sm:$0xf] %vm402_vm5, %v7080_v0  ;;  %v7049_v34 = vadd.f32 %v7026_v5, %v6704_v39  ;;  %v7980_v0 = vld [vmem:[#allocation3 + $0xc0] sm:$0xe]  ;;  %v7883_v4 = vrot.slane %v7881_v49, 5  ;;  %v7887_v5 = vrot.slane %v7885_v31, 4 }
 0x565   : > { %8663 = vst.msk [vmem:[#allocation4 + $0x5c] sm:$0xf] %vm6535_vm8, %v12970_v60  ;;  %v7536_v25 = vpop.permute.xlu0 %7535  ;;  %v8910_v60 = vsel %vm9782_vm13, %v8905_v3, %v8909_v13  ;;  %v7518_v23 = vsel %vm9959_vm1, %v7516_v46, %v7517_v10  ;;  %v9490_v19 = vrot.slane %v7980_v0, 9  ;;  %v7702_v39 = vld [vmem:[#allocation3 + $0xc8] sm:$0x1] }
 0x566   : > { %v13008_v1 = vpop.permute.xlu2 %7913  ;;  %7575 = vst.msk [vmem:[#allocation4 + $0x60] sm:$0xf] %vm5440_vm2, %v7536_v25  ;;  %v7065_v59 = vmax.f32 %v7049_v34, 0.0  ;;  %v9028_v16 = vunpack.c.l.b16 %v8910_v60  ;;  %v7888_v14 = vor.u32 %v7887_v5, %v7883_v4  ;;  %v7879_v34 = vrot.slane %v7878_v2, 4  ;;  %v13057_v49 = vld [vmem:[#allocation3 + $0xd0] sm:$0xf] }
 0x567   : > { %8632 = vrot.lane.b32.xlu1 %v8597_v44, %s9658_s30  ;;  %7671 = vst.msk [vmem:[#allocation4 + $0x60] sm:$0xf] %vm5537_vm4, %v7632_v15  ;;  %v7598_v15 = vld [vmem:[#allocation3 + $0xc4] sm:$0xf]  ;;  %v8059_v52 = vsel %vm9959_vm1, %v9490_v19, %v8058_v18  ;;  %v7891_v25 = vshll.u32 %v7702_v39, 16  ;;  %v520_v60 = vsel %vm11124_vm12, 0, %v519_v6 }
 0x568   : > { %v7081_v30 = vpack.c.bf16 %v7065_v59, %v7065_v59  ;;  %v9041_v21 = vpack.c.b16 %v9029_v40, %v9028_v16  ;;  %v7884_v8 = vsel %vm9782_vm13, %v7879_v34, %v7883_v4  ;;  %v7889_v16 = vrot.slane %v7888_v14, 4  ;;  %521 = vst [vmem:[#allocation3 + $0xd4] sm:$0x1] %v520_v60  ;;  %v8143_v31 = vld [vmem:[#allocation3 + $0xd0] sm:$0xf] }
 0x569   : > { %v8621_v26 = vpop.permute.xlu1 %8620  ;;  %v6706_v58 = vpop.f32.mrf.mxu2  ;;  %v7893_v46 = vrot.slane %v7891_v25, 5  ;;  %v8426_v10 = vshll.u32 %v13057_v49, 16  ;;  %v8603_v5 = vrot.slane %v8526_v22, 5  ;;  %v8142_v14 = vld [vmem:[#allocation3 + $0xcc] sm:$0xf]  ;;  %v8430_v34 = vshrl.u32 %v13057_v49, 16 }
 0x56a   : > { %8662 = vst.msk [vmem:[#allocation4 + $0x58] sm:$0xf] %vm6535_vm8, %v8621_v26  ;;  %v6707_v12 = vadd.f32 %v12887_v27, %v6706_v58  ;;  %9542 = vmatmul.msk.bf16.gmra.mxu0 %vm6961_vm6, %v9041_v21  ;;  %v8420_v26 = vshll.u32 %v8245_v29, 16  ;;  %v7034_v58 = vadd.f32 %v12879_v42, %v7033_v9  ;;  %v8814_v9 = vld [vmem:[#allocation2 + $0xa0] sm:$0xf] }
 0x56b   : > { %7097 = vst.msk [vmem:[%s12909_s8 + $0x2c] sm:$0xf] %vm402_vm5, %v7081_v30  ;;  %7645 = vrot.lane.b32.xlu0 %v7598_v15, %s9652_s12  ;;  %v7894_v15 = vsel %vm9782_vm13, %v7889_v16, %v7893_v46  ;;  %v7035_v4 = vpop.f32.mrf.mxu3  ;;  %v8605_v25 = vrot.slane %v8603_v5, 4  ;;  %v8931_v16 = vshll.u32 %v8814_v9, 16 }
 0x56c   : > { %8634 = vrot.lane.b32.xlu2 %v8600_v56, %s9658_s30  ;;  %v7050_v47 = vadd.f32 %v7029_v37, %v6707_v12  ;;  %v8417_v56 = vshrl.u32 %v8245_v29, 16  ;;  %v8422_v40 = vrot.slane %v8420_v26, 5  ;;  %v7982_v37 = vld [vmem:[#allocation3 + $0xc8] sm:$0x1]  ;;  %v7036_v19 = vadd.f32 %v12879_v42, %v7035_v4  ;;  %v8815_v29 = vld [vmem:[#allocation2 + $0xa4] sm:$0x1] }
 0x56d   : > { %v7634_v13 = vpop.permute.xlu0 %7633  ;;  %v8061_v21 = vrot.slane %v7982_v37, 5  ;;  %v8941_v26 = vshll.u32 %v8815_v29, 16 }
 0x56e   : > { %v13030_v11 = vpop.permute.xlu2 %8176  ;;  %v7066_v41 = vmax.f32 %v7050_v47, 0.0  ;;  %v9498_v47 = vrot.slane %v8525_v43, 9 }
 0x56f   : > { %7549 = vrot.lane.b32.xlu1 %v7518_v23, %s9650_s10 }
 0x570   : > { %v7082_v17 = vpack.c.bf16 %v7066_v41, %v7066_v41  ;;  %v13076_v41 = vrot.slane %v8426_v10, 5 }
 0x571   : > { %v7538_v28 = vpop.permute.xlu1 %7537  ;;  %v9600_v48 = vld [vmem:[#allocation4 + $0x58] sm:$0xff]  ;;  %v6708_v3 = vpop.f32.mrf.mxu2 }
 0x572   : > { %7576 = vst.msk [vmem:[#allocation4 + $0x64] sm:$0xf] %vm5440_vm2, %v7538_v28  ;;  %9534 = vmatmul.msk.bf16.gmra.mxu3 %vm6638_vm9, %v9600_v48  ;;  %v6709_v44 = vadd.f32 %v12887_v27, %v6708_v3 }
 0x573   : > { %7672 = vst.msk [vmem:[#allocation4 + $0x64] sm:$0xf] %vm5537_vm4, %v7634_v13  ;;  %8091 = vrot.lane.b32.xlu0 %v8059_v52, %s9655_s23  ;;  %v8062_v13 = vsel %vm9959_vm1, %v8060_v50, %v8061_v21  ;;  %v8432_v50 = vrot.slane %v8430_v34, 4 }
 0x574   : > { %7643 = vrot.lane.b32.xlu2 %v7597_v32, %s9652_s12  ;;  %7098 = vst.msk [vmem:[%s12909_s8 + $0x30] sm:$0xf] %vm402_vm5, %v7082_v17  ;;  %v7051_v59 = vadd.f32 %v7031_v51, %v6709_v44  ;;  %v8527_v17 = vld [vmem:[#allocation3 + $0xd4] sm:$0x1] }
 0x575   : > { %7952 = vst.msk [vmem:[#allocation4 + $0x64] sm:$0xf] %vm5818_vm14, %v13008_v1  ;;  %v8080_v53 = vpop.permute.xlu0 %8079  ;;  %v8419_v1 = vrot.slane %v8417_v56, 4  ;;  %v8606_v6 = vrot.slane %v8527_v17, 5  ;;  %v8935_v56 = vshrl.u32 %v8814_v9, 16  ;;  %v8433_v22 = vor.u32 %v8432_v50, %v13076_v41 }
 0x576   : > { %v8459_v38 = vpop.permute.xlu2 %8458  ;;  %v7067_v7 = vmax.f32 %v7051_v59, 0.0 }
 0x577   : > { %7923 = vrot.lane.b32.xlu1 %v7884_v8, %s9654_s14  ;;  %v8423_v12 = vor.u32 %v8422_v40, %v8419_v1  ;;  %v8813_v8 = vld [vmem:[#allocation2 + $0x9c] sm:$0xf]  ;;  %v8933_v40 = vrot.slane %v8931_v16, 5  ;;  %v8937_v49 = vrot.slane %v8935_v56, 4 }
 0x578   : > { %v7083_v36 = vpack.c.bf16 %v7067_v7, %v7067_v7  ;;  %v8922_v59 = vshrl.u32 %v8813_v8, 16 }
 0x579   : > { %v7912_v30 = vpop.permute.xlu1 %7911  ;;  %v6711_v45 = vpop.f32.mrf.mxu2  ;;  %v8424_v2 = vrot.slane %v8423_v12, 4 }
 0x57a   : > { %7951 = vst.msk [vmem:[#allocation4 + $0x60] sm:$0xf] %vm5818_vm14, %v7912_v30  ;;  %v6712_v54 = vadd.f32 %v12887_v27, %v6711_v45  ;;  %v8924_v46 = vrot.slane %v8922_v59, 4  ;;  %v6677_v30 = vadd.f32 %v12887_v27, %v12761_v20  ;;  %v8938_v45 = vor.u32 %v8937_v49, %v8933_v40 }
 0x57b   : > { %8119 = vst.msk [vmem:[#allocation4 + $0x60] sm:$0xf] %vm5987_vm7, %v8080_v53  ;;  %8190 = vrot.lane.b32.xlu0 %v8143_v31, %s9656_s26  ;;  %v8429_v51 = vsel %vm9782_vm13, %v8424_v2, %v13076_v41  ;;  %v8925_v53 = vshll.u32 %v8813_v8, 16  ;;  %v6682_v59 = vadd.f32 %v12887_v27, %v12810_v62 }
 0x57c   : > { %7925 = vrot.lane.b32.xlu2 %v7894_v15, %s9654_s14  ;;  %7099 = vst.msk [vmem:[%s12909_s8 + $0x34] sm:$0xf] %vm402_vm5, %v7083_v36  ;;  %v7052_v23 = vadd.f32 %v7034_v58, %v6712_v54  ;;  %v8607_v36 = vsel %vm9959_vm1, %v8605_v25, %v8606_v6  ;;  %v8247_v58 = vld [vmem:[#allocation3 + $0xd4] sm:$0x1]  ;;  %v8943_v54 = vrot.slane %v8941_v26, 5 }
 0x57d   : > { %8216 = vst.msk [vmem:[#allocation4 + $0x60] sm:$0xf] %vm6085_vm10, %v13030_v11  ;;  %v8179_v0 = vpop.permute.xlu0 %8178  ;;  %v8604_v11 = vsel %vm9959_vm1, %v9498_v47, %v8603_v5  ;;  %v8927_v1 = vrot.slane %v8925_v53, 5  ;;  %v8436_v21 = vshll.u32 %v8247_v58, 16  ;;  %v13112_v5 = vld [vmem:[%s13286_s6] ss:$0 sm:$0xff] }
 0x57e   : > { %v7540_v57 = vpop.permute.xlu2 %7539  ;;  %v7068_v18 = vmax.f32 %v7052_v23, 0.0 }
 0x57f   : > { %7577 = vst.msk [vmem:[#allocation4 + $0x68] sm:$0xf] %vm5440_vm2, %v7540_v57  ;;  %8093 = vrot.lane.b32.xlu1 %v8062_v13, %s9655_s23  ;;  %v8928_v15 = vor.u32 %v8927_v1, %v8924_v46  ;;  %v8939_v57 = vrot.slane %v8938_v45, 4  ;;  %v8438_v47 = vrot.slane %v8436_v21, 5  ;;  %v8817_v21 = vld [vmem:[#allocation2 + $0xac] sm:$0xf] }
 0x580   : > { %v7084_v48 = vpack.c.bf16 %v7068_v18, %v7068_v18 }
 0x581   : > { %v8082_v28 = vpop.permute.xlu1 %8081  ;;  %v6713_v39 = vpop.f32.mrf.mxu2  ;;  %v8929_v10 = vrot.slane %v8928_v15, 4  ;;  %v8944_v18 = vsel %vm9782_vm13, %v8939_v57, %v8943_v54  ;;  %v8816_v54 = vld [vmem:[#allocation2 + $0xa8] sm:$0xf] }
 0x582   : > { %8120 = vst.msk [vmem:[#allocation4 + $0x64] sm:$0xf] %vm5987_vm7, %v8082_v28  ;;  %v6714_v32 = vadd.f32 %v12887_v27, %v6713_v39  ;;  %v9031_v28 = vunpack.c.l.b16 %v8944_v18 }
 0x583   : > { %8217 = vst.msk [vmem:[#allocation4 + $0x64] sm:$0xf] %vm6085_vm10, %v8179_v0  ;;  %8636 = vrot.lane.b32.xlu0 %v8604_v11, %s9658_s30  ;;  %v8934_v13 = vsel %vm9782_vm13, %v8929_v10, %v8933_v40  ;;  %v8434_v0 = vrot.slane %v8433_v22, 4  ;;  %v8949_v10 = vshll.u32 %v8816_v54, 16  ;;  %v8955_v22 = vshll.u32 %v8817_v21, 16 }
 0x584   : > { %7100 = vst.msk [vmem:[%s12909_s8 + $0x38] sm:$0xf] %vm402_vm5, %v7084_v48  ;;  %8188 = vrot.lane.b32.xlu2 %v8142_v14, %s9656_s26  ;;  %v7053_v3 = vadd.f32 %v7036_v19, %v6714_v32  ;;  %v9030_v2 = vunpack.c.l.b16 %v8934_v13  ;;  %v6679_v19 = vadd.f32 %v12887_v27, %v12788_v24 }
 0x585   : > { %8497 = vst.msk [vmem:[#allocation4 + $0x64] sm:$0xf] %vm6366_vm11, %v8459_v38  ;;  %v8625_v44 = vpop.permute.xlu0 %8624  ;;  %v8439_v11 = vsel %vm9782_vm13, %v8434_v0, %v8438_v47  ;;  %v8959_v47 = vshrl.u32 %v8817_v21, 16  ;;  %v8951_v0 = vrot.slane %v8949_v10, 5  ;;  %v8820_v10 = vld [vmem:[#allocation2 + $0xb8] sm:$0xf] }
 0x586   : > { %v7638_v52 = vpop.permute.xlu2 %7637  ;;  %v7069_v60 = vmax.f32 %v7053_v3, 0.0  ;;  %v9042_v17 = vpack.c.b16 %v9031_v28, %v9030_v2 }
 0x587   : > { %8468 = vrot.lane.b32.xlu1 %v8429_v51, %s9657_s29  ;;  %v8961_v2 = vrot.slane %v8959_v47, 4 }
 0x588   : > { %v7085_v7 = vpack.c.bf16 %v7069_v60, %v7069_v60  ;;  %9543 = vmatmul.msk.bf16.gmra.mxu0 %vm6961_vm6, %v9042_v17 }
 0x589   : > { %v8457_v38 = vpop.permute.xlu1 %8456  ;;  %v6998_v37 = vpop.f32.mrf.mxu2 }
 0x58a   : > { %8496 = vst.msk [vmem:[#allocation4 + $0x60] sm:$0xf] %vm6366_vm11, %v8457_v38  ;;  %v6999_v31 = vadd.f32 %v12879_v42, %v6998_v37  ;;  %v9082_v23 = vpop.f32.mrf.mxu0 }
 0x58b   : > { %8664 = vst.msk [vmem:[#allocation4 + $0x60] sm:$0xf] %vm6535_vm8, %v8625_v44  ;;  %v9083_v51 = vadd.f32 %v13112_v5, %v9082_v23 }
 0x58c   : > { %7101 = vst.msk [vmem:[%s12909_s8 + $0x3c] sm:$0xf] %vm402_vm5, %v7085_v7  ;;  %v7038_v12 = vadd.f32 %v6999_v31, %v6677_v30  ;;  %8470 = vrot.lane.b32.xlu2 %v8439_v11, %s9657_s29 }
 0x58d   : > { %v7542_v20 = vpop.permute.xlu0 %7541 }
 0x58e   : > { %v8084_v43 = vpop.permute.xlu2 %8083  ;;  %7578 = vst.msk [vmem:[#allocation4 + $0x6c] sm:$0xf] %vm5440_vm2, %v7542_v20  ;;  %v7054_v33 = vmax.f32 %v7038_v12, 0.0  ;;  %v8818_v20 = vld [vmem:[#allocation2 + $0xb0] sm:$0x1] }
 0x58f   : > { %8638 = vrot.lane.b32.xlu1 %v8607_v36, %s9658_s30  ;;  %7674 = vst.msk [vmem:[#allocation4 + $0x6c] sm:$0xf] %vm5537_vm4, %v7638_v52  ;;  %v6684_v36 = vadd.f32 %v12887_v27, %v12834_v63  ;;  %v8946_v63 = vshrl.u32 %v8816_v54, 16 }
 0x590   : > { %v7070_v41 = vpack.c.bf16 %v7054_v33, %v7054_v33  ;;  %v8965_v33 = vshll.u32 %v8818_v20, 16 }
 0x591   : > { %v8627_v4 = vpop.permute.xlu1 %8626  ;;  %v7000_v48 = vpop.f32.mrf.mxu2  ;;  %v8948_v13 = vrot.slane %v8946_v63, 4  ;;  %v8819_v63 = vld [vmem:[#allocation2 + $0xb4] sm:$0xf] }
 0x592   : > { %8665 = vst.msk [vmem:[#allocation4 + $0x64] sm:$0xf] %vm6535_vm8, %v8627_v4  ;;  %v7001_v39 = vadd.f32 %v12879_v42, %v7000_v48  ;;  %v9084_v9 = vpop.f32.mrf.mxu0  ;;  %v8957_v4 = vrot.slane %v8955_v22, 5  ;;  %v8821_v22 = vld [vmem:[#allocation2 + $0xbc] sm:$0x1]  ;;  %v8973_v47 = vshll.u32 %v8819_v63, 16 }
 0x593   : > { %7086 = vst.msk [vmem:[%s12909_s8] sm:$0xf] %vm402_vm5, %v7070_v41  ;;  %v9085_v56 = vadd.f32 %v13112_v5, %v9084_v9  ;;  %v6687_v41 = vadd.f32 %v12887_v27, %v12852_v35  ;;  %v8952_v11 = vor.u32 %v8951_v0, %v8948_v13  ;;  %v9636_v9 = vld [vmem:[%s13286_s6] ss:$0 sm:$0xff]  ;;  %v8989_v13 = vshll.u32 %v8821_v22, 16 }
 0x594   : > { %v7039_v14 = vadd.f32 %v7001_v39, %v6679_v19  ;;  %v8962_v19 = vor.u32 %v8961_v2, %v8957_v4  ;;  %v8967_v39 = vrot.slane %v8965_v33, 5  ;;  %v8979_v33 = vshll.u32 %v8820_v10, 16 }
 0x595   : > { %v7916_v52 = vpop.permute.xlu0 %7915  ;;  %v8761_v3 = vpop.f32.mrf.mxu3 }
 0x596   : > { %v8183_v32 = vpop.permute.xlu2 %8182  ;;  %v8762_v34 = vadd.f32 %v12887_v27, %v8761_v3  ;;  %v7055_v44 = vmax.f32 %v7039_v14, 0.0  ;;  %v8963_v14 = vrot.slane %v8962_v19, 4  ;;  %v8981_v2 = vrot.slane %v8979_v33, 5 }
 0x598   : > { %v9122_v25 = vadd.f32 %v9083_v51, %v8762_v34  ;;  %v7071_v8 = vpack.c.bf16 %v7055_v44, %v7055_v44  ;;  %v8953_v51 = vrot.slane %v8952_v11, 4 }
 0x599   : > { %v7636_v6 = vpop.permute.xlu1 %7635  ;;  %v9601_v24 = vld [vmem:[#allocation4 + $0x60] sm:$0xff]  ;;  %v7003_v60 = vpop.f32.mrf.mxu2 }
 0x59a   : > { %7673 = vst.msk [vmem:[#allocation4 + $0x68] sm:$0xf] %vm5537_vm4, %v7636_v6  ;;  %v9138_v29 = vmax.f32 %v9122_v25, 0.0  ;;  %9535 = vmatmul.msk.bf16.gmra.mxu3 %vm6638_vm9, %v9601_v24  ;;  %v7004_v53 = vadd.f32 %v12879_v42, %v7003_v60  ;;  %v8958_v35 = vsel %vm9782_vm13, %v8953_v51, %v8957_v4 }
 0x59b   : > { %7953 = vst.msk [vmem:[#allocation4 + $0x68] sm:$0xf] %vm5818_vm14, %v7916_v52  ;;  %v9032_v44 = vunpack.c.l.b16 %v8958_v35 }
 0x59c   : > { %7087 = vst.msk [vmem:[%s12909_s8 + $0x4] sm:$0xf] %vm402_vm5, %v7071_v8  ;;  %v9154_v16 = vpack.c.bf16 %v9138_v29, %v9138_v29  ;;  %v7040_v26 = vadd.f32 %v7004_v53, %v6682_v59  ;;  %v6689_v8 = vadd.f32 %v12887_v27, %v12869_v55  ;;  %v13178_v55 = vld [vmem:[%s13284_s4] ss:$0 sm:$0xff] }
 0x59d   : > { %8121 = vst.msk [vmem:[#allocation4 + $0x68] sm:$0xf] %vm5987_vm7, %v8084_v43  ;;  %v8086_v7 = vpop.permute.xlu0 %8085  ;;  %v8763_v46 = vpop.f32.mrf.mxu3 }
 0x59e   : > { %v8629_v38 = vpop.permute.xlu2 %8628  ;;  %9547 = vst.msk [vmem:[%s12909_s8 + $0x40] sm:$0xf] %vm402_vm5, %v9154_v16  ;;  %v8764_v1 = vadd.f32 %v12887_v27, %v8763_v46  ;;  %v7056_v40 = vmax.f32 %v7040_v26, 0.0 }
 0x59f   : > { %v9087_v3 = vpop.f32.mrf.mxu0 }
 0x5a0   : > { %v9123_v62 = vadd.f32 %v9085_v56, %v8764_v1  ;;  %v7072_v37 = vpack.c.bf16 %v7056_v40, %v7056_v40  ;;  %v9088_v59 = vadd.f32 %v13112_v5, %v9087_v3 }
 0x5a1   : > { %v7918_v30 = vpop.permute.xlu1 %7917  ;;  %v7005_v31 = vpop.f32.mrf.mxu2 }
 0x5a2   : > { %7954 = vst.msk [vmem:[#allocation4 + $0x6c] sm:$0xf] %vm5818_vm14, %v7918_v30  ;;  %v9139_v49 = vmax.f32 %v9123_v62, 0.0  ;;  %v7006_v15 = vadd.f32 %v12879_v42, %v7005_v31 }
 0x5a3   : > { %8122 = vst.msk [vmem:[#allocation4 + $0x6c] sm:$0xf] %vm5987_vm7, %v8086_v7 }
 0x5a4   : > { %7088 = vst.msk [vmem:[%s12909_s8 + $0x8] sm:$0xf] %vm402_vm5, %v7072_v37  ;;  %v9155_v58 = vpack.c.bf16 %v9139_v49, %v9139_v49  ;;  %v7041_v43 = vadd.f32 %v7006_v15, %v6684_v36 }
 0x5a5   : > { %8219 = vst.msk [vmem:[#allocation4 + $0x6c] sm:$0xf] %vm6085_vm10, %v8183_v32  ;;  %v8461_v45 = vpop.permute.xlu0 %8460 }
 0x5a6   : > { %v7546_v50 = vpop.permute.xlu2 %7545  ;;  %9548 = vst.msk [vmem:[%s12909_s8 + $0x44] sm:$0xf] %vm402_vm5, %v9155_v58  ;;  %v7057_v12 = vmax.f32 %v7041_v43, 0.0 }
 0x5a7   : > { %7580 = vst.msk [vmem:[#allocation4 + $0x74] sm:$0xf] %vm5440_vm2, %v7546_v50  ;;  %v9089_v62 = vpop.f32.mrf.mxu0 }
 0x5a8   : > { %v7073_v23 = vpack.c.bf16 %v7057_v12, %v7057_v12  ;;  %v9090_v49 = vadd.f32 %v13112_v5, %v9089_v62 }
 0x5a9   : > { %v8181_v57 = vpop.permute.xlu1 %8180  ;;  %v7008_v18 = vpop.f32.mrf.mxu2 }
 0x5aa   : > { %8218 = vst.msk [vmem:[#allocation4 + $0x68] sm:$0xf] %vm6085_vm10, %v8181_v57  ;;  %v7009_v28 = vadd.f32 %v12879_v42, %v7008_v18  ;;  %v8968_v42 = vsel %vm9782_vm13, %v8963_v14, %v8967_v39  ;;  %v8970_v57 = vshrl.u32 %v8819_v63, 16  ;;  %v8975_v18 = vrot.slane %v8973_v47, 5 }
 0x5ab   : > { %8498 = vst.msk [vmem:[#allocation4 + $0x68] sm:$0xf] %vm6366_vm11, %v8461_v45  ;;  %v9033_v6 = vunpack.c.l.b16 %v8968_v42  ;;  %v8991_v39 = vrot.slane %v8989_v13, 5 }
 0x5ac   : > { %7089 = vst.msk [vmem:[%s12909_s8 + $0xc] sm:$0xf] %vm402_vm5, %v7073_v23  ;;  %v7042_v17 = vadd.f32 %v7009_v28, %v6687_v41  ;;  %v8983_v23 = vshrl.u32 %v8820_v10, 16  ;;  %v8972_v4 = vrot.slane %v8970_v57, 4 }
 0x5ad   : > { %8666 = vst.msk [vmem:[#allocation4 + $0x68] sm:$0xf] %vm6535_vm8, %v8629_v38  ;;  %v8631_v32 = vpop.permute.xlu0 %8630  ;;  %v9043_v60 = vpack.c.b16 %v9033_v6, %v9032_v44 }
 0x5ae   : > { %v7920_v48 = vpop.permute.xlu2 %7919  ;;  %v7058_v52 = vmax.f32 %v7042_v17, 0.0  ;;  %v8985_v41 = vrot.slane %v8983_v23, 4  ;;  %v8976_v11 = vor.u32 %v8975_v18, %v8972_v4 }
 0x5af   : > { %9544 = vmatmul.msk.bf16.gmra.mxu0 %vm6961_vm6, %v9043_v60 }
 0x5b0   : > { %v7074_v25 = vpack.c.bf16 %v7058_v52, %v7058_v52  ;;  %v8986_v19 = vor.u32 %v8985_v41, %v8981_v2  ;;  %v8977_v17 = vrot.slane %v8976_v11, 4 }
 0x5b1   : > { %v8463_v34 = vpop.permute.xlu1 %8462  ;;  %v7010_v24 = vpop.f32.mrf.mxu2 }
 0x5b2   : > { %8499 = vst.msk [vmem:[#allocation4 + $0x6c] sm:$0xf] %vm6366_vm11, %v8463_v34  ;;  %v7011_v29 = vadd.f32 %v9636_v9, %v7010_v24  ;;  %v8982_v51 = vsel %vm9782_vm13, %v8977_v17, %v8981_v2 }
 0x5b3   : > { %8667 = vst.msk [vmem:[#allocation4 + $0x6c] sm:$0xf] %vm6535_vm8, %v8631_v32  ;;  %v8987_v32 = vrot.slane %v8986_v19, 4  ;;  %v9034_v35 = vunpack.c.l.b16 %v8982_v51 }
 0x5b4   : > { %7090 = vst.msk [vmem:[%s12909_s8 + $0x10] sm:$0xf] %vm402_vm5, %v7074_v25  ;;  %v7043_v53 = vadd.f32 %v7011_v29, %v6689_v8 }
 0x5b5   : > { %v7640_v16 = vpop.permute.xlu0 %7639  ;;  %v8766_v38 = vpop.f32.mrf.mxu3  ;;  %v8992_v3 = vsel %vm9782_vm13, %v8987_v32, %v8991_v39 }
 0x5b6   : > { %v8090_v56 = vpop.permute.xlu2 %8089  ;;  %v8767_v27 = vadd.f32 %v13178_v55, %v8766_v38  ;;  %v7059_v26 = vmax.f32 %v7043_v53, 0.0  ;;  %v9035_v44 = vunpack.c.l.b16 %v8992_v3 }
 0x5b8   : > { %v9124_v7 = vadd.f32 %v9088_v59, %v8767_v27  ;;  %v7075_v1 = vpack.c.bf16 %v7059_v26, %v7059_v26  ;;  %v9044_v6 = vpack.c.b16 %v9035_v44, %v9034_v35 }
 0x5b9   : > { %v7544_v46 = vpop.permute.xlu1 %7543 }
 0x5ba   : > { %7579 = vst.msk [vmem:[#allocation4 + $0x70] sm:$0xf] %vm5440_vm2, %v7544_v46  ;;  %v9602_v40 = vld [vmem:[#allocation4 + $0x68] sm:$0xff]  ;;  %v9140_v30 = vmax.f32 %v9124_v7, 0.0 }
 0x5bb   : > { %7675 = vst.msk [vmem:[#allocation4 + $0x70] sm:$0xf] %vm5537_vm4, %v7640_v16  ;;  %9536 = vmatmul.msk.bf16.gmra.mxu3 %vm6638_vm9, %v9602_v40 }
 0x5bc   : > { %7091 = vst.msk [vmem:[%s12909_s8 + $0x14] sm:$0xf] %vm402_vm5, %v7075_v1  ;;  %v9156_v37 = vpack.c.bf16 %v9140_v30, %v9140_v30  ;;  %v8822_v30 = vld [vmem:[#allocation2 + $0xc0] sm:$0xf] }
 0x5bd   : > { %7955 = vst.msk [vmem:[#allocation4 + $0x70] sm:$0xf] %vm5818_vm14, %v7920_v48  ;;  %v7922_v31 = vpop.permute.xlu0 %7921  ;;  %v8768_v36 = vpop.f32.mrf.mxu3 }
 0x5be   : > { %9549 = vst.msk [vmem:[%s12909_s8 + $0x48] sm:$0xf] %vm402_vm5, %v9156_v37  ;;  %v8769_v15 = vadd.f32 %v13178_v55, %v8768_v36  ;;  %v8465_v58 = vpop.permute.xlu2 %8464  ;;  %v8823_v37 = vld [vmem:[#allocation2 + $0xc4] sm:$0xf]  ;;  %v8997_v36 = vshll.u32 %v8822_v30, 16 }
 0x5bf   : > { %9545 = vmatmul.msk.bf16.gmra.mxu0 %vm6961_vm6, %v9044_v6 }
 0x5c0   : > { %v9125_v50 = vadd.f32 %v9090_v49, %v8769_v15  ;;  %v9092_v28 = vpop.f32.mrf.mxu0  ;;  %v8824_v49 = vld [vmem:[#allocation2 + $0xc8] sm:$0x1]  ;;  %v9003_v15 = vshll.u32 %v8823_v37, 16 }
 0x5c1   : > { %v7642_v43 = vpop.permute.xlu1 %7641  ;;  %v9093_v52 = vadd.f32 %v13112_v5, %v9092_v28 }
 0x5c2   : > { %7676 = vst.msk [vmem:[#allocation4 + $0x74] sm:$0xf] %vm5537_vm4, %v7642_v43  ;;  %v9141_v45 = vmax.f32 %v9125_v50, 0.0  ;;  %v9013_v43 = vshll.u32 %v8824_v49, 16 }
 0x5c3   : > { %7956 = vst.msk [vmem:[#allocation4 + $0x74] sm:$0xf] %vm5818_vm14, %v7922_v31  ;;  %v8994_v31 = vshrl.u32 %v8822_v30, 16 }
 0x5c4   : > { %8124 = vst.msk [vmem:[#allocation4 + $0x74] sm:$0xf] %vm5987_vm7, %v8090_v56  ;;  %v9157_v54 = vpack.c.bf16 %v9141_v45, %v9141_v45  ;;  %v9015_v10 = vrot.slane %v9013_v43, 5 }
 0x5c5   : > { %v8185_v21 = vpop.permute.xlu0 %8184  ;;  %v8996_v45 = vrot.slane %v8994_v31, 4 }
 0x5c6   : > { %9550 = vst.msk [vmem:[%s12909_s8 + $0x4c] sm:$0xf] %vm402_vm5, %v9157_v54  ;;  %v8635_v20 = vpop.permute.xlu2 %8634  ;;  %v8999_v54 = vrot.slane %v8997_v36, 5 }
 0x5c8   : > { %v9094_v9 = vpop.f32.mrf.mxu0 }
 0x5c9   : > { %v8088_v12 = vpop.permute.xlu1 %8087  ;;  %v9095_v59 = vadd.f32 %v13112_v5, %v9094_v9 }
 0x5ca   : > { %8123 = vst.msk [vmem:[#allocation4 + $0x70] sm:$0xf] %vm5987_vm7, %v8088_v12 }
 0x5cb   : > { %8220 = vst.msk [vmem:[#allocation4 + $0x70] sm:$0xf] %vm6085_vm10, %v8185_v21  ;;  %v9005_v21 = vrot.slane %v9003_v15, 5 }
 0x5cc   : > { %8500 = vst.msk [vmem:[#allocation4 + $0x70] sm:$0xf] %vm6366_vm11, %v8465_v58  ;;  %v9007_v58 = vshrl.u32 %v8823_v37, 16 }
 0x5cd   : > { %v8467_v0 = vpop.permute.xlu0 %8466 }
 0x5ce   : > { %v7644_v14 = vpop.permute.xlu2 %7643  ;;  %v9009_v12 = vrot.slane %v9007_v58, 4 }
 0x5d0   : > { %v9010_v63 = vor.u32 %v9009_v12, %v9005_v21 }
 0x5d1   : > { %v8187_v48 = vpop.permute.xlu1 %8186 }
 0x5d2   : > { %8221 = vst.msk [vmem:[#allocation4 + $0x74] sm:$0xf] %vm6085_vm10, %v8187_v48  ;;  %v9011_v47 = vrot.slane %v9010_v63, 4 }
 0x5d3   : > { %8501 = vst.msk [vmem:[#allocation4 + $0x74] sm:$0xf] %vm6366_vm11, %v8467_v0 }
 0x5d4   : > { %8669 = vst.msk [vmem:[#allocation4 + $0x74] sm:$0xf] %vm6535_vm8, %v8635_v20  ;;  %v9000_v20 = vor.u32 %v8999_v54, %v8996_v45  ;;  %v9016_v13 = vsel %vm9782_vm13, %v9011_v47, %v9015_v10 }
 0x5d5   : > { %v7548_v34 = vpop.permute.xlu0 %7547  ;;  %v8771_v42 = vpop.f32.mrf.mxu3  ;;  %v9037_v2 = vunpack.c.l.b16 %v9016_v13 }
 0x5d6   : > { %7581 = vst.msk [vmem:[#allocation4 + $0x78] sm:$0xf] %vm5440_vm2, %v7548_v34  ;;  %v8772_v25 = vadd.f32 %v13178_v55, %v8771_v42  ;;  %v7926_v38 = vpop.permute.xlu2 %7925  ;;  %v9001_v57 = vrot.slane %v9000_v20, 4 }
 0x5d7   : > { %7677 = vst.msk [vmem:[#allocation4 + $0x78] sm:$0xf] %vm5537_vm4, %v7644_v14 }
 0x5d8   : > { %v9126_v24 = vadd.f32 %v9093_v52, %v8772_v25  ;;  %v9006_v23 = vsel %vm9782_vm13, %v9001_v57, %v9005_v21 }
 0x5d9   : > { %v8633_v8 = vpop.permute.xlu1 %8632  ;;  %v9036_v18 = vunpack.c.l.b16 %v9006_v23 }
 0x5da   : > { %8668 = vst.msk [vmem:[#allocation4 + $0x70] sm:$0xf] %vm6535_vm8, %v8633_v8  ;;  %v9142_v29 = vmax.f32 %v9126_v24, 0.0 }
 0x5db   : > { %v9045_v41 = vpack.c.b16 %v9037_v2, %v9036_v18 }
 0x5dc   : > { %v9158_v60 = vpack.c.bf16 %v9142_v29, %v9142_v29 }
 0x5dd   : > { %v7646_v53 = vpop.permute.xlu0 %7645  ;;  %v8773_v16 = vpop.f32.mrf.mxu3  ;;  %9546 = vmatmul.msk.bf16.gmra.mxu0 %vm6961_vm6, %v9045_v41 }
 0x5de   : > { %9551 = vst.msk [vmem:[%s12909_s8 + $0x50] sm:$0xf] %vm402_vm5, %v9158_v60  ;;  %v8774_v56 = vadd.f32 %v13178_v55, %v8773_v16  ;;  %v8189_v62 = vpop.permute.xlu2 %8188 }
 0x5e0   : > { %v9127_v27 = vadd.f32 %v9095_v59, %v8774_v56 }
 0x5e1   : > { %v7550_v26 = vpop.permute.xlu1 %7549  ;;  %v9603_v7 = vld [vmem:[#allocation4 + $0x70] sm:$0xff] }
 0x5e2   : > { %7582 = vst.msk [vmem:[#allocation4 + $0x7c] sm:$0xf] %vm5440_vm2, %v7550_v26  ;;  %v9143_v46 = vmax.f32 %v9127_v27, 0.0  ;;  %9537 = vmatmul.msk.bf16.gmra.mxu3 %vm6638_vm9, %v9603_v7 }
 0x5e3   : > { %7678 = vst.msk [vmem:[#allocation4 + $0x7c] sm:$0xf] %vm5537_vm4, %v7646_v53 }
 0x5e4   : > { %7958 = vst.msk [vmem:[#allocation4 + $0x7c] sm:$0xf] %vm5818_vm14, %v7926_v38  ;;  %v9159_v1 = vpack.c.bf16 %v9143_v46, %v9143_v46 }
 0x5e5   : > { %v8092_v40 = vpop.permute.xlu0 %8091 }
 0x5e6   : > { %9552 = vst.msk [vmem:[%s12909_s8 + $0x54] sm:$0xf] %vm402_vm5, %v9159_v1  ;;  %v8471_v4 = vpop.permute.xlu2 %8470 }
 0x5e7   : > { %v9097_v33 = vpop.f32.mrf.mxu0 }
 0x5e8   : > { %v9098_v28 = vadd.f32 %v13112_v5, %v9097_v33 }
 0x5e9   : > { %v7924_v50 = vpop.permute.xlu1 %7923 }
 0x5ea   : > { %7957 = vst.msk [vmem:[#allocation4 + $0x78] sm:$0xf] %vm5818_vm14, %v7924_v50 }
 0x5eb   : > { %8125 = vst.msk [vmem:[#allocation4 + $0x78] sm:$0xf] %vm5987_vm7, %v8092_v40 }
 0x5ec   : > { %8222 = vst.msk [vmem:[#allocation4 + $0x78] sm:$0xf] %vm6085_vm10, %v8189_v62 }
 0x5ed   : > { %v8191_v22 = vpop.permute.xlu0 %8190 }
 0x5ef   : > { %v9099_v17 = vpop.f32.mrf.mxu0 }
 0x5f0   : > { %v9100_v14 = vadd.f32 %v13112_v5, %v9099_v17 }
 0x5f1   : > { %v8094_v0 = vpop.permute.xlu1 %8093 }
 0x5f2   : > { %8126 = vst.msk [vmem:[#allocation4 + $0x7c] sm:$0xf] %vm5987_vm7, %v8094_v0 }
 0x5f3   : > { %8223 = vst.msk [vmem:[#allocation4 + $0x7c] sm:$0xf] %vm6085_vm10, %v8191_v22 }
 0x5f4   : > { %8503 = vst.msk [vmem:[#allocation4 + $0x7c] sm:$0xf] %vm6366_vm11, %v8471_v4 }
 0x5f5   : > { %v8776_v11 = vpop.f32.mrf.mxu3  ;;  %v8637_v48 = vpop.permute.xlu0 %8636 }
 0x5f6   : > { %v8777_v61 = vadd.f32 %v13178_v55, %v8776_v11 }
 0x5f8   : > { %v9128_v19 = vadd.f32 %v9098_v28, %v8777_v61 }
 0x5f9   : > { %v8469_v39 = vpop.permute.xlu1 %8468 }
 0x5fa   : > { %8502 = vst.msk [vmem:[#allocation4 + $0x78] sm:$0xf] %vm6366_vm11, %v8469_v39  ;;  %v9144_v32 = vmax.f32 %v9128_v19, 0.0 }
 0x5fb   : > { %8670 = vst.msk [vmem:[#allocation4 + $0x78] sm:$0xf] %vm6535_vm8, %v8637_v48 }
 0x5fc   : > { %v9160_v51 = vpack.c.bf16 %v9144_v32, %v9144_v32 }
 0x5fd   : > { %v8778_v52 = vpop.f32.mrf.mxu3 }
 0x5fe   : > { %9553 = vst.msk [vmem:[%s12909_s8 + $0x58] sm:$0xf] %vm402_vm5, %v9160_v51  ;;  %v8779_v3 = vadd.f32 %v13178_v55, %v8778_v52 }
 0x600   : > { %v9129_v35 = vadd.f32 %v9100_v14, %v8779_v3 }
 0x601   : > { %v8639_v34 = vpop.permute.xlu1 %8638 }
 0x602   : > { %8671 = vst.msk [vmem:[#allocation4 + $0x7c] sm:$0xf] %vm6535_vm8, %v8639_v34  ;;  %v9145_v42 = vmax.f32 %v9129_v35, 0.0 }
 0x604   : > { %v9161_v44 = vpack.c.bf16 %v9145_v42, %v9145_v42 }
 0x605   : > { %v9102_v6 = vpop.f32.mrf.mxu0 }
 0x606   : > { %9554 = vst.msk [vmem:[%s12909_s8 + $0x5c] sm:$0xf] %vm402_vm5, %v9161_v44  ;;  %v9103_v24 = vadd.f32 %v13112_v5, %v9102_v6 }
 0x609   : > { %v9604_v25 = vld [vmem:[#allocation4 + $0x78] sm:$0xff] }
 0x60a   : > { %9538 = vmatmul.msk.bf16.gmra.mxu3 %vm6638_vm9, %v9604_v25 }
 0x60d   : > { %v9104_v60 = vpop.f32.mrf.mxu0 }
 0x60e   : > { %v9105_v16 = vadd.f32 %v13112_v5, %v9104_v60 }
 0x61d   : > { %v8781_v8 = vpop.f32.mrf.mxu3 }
 0x61e   : > { %v8782_v9 = vadd.f32 %v13178_v55, %v8781_v8 }
 0x620   : > { %v9130_v29 = vadd.f32 %v9103_v24, %v8782_v9 }
 0x622   : > { %v9146_v59 = vmax.f32 %v9130_v29, 0.0 }
 0x624   : > { %v9162_v53 = vpack.c.bf16 %v9146_v59, %v9146_v59 }
 0x625   : > { %v8783_v38 = vpop.f32.mrf.mxu3 }
 0x626   : > { %9555 = vst.msk [vmem:[%s12909_s8 + $0x60] sm:$0xf] %vm402_vm5, %v9162_v53  ;;  %v8784_v56 = vadd.f32 %v13178_v55, %v8783_v38 }
 0x628   : > { %v9131_v27 = vadd.f32 %v9105_v16, %v8784_v56 }
 0x62a   : > { %v9147_v26 = vmax.f32 %v9131_v27, 0.0 }
 0x62c   : > { %v9163_v7 = vpack.c.bf16 %v9147_v26, %v9147_v26  ;;  %v9107_v46 = vpop.f32.mrf.mxu0 }
 0x62d   : > { %v9108_v1 = vadd.f32 %v13112_v5, %v9107_v46 }
 0x62e   : > { %9556 = vst.msk [vmem:[%s12909_s8 + $0x64] sm:$0xf] %vm402_vm5, %v9163_v7 }
 0x634   : > { %v9109_v37 = vpop.f32.mrf.mxu0 }
 0x635   : > { %v9110_v36 = vadd.f32 %v13112_v5, %v9109_v37 }
 0x63c   : > { %v9112_v54 = vpop.f32.mrf.mxu0 }
 0x63d   : > { %v9113_v21 = vadd.f32 %v13112_v5, %v9112_v54 }
 0x63e   : > { %v8786_v40 = vpop.f32.mrf.mxu3 }
 0x63f   : > { %v8787_v62 = vadd.f32 %v13178_v55, %v8786_v40 }
 0x641   : > { %v9132_v30 = vadd.f32 %v9108_v1, %v8787_v62 }
 0x643   : > { %v9148_v49 = vmax.f32 %v9132_v30, 0.0 }
 0x644   : > { %v9114_v10 = vpop.f32.mrf.mxu0 }
 0x645   : > { %v9164_v31 = vpack.c.bf16 %v9148_v49, %v9148_v49  ;;  %v9115_v47 = vadd.f32 %v13112_v5, %v9114_v10 }
 0x646   : > { %v8788_v15 = vpop.f32.mrf.mxu3 }
 0x647   : > { %9557 = vst.msk [vmem:[%s12909_s8 + $0x68] sm:$0xf] %vm402_vm5, %v9164_v31  ;;  %v8789_v58 = vadd.f32 %v13178_v55, %v8788_v15 }
 0x649   : > { %v9133_v50 = vadd.f32 %v9110_v36, %v8789_v58 }
 0x64b   : > { %v9149_v43 = vmax.f32 %v9133_v50, 0.0 }
 0x64d   : > { %v9165_v45 = vpack.c.bf16 %v9149_v43, %v9149_v43 }
 0x64f   : > { %9558 = vst.msk [vmem:[%s12909_s8 + $0x6c] sm:$0xf] %vm402_vm5, %v9165_v45 }
 0x65a   : > { %v9117_v18 = vpop.f32.mrf.mxu0 }
 0x65b   : > { %v9118_v2 = vadd.f32 %v13112_v5, %v9117_v18 }
 0x662   : > { %v9119_v48 = vpop.f32.mrf.mxu0 }
 0x663   : > { %v9120_v17 = vadd.f32 %v13112_v5, %v9119_v48 }
 0x665   : > { %v8791_v12 = vpop.f32.mrf.mxu3 }
 0x666   : > { %v8792_v20 = vadd.f32 %v13178_v55, %v8791_v12 }
 0x668   : > { %v9134_v63 = vadd.f32 %v9113_v21, %v8792_v20 }
 0x66a   : > { %v9150_v22 = vmax.f32 %v9134_v63, 0.0 }
 0x66c   : > { %v9166_v57 = vpack.c.bf16 %v9150_v22, %v9150_v22 }
 0x66d   : > { %v8793_v33 = vpop.f32.mrf.mxu3 }
 0x66e   : > { %9559 = vst.msk [vmem:[%s12909_s8 + $0x70] sm:$0xf] %vm402_vm5, %v9166_v57  ;;  %v8794_v23 = vadd.f32 %v13178_v55, %v8793_v33 }
 0x670   : > { %v9135_v13 = vadd.f32 %v9115_v47, %v8794_v23 }
 0x672   : > { %v9151_v0 = vmax.f32 %v9135_v13, 0.0 }
 0x674   : > { %v9167_v4 = vpack.c.bf16 %v9151_v0, %v9151_v0 }
 0x676   : > { %9560 = vst.msk [vmem:[%s12909_s8 + $0x74] sm:$0xf] %vm402_vm5, %v9167_v4 }
 0x68d   : > { %v8796_v41 = vpop.f32.mrf.mxu3 }
 0x68e   : > { %v8797_v28 = vadd.f32 %v13178_v55, %v8796_v41 }
 0x690   : > { %v9136_v11 = vadd.f32 %v9118_v2, %v8797_v28 }
 0x692   : > { %v9152_v61 = vmax.f32 %v9136_v11, 0.0 }
 0x694   : > { %v9168_v19 = vpack.c.bf16 %v9152_v61, %v9152_v61 }
 0x695   : > { %v8798_v39 = vpop.f32.mrf.mxu3 }
 0x696   : > { %9561 = vst.msk [vmem:[%s12909_s8 + $0x78] sm:$0xf] %vm402_vm5, %v9168_v19  ;;  %v8799_v32 = vadd.f32 %v13178_v55, %v8798_v39 }
 0x698   : > { %v9137_v51 = vadd.f32 %v9120_v17, %v8799_v32 }
 0x69a   : > { %v9153_v14 = vmax.f32 %v9137_v51, 0.0 }
 0x69c   : > { %v9169_v52 = vpack.c.bf16 %v9153_v14, %v9153_v14 }
 0x69e   : > { %9562 = vst.msk [vmem:[%s12909_s8 + $0x7c] sm:$0xf] %vm402_vm5, %v9169_v52 }
 0x69f PF: > { %s17_s24 = sadd.s32 1, %s9644_s24  }
 0x6a0   : > { %p14_p4 = scmp.ge.s32.totalorder %s17_s24, 4  }
 0x6a2   :  { %16 = sbr.rel (!%p14_p4) target bundleno = 1 (0x1), region = 92 }

</bundles_post_ra>
